<compile_context>
chip_gen: v6e
topology: v6e:2x2x1
jax: 0.10.0
libtpu: 0.0.40
codegen_flags: <defaults>
</compile_context>

<pallas_src>
import jax
import jax.numpy as jnp
from jax.experimental import pallas as pl
from jax.experimental.pallas import tpu as pltpu


_LANE = 128  # lane width used for the lane-dense output slab


def _disc_fwd_kernel(x_ref,
                     w1_ref, s1_ref, b1_ref,
                     w2_ref, s2_ref, b2_ref,
                     w3_ref, s3_ref, b3_ref,
                     w4_ref, b4_ref,
                     o_ref):
    """Whole discriminator forward for one batch block, fully resident in VMEM."""
    x = x_ref[...]  # (bm, 3072) f32

    # Layer 1: 3072 -> 1024. int8 weights (half the HBM stream of bf16), cast to
    # bf16 in VMEM, MXU matmul with f32 accumulation; per-output-channel dequant
    # scale folded into the f32 epilogue on the VPU.
    h = jnp.dot(x.astype(jnp.bfloat16), w1_ref[...].astype(jnp.bfloat16),
                preferred_element_type=jnp.float32)
    h = h * s1_ref[...] + b1_ref[...]
    h = jnp.where(h > 0, h, 0.2 * h)          # LeakyReLU(0.2)

    # Layer 2: 1024 -> 512.
    h = jnp.dot(h.astype(jnp.bfloat16), w2_ref[...].astype(jnp.bfloat16),
                preferred_element_type=jnp.float32)
    h = h * s2_ref[...] + b2_ref[...]
    h = jnp.where(h > 0, h, 0.2 * h)

    # Layer 3: 512 -> 256.
    h = jnp.dot(h.astype(jnp.bfloat16), w3_ref[...].astype(jnp.bfloat16),
                preferred_element_type=jnp.float32)
    h = h * s3_ref[...] + b3_ref[...]
    h = jnp.where(h > 0, h, 0.2 * h)

    # Layer 4: 256 -> 1 on the VPU/XLU (row-wise multiply + lane reduce) in f32;
    # avoids a near-empty N=1 MXU matmul.
    logit = jnp.sum(h * w4_ref[...], axis=-1, keepdims=True) + b4_ref[...]
    sig = jax.nn.sigmoid(logit)                                  # (bm, 1)

    # Lane-dense store: broadcast the scalar column across 128 lanes so the
    # writeback is an unmasked full-lane vst; the wrapper slices [:, :1].
    o_ref[...] = jnp.broadcast_to(sig, o_ref.shape).astype(o_ref.dtype)


def _fused_forward(x2d, kp):
    """x2d: (B, 3072) f32, kp: dict of kernel-layout params -> (B, 1) f32."""
    B, K = x2d.shape
    assert K == kp["w1"].shape[0]

    # Batch block: one grid step for small B (weights DMA'd exactly once, no
    # per-step overhead); 256-row blocks for big B to fill the 256x256 MXU on
    # v6e/v7x and let the "parallel" axis shard across v7x's two TensorCores.
    bm = B if B <= 256 else 256
    grid = (pl.cdiv(B, bm),)

    def resident(shape):
        # Constant-index operand: fetched once, single VMEM buffer is enough.
        return pl.BlockSpec(shape, lambda i: (0,) * len(shape),
                            pipeline_mode=pl.Buffered(1))

    out_wide = pl.pallas_call(
        _disc_fwd_kernel,
        out_shape=jax.ShapeDtypeStruct((B, _LANE), jnp.float32),
        grid_spec=pltpu.PrefetchScalarGridSpec(
            num_scalar_prefetch=0,
            grid=grid,
            in_specs=[
                pl.BlockSpec((bm, K), lambda i: (i, 0)),   # x (double-buffered)
                resident((K, 1024)),                       # w1 (int8)
                resident((1, 1024)),                       # s1 (f32 dequant scale)
                resident((1, 1024)),                       # b1
                resident((1024, 512)),                     # w2 (int8)
                resident((1, 512)),                        # s2
                resident((1, 512)),                        # b2
                resident((512, 256)),                      # w3 (int8)
                resident((1, 256)),                        # s3
                resident((1, 256)),                        # b3
                resident((1, 256)),                        # w4 row (f32)
                resident((1, 1)),                          # b4
            ],
            out_specs=pl.BlockSpec((bm, _LANE), lambda i: (i, 0)),
        ),
        compiler_params=pltpu.CompilerParams(
            dimension_semantics=("parallel",),
            vmem_limit_bytes=48 << 20,   # under v7x's 64 MiB physical VMEM
        ),
    )(x2d,
      kp["w1"], kp["s1"], kp["b1"],
      kp["w2"], kp["s2"], kp["b2"],
      kp["w3"], kp["s3"], kp["b3"],
      kp["w4"], kp["b4"])

    return out_wide[:, :1]


def init_params(key, input_size=3072, num_classes=1):
    """Deterministic init mimicking torch.nn.Linear default (uniform +/- 1/sqrt(fan_in))."""
    dims = [input_size, 1024, 512, 256, num_classes]
    params = []
    for fan_in, fan_out in zip(dims[:-1], dims[1:]):
        key, kw, kb = jax.random.split(key, 3)
        bound = 1.0 / jnp.sqrt(jnp.float32(fan_in))
        w = jax.random.uniform(kw, (fan_in, fan_out), jnp.float32,
                               minval=-bound, maxval=bound)
        b = jax.random.uniform(kb, (fan_out,), jnp.float32,
                               minval=-bound, maxval=bound)
        params.append((w, b))
    return params


def _quantize_per_channel_int8(w):
    """Symmetric per-output-channel int8 quantization of an (in, out) weight."""
    scale = jnp.maximum(jnp.max(jnp.abs(w), axis=0) / 127.0, 1e-8)   # (out,)
    w_q = jnp.clip(jnp.round(w / scale), -127.0, 127.0).astype(jnp.int8)
    return w_q, scale.astype(jnp.float32)


def prepare_kernel_params(params):
    """Quantize the big weights to int8 (per-channel scales), reshape biases for the kernel."""
    (w1, b1), (w2, b2), (w3, b3), (w4, b4) = params
    w1q, s1 = _quantize_per_channel_int8(w1)
    w2q, s2 = _quantize_per_channel_int8(w2)
    w3q, s3 = _quantize_per_channel_int8(w3)
    return dict(
        w1=w1q, s1=s1.reshape(1, -1), b1=b1.reshape(1, -1).astype(jnp.float32),
        w2=w2q, s2=s2.reshape(1, -1), b2=b2.reshape(1, -1).astype(jnp.float32),
        w3=w3q, s3=s3.reshape(1, -1), b3=b3.reshape(1, -1).astype(jnp.float32),
        w4=w4.reshape(1, -1).astype(jnp.float32),
        b4=b4.reshape(1, -1).astype(jnp.float32),
    )


@jax.jit
def cifar_discriminator_forward(x_nchw, kernel_params):
    B = x_nchw.shape[0]
    x2d = x_nchw.reshape(B, -1).astype(jnp.float32)    # torch x.view(B, -1)
    return _fused_forward(x2d, kernel_params)           # (B, 1) in (0, 1)


# ----------------------------- references ------------------------------------

def _reference_forward_quantized(x_nchw, kp):
    """Pure-JAX reference matching the kernel's int8-weight / bf16 / f32-acc math."""
    B = x_nchw.shape[0]
    y = x_nchw.reshape(B, -1).astype(jnp.float32)
    for w, s, b in ((kp["w1"], kp["s1"], kp["b1"]),
                    (kp["w2"], kp["s2"], kp["b2"]),
                    (kp["w3"], kp["s3"], kp["b3"])):
        y = jnp.dot(y.astype(jnp.bfloat16), w.astype(jnp.bfloat16),
                    preferred_element_type=jnp.float32) * s + b
        y = jnp.where(y > 0, y, 0.2 * y)
    y = jnp.sum(y * kp["w4"], axis=-1, keepdims=True) + kp["b4"]
    return jax.nn.sigmoid(y)


def _reference_forward_f32(x_nchw, params):
    """Full-f32 reference (exact PyTorch semantics)."""
    B = x_nchw.shape[0]
    y = x_nchw.reshape(B, -1).astype(jnp.float32)
    (w1, b1), (w2, b2), (w3, b3), (w4, b4) = params
    y = jax.nn.leaky_relu(y @ w1 + b1, 0.2)
    y = jax.nn.leaky_relu(y @ w2 + b2, 0.2)
    y = jax.nn.leaky_relu(y @ w3 + b3, 0.2)
    return jax.nn.sigmoid(y @ w4 + b4)


if __name__ == "__main__":
    key = jax.random.PRNGKey(0)
    key, kx = jax.random.split(key)

    # CIFAR-like input: batch=2, NCHW (2, 3, 32, 32) -> flattens to 3072 features.
    x = jax.random.normal(kx, (2, 3, 32, 32), dtype=jnp.float32)
    params = init_params(key)
    kparams = prepare_kernel_params(params)

    out = jax.block_until_ready(cifar_discriminator_forward(x, kparams))

    assert out.shape == (2, 1), out.shape
    assert bool(jnp.all((out > 0.0) & (out < 1.0)))

    # Tight check against a reference that replicates the kernel's quantized math,
    # loose check against exact f32 PyTorch semantics (precision contract: int8
    # weights + bf16 activations on the MXU, f32 accumulation/epilogue).
    ref_q = _reference_forward_quantized(x, kparams)
    ref_f32 = _reference_forward_f32(x, params)
    assert jnp.allclose(out, ref_q, atol=1e-3, rtol=1e-3), (out, ref_q)
    assert jnp.allclose(out, ref_f32, atol=5e-2, rtol=5e-2), (out, ref_f32)

    print("KERNEL_OK")
</pallas_src>

<mosaic_0001>
module attributes {stable_mosaic.version = 11 : i64} {
  func.func @_disc_fwd_kernel(%arg0: i32, %arg1: memref<2x3072xf32, #tpu.memory_space<vmem>>, %arg2: memref<3072x1024xi8, #tpu.memory_space<vmem>>, %arg3: memref<1x1024xf32, #tpu.memory_space<vmem>>, %arg4: memref<1x1024xf32, #tpu.memory_space<vmem>>, %arg5: memref<1024x512xi8, #tpu.memory_space<vmem>>, %arg6: memref<1x512xf32, #tpu.memory_space<vmem>>, %arg7: memref<1x512xf32, #tpu.memory_space<vmem>>, %arg8: memref<512x256xi8, #tpu.memory_space<vmem>>, %arg9: memref<1x256xf32, #tpu.memory_space<vmem>>, %arg10: memref<1x256xf32, #tpu.memory_space<vmem>>, %arg11: memref<1x256xf32, #tpu.memory_space<vmem>>, %arg12: memref<1x1xf32, #tpu.memory_space<vmem>>, %arg13: memref<2x128xf32, #tpu.memory_space<vmem>>) attributes {dimension_semantics = [#tpu.dimension_semantics<parallel>], iteration_bounds = array<i64: 1>, scalar_prefetch = 0 : i64, scratch_operands = 0 : i64, tpu.core_type = #tpu.core_type<tc>, window_params = [{transform_indices = @transform_0, window_bounds = array<i64: 2, 3072>}, {pipeline_mode = #tpu.pipeline_mode<synchronous>, transform_indices = @transform_1, window_bounds = array<i64: 3072, 1024>}, {pipeline_mode = #tpu.pipeline_mode<synchronous>, transform_indices = @transform_2, window_bounds = array<i64: 1, 1024>}, {pipeline_mode = #tpu.pipeline_mode<synchronous>, transform_indices = @transform_3, window_bounds = array<i64: 1, 1024>}, {pipeline_mode = #tpu.pipeline_mode<synchronous>, transform_indices = @transform_4, window_bounds = array<i64: 1024, 512>}, {pipeline_mode = #tpu.pipeline_mode<synchronous>, transform_indices = @transform_5, window_bounds = array<i64: 1, 512>}, {pipeline_mode = #tpu.pipeline_mode<synchronous>, transform_indices = @transform_6, window_bounds = array<i64: 1, 512>}, {pipeline_mode = #tpu.pipeline_mode<synchronous>, transform_indices = @transform_7, window_bounds = array<i64: 512, 256>}, {pipeline_mode = #tpu.pipeline_mode<synchronous>, transform_indices = @transform_8, window_bounds = array<i64: 1, 256>}, {pipeline_mode = #tpu.pipeline_mode<synchronous>, transform_indices = @transform_9, window_bounds = array<i64: 1, 256>}, {pipeline_mode = #tpu.pipeline_mode<synchronous>, transform_indices = @transform_10, window_bounds = array<i64: 1, 256>}, {pipeline_mode = #tpu.pipeline_mode<synchronous>, transform_indices = @transform_11, window_bounds = array<i64: 1, 1>}, {transform_indices = @transform_12, window_bounds = array<i64: 2, 128>}]} {
    %c0 = arith.constant 0 : index
    %c0_0 = arith.constant 0 : index
    %0 = vector.load %arg1[%c0, %c0_0] : memref<2x3072xf32, #tpu.memory_space<vmem>>, vector<2x3072xf32>
    %1 = arith.truncf %0 : vector<2x3072xf32> to vector<2x3072xbf16>
    %c0_1 = arith.constant 0 : index
    %c0_2 = arith.constant 0 : index
    %2 = vector.load %arg2[%c0_1, %c0_2] : memref<3072x1024xi8, #tpu.memory_space<vmem>>, vector<3072x1024xi8>
    %3 = arith.sitofp %2 : vector<3072x1024xi8> to vector<3072x1024xbf16>
    %cst = arith.constant dense<0.000000e+00> : vector<2x1024xf32>
    %4 = tpu.matmul %1, %3, %cst {dimension_numbers = #tpu.dot_dimension_numbers<[1], [0], [0], [1], [0, 0, 1, 1], [], []>} : vector<2x3072xbf16>, vector<3072x1024xbf16>, vector<2x1024xf32> -> vector<2x1024xf32>
    %c0_3 = arith.constant 0 : index
    %c0_4 = arith.constant 0 : index
    %5 = vector.load %arg3[%c0_3, %c0_4] : memref<1x1024xf32, #tpu.memory_space<vmem>>, vector<1x1024xf32>
    %6 = vector.broadcast %5 : vector<1x1024xf32> to vector<2x1024xf32>
    %7 = arith.mulf %4, %6 : vector<2x1024xf32>
    %c0_5 = arith.constant 0 : index
    %c0_6 = arith.constant 0 : index
    %8 = vector.load %arg4[%c0_5, %c0_6] : memref<1x1024xf32, #tpu.memory_space<vmem>>, vector<1x1024xf32>
    %9 = vector.broadcast %8 : vector<1x1024xf32> to vector<2x1024xf32>
    %10 = arith.addf %7, %9 : vector<2x1024xf32>
    %cst_7 = arith.constant 0.000000e+00 : f32
    %11 = vector.broadcast %cst_7 : f32 to vector<2x1024xf32>
    %12 = arith.cmpf ogt, %10, %11 : vector<2x1024xf32>
    %cst_8 = arith.constant 2.000000e-01 : f32
    %13 = vector.broadcast %cst_8 : f32 to vector<2x1024xf32>
    %14 = arith.mulf %13, %10 : vector<2x1024xf32>
    %15 = arith.select %12, %10, %14 : vector<2x1024xi1>, vector<2x1024xf32>
    %16 = arith.truncf %15 : vector<2x1024xf32> to vector<2x1024xbf16>
    %c0_9 = arith.constant 0 : index
    %c0_10 = arith.constant 0 : index
    %17 = vector.load %arg5[%c0_9, %c0_10] : memref<1024x512xi8, #tpu.memory_space<vmem>>, vector<1024x512xi8>
    %18 = arith.sitofp %17 : vector<1024x512xi8> to vector<1024x512xbf16>
    %cst_11 = arith.constant dense<0.000000e+00> : vector<2x512xf32>
    %19 = tpu.matmul %16, %18, %cst_11 {dimension_numbers = #tpu.dot_dimension_numbers<[1], [0], [0], [1], [0, 0, 1, 1], [], []>} : vector<2x1024xbf16>, vector<1024x512xbf16>, vector<2x512xf32> -> vector<2x512xf32>
    %c0_12 = arith.constant 0 : index
    %c0_13 = arith.constant 0 : index
    %20 = vector.load %arg6[%c0_12, %c0_13] : memref<1x512xf32, #tpu.memory_space<vmem>>, vector<1x512xf32>
    %21 = vector.broadcast %20 : vector<1x512xf32> to vector<2x512xf32>
    %22 = arith.mulf %19, %21 : vector<2x512xf32>
    %c0_14 = arith.constant 0 : index
    %c0_15 = arith.constant 0 : index
    %23 = vector.load %arg7[%c0_14, %c0_15] : memref<1x512xf32, #tpu.memory_space<vmem>>, vector<1x512xf32>
    %24 = vector.broadcast %23 : vector<1x512xf32> to vector<2x512xf32>
    %25 = arith.addf %22, %24 : vector<2x512xf32>
    %cst_16 = arith.constant 0.000000e+00 : f32
    %26 = vector.broadcast %cst_16 : f32 to vector<2x512xf32>
    %27 = arith.cmpf ogt, %25, %26 : vector<2x512xf32>
    %cst_17 = arith.constant 2.000000e-01 : f32
    %28 = vector.broadcast %cst_17 : f32 to vector<2x512xf32>
    %29 = arith.mulf %28, %25 : vector<2x512xf32>
    %30 = arith.select %27, %25, %29 : vector<2x512xi1>, vector<2x512xf32>
    %31 = arith.truncf %30 : vector<2x512xf32> to vector<2x512xbf16>
    %c0_18 = arith.constant 0 : index
    %c0_19 = arith.constant 0 : index
    %32 = vector.load %arg8[%c0_18, %c0_19] : memref<512x256xi8, #tpu.memory_space<vmem>>, vector<512x256xi8>
    %33 = arith.sitofp %32 : vector<512x256xi8> to vector<512x256xbf16>
    %cst_20 = arith.constant dense<0.000000e+00> : vector<2x256xf32>
    %34 = tpu.matmul %31, %33, %cst_20 {dimension_numbers = #tpu.dot_dimension_numbers<[1], [0], [0], [1], [0, 0, 1, 1], [], []>} : vector<2x512xbf16>, vector<512x256xbf16>, vector<2x256xf32> -> vector<2x256xf32>
    %c0_21 = arith.constant 0 : index
    %c0_22 = arith.constant 0 : index
    %35 = vector.load %arg9[%c0_21, %c0_22] : memref<1x256xf32, #tpu.memory_space<vmem>>, vector<1x256xf32>
    %36 = vector.broadcast %35 : vector<1x256xf32> to vector<2x256xf32>
    %37 = arith.mulf %34, %36 : vector<2x256xf32>
    %c0_23 = arith.constant 0 : index
    %c0_24 = arith.constant 0 : index
    %38 = vector.load %arg10[%c0_23, %c0_24] : memref<1x256xf32, #tpu.memory_space<vmem>>, vector<1x256xf32>
    %39 = vector.broadcast %38 : vector<1x256xf32> to vector<2x256xf32>
    %40 = arith.addf %37, %39 : vector<2x256xf32>
    %cst_25 = arith.constant 0.000000e+00 : f32
    %41 = vector.broadcast %cst_25 : f32 to vector<2x256xf32>
    %42 = arith.cmpf ogt, %40, %41 : vector<2x256xf32>
    %cst_26 = arith.constant 2.000000e-01 : f32
    %43 = vector.broadcast %cst_26 : f32 to vector<2x256xf32>
    %44 = arith.mulf %43, %40 : vector<2x256xf32>
    %45 = arith.select %42, %40, %44 : vector<2x256xi1>, vector<2x256xf32>
    %c0_27 = arith.constant 0 : index
    %c0_28 = arith.constant 0 : index
    %46 = vector.load %arg11[%c0_27, %c0_28] : memref<1x256xf32, #tpu.memory_space<vmem>>, vector<1x256xf32>
    %47 = vector.broadcast %46 : vector<1x256xf32> to vector<2x256xf32>
    %48 = arith.mulf %45, %47 : vector<2x256xf32>
    %cst_29 = arith.constant dense<0.000000e+00> : vector<2xf32>
    %49 = vector.multi_reduction <add>, %48, %cst_29 [1] : vector<2x256xf32> to vector<2xf32>
    %50 = vector.shape_cast %49 : vector<2xf32> to vector<2x1xf32>
    %c0_30 = arith.constant 0 : index
    %c0_31 = arith.constant 0 : index
    %51 = vector.load %arg12[%c0_30, %c0_31] : memref<1x1xf32, #tpu.memory_space<vmem>>, vector<1x1xf32>
    %52 = vector.broadcast %51 : vector<1x1xf32> to vector<2x1xf32>
    %53 = arith.addf %50, %52 : vector<2x1xf32>
    %54 = arith.negf %53 : vector<2x1xf32>
    %55 = math.exp %54 : vector<2x1xf32>
    %cst_32 = arith.constant 1.000000e+00 : f32
    %56 = vector.broadcast %cst_32 : f32 to vector<2x1xf32>
    %57 = arith.addf %56, %55 : vector<2x1xf32>
    %58 = arith.divf %56, %57 : vector<2x1xf32>
    %59 = vector.shape_cast %58 : vector<2x1xf32> to vector<2x1xf32>
    %60 = vector.broadcast %59 : vector<2x1xf32> to vector<2x128xf32>
    %c0_33 = arith.constant 0 : index
    %c0_34 = arith.constant 0 : index
    %61 = vector.load %arg13[%c0_33, %c0_34] : memref<2x128xf32, #tpu.memory_space<vmem>>, vector<2x128xf32>
    tpu.vector_store %arg13[%c0_33, %c0_34], %60 {strides = array<i32>} : memref<2x128xf32, #tpu.memory_space<vmem>>, vector<2x128xf32>,
    return
  }
  func.func @transform_0(%arg0: i32) -> (i32, i32) {
    %c0_i32 = arith.constant 0 : i32
    %c0_i32_0 = arith.constant 0 : i32
    return %arg0, %c0_i32 : i32, i32
  }
  func.func @transform_1(%arg0: i32) -> (i32, i32) {
    %c0_i32 = arith.constant 0 : i32
    %c0_i32_0 = arith.constant 0 : i32
    %c0_i32_1 = arith.constant 0 : i32
    return %c0_i32, %c0_i32_0 : i32, i32
  }
  func.func @transform_2(%arg0: i32) -> (i32, i32) {
    %c0_i32 = arith.constant 0 : i32
    %c0_i32_0 = arith.constant 0 : i32
    %c0_i32_1 = arith.constant 0 : i32
    return %c0_i32, %c0_i32_0 : i32, i32
  }
  func.func @transform_3(%arg0: i32) -> (i32, i32) {
    %c0_i32 = arith.constant 0 : i32
    %c0_i32_0 = arith.constant 0 : i32
    %c0_i32_1 = arith.constant 0 : i32
    return %c0_i32, %c0_i32_0 : i32, i32
  }
  func.func @transform_4(%arg0: i32) -> (i32, i32) {
    %c0_i32 = arith.constant 0 : i32
    %c0_i32_0 = arith.constant 0 : i32
    %c0_i32_1 = arith.constant 0 : i32
    return %c0_i32, %c0_i32_0 : i32, i32
  }
  func.func @transform_5(%arg0: i32) -> (i32, i32) {
    %c0_i32 = arith.constant 0 : i32
    %c0_i32_0 = arith.constant 0 : i32
    %c0_i32_1 = arith.constant 0 : i32
    return %c0_i32, %c0_i32_0 : i32, i32
  }
  func.func @transform_6(%arg0: i32) -> (i32, i32) {
    %c0_i32 = arith.constant 0 : i32
    %c0_i32_0 = arith.constant 0 : i32
    %c0_i32_1 = arith.constant 0 : i32
    return %c0_i32, %c0_i32_0 : i32, i32
  }
  func.func @transform_7(%arg0: i32) -> (i32, i32) {
    %c0_i32 = arith.constant 0 : i32
    %c0_i32_0 = arith.constant 0 : i32
    %c0_i32_1 = arith.constant 0 : i32
    return %c0_i32, %c0_i32_0 : i32, i32
  }
  func.func @transform_8(%arg0: i32) -> (i32, i32) {
    %c0_i32 = arith.constant 0 : i32
    %c0_i32_0 = arith.constant 0 : i32
    %c0_i32_1 = arith.constant 0 : i32
    return %c0_i32, %c0_i32_0 : i32, i32
  }
  func.func @transform_9(%arg0: i32) -> (i32, i32) {
    %c0_i32 = arith.constant 0 : i32
    %c0_i32_0 = arith.constant 0 : i32
    %c0_i32_1 = arith.constant 0 : i32
    return %c0_i32, %c0_i32_0 : i32, i32
  }
  func.func @transform_10(%arg0: i32) -> (i32, i32) {
    %c0_i32 = arith.constant 0 : i32
    %c0_i32_0 = arith.constant 0 : i32
    %c0_i32_1 = arith.constant 0 : i32
    return %c0_i32, %c0_i32_0 : i32, i32
  }
  func.func @transform_11(%arg0: i32) -> (i32, i32) {
    %c0_i32 = arith.constant 0 : i32
    %c0_i32_0 = arith.constant 0 : i32
    %c0_i32_1 = arith.constant 0 : i32
    return %c0_i32, %c0_i32_0 : i32, i32
  }
  func.func @transform_12(%arg0: i32) -> (i32, i32) {
    %c0_i32 = arith.constant 0 : i32
    %c0_i32_0 = arith.constant 0 : i32
    return %arg0, %c0_i32 : i32, i32
  }
}

</mosaic_0001>

<bundles_post_ra>
// kernel: cifar_discriminator_forward.1
= control target key start
LH: loop header
LB: loop body
LE: loop exit
PB: predicated region body
PF: predicated region fallthrough
CT: control target
= control target key end

     0   :  { %s6646_s0 = inlined_call_operand.vmem [shape: f32[2,3072], index: 0, kind: input, shape index: {}]   ;;  %s6647_s1 = inlined_call_operand.hbm [shape: s8[3072,1024], index: 1, kind: input, shape index: {}]   ;;  %s6648_s2 = inlined_call_operand.hbm [shape: f32[1,1024], index: 2, kind: input, shape index: {}]   ;;  %s6649_s3 = inlined_call_operand.hbm [shape: f32[1,1024], index: 3, kind: input, shape index: {}]   ;;  %s6650_s4 = inlined_call_operand.hbm [shape: s8[1024,512], index: 4, kind: input, shape index: {}]   ;;  %s6651_s5 = inlined_call_operand.hbm [shape: f32[1,512], index: 5, kind: input, shape index: {}]   ;;  %s6652_s6 = inlined_call_operand.hbm [shape: f32[1,512], index: 6, kind: input, shape index: {}]   ;;  %s6653_s7 = inlined_call_operand.hbm [shape: s8[512,256], index: 7, kind: input, shape index: {}]   ;;  %s6654_s8 = inlined_call_operand.hbm [shape: f32[1,256], index: 8, kind: input, shape index: {}]   ;;  %s6655_s9 = inlined_call_operand.hbm [shape: f32[1,256], index: 9, kind: input, shape index: {}]   ;;  %s6656_s10 = inlined_call_operand.hbm [shape: f32[1,256], index: 10, kind: input, shape index: {}]   ;;  %s6657_s11 = inlined_call_operand.<no memory space> [shape: f32[1,1], index: 11, kind: input, shape index: {}]   ;;  %s6658_s12 = inlined_call_operand.vmem [shape: f32[2,128], index: 12, kind: output, shape index: {}]  }
   0x1   :  { %v17_v0 = vstv %s6657_s11 }
   0x2   :  { %18 = vst [vmem:[#allocation2] sm:$0x1] %v17_v0 }
   0x3   :  { %19 = vsyncpa [#allocation4], 0 }
   0x4   :  { %20 = vsyncpa [#allocation6], 0 }
   0x5   :  { %21 = vsyncpa [#allocation9], 0 }
   0x6   :  { %22 = vsyncpa [#allocation12], 0 }
   0x7   :  { %23 = vsyncpa [#allocation15], 0 }
   0x8   :  { %24 = vsyncpa [#allocation18], 0  ;;  %s6018_s23 = smov [#allocation5]   ;;  %s6019_s25 = smov [#allocation8]  }
   0x9   :  { %s45_s24 = sshll.u32 %s6018_s23, 4  ;;  %s64_s26 = sshll.u32 %s6019_s25, 4  ;;  %s46_s24 = int_to_ptr.vmem [resolvable:$true] %s45_s24  ;;  %s65_s26 = int_to_ptr.vmem [resolvable:$true] %s64_s26 }
   0xa   :  { %s5814_s27 = scalar_lea.vmem %s46_s24, 128  ;;  %p5819_p1 = scmp.lt.s32.totalorder %s46_s24, %s46_s24 }
   0xb   :  { %p5815_p0 = scmp.ne.s32.totalorder %s46_s24, %s5814_s27  ;;  %p5820_p2 = scmp.lt.s32.totalorder %s5814_s27, %s5814_s27 }
   0xd   :  { %p5821_p3 = por %p5820_p2, %p5819_p1 }
   0xf   :  { %p5822_p4 = pnand %p5821_p3, %p5815_p0 }
  0x11   :  { %5825 = shalt.err (!%p5822_p4)
}
  0x12   :  { %48 = dma.hbm_to_vmem [thread:$0]  %s6648_s2, 128, %s46_s24, [#allocation6]  }
  0x13   :  { %s5834_s29 = scalar_lea.vmem %s65_s26, 16384  ;;  %p5839_p6 = scmp.lt.s32.totalorder %s65_s26, %s65_s26 }
  0x14   :  { %p5835_p5 = scmp.ne.s32.totalorder %s65_s26, %s5834_s29  ;;  %p5840_p7 = scmp.lt.s32.totalorder %s5834_s29, %s5834_s29 }
  0x16   :  { %p5841_p8 = por %p5840_p7, %p5839_p6 }
  0x18   :  { %p5842_p9 = pnand %p5841_p8, %p5835_p5 }
  0x1a   :  { %5845 = shalt.err (!%p5842_p9)
}
  0x1b   :  { %s6020_s30 = smov 512   ;;  %s6021_s13 = smov 32  }
  0x1c   :  { %70 = dma.hbm_to_vmem [thread:$0]  %s6650_s4, 16384, %s65_s26, [#allocation9], %s6020_s30, %s6020_s30, %s6021_s13  }
  0x1d   :  { %s6022_s16 = smov [#allocation11]   ;;  %s6023_s18 = smov [#allocation14]  }
  0x1e   :  { %s87_s17 = sshll.u32 %s6022_s16, 4  ;;  %s109_s19 = sshll.u32 %s6023_s18, 4  ;;  %s88_s17 = int_to_ptr.vmem [resolvable:$true] %s87_s17  ;;  %s110_s19 = int_to_ptr.vmem [resolvable:$true] %s109_s19 }
  0x1f   :  { %s5854_s2 = scalar_lea.vmem %s88_s17, 64  ;;  %p5859_p11 = scmp.lt.s32.totalorder %s88_s17, %s88_s17 }
  0x20   :  { %p5855_p10 = scmp.ne.s32.totalorder %s88_s17, %s5854_s2  ;;  %p5860_p12 = scmp.lt.s32.totalorder %s5854_s2, %s5854_s2 }
  0x22   :  { %p5861_p13 = por %p5860_p12, %p5859_p11 }
  0x24   :  { %p5862_p0 = pnand %p5861_p13, %p5855_p10 }
  0x26   :  { %5865 = shalt.err (!%p5862_p0)
}
  0x27   :  { %90 = dma.hbm_to_vmem [thread:$0]  %s6652_s6, 64, %s88_s17, [#allocation12]  }
  0x28   :  { %s5874_s22 = scalar_lea.vmem %s110_s19, 32  ;;  %p5879_p2 = scmp.lt.s32.totalorder %s110_s19, %s110_s19 }
  0x29   :  { %p5875_p1 = scmp.ne.s32.totalorder %s110_s19, %s5874_s22  ;;  %p5880_p3 = scmp.lt.s32.totalorder %s5874_s22, %s5874_s22 }
  0x2b   :  { %p5881_p4 = por %p5880_p3, %p5879_p2 }
  0x2d   :  { %p5882_p5 = pnand %p5881_p4, %p5875_p1 }
  0x2f   :  { %5885 = shalt.err (!%p5882_p5)
}
  0x30   :  { %112 = dma.hbm_to_vmem [thread:$0]  %s6654_s8, 32, %s110_s19, [#allocation15]  }
  0x31   :  { %s6024_s24 = smov [#allocation3]  }
  0x32   :  { %s32_s25 = sshll.u32 %s6024_s24, 4  ;;  %s33_s25 = int_to_ptr.vmem [resolvable:$true] %s32_s25 }
  0x33   :  { %s5894_s26 = scalar_lea.vmem %s33_s25, 98304  ;;  %p5899_p7 = scmp.lt.s32.totalorder %s33_s25, %s33_s25 }
  0x34   :  { %p5895_p6 = scmp.ne.s32.totalorder %s33_s25, %s5894_s26  ;;  %p5900_p8 = scmp.lt.s32.totalorder %s5894_s26, %s5894_s26 }
  0x36   :  { %p5901_p9 = por %p5900_p8, %p5899_p7 }
  0x38   :  { %p5902_p10 = pnand %p5901_p9, %p5895_p6 }
  0x3a   :  { %5905 = shalt.err (!%p5902_p10)
}
  0x3b   :  { %s6025_s6 = smov 1024   ;;  %s6026_s27 = smov 64  }
  0x3c   :  { %38 = dma.hbm_to_vmem [thread:$0]  %s6647_s1, 98304, %s33_s25, [#allocation4], %s6025_s6, %s6025_s6, %s6026_s27  }
  0x3d   :  { %s6027_s29 = smov [#allocation7]   ;;  %s6028_s8 = smov [#allocation10]  }
  0x3e   :  { %s55_s30 = sshll.u32 %s6027_s29, 4  ;;  %s77_s13 = sshll.u32 %s6028_s8, 4  ;;  %s56_s30 = int_to_ptr.vmem [resolvable:$true] %s55_s30  ;;  %s78_s13 = int_to_ptr.vmem [resolvable:$true] %s77_s13 }
  0x3f   :  { %s5914_s14 = scalar_lea.vmem %s56_s30, 128  ;;  %p5919_p12 = scmp.lt.s32.totalorder %s56_s30, %s56_s30 }
  0x40   :  { %p5915_p11 = scmp.ne.s32.totalorder %s56_s30, %s5914_s14  ;;  %p5920_p13 = scmp.lt.s32.totalorder %s5914_s14, %s5914_s14 }
  0x42   :  { %p5921_p0 = por %p5920_p13, %p5919_p12 }
  0x44   :  { %p5922_p1 = pnand %p5921_p0, %p5915_p11 }
  0x46   :  { %5925 = shalt.err (!%p5922_p1)
}
  0x47   :  { %58 = dma.hbm_to_vmem [thread:$0]  %s6649_s3, 128, %s56_s30, [#allocation6]  }
  0x48   :  { %s5934_s17 = scalar_lea.vmem %s78_s13, 64  ;;  %p5939_p3 = scmp.lt.s32.totalorder %s78_s13, %s78_s13 }
  0x49   :  { %p5935_p2 = scmp.ne.s32.totalorder %s78_s13, %s5934_s17  ;;  %p5940_p4 = scmp.lt.s32.totalorder %s5934_s17, %s5934_s17 }
  0x4b   :  { %p5941_p5 = por %p5940_p4, %p5939_p3 }
  0x4d   :  { %p5942_p6 = pnand %p5941_p5, %p5935_p2 }
  0x4f   :  { %5945 = shalt.err (!%p5942_p6)
}
  0x50   :  { %80 = dma.hbm_to_vmem [thread:$0]  %s6651_s5, 64, %s78_s13, [#allocation9]  }
  0x51   :  { %s6029_s19 = smov [#allocation13]  }
  0x52   :  { %s96_s2 = sshll.u32 %s6029_s19, 4  ;;  %s97_s2 = int_to_ptr.vmem [resolvable:$true] %s96_s2 }
  0x53   :  { %s5954_s20 = scalar_lea.vmem %s97_s2, 4096  ;;  %p5959_p8 = scmp.lt.s32.totalorder %s97_s2, %s97_s2 }
  0x54   :  { %p5955_p7 = scmp.ne.s32.totalorder %s97_s2, %s5954_s20  ;;  %p5960_p9 = scmp.lt.s32.totalorder %s5954_s20, %s5954_s20 }
  0x56   :  { %p5961_p10 = por %p5960_p9, %p5959_p8 }
  0x58   :  { %p5962_p11 = pnand %p5961_p10, %p5955_p7 }
  0x5a   :  { %5965 = shalt.err (!%p5962_p11)
}
  0x5b   :  { %s6030_s3 = smov 256   ;;  %s6031_s21 = smov 16  }
  0x5c   :  { %102 = dma.hbm_to_vmem [thread:$0]  %s6653_s7, 4096, %s97_s2, [#allocation12], %s6030_s3, %s6030_s3, %s6031_s21  }
  0x5d   :  { %s6032_s23 = smov [#allocation16]   ;;  %s6033_s25 = smov [#allocation17]  }
  0x5e   :  { %s119_s24 = sshll.u32 %s6032_s23, 4  ;;  %s129_s5 = sshll.u32 %s6033_s25, 4  ;;  %s120_s24 = int_to_ptr.vmem [resolvable:$true] %s119_s24  ;;  %s130_s5 = int_to_ptr.vmem [resolvable:$true] %s129_s5 }
  0x5f   :  { %s5974_s26 = scalar_lea.vmem %s120_s24, 32  ;;  %p5979_p13 = scmp.lt.s32.totalorder %s120_s24, %s120_s24 }
  0x60   :  { %p5975_p12 = scmp.ne.s32.totalorder %s120_s24, %s5974_s26  ;;  %p5980_p0 = scmp.lt.s32.totalorder %s5974_s26, %s5974_s26 }
  0x62   :  { %p5981_p1 = por %p5980_p0, %p5979_p13 }
  0x64   :  { %p5982_p2 = pnand %p5981_p1, %p5975_p12 }
  0x66   :  { %5985 = shalt.err (!%p5982_p2)
}
  0x67   :  { %122 = dma.hbm_to_vmem [thread:$0]  %s6655_s9, 32, %s120_s24, [#allocation15]  }
  0x68   :  { %s5994_s11 = scalar_lea.vmem %s130_s5, 32  ;;  %p5999_p4 = scmp.lt.s32.totalorder %s130_s5, %s130_s5 }
  0x69   :  { %p5995_p3 = scmp.ne.s32.totalorder %s130_s5, %s5994_s11  ;;  %p6000_p5 = scmp.lt.s32.totalorder %s5994_s11, %s5994_s11 }
  0x6b   :  { %p6001_p6 = por %p6000_p5, %p5999_p4 }
  0x6d   :  { %p6002_p7 = pnand %p6001_p6, %p5995_p3 }
  0x6f   :  { %6005 = shalt.err (!%p6002_p7)
}
  0x70   :  { %132 = dma.hbm_to_vmem [thread:$0]  %s6656_s10, 32, %s130_s5, [#allocation18]  }
  0x71   :  { %6006 = dma.done.wait [#allocation4], 98304  }
  0x72   :  { %6007 = vsyncadd [#allocation4], 4294868992 }
  0x73   :  { %6008 = dma.done.wait [#allocation6], 256  }
  0x74   :  { %6009 = vsyncadd [#allocation6], 4294967040 }
  0x75   :  { %6010 = dma.done.wait [#allocation9], 16448  }
  0x76   :  { %6011 = vsyncadd [#allocation9], 4294950848 }
  0x77   :  { %6012 = dma.done.wait [#allocation12], 4160  }
  0x78   :  { %6013 = vsyncadd [#allocation12], 4294963136 }
  0x79   :  { %6014 = dma.done.wait [#allocation15], 64  }
  0x7a   :  { %6015 = vsyncadd [#allocation15], 4294967232 }
  0x7b   :  { %6016 = dma.done.wait [#allocation18], 32  }
  0x7c   :  { %6017 = vsyncadd [#allocation18], 4294967264  ;;  %v352_v1 = vld [vmem:[#allocation3 + $0xc8] sm:$0xff]  ;;  %v351_v3 = vld [vmem:[#allocation3 + $0xc0] sm:$0xff]  ;;  %v6034_v19 = vmov 1983009808   ;;  %v181_v21 = vlaneseq }
  0x7d   :  { %v416_v2 = vld [vmem:[#allocation3 + $0x2c8] sm:$0xff]  ;;  %v1144_v4 = vunpack.c.l.s8.bf16 %v352_v1  ;;  %v1152_v5 = vunpack.c.h.s8.bf16 %v352_v1  ;;  %v415_v8 = vld [vmem:[#allocation3 + $0x2c0] sm:$0xff]  ;;  %v1151_v9 = vunpack.c.h.s8.bf16 %v351_v3  ;;  %v1143_v13 = vunpack.c.l.s8.bf16 %v351_v3 }
  0x7e   :  { %v1272_v6 = vunpack.c.l.s8.bf16 %v416_v2  ;;  %v1280_v7 = vunpack.c.h.s8.bf16 %v416_v2  ;;  %v1279_v10 = vunpack.c.h.s8.bf16 %v415_v8  ;;  %v344_v11 = vld [vmem:[#allocation3 + $0x88] sm:$0xff]  ;;  %v1271_v14 = vunpack.c.l.s8.bf16 %v415_v8  ;;  %v343_v17 = vld [vmem:[#allocation3 + $0x80] sm:$0xff] }
  0x7f   :  { %v408_v12 = vld [vmem:[#allocation3 + $0x288] sm:$0xff]  ;;  %2631 = vmatprep.subr.bf16.mxu0 %v1152_v5  ;;  %v1136_v15 = vunpack.c.h.s8.bf16 %v344_v11  ;;  %v407_v18 = vld [vmem:[#allocation3 + $0x280] sm:$0xff]  ;;  %v179_v20 = vunpack.c.l.s4 %v6034_v19  ;;  %v1135_v22 = vunpack.c.h.s8.bf16 %v343_v17  ;;  %v1128_v24 = vunpack.c.l.s8.bf16 %v344_v11 }
  0x80   :  { %2672 = vmatprep.subr.bf16.mxu1 %v1280_v7  ;;  %2632 = vmatpush1.bf16.msra.mxu0 %v1151_v9  ;;  %v1264_v16 = vunpack.c.h.s8.bf16 %v408_v12  ;;  %v1263_v23 = vunpack.c.h.s8.bf16 %v407_v18  ;;  %v1256_v25 = vunpack.c.l.s8.bf16 %v408_v12  ;;  %v6134_v27 = vshrl.u32 %v181_v21, 7  ;;  %v336_v28 = vld [vmem:[#allocation3 + $0x48] sm:$0xff]  ;;  %v335_v34 = vld [vmem:[#allocation3 + $0x40] sm:$0xff] }
  0x81   :  { %2673 = vmatpush1.bf16.msra.mxu1 %v1279_v10  ;;  %2633 = vmatprep.subr.bf16.mxu0 %v1144_v4  ;;  %v180_v26 = vunpack.c.0.s8 %v179_v20  ;;  %v400_v29 = vld [vmem:[#allocation3 + $0x248] sm:$0xff]  ;;  %v1127_v30 = vunpack.c.l.s8.bf16 %v343_v17  ;;  %v1255_v31 = vunpack.c.l.s8.bf16 %v407_v18  ;;  %v1120_v32 = vunpack.c.h.s8.bf16 %v336_v28  ;;  %v399_v35 = vld [vmem:[#allocation3 + $0x240] sm:$0xff] }
  0x82   :  { %2674 = vmatprep.subr.bf16.mxu1 %v1272_v6  ;;  %v1248_v33 = vunpack.c.h.s8.bf16 %v400_v29  ;;  %v165_v37 = vld [vmem:[%s6646_s0] sm:$0xff]  ;;  %v1119_v38 = vunpack.c.h.s8.bf16 %v335_v34  ;;  %v1247_v39 = vunpack.c.h.s8.bf16 %v399_v35  ;;  %v1112_v40 = vunpack.c.l.s8.bf16 %v336_v28  ;;  %v328_v44 = vld [vmem:[#allocation3 + $0x8] sm:$0xff] }
  0x83   :  { %v6137_v36 = vsub.s32 %v180_v26, %v6134_v27  ;;  %v1240_v41 = vunpack.c.l.s8.bf16 %v400_v29  ;;  %v177_v43 = vcombine.high %v165_v37, %v165_v37  ;;  %v392_v45 = vld [vmem:[#allocation3 + $0x208] sm:$0xff]  ;;  %v1111_v48 = vunpack.c.l.s8.bf16 %v335_v34  ;;  %v327_v52 = vld [vmem:[#allocation3] sm:$0xff] }
  0x84   :  { %2634 = vmatpush1.bf16.msra.mxu0 %v1143_v13  ;;  %v1239_v49 = vunpack.c.l.s8.bf16 %v399_v35  ;;  %v1104_v50 = vunpack.c.h.s8.bf16 %v328_v44  ;;  %v1232_v51 = vunpack.c.h.s8.bf16 %v392_v45  ;;  %v391_v53 = vld [vmem:[#allocation3 + $0x200] sm:$0xff]  ;;  %v1103_v57 = vunpack.c.h.s8.bf16 %v327_v52  ;;  %v384_v61 = vld [vmem:[#allocation3 + $0x1c8] sm:$0xff] }
  0x85   :  { %2675 = vmatpush1.bf16.msra.mxu1 %v1271_v14  ;;  %2635 = vmatprep.subr.bf16.mxu0 %v1136_v15  ;;  %v6143_v42 = vrot.slane %v165_v37, %v6137_v36  ;;  %v6148_v47 = vrot.slane %v177_v43, %v6137_v36  ;;  %v1231_v58 = vunpack.c.h.s8.bf16 %v391_v53  ;;  %v1096_v59 = vunpack.c.l.s8.bf16 %v328_v44  ;;  %v448_v62 = vld [vmem:[#allocation3 + $0x3c8] sm:$0xff]  ;;  %v383_v3 = vld [vmem:[#allocation3 + $0x1c0] sm:$0xff] }
  0x86   :  { %2676 = vmatprep.subr.bf16.mxu1 %v1264_v16  ;;  %v1224_v60 = vunpack.c.l.s8.bf16 %v392_v45  ;;  %v1095_v63 = vunpack.c.l.s8.bf16 %v327_v52  ;;  %v1223_v0 = vunpack.c.l.s8.bf16 %v391_v53  ;;  %v1216_v1 = vunpack.c.h.s8.bf16 %v384_v61  ;;  %v447_v4 = vld [vmem:[#allocation3 + $0x3c0] sm:$0xff]  ;;  %v376_v9 = vld [vmem:[#allocation3 + $0x188] sm:$0xff] }
  0x87   :  { %v192_v46 = vcombine.high %v6143_v42, %v6143_v42  ;;  %v193_v55 = vcombine.high %v6148_v47, %v6148_v47  ;;  %v1344_v2 = vunpack.c.h.s8.bf16 %v448_v62  ;;  %v1215_v5 = vunpack.c.h.s8.bf16 %v383_v3  ;;  %v440_v10 = vld [vmem:[#allocation3 + $0x388] sm:$0xff]  ;;  %v375_v15 = vld [vmem:[#allocation3 + $0x180] sm:$0xff] }
  0x88   :  { %2636 = vmatpush1.bf16.msra.mxu0 %v1135_v22  ;;  %v1343_v6 = vunpack.c.h.s8.bf16 %v447_v4  ;;  %v1208_v7 = vunpack.c.l.s8.bf16 %v384_v61  ;;  %v1336_v8 = vunpack.c.l.s8.bf16 %v448_v62  ;;  %v1207_v11 = vunpack.c.l.s8.bf16 %v383_v3  ;;  %v439_v16 = vld [vmem:[#allocation3 + $0x380] sm:$0xff]  ;;  %v368_v21 = vld [vmem:[#allocation3 + $0x148] sm:$0xff] }
  0x89   :  { %2677 = vmatpush1.bf16.msra.mxu1 %v1263_v23  ;;  %2637 = vmatprep.subr.bf16.mxu0 %v1128_v24  ;;  %v6150_v54 = vpack.c.bf16 %v192_v46, %v192_v46  ;;  %v6155_v56 = vpack.c.bf16 %v193_v55, %v193_v55  ;;  %v1335_v12 = vunpack.c.l.s8.bf16 %v447_v4  ;;  %v1200_v13 = vunpack.c.h.s8.bf16 %v376_v9  ;;  %v432_v22 = vld [vmem:[#allocation3 + $0x348] sm:$0xff]  ;;  %v367_v28 = vld [vmem:[#allocation3 + $0x140] sm:$0xff] }
  0x8a   :  { %2678 = vmatprep.subr.bf16.mxu1 %v1256_v25  ;;  %v1328_v14 = vunpack.c.h.s8.bf16 %v440_v10  ;;  %v1199_v17 = vunpack.c.h.s8.bf16 %v375_v15  ;;  %v1327_v18 = vunpack.c.h.s8.bf16 %v439_v16  ;;  %v1192_v19 = vunpack.c.l.s8.bf16 %v376_v9  ;;  %v431_v29 = vld [vmem:[#allocation3 + $0x340] sm:$0xff]  ;;  %v360_v34 = vld [vmem:[#allocation3 + $0x108] sm:$0xff] }
  0x8b   :  { %2663 = vmatprep.mubr.bf16.mxu0 %v6150_v54  ;;  %2704 = vmatprep.mubr.bf16.mxu1 %v6155_v56  ;;  %v1320_v20 = vunpack.c.l.s8.bf16 %v440_v10  ;;  %v1191_v23 = vunpack.c.l.s8.bf16 %v375_v15  ;;  %v1319_v24 = vunpack.c.l.s8.bf16 %v439_v16  ;;  %v1184_v25 = vunpack.c.h.s8.bf16 %v368_v21  ;;  %v424_v35 = vld [vmem:[#allocation3 + $0x308] sm:$0xff]  ;;  %v359_v43 = vld [vmem:[#allocation3 + $0x100] sm:$0xff] }
  0x8c   :  { %2638 = vmatpush1.bf16.msra.mxu0 %v1127_v30  ;;  %v1312_v26 = vunpack.c.h.s8.bf16 %v432_v22  ;;  %v1183_v30 = vunpack.c.h.s8.bf16 %v367_v28  ;;  %v166_v37 = vld [vmem:[%s6646_s0 + $0x8] sm:$0xff]  ;;  %v1167_v46 = vunpack.c.h.s8.bf16 %v359_v43  ;;  %vm5737_vm14 = vcmask 1041408  }
  0x8d   :  { %2679 = vmatpush1.bf16.msra.mxu1 %v1255_v31  ;;  %2639 = vmatprep.subr.bf16.mxu0 %v1120_v32  ;;  %v1311_v31 = vunpack.c.h.s8.bf16 %v431_v29  ;;  %v1176_v32 = vunpack.c.l.s8.bf16 %v368_v21  ;;  %v423_v44 = vld [vmem:[#allocation3 + $0x300] sm:$0xff]  ;;  %v194_v45 = vcombine.high %v166_v37, %v166_v37  ;;  %v544_v52 = vld [vmem:[#allocation3 + $0x6c8] sm:$0xff]  ;;  %v6162_v53 = vrot.slane %v166_v37, %v6137_v36 }
  0x8e   :  { %2680 = vmatprep.subr.bf16.mxu1 %v1248_v33  ;;  %v1304_v33 = vunpack.c.l.s8.bf16 %v432_v22  ;;  %v479_v61 = vld [vmem:[#allocation3 + $0x4c0] sm:$0xff] }
  0x8f   :  { %v6165_v55 = vrot.slane %v194_v45, %v6137_v36  ;;  %v543_v62 = vld [vmem:[#allocation3 + $0x6c0] sm:$0xff]  ;;  %v1407_v3 = vunpack.c.h.s8.bf16 %v479_v61 }
  0x90   :  { %2640 = vmatpush1.bf16.msra.mxu0 %v1119_v38  ;;  %v1175_v38 = vunpack.c.l.s8.bf16 %v367_v28  ;;  %v1535_v4 = vunpack.c.h.s8.bf16 %v543_v62 }
  0x91   :  { %2681 = vmatpush1.bf16.msra.mxu1 %v1247_v39  ;;  %2641 = vmatprep.subr.bf16.mxu0 %v1112_v40  ;;  %v1303_v39 = vunpack.c.l.s8.bf16 %v431_v29  ;;  %v1168_v40 = vunpack.c.h.s8.bf16 %v360_v34 }
  0x92   :  { %2682 = vmatprep.subr.bf16.mxu1 %v1240_v41  ;;  %v1296_v41 = vunpack.c.h.s8.bf16 %v424_v35 }
  0x94   :  { %2642 = vmatpush1.bf16.msra.mxu0 %v1111_v48  ;;  %v1295_v48 = vunpack.c.h.s8.bf16 %v423_v44 }
  0x95   :  { %2683 = vmatpush1.bf16.msra.mxu1 %v1239_v49  ;;  %2643 = vmatprep.subr.bf16.mxu0 %v1104_v50  ;;  %v1160_v49 = vunpack.c.l.s8.bf16 %v360_v34  ;;  %v1288_v50 = vunpack.c.l.s8.bf16 %v424_v35 }
  0x96   :  { %2684 = vmatprep.subr.bf16.mxu1 %v1232_v51  ;;  %v480_v51 = vld [vmem:[#allocation3 + $0x4c8] sm:$0xff] }
  0x98   :  { %2644 = vmatpush1.bf16.msra.mxu0 %v1103_v57  ;;  %v1159_v57 = vunpack.c.l.s8.bf16 %v359_v43 }
  0x99   :  { %2685 = vmatpush1.bf16.msra.mxu1 %v1231_v58  ;;  %2645 = vmatprep.subr.bf16.mxu0 %v1096_v59  ;;  %v1287_v58 = vunpack.c.l.s8.bf16 %v423_v44  ;;  %v1408_v59 = vunpack.c.h.s8.bf16 %v480_v51 }
  0x9a   :  { %2686 = vmatprep.subr.bf16.mxu1 %v1224_v60  ;;  %v1536_v60 = vunpack.c.h.s8.bf16 %v544_v52 }
  0x9c   :  { %2646 = vmatpush1.bf16.msra.mxu0 %v1095_v63  ;;  %v209_v63 = vcombine.high %v6162_v53, %v6162_v53 }
  0x9d   :  { %2687 = vmatpush1.bf16.msra.mxu1 %v1223_v0  ;;  %2647 = vmatprep.subr.bf16.mxu0 %v1216_v1  ;;  %v210_v0 = vcombine.high %v6165_v55, %v6165_v55  ;;  %v6173_v1 = vpack.c.bf16 %v6143_v42, %v6143_v42  ;;  %v1399_v42 = vunpack.c.l.s8.bf16 %v479_v61 }
  0x9e   :  { %2688 = vmatprep.subr.bf16.mxu1 %v1344_v2  ;;  %v6177_v2 = vpack.c.bf16 %v6148_v47, %v6148_v47  ;;  %v6179_v9 = vpack.c.bf16 %v209_v63, %v209_v63  ;;  %v1527_v47 = vunpack.c.l.s8.bf16 %v543_v62  ;;  %v504_v63 = vld [vmem:[#allocation3 + $0x588] sm:$0xff] }
  0x9f   :  { %v6181_v10 = vpack.c.bf16 %v210_v0, %v210_v0  ;;  %v568_v0 = vld [vmem:[#allocation3 + $0x788] sm:$0xff] }
  0xa0   :  { %2648 = vmatpush2.bf16.msra.mxu0 %v1215_v5  ;;  %v1400_v5 = vunpack.c.l.s8.bf16 %v480_v51 }
  0xa1   :  { %2689 = vmatpush2.bf16.msra.mxu1 %v1343_v6  ;;  %2649 = vmatprep.subr.bf16.mxu0 %v1208_v7  ;;  %v1528_v6 = vunpack.c.l.s8.bf16 %v544_v52  ;;  %v472_v7 = vld [vmem:[#allocation3 + $0x488] sm:$0xff] }
  0xa2   :  { %2690 = vmatprep.subr.bf16.mxu1 %v1336_v8  ;;  %v536_v8 = vld [vmem:[#allocation3 + $0x688] sm:$0xff] }
  0xa4   :  { %2650 = vmatpush2.bf16.msra.mxu0 %v1207_v11  ;;  %v1392_v11 = vunpack.c.h.s8.bf16 %v472_v7 }
  0xa5   :  { %2691 = vmatpush2.bf16.msra.mxu1 %v1335_v12  ;;  %2651 = vmatprep.subr.bf16.mxu0 %v1200_v13  ;;  %v1520_v12 = vunpack.c.h.s8.bf16 %v536_v8  ;;  %v471_v13 = vld [vmem:[#allocation3 + $0x480] sm:$0xff] }
  0xa6   :  { %2692 = vmatprep.subr.bf16.mxu1 %v1328_v14  ;;  %v535_v14 = vld [vmem:[#allocation3 + $0x680] sm:$0xff]  ;;  %v1391_v15 = vunpack.c.h.s8.bf16 %v471_v13  ;;  %v1383_v21 = vunpack.c.l.s8.bf16 %v471_v13  ;;  %v496_v13 = vld [vmem:[#allocation3 + $0x548] sm:$0xff] }
  0xa7   :  { %v1519_v16 = vunpack.c.h.s8.bf16 %v535_v14  ;;  %v1511_v22 = vunpack.c.l.s8.bf16 %v535_v14  ;;  %v560_v14 = vld [vmem:[#allocation3 + $0x748] sm:$0xff] }
  0xa8   :  { %2652 = vmatpush2.bf16.msra.mxu0 %v1199_v17  ;;  %v1384_v17 = vunpack.c.l.s8.bf16 %v472_v7  ;;  %v503_v7 = vld [vmem:[#allocation3 + $0x580] sm:$0xff] }
  0xa9   :  { %2693 = vmatpush2.bf16.msra.mxu1 %v1327_v18  ;;  %2653 = vmatprep.subr.bf16.mxu0 %v1192_v19  ;;  %v1512_v18 = vunpack.c.l.s8.bf16 %v536_v8  ;;  %v464_v19 = vld [vmem:[#allocation3 + $0x448] sm:$0xff]  ;;  %v567_v8 = vld [vmem:[#allocation3 + $0x780] sm:$0xff] }
  0xaa   :  { %2694 = vmatprep.subr.bf16.mxu1 %v1320_v20  ;;  %v528_v20 = vld [vmem:[#allocation3 + $0x648] sm:$0xff] }
  0xac   :  { %2654 = vmatpush2.bf16.msra.mxu0 %v1191_v23  ;;  %v1376_v23 = vunpack.c.h.s8.bf16 %v464_v19 }
  0xad   :  { %2695 = vmatpush2.bf16.msra.mxu1 %v1319_v24  ;;  %2655 = vmatprep.subr.bf16.mxu0 %v1184_v25  ;;  %v1504_v24 = vunpack.c.h.s8.bf16 %v528_v20  ;;  %v463_v25 = vld [vmem:[#allocation3 + $0x440] sm:$0xff] }
  0xae   :  { %2696 = vmatprep.subr.bf16.mxu1 %v1312_v26  ;;  %v527_v26 = vld [vmem:[#allocation3 + $0x640] sm:$0xff]  ;;  %v1375_v28 = vunpack.c.h.s8.bf16 %v463_v25  ;;  %v1367_v34 = vunpack.c.l.s8.bf16 %v463_v25  ;;  %v488_v25 = vld [vmem:[#allocation3 + $0x508] sm:$0xff] }
  0xaf   :  { %v1503_v29 = vunpack.c.h.s8.bf16 %v527_v26  ;;  %v1495_v35 = vunpack.c.l.s8.bf16 %v527_v26  ;;  %v552_v26 = vld [vmem:[#allocation3 + $0x708] sm:$0xff] }
  0xb0   :  { %2656 = vmatpush2.bf16.msra.mxu0 %v1183_v30  ;;  %v1368_v30 = vunpack.c.l.s8.bf16 %v464_v19  ;;  %v495_v19 = vld [vmem:[#allocation3 + $0x540] sm:$0xff] }
  0xb1   :  { %2697 = vmatpush2.bf16.msra.mxu1 %v1311_v31  ;;  %2657 = vmatprep.subr.bf16.mxu0 %v1176_v32  ;;  %v1496_v31 = vunpack.c.l.s8.bf16 %v528_v20  ;;  %v456_v32 = vld [vmem:[#allocation3 + $0x408] sm:$0xff]  ;;  %v559_v20 = vld [vmem:[#allocation3 + $0x740] sm:$0xff] }
  0xb2   :  { %2698 = vmatprep.subr.bf16.mxu1 %v1304_v33  ;;  %v520_v33 = vld [vmem:[#allocation3 + $0x608] sm:$0xff]  ;;  %v1360_v37 = vunpack.c.h.s8.bf16 %v456_v32  ;;  %v1352_v44 = vunpack.c.l.s8.bf16 %v456_v32  ;;  %v1552_v32 = vunpack.c.h.s8.bf16 %v552_v26 }
  0xb3   :  { %v1480_v45 = vunpack.c.l.s8.bf16 %v520_v33 }
  0xb4   :  { %2658 = vmatpush2.bf16.msra.mxu0 %v1175_v38  ;;  %v1488_v38 = vunpack.c.h.s8.bf16 %v520_v33  ;;  %v487_v33 = vld [vmem:[#allocation3 + $0x500] sm:$0xff] }
  0xb5   :  { %2699 = vmatpush2.bf16.msra.mxu1 %v1303_v39  ;;  %2659 = vmatprep.subr.bf16.mxu0 %v1168_v40  ;;  %v455_v39 = vld [vmem:[#allocation3 + $0x400] sm:$0xff] }
  0xb6   :  { %2700 = vmatprep.subr.bf16.mxu1 %v1296_v41  ;;  %v519_v40 = vld [vmem:[#allocation3 + $0x600] sm:$0xff]  ;;  %v1359_v41 = vunpack.c.h.s8.bf16 %v455_v39 }
  0xb7   :  { %v1487_v43 = vunpack.c.h.s8.bf16 %v519_v40 }
  0xb8   :  { %2660 = vmatpush2.bf16.msra.mxu0 %v1167_v46  ;;  %v512_v46 = vld [vmem:[#allocation3 + $0x5c8] sm:$0xff] }
  0xb9   :  { %2701 = vmatpush2.bf16.msra.mxu1 %v1295_v48  ;;  %2661 = vmatprep.subr.bf16.mxu0 %v1160_v49  ;;  %v576_v48 = vld [vmem:[#allocation3 + $0x7c8] sm:$0xff]  ;;  %v1351_v49 = vunpack.c.l.s8.bf16 %v455_v39  ;;  %v1472_v51 = vunpack.c.h.s8.bf16 %v512_v46  ;;  %v1464_v61 = vunpack.c.l.s8.bf16 %v512_v46  ;;  %v1416_v39 = vunpack.c.l.s8.bf16 %v488_v25 }
  0xba   :  { %2702 = vmatprep.subr.bf16.mxu1 %v1288_v50  ;;  %v1479_v50 = vunpack.c.l.s8.bf16 %v519_v40  ;;  %v1600_v52 = vunpack.c.h.s8.bf16 %v576_v48  ;;  %v1592_v62 = vunpack.c.l.s8.bf16 %v576_v48  ;;  %v1544_v40 = vunpack.c.l.s8.bf16 %v552_v26 }
  0xbb   :  { %v1415_v46 = vunpack.c.l.s8.bf16 %v487_v33 }
  0xbc   :  { %2662 = vmatpush2.bf16.msra.mxu0 %v1159_v57  ;;  %v511_v57 = vld [vmem:[#allocation3 + $0x5c0] sm:$0xff] }
  0xbd   :  { %2703 = vmatpush2.bf16.msra.mxu1 %v1287_v58  ;;  %2713 = vmatprep.subr.bf16.mxu0 %v1408_v59  ;;  %v575_v58 = vld [vmem:[#allocation3 + $0x7c0] sm:$0xff]  ;;  %v1471_v59 = vunpack.c.h.s8.bf16 %v511_v57 }
  0xbe   :  { %2754 = vmatprep.subr.bf16.mxu1 %v1536_v60  ;;  %v1599_v60 = vunpack.c.h.s8.bf16 %v575_v58 }
  0xbf   :  { %2664 = vmatmul.mubr.bf16.vlgmr.msra.gmra.mxu0 %v6173_v1 }
  0xc0   :  { %2705 = vmatmul.mubr.bf16.vlgmr.msra.gmra.mxu1 %v6177_v2  ;;  %2714 = vmatpush1.bf16.msra.mxu0 %v1407_v3  ;;  %v1463_v3 = vunpack.c.l.s8.bf16 %v511_v57 }
  0xc1   :  { %2755 = vmatpush1.bf16.msra.mxu1 %v1535_v4  ;;  %2715 = vmatprep.subr.bf16.mxu0 %v1400_v5  ;;  %v1591_v4 = vunpack.c.l.s8.bf16 %v575_v58  ;;  %v1456_v5 = vunpack.c.h.s8.bf16 %v504_v63 }
  0xc2   :  { %2756 = vmatprep.subr.bf16.mxu1 %v1528_v6  ;;  %2745 = vmatprep.mubr.bf16.mxu0 %v6179_v9  ;;  %v1584_v6 = vunpack.c.h.s8.bf16 %v568_v0 }
  0xc3   :  { %2786 = vmatprep.mubr.bf16.mxu1 %v6181_v10 }
  0xc4   :  { %2716 = vmatpush1.bf16.msra.mxu0 %v1399_v42  ;;  %v1455_v42 = vunpack.c.h.s8.bf16 %v503_v7 }
  0xc5   :  { %2757 = vmatpush1.bf16.msra.mxu1 %v1527_v47  ;;  %2717 = vmatprep.subr.bf16.mxu0 %v1392_v11  ;;  %v1583_v47 = vunpack.c.h.s8.bf16 %v567_v8  ;;  %v1448_v11 = vunpack.c.l.s8.bf16 %v504_v63 }
  0xc6   :  { %2758 = vmatprep.subr.bf16.mxu1 %v1520_v12  ;;  %v1576_v12 = vunpack.c.l.s8.bf16 %v568_v0 }
  0xc8   :  { %2718 = vmatpush1.bf16.msra.mxu0 %v1391_v15  ;;  %v1447_v15 = vunpack.c.l.s8.bf16 %v503_v7 }
  0xc9   :  { %2759 = vmatpush1.bf16.msra.mxu1 %v1519_v16  ;;  %2719 = vmatprep.subr.bf16.mxu0 %v1384_v17  ;;  %v1575_v16 = vunpack.c.l.s8.bf16 %v567_v8  ;;  %v1440_v17 = vunpack.c.h.s8.bf16 %v496_v13 }
  0xca   :  { %2760 = vmatprep.subr.bf16.mxu1 %v1512_v18  ;;  %v1568_v18 = vunpack.c.h.s8.bf16 %v560_v14 }
  0xcc   :  { %2720 = vmatpush1.bf16.msra.mxu0 %v1383_v21  ;;  %v1439_v21 = vunpack.c.h.s8.bf16 %v495_v19 }
  0xcd   :  { %2761 = vmatpush1.bf16.msra.mxu1 %v1511_v22  ;;  %2721 = vmatprep.subr.bf16.mxu0 %v1376_v23  ;;  %v1567_v22 = vunpack.c.h.s8.bf16 %v559_v20  ;;  %v1432_v23 = vunpack.c.l.s8.bf16 %v496_v13 }
  0xce   :  { %2762 = vmatprep.subr.bf16.mxu1 %v1504_v24  ;;  %v1560_v24 = vunpack.c.l.s8.bf16 %v560_v14 }
  0xd0   :  { %2722 = vmatpush1.bf16.msra.mxu0 %v1375_v28  ;;  %v167_v28 = vld [vmem:[%s6646_s0 + $0x10] sm:$0xff] }
  0xd1   :  { %2763 = vmatpush1.bf16.msra.mxu1 %v1503_v29  ;;  %2723 = vmatprep.subr.bf16.mxu0 %v1368_v30  ;;  %v1431_v29 = vunpack.c.l.s8.bf16 %v495_v19  ;;  %v1559_v30 = vunpack.c.l.s8.bf16 %v559_v20 }
  0xd2   :  { %2764 = vmatprep.subr.bf16.mxu1 %v1496_v31  ;;  %v1424_v31 = vunpack.c.h.s8.bf16 %v488_v25 }
  0xd4   :  { %2724 = vmatpush1.bf16.msra.mxu0 %v1367_v34  ;;  %v551_v34 = vld [vmem:[#allocation3 + $0x700] sm:$0xff] }
  0xd5   :  { %2765 = vmatpush1.bf16.msra.mxu1 %v1495_v35  ;;  %2725 = vmatprep.subr.bf16.mxu0 %v1360_v37  ;;  %v211_v35 = vcombine.high %v167_v28, %v167_v28  ;;  %v1423_v37 = vunpack.c.h.s8.bf16 %v487_v33  ;;  %v1543_v48 = vunpack.c.l.s8.bf16 %v551_v34 }
  0xd6   :  { %2766 = vmatprep.subr.bf16.mxu1 %v1488_v38  ;;  %v1551_v38 = vunpack.c.h.s8.bf16 %v551_v34  ;;  %v583_v34 = vld [vmem:[#allocation3 + $0x800] sm:$0xff] }
  0xd8   :  { %2726 = vmatpush1.bf16.msra.mxu0 %v1359_v41  ;;  %v608_v41 = vld [vmem:[#allocation3 + $0x8c8] sm:$0xff] }
  0xd9   :  { %2767 = vmatpush1.bf16.msra.mxu1 %v1487_v43  ;;  %2727 = vmatprep.subr.bf16.mxu0 %v1352_v44  ;;  %v672_v43 = vld [vmem:[#allocation3 + $0xac8] sm:$0xff]  ;;  %v6191_v44 = vrot.slane %v167_v28, %v6137_v36  ;;  %v1656_v63 = vunpack.c.l.s8.bf16 %v608_v41 }
  0xda   :  { %2768 = vmatprep.subr.bf16.mxu1 %v1480_v45  ;;  %v6194_v45 = vrot.slane %v211_v35, %v6137_v36  ;;  %v1784_v0 = vunpack.c.l.s8.bf16 %v672_v43  ;;  %v584_v28 = vld [vmem:[#allocation3 + $0x808] sm:$0xff]  ;;  %v647_v35 = vld [vmem:[#allocation3 + $0xa00] sm:$0xff] }
  0xdb   :  { %v226_v57 = vcombine.high %v6191_v44, %v6191_v44 }
  0xdc   :  { %2728 = vmatpush1.bf16.msra.mxu0 %v1351_v49  ;;  %v1664_v49 = vunpack.c.h.s8.bf16 %v608_v41  ;;  %v227_v58 = vcombine.high %v6194_v45, %v6194_v45  ;;  %v640_v41 = vld [vmem:[#allocation3 + $0x9c8] sm:$0xff] }
  0xdd   :  { %2769 = vmatpush1.bf16.msra.mxu1 %v1479_v50  ;;  %2729 = vmatprep.subr.bf16.mxu0 %v1472_v51  ;;  %v1792_v50 = vunpack.c.h.s8.bf16 %v672_v43  ;;  %v607_v51 = vld [vmem:[#allocation3 + $0x8c0] sm:$0xff]  ;;  %v704_v43 = vld [vmem:[#allocation3 + $0xbc8] sm:$0xff] }
  0xde   :  { %2770 = vmatprep.subr.bf16.mxu1 %v1600_v52  ;;  %v671_v52 = vld [vmem:[#allocation3 + $0xac0] sm:$0xff] }
  0xe0   :  { %2730 = vmatpush2.bf16.msra.mxu0 %v1471_v59  ;;  %v6202_v59 = vpack.c.bf16 %v6162_v53, %v6162_v53  ;;  %v1655_v53 = vunpack.c.l.s8.bf16 %v607_v51 }
  0xe1   :  { %2771 = vmatpush2.bf16.msra.mxu1 %v1599_v60  ;;  %2731 = vmatprep.subr.bf16.mxu0 %v1464_v61  ;;  %v6206_v60 = vpack.c.bf16 %v6165_v55, %v6165_v55  ;;  %v1663_v61 = vunpack.c.h.s8.bf16 %v607_v51  ;;  %v1783_v55 = vunpack.c.l.s8.bf16 %v671_v52  ;;  %v639_v51 = vld [vmem:[#allocation3 + $0x9c0] sm:$0xff] }
  0xe2   :  { %2772 = vmatprep.subr.bf16.mxu1 %v1592_v62  ;;  %v1791_v62 = vunpack.c.h.s8.bf16 %v671_v52  ;;  %v703_v52 = vld [vmem:[#allocation3 + $0xbc0] sm:$0xff] }
  0xe4   :  { %2732 = vmatpush2.bf16.msra.mxu0 %v1463_v3  ;;  %v600_v3 = vld [vmem:[#allocation3 + $0x888] sm:$0xff] }
  0xe5   :  { %2773 = vmatpush2.bf16.msra.mxu1 %v1591_v4  ;;  %2733 = vmatprep.subr.bf16.mxu0 %v1456_v5  ;;  %v664_v4 = vld [vmem:[#allocation3 + $0xa88] sm:$0xff]  ;;  %v6208_v5 = vpack.c.bf16 %v226_v57, %v226_v57  ;;  %v1648_v7 = vunpack.c.h.s8.bf16 %v600_v3  ;;  %v1640_v13 = vunpack.c.l.s8.bf16 %v600_v3  ;;  %v1727_v57 = vunpack.c.h.s8.bf16 %v639_v51 }
  0xe6   :  { %2774 = vmatprep.subr.bf16.mxu1 %v1584_v6  ;;  %v6210_v6 = vpack.c.bf16 %v227_v58, %v227_v58  ;;  %v1776_v8 = vunpack.c.h.s8.bf16 %v664_v4  ;;  %v1768_v14 = vunpack.c.l.s8.bf16 %v664_v4  ;;  %v1855_v58 = vunpack.c.h.s8.bf16 %v703_v52 }
  0xe7   :  { %v1719_v3 = vunpack.c.l.s8.bf16 %v639_v51  ;;  %v1847_v4 = vunpack.c.l.s8.bf16 %v703_v52 }
  0xe8   :  { %2734 = vmatpush2.bf16.msra.mxu0 %v1455_v42  ;;  %v599_v42 = vld [vmem:[#allocation3 + $0x880] sm:$0xff] }
  0xe9   :  { %2775 = vmatpush2.bf16.msra.mxu1 %v1583_v47  ;;  %2735 = vmatprep.subr.bf16.mxu0 %v1448_v11  ;;  %v663_v47 = vld [vmem:[#allocation3 + $0xa80] sm:$0xff]  ;;  %v1647_v11 = vunpack.c.h.s8.bf16 %v599_v42 }
  0xea   :  { %2776 = vmatprep.subr.bf16.mxu1 %v1576_v12  ;;  %v1775_v12 = vunpack.c.h.s8.bf16 %v663_v47 }
  0xec   :  { %2736 = vmatpush2.bf16.msra.mxu0 %v1447_v15  ;;  %v592_v15 = vld [vmem:[#allocation3 + $0x848] sm:$0xff] }
  0xed   :  { %2777 = vmatpush2.bf16.msra.mxu1 %v1575_v16  ;;  %2737 = vmatprep.subr.bf16.mxu0 %v1440_v17  ;;  %v656_v16 = vld [vmem:[#allocation3 + $0xa48] sm:$0xff]  ;;  %v1639_v17 = vunpack.c.l.s8.bf16 %v599_v42  ;;  %v1632_v19 = vunpack.c.h.s8.bf16 %v592_v15  ;;  %v1624_v25 = vunpack.c.l.s8.bf16 %v592_v15 }
  0xee   :  { %2778 = vmatprep.subr.bf16.mxu1 %v1568_v18  ;;  %v1767_v18 = vunpack.c.l.s8.bf16 %v663_v47  ;;  %v1760_v20 = vunpack.c.h.s8.bf16 %v656_v16  ;;  %v1752_v26 = vunpack.c.l.s8.bf16 %v656_v16 }
  0xf0   :  { %2738 = vmatpush2.bf16.msra.mxu0 %v1439_v21  ;;  %v591_v21 = vld [vmem:[#allocation3 + $0x840] sm:$0xff] }
  0xf1   :  { %2779 = vmatpush2.bf16.msra.mxu1 %v1567_v22  ;;  %2739 = vmatprep.subr.bf16.mxu0 %v1432_v23  ;;  %v655_v22 = vld [vmem:[#allocation3 + $0xa40] sm:$0xff]  ;;  %v1631_v23 = vunpack.c.h.s8.bf16 %v591_v21 }
  0xf2   :  { %2780 = vmatprep.subr.bf16.mxu1 %v1560_v24  ;;  %v1759_v24 = vunpack.c.h.s8.bf16 %v655_v22 }
  0xf4   :  { %2740 = vmatpush2.bf16.msra.mxu0 %v1431_v29  ;;  %v648_v29 = vld [vmem:[#allocation3 + $0xa08] sm:$0xff] }
  0xf5   :  { %2781 = vmatpush2.bf16.msra.mxu1 %v1559_v30  ;;  %2741 = vmatprep.subr.bf16.mxu0 %v1424_v31  ;;  %v1623_v30 = vunpack.c.l.s8.bf16 %v591_v21  ;;  %v1751_v31 = vunpack.c.l.s8.bf16 %v655_v22  ;;  %v1744_v33 = vunpack.c.h.s8.bf16 %v648_v29 }
  0xf6   :  { %2782 = vmatprep.subr.bf16.mxu1 %v1552_v32  ;;  %v1616_v32 = vunpack.c.h.s8.bf16 %v584_v28 }
  0xf8   :  { %2742 = vmatpush2.bf16.msra.mxu0 %v1423_v37  ;;  %v1615_v37 = vunpack.c.h.s8.bf16 %v583_v34 }
  0xf9   :  { %2783 = vmatpush2.bf16.msra.mxu1 %v1551_v38  ;;  %2743 = vmatprep.subr.bf16.mxu0 %v1416_v39  ;;  %v1743_v38 = vunpack.c.h.s8.bf16 %v647_v35  ;;  %v1608_v39 = vunpack.c.l.s8.bf16 %v584_v28  ;;  %v168_v28 = vld [vmem:[%s6646_s0 + $0x18] sm:$0xff] }
  0xfa   :  { %2784 = vmatprep.subr.bf16.mxu1 %v1544_v40  ;;  %v1736_v40 = vunpack.c.l.s8.bf16 %v648_v29 }
  0xfc   :  { %2744 = vmatpush2.bf16.msra.mxu0 %v1415_v46  ;;  %v1607_v46 = vunpack.c.l.s8.bf16 %v583_v34  ;;  %v679_v34 = vld [vmem:[#allocation3 + $0xb00] sm:$0xff] }
  0xfd   :  { %2785 = vmatpush2.bf16.msra.mxu1 %v1543_v48  ;;  %2795 = vmatprep.subr.bf16.mxu0 %v1664_v49  ;;  %v1735_v48 = vunpack.c.l.s8.bf16 %v647_v35  ;;  %v1728_v49 = vunpack.c.h.s8.bf16 %v640_v41  ;;  %v228_v35 = vcombine.high %v168_v28, %v168_v28 }
  0xfe   :  { %2836 = vmatprep.subr.bf16.mxu1 %v1792_v50  ;;  %v1856_v50 = vunpack.c.h.s8.bf16 %v704_v43 }
  0xff   :  { %2746 = vmatmul.mubr.bf16.vlgmr.msra.gmra.mxu0 %v6202_v59 }
 0x100   :  { %2787 = vmatmul.mubr.bf16.vlgmr.msra.gmra.mxu1 %v6206_v60  ;;  %2796 = vmatpush1.bf16.msra.mxu0 %v1663_v61  ;;  %v1720_v61 = vunpack.c.l.s8.bf16 %v640_v41  ;;  %v736_v41 = vld [vmem:[#allocation3 + $0xcc8] sm:$0xff] }
 0x101   :  { %2837 = vmatpush1.bf16.msra.mxu1 %v1791_v62  ;;  %2797 = vmatprep.subr.bf16.mxu0 %v1656_v63  ;;  %v1848_v62 = vunpack.c.l.s8.bf16 %v704_v43  ;;  %v632_v63 = vld [vmem:[#allocation3 + $0x988] sm:$0xff]  ;;  %v1920_v51 = vunpack.c.h.s8.bf16 %v736_v41 }
 0x102   :  { %2838 = vmatprep.subr.bf16.mxu1 %v1784_v0  ;;  %2827 = vmatprep.mubr.bf16.mxu0 %v6208_v5  ;;  %v696_v0 = vld [vmem:[#allocation3 + $0xb88] sm:$0xff] }
 0x103   :  { %2868 = vmatprep.mubr.bf16.mxu1 %v6210_v6  ;;  %v800_v43 = vld [vmem:[#allocation3 + $0xec8] sm:$0xff] }
 0x104   :  { %2798 = vmatpush1.bf16.msra.mxu0 %v1655_v53  ;;  %v1712_v53 = vunpack.c.h.s8.bf16 %v632_v63  ;;  %v2048_v52 = vunpack.c.h.s8.bf16 %v800_v43 }
 0x105   :  { %2839 = vmatpush1.bf16.msra.mxu1 %v1783_v55  ;;  %2799 = vmatprep.subr.bf16.mxu0 %v1648_v7  ;;  %v1840_v55 = vunpack.c.h.s8.bf16 %v696_v0  ;;  %v631_v7 = vld [vmem:[#allocation3 + $0x980] sm:$0xff] }
 0x106   :  { %2840 = vmatprep.subr.bf16.mxu1 %v1776_v8  ;;  %v695_v8 = vld [vmem:[#allocation3 + $0xb80] sm:$0xff]  ;;  %v1711_v42 = vunpack.c.h.s8.bf16 %v631_v7  ;;  %v1703_v15 = vunpack.c.l.s8.bf16 %v631_v7  ;;  %v728_v7 = vld [vmem:[#allocation3 + $0xc88] sm:$0xff] }
 0x107   :  { %v1839_v47 = vunpack.c.h.s8.bf16 %v695_v8  ;;  %v1831_v16 = vunpack.c.l.s8.bf16 %v695_v8  ;;  %v792_v8 = vld [vmem:[#allocation3 + $0xe88] sm:$0xff] }
 0x108   :  { %2800 = vmatpush1.bf16.msra.mxu0 %v1647_v11  ;;  %v1704_v11 = vunpack.c.l.s8.bf16 %v632_v63  ;;  %v6231_v63 = vpack.c.bf16 %v6191_v44, %v6191_v44 }
 0x109   :  { %2841 = vmatpush1.bf16.msra.mxu1 %v1775_v12  ;;  %2801 = vmatprep.subr.bf16.mxu0 %v1640_v13  ;;  %v1832_v12 = vunpack.c.l.s8.bf16 %v696_v0  ;;  %v624_v13 = vld [vmem:[#allocation3 + $0x948] sm:$0xff]  ;;  %v6235_v0 = vpack.c.bf16 %v6194_v45, %v6194_v45 }
 0x10a   :  { %2842 = vmatprep.subr.bf16.mxu1 %v1768_v14  ;;  %v688_v14 = vld [vmem:[#allocation3 + $0xb48] sm:$0xff] }
 0x10c   :  { %2802 = vmatpush1.bf16.msra.mxu0 %v1639_v17  ;;  %v1696_v17 = vunpack.c.h.s8.bf16 %v624_v13 }
 0x10d   :  { %2843 = vmatpush1.bf16.msra.mxu1 %v1767_v18  ;;  %2803 = vmatprep.subr.bf16.mxu0 %v1632_v19  ;;  %v1824_v18 = vunpack.c.h.s8.bf16 %v688_v14  ;;  %v623_v19 = vld [vmem:[#allocation3 + $0x940] sm:$0xff] }
 0x10e   :  { %2844 = vmatprep.subr.bf16.mxu1 %v1760_v20  ;;  %v687_v20 = vld [vmem:[#allocation3 + $0xb40] sm:$0xff]  ;;  %v1695_v21 = vunpack.c.h.s8.bf16 %v623_v19  ;;  %v1687_v29 = vunpack.c.l.s8.bf16 %v623_v19  ;;  %v720_v19 = vld [vmem:[#allocation3 + $0xc48] sm:$0xff] }
 0x10f   :  { %v1823_v22 = vunpack.c.h.s8.bf16 %v687_v20 }
 0x110   :  { %2804 = vmatpush1.bf16.msra.mxu0 %v1631_v23  ;;  %v1688_v23 = vunpack.c.l.s8.bf16 %v624_v13  ;;  %v727_v13 = vld [vmem:[#allocation3 + $0xc80] sm:$0xff] }
 0x111   :  { %2845 = vmatpush1.bf16.msra.mxu1 %v1759_v24  ;;  %2805 = vmatprep.subr.bf16.mxu0 %v1624_v25  ;;  %v1816_v24 = vunpack.c.l.s8.bf16 %v688_v14  ;;  %v616_v25 = vld [vmem:[#allocation3 + $0x908] sm:$0xff]  ;;  %v791_v14 = vld [vmem:[#allocation3 + $0xe80] sm:$0xff] }
 0x112   :  { %2846 = vmatprep.subr.bf16.mxu1 %v1752_v26  ;;  %v680_v26 = vld [vmem:[#allocation3 + $0xb08] sm:$0xff] }
 0x114   :  { %2806 = vmatpush1.bf16.msra.mxu0 %v1623_v30  ;;  %v1815_v30 = vunpack.c.l.s8.bf16 %v687_v20  ;;  %v784_v20 = vld [vmem:[#allocation3 + $0xe48] sm:$0xff] }
 0x115   :  { %2847 = vmatpush1.bf16.msra.mxu1 %v1751_v31  ;;  %2807 = vmatprep.subr.bf16.mxu0 %v1616_v32  ;;  %v1680_v31 = vunpack.c.h.s8.bf16 %v616_v25  ;;  %v1808_v32 = vunpack.c.h.s8.bf16 %v680_v26 }
 0x116   :  { %2848 = vmatprep.subr.bf16.mxu1 %v1744_v33  ;;  %v615_v33 = vld [vmem:[#allocation3 + $0x900] sm:$0xff] }
 0x118   :  { %2808 = vmatpush1.bf16.msra.mxu0 %v1615_v37  ;;  %v1679_v37 = vunpack.c.h.s8.bf16 %v615_v33 }
 0x119   :  { %2849 = vmatpush1.bf16.msra.mxu1 %v1743_v38  ;;  %2809 = vmatprep.subr.bf16.mxu0 %v1608_v39  ;;  %v1807_v38 = vunpack.c.h.s8.bf16 %v679_v34  ;;  %v1672_v39 = vunpack.c.l.s8.bf16 %v616_v25  ;;  %v719_v25 = vld [vmem:[#allocation3 + $0xc40] sm:$0xff] }
 0x11a   :  { %2850 = vmatprep.subr.bf16.mxu1 %v1736_v40  ;;  %v1800_v40 = vunpack.c.l.s8.bf16 %v680_v26  ;;  %v783_v26 = vld [vmem:[#allocation3 + $0xe40] sm:$0xff] }
 0x11c   :  { %2810 = vmatpush1.bf16.msra.mxu0 %v1607_v46  ;;  %v6220_v46 = vrot.slane %v168_v28, %v6137_v36  ;;  %v1887_v28 = vunpack.c.h.s8.bf16 %v719_v25 }
 0x11d   :  { %2851 = vmatpush1.bf16.msra.mxu1 %v1735_v48  ;;  %2811 = vmatprep.subr.bf16.mxu0 %v1728_v49  ;;  %v6223_v48 = vrot.slane %v228_v35, %v6137_v36  ;;  %v1671_v49 = vunpack.c.l.s8.bf16 %v615_v33  ;;  %v776_v33 = vld [vmem:[#allocation3 + $0xe08] sm:$0xff]  ;;  %v2007_v35 = vunpack.c.l.s8.bf16 %v783_v26 }
 0x11e   :  { %2852 = vmatprep.subr.bf16.mxu1 %v1856_v50  ;;  %v1799_v50 = vunpack.c.l.s8.bf16 %v679_v34  ;;  %v1879_v34 = vunpack.c.l.s8.bf16 %v719_v25 }
 0x120   :  { %2812 = vmatpush2.bf16.msra.mxu0 %v1727_v57  ;;  %v735_v57 = vld [vmem:[#allocation3 + $0xcc0] sm:$0xff] }
 0x121   :  { %2853 = vmatpush2.bf16.msra.mxu1 %v1855_v58  ;;  %2813 = vmatprep.subr.bf16.mxu0 %v1720_v61  ;;  %v799_v58 = vld [vmem:[#allocation3 + $0xec0] sm:$0xff]  ;;  %v243_v61 = vcombine.high %v6220_v46, %v6220_v46  ;;  %v1911_v44 = vunpack.c.l.s8.bf16 %v735_v57 }
 0x122   :  { %2854 = vmatprep.subr.bf16.mxu1 %v1848_v62  ;;  %v244_v62 = vcombine.high %v6223_v48, %v6223_v48  ;;  %v2039_v45 = vunpack.c.l.s8.bf16 %v799_v58 }
 0x124   :  { %2814 = vmatpush2.bf16.msra.mxu0 %v1719_v3  ;;  %v1919_v3 = vunpack.c.h.s8.bf16 %v735_v57 }
 0x125   :  { %2855 = vmatpush2.bf16.msra.mxu1 %v1847_v4  ;;  %2815 = vmatprep.subr.bf16.mxu0 %v1712_v53  ;;  %v2047_v4 = vunpack.c.h.s8.bf16 %v799_v58  ;;  %v1912_v53 = vunpack.c.l.s8.bf16 %v736_v41 }
 0x126   :  { %2856 = vmatprep.subr.bf16.mxu1 %v1840_v55  ;;  %v2040_v55 = vunpack.c.l.s8.bf16 %v800_v43 }
 0x128   :  { %2816 = vmatpush2.bf16.msra.mxu0 %v1711_v42  ;;  %v6237_v42 = vpack.c.bf16 %v243_v61, %v243_v61 }
 0x129   :  { %2857 = vmatpush2.bf16.msra.mxu1 %v1839_v47  ;;  %2817 = vmatprep.subr.bf16.mxu0 %v1704_v11  ;;  %v6239_v47 = vpack.c.bf16 %v244_v62, %v244_v62  ;;  %v1904_v11 = vunpack.c.h.s8.bf16 %v728_v7 }
 0x12a   :  { %2858 = vmatprep.subr.bf16.mxu1 %v1832_v12  ;;  %v2032_v12 = vunpack.c.h.s8.bf16 %v792_v8 }
 0x12c   :  { %2818 = vmatpush2.bf16.msra.mxu0 %v1703_v15  ;;  %v1903_v15 = vunpack.c.h.s8.bf16 %v727_v13 }
 0x12d   :  { %2859 = vmatpush2.bf16.msra.mxu1 %v1831_v16  ;;  %2819 = vmatprep.subr.bf16.mxu0 %v1696_v17  ;;  %v2031_v16 = vunpack.c.h.s8.bf16 %v791_v14  ;;  %v1896_v17 = vunpack.c.l.s8.bf16 %v728_v7 }
 0x12e   :  { %2860 = vmatprep.subr.bf16.mxu1 %v1824_v18  ;;  %v2024_v18 = vunpack.c.l.s8.bf16 %v792_v8 }
 0x130   :  { %2820 = vmatpush2.bf16.msra.mxu0 %v1695_v21  ;;  %v1895_v21 = vunpack.c.l.s8.bf16 %v727_v13 }
 0x131   :  { %2861 = vmatpush2.bf16.msra.mxu1 %v1823_v22  ;;  %2821 = vmatprep.subr.bf16.mxu0 %v1688_v23  ;;  %v2023_v22 = vunpack.c.l.s8.bf16 %v791_v14  ;;  %v1888_v23 = vunpack.c.h.s8.bf16 %v720_v19 }
 0x132   :  { %2862 = vmatprep.subr.bf16.mxu1 %v1816_v24  ;;  %v2016_v24 = vunpack.c.h.s8.bf16 %v784_v20 }
 0x134   :  { %2822 = vmatpush2.bf16.msra.mxu0 %v1687_v29  ;;  %v2015_v29 = vunpack.c.h.s8.bf16 %v783_v26 }
 0x135   :  { %2863 = vmatpush2.bf16.msra.mxu1 %v1815_v30  ;;  %2823 = vmatprep.subr.bf16.mxu0 %v1680_v31  ;;  %v1880_v30 = vunpack.c.l.s8.bf16 %v720_v19  ;;  %v2008_v31 = vunpack.c.l.s8.bf16 %v784_v20 }
 0x136   :  { %2864 = vmatprep.subr.bf16.mxu1 %v1808_v32  ;;  %v712_v32 = vld [vmem:[#allocation3 + $0xc08] sm:$0xff] }
 0x138   :  { %2824 = vmatpush2.bf16.msra.mxu0 %v1679_v37  ;;  %v1872_v37 = vunpack.c.h.s8.bf16 %v712_v32 }
 0x139   :  { %2865 = vmatpush2.bf16.msra.mxu1 %v1807_v38  ;;  %2825 = vmatprep.subr.bf16.mxu0 %v1672_v39  ;;  %v2000_v38 = vunpack.c.h.s8.bf16 %v776_v33  ;;  %v711_v39 = vld [vmem:[#allocation3 + $0xc00] sm:$0xff] }
 0x13a   :  { %2866 = vmatprep.subr.bf16.mxu1 %v1800_v40  ;;  %v775_v40 = vld [vmem:[#allocation3 + $0xe00] sm:$0xff]  ;;  %v1871_v41 = vunpack.c.h.s8.bf16 %v711_v39  ;;  %v1863_v57 = vunpack.c.l.s8.bf16 %v711_v39 }
 0x13b   :  { %v1999_v43 = vunpack.c.h.s8.bf16 %v775_v40  ;;  %v1991_v58 = vunpack.c.l.s8.bf16 %v775_v40 }
 0x13c   :  { %2826 = vmatpush2.bf16.msra.mxu0 %v1671_v49  ;;  %v1864_v49 = vunpack.c.l.s8.bf16 %v712_v32 }
 0x13d   :  { %2867 = vmatpush2.bf16.msra.mxu1 %v1799_v50  ;;  %2877 = vmatprep.subr.bf16.mxu0 %v1920_v51  ;;  %v1992_v50 = vunpack.c.l.s8.bf16 %v776_v33  ;;  %v768_v51 = vld [vmem:[#allocation3 + $0xdc8] sm:$0xff] }
 0x13e   :  { %2918 = vmatprep.subr.bf16.mxu1 %v2048_v52  ;;  %v832_v52 = vld [vmem:[#allocation3 + $0xfc8] sm:$0xff]  ;;  %v1984_v61 = vunpack.c.h.s8.bf16 %v768_v51  ;;  %v1976_v7 = vunpack.c.l.s8.bf16 %v768_v51 }
 0x13f   :  { %2828 = vmatmul.mubr.bf16.vlgmr.msra.gmra.mxu0 %v6231_v63  ;;  %v2112_v62 = vunpack.c.h.s8.bf16 %v832_v52  ;;  %v2104_v8 = vunpack.c.l.s8.bf16 %v832_v52 }
 0x140   :  { %2869 = vmatmul.mubr.bf16.vlgmr.msra.gmra.mxu1 %v6235_v0  ;;  %2878 = vmatpush1.bf16.msra.mxu0 %v1919_v3  ;;  %v767_v3 = vld [vmem:[#allocation3 + $0xdc0] sm:$0xff] }
 0x141   :  { %2919 = vmatpush1.bf16.msra.mxu1 %v2047_v4  ;;  %2879 = vmatprep.subr.bf16.mxu0 %v1912_v53  ;;  %v831_v4 = vld [vmem:[#allocation3 + $0xfc0] sm:$0xff]  ;;  %v1983_v53 = vunpack.c.h.s8.bf16 %v767_v3 }
 0x142   :  { %2920 = vmatprep.subr.bf16.mxu1 %v2040_v55  ;;  %2909 = vmatprep.mubr.bf16.mxu0 %v6237_v42  ;;  %v2111_v55 = vunpack.c.h.s8.bf16 %v831_v4 }
 0x143   :  { %2950 = vmatprep.mubr.bf16.mxu1 %v6239_v47 }
 0x144   :  { %2880 = vmatpush1.bf16.msra.mxu0 %v1911_v44  ;;  %v760_v44 = vld [vmem:[#allocation3 + $0xd88] sm:$0xff] }
 0x145   :  { %2921 = vmatpush1.bf16.msra.mxu1 %v2039_v45  ;;  %2881 = vmatprep.subr.bf16.mxu0 %v1904_v11  ;;  %v824_v45 = vld [vmem:[#allocation3 + $0xf88] sm:$0xff]  ;;  %v1975_v11 = vunpack.c.l.s8.bf16 %v767_v3  ;;  %v1968_v13 = vunpack.c.h.s8.bf16 %v760_v44  ;;  %v1960_v19 = vunpack.c.l.s8.bf16 %v760_v44  ;;  %v863_v44 = vld [vmem:[#allocation3 + $0x10c0] sm:$0xff] }
 0x146   :  { %2922 = vmatprep.subr.bf16.mxu1 %v2032_v12  ;;  %v2103_v12 = vunpack.c.l.s8.bf16 %v831_v4  ;;  %v2096_v14 = vunpack.c.h.s8.bf16 %v824_v45  ;;  %v2088_v20 = vunpack.c.l.s8.bf16 %v824_v45  ;;  %v927_v45 = vld [vmem:[#allocation3 + $0x12c0] sm:$0xff] }
 0x148   :  { %2882 = vmatpush1.bf16.msra.mxu0 %v1903_v15  ;;  %v759_v15 = vld [vmem:[#allocation3 + $0xd80] sm:$0xff] }
 0x149   :  { %2923 = vmatpush1.bf16.msra.mxu1 %v2031_v16  ;;  %2883 = vmatprep.subr.bf16.mxu0 %v1896_v17  ;;  %v823_v16 = vld [vmem:[#allocation3 + $0xf80] sm:$0xff]  ;;  %v1967_v17 = vunpack.c.h.s8.bf16 %v759_v15 }
 0x14a   :  { %2924 = vmatprep.subr.bf16.mxu1 %v2024_v18  ;;  %v2095_v18 = vunpack.c.h.s8.bf16 %v823_v16 }
 0x14c   :  { %2884 = vmatpush1.bf16.msra.mxu0 %v1895_v21  ;;  %v752_v21 = vld [vmem:[#allocation3 + $0xd48] sm:$0xff] }
 0x14d   :  { %2925 = vmatpush1.bf16.msra.mxu1 %v2023_v22  ;;  %2885 = vmatprep.subr.bf16.mxu0 %v1888_v23  ;;  %v816_v22 = vld [vmem:[#allocation3 + $0xf48] sm:$0xff]  ;;  %v1959_v23 = vunpack.c.l.s8.bf16 %v759_v15  ;;  %v1952_v25 = vunpack.c.h.s8.bf16 %v752_v21  ;;  %v1944_v32 = vunpack.c.l.s8.bf16 %v752_v21  ;;  %v2175_v15 = vunpack.c.h.s8.bf16 %v863_v44 }
 0x14e   :  { %2926 = vmatprep.subr.bf16.mxu1 %v2016_v24  ;;  %v2087_v24 = vunpack.c.l.s8.bf16 %v823_v16  ;;  %v2080_v26 = vunpack.c.h.s8.bf16 %v816_v22  ;;  %v2072_v33 = vunpack.c.l.s8.bf16 %v816_v22  ;;  %v2303_v16 = vunpack.c.h.s8.bf16 %v927_v45 }
 0x150   :  { %2886 = vmatpush1.bf16.msra.mxu0 %v1887_v28  ;;  %v751_v28 = vld [vmem:[#allocation3 + $0xd40] sm:$0xff] }
 0x151   :  { %2927 = vmatpush1.bf16.msra.mxu1 %v2015_v29  ;;  %2887 = vmatprep.subr.bf16.mxu0 %v1880_v30  ;;  %v815_v29 = vld [vmem:[#allocation3 + $0xf40] sm:$0xff]  ;;  %v1951_v30 = vunpack.c.h.s8.bf16 %v751_v28 }
 0x152   :  { %2928 = vmatprep.subr.bf16.mxu1 %v2008_v31  ;;  %v2079_v31 = vunpack.c.h.s8.bf16 %v815_v29  ;;  %v2071_v39 = vunpack.c.l.s8.bf16 %v815_v29 }
 0x154   :  { %2888 = vmatpush1.bf16.msra.mxu0 %v1879_v34  ;;  %v744_v34 = vld [vmem:[#allocation3 + $0xd08] sm:$0xff] }
 0x155   :  { %2929 = vmatpush1.bf16.msra.mxu1 %v2007_v35  ;;  %2889 = vmatprep.subr.bf16.mxu0 %v1872_v37  ;;  %v808_v35 = vld [vmem:[#allocation3 + $0xf08] sm:$0xff]  ;;  %v169_v37 = vld [vmem:[%s6646_s0 + $0x20] sm:$0xff]  ;;  %v1936_v40 = vunpack.c.h.s8.bf16 %v744_v34 }
 0x156   :  { %2930 = vmatprep.subr.bf16.mxu1 %v2000_v38  ;;  %v1943_v38 = vunpack.c.l.s8.bf16 %v751_v28  ;;  %v6249_v3 = vrot.slane %v169_v37, %v6137_v36 }
 0x158   :  { %2890 = vmatpush1.bf16.msra.mxu0 %v1871_v41  ;;  %v2064_v41 = vunpack.c.h.s8.bf16 %v808_v35 }
 0x159   :  { %2931 = vmatpush1.bf16.msra.mxu1 %v1999_v43  ;;  %2891 = vmatprep.subr.bf16.mxu0 %v1864_v49  ;;  %v743_v43 = vld [vmem:[#allocation3 + $0xd00] sm:$0xff] }
 0x15a   :  { %2932 = vmatprep.subr.bf16.mxu1 %v1992_v50  ;;  %v807_v49 = vld [vmem:[#allocation3 + $0xf00] sm:$0xff]  ;;  %v245_v50 = vcombine.high %v169_v37, %v169_v37  ;;  %v1935_v51 = vunpack.c.h.s8.bf16 %v743_v43 }
 0x15b   :  { %v2063_v52 = vunpack.c.h.s8.bf16 %v807_v49 }
 0x15c   :  { %2892 = vmatpush1.bf16.msra.mxu0 %v1863_v57  ;;  %v1928_v57 = vunpack.c.l.s8.bf16 %v744_v34  ;;  %v6252_v4 = vrot.slane %v245_v50, %v6137_v36  ;;  %v912_v50 = vld [vmem:[#allocation3 + $0x1248] sm:$0xff] }
 0x15d   :  { %2933 = vmatpush1.bf16.msra.mxu1 %v1991_v58  ;;  %2893 = vmatprep.subr.bf16.mxu0 %v1984_v61  ;;  %v2056_v58 = vunpack.c.l.s8.bf16 %v808_v35  ;;  %v864_v61 = vld [vmem:[#allocation3 + $0x10c8] sm:$0xff] }
 0x15e   :  { %2934 = vmatprep.subr.bf16.mxu1 %v2112_v62  ;;  %v928_v62 = vld [vmem:[#allocation3 + $0x12c8] sm:$0xff] }
 0x160   :  { %2894 = vmatpush2.bf16.msra.mxu0 %v1983_v53  ;;  %v1927_v53 = vunpack.c.l.s8.bf16 %v743_v43 }
 0x161   :  { %2935 = vmatpush2.bf16.msra.mxu1 %v2111_v55  ;;  %2895 = vmatprep.subr.bf16.mxu0 %v1976_v7  ;;  %v2055_v55 = vunpack.c.l.s8.bf16 %v807_v49  ;;  %v2176_v7 = vunpack.c.h.s8.bf16 %v864_v61  ;;  %v848_v49 = vld [vmem:[#allocation3 + $0x1048] sm:$0xff] }
 0x162   :  { %2936 = vmatprep.subr.bf16.mxu1 %v2104_v8  ;;  %v2304_v8 = vunpack.c.h.s8.bf16 %v928_v62 }
 0x164   :  { %2896 = vmatpush2.bf16.msra.mxu0 %v1975_v11  ;;  %v260_v11 = vcombine.high %v6249_v3, %v6249_v3 }
 0x165   :  { %2937 = vmatpush2.bf16.msra.mxu1 %v2103_v12  ;;  %2897 = vmatprep.subr.bf16.mxu0 %v1968_v13  ;;  %v261_v12 = vcombine.high %v6252_v4, %v6252_v4  ;;  %v6260_v13 = vpack.c.bf16 %v6220_v46, %v6220_v46 }
 0x166   :  { %2938 = vmatprep.subr.bf16.mxu1 %v2096_v14  ;;  %v6264_v14 = vpack.c.bf16 %v6223_v48, %v6223_v48  ;;  %v6266_v21 = vpack.c.bf16 %v260_v11, %v260_v11 }
 0x167   :  { %v6268_v22 = vpack.c.bf16 %v261_v12, %v261_v12 }
 0x168   :  { %2898 = vmatpush2.bf16.msra.mxu0 %v1967_v17  ;;  %v2168_v17 = vunpack.c.l.s8.bf16 %v864_v61  ;;  %v847_v61 = vld [vmem:[#allocation3 + $0x1040] sm:$0xff] }
 0x169   :  { %2939 = vmatpush2.bf16.msra.mxu1 %v2095_v18  ;;  %2899 = vmatprep.subr.bf16.mxu0 %v1960_v19  ;;  %v2296_v18 = vunpack.c.l.s8.bf16 %v928_v62  ;;  %v856_v19 = vld [vmem:[#allocation3 + $0x1088] sm:$0xff]  ;;  %v911_v62 = vld [vmem:[#allocation3 + $0x1240] sm:$0xff]  ;;  %v2135_v11 = vunpack.c.l.s8.bf16 %v847_v61 }
 0x16a   :  { %2940 = vmatprep.subr.bf16.mxu1 %v2088_v20  ;;  %v920_v20 = vld [vmem:[#allocation3 + $0x1288] sm:$0xff]  ;;  %v2160_v29 = vunpack.c.h.s8.bf16 %v856_v19  ;;  %v2263_v12 = vunpack.c.l.s8.bf16 %v911_v62 }
 0x16b   :  { %v2280_v43 = vunpack.c.l.s8.bf16 %v920_v20 }
 0x16c   :  { %2900 = vmatpush2.bf16.msra.mxu0 %v1959_v23 }
 0x16d   :  { %2941 = vmatpush2.bf16.msra.mxu1 %v2087_v24  ;;  %2901 = vmatprep.subr.bf16.mxu0 %v1952_v25  ;;  %v2167_v24 = vunpack.c.l.s8.bf16 %v863_v44  ;;  %v2295_v25 = vunpack.c.l.s8.bf16 %v927_v45  ;;  %v840_v44 = vld [vmem:[#allocation3 + $0x1008] sm:$0xff] }
 0x16e   :  { %2942 = vmatprep.subr.bf16.mxu1 %v2080_v26  ;;  %v904_v45 = vld [vmem:[#allocation3 + $0x1208] sm:$0xff] }
 0x170   :  { %2902 = vmatpush2.bf16.msra.mxu0 %v1951_v30  ;;  %v2288_v30 = vunpack.c.h.s8.bf16 %v920_v20 }
 0x171   :  { %2943 = vmatpush2.bf16.msra.mxu1 %v2079_v31  ;;  %2903 = vmatprep.subr.bf16.mxu0 %v1944_v32  ;;  %v855_v31 = vld [vmem:[#allocation3 + $0x1080] sm:$0xff] }
 0x172   :  { %2944 = vmatprep.subr.bf16.mxu1 %v2072_v33  ;;  %v919_v32 = vld [vmem:[#allocation3 + $0x1280] sm:$0xff]  ;;  %v2159_v37 = vunpack.c.h.s8.bf16 %v855_v31 }
 0x174   :  { %2904 = vmatpush2.bf16.msra.mxu0 %v1943_v38  ;;  %v2287_v38 = vunpack.c.h.s8.bf16 %v919_v32 }
 0x175   :  { %2945 = vmatpush2.bf16.msra.mxu1 %v2071_v39  ;;  %2905 = vmatprep.subr.bf16.mxu0 %v1936_v40 }
 0x176   :  { %2946 = vmatprep.subr.bf16.mxu1 %v2064_v41  ;;  %v2152_v41 = vunpack.c.l.s8.bf16 %v856_v19 }
 0x178   :  { %2906 = vmatpush2.bf16.msra.mxu0 %v1935_v51  ;;  %v2151_v51 = vunpack.c.l.s8.bf16 %v855_v31  ;;  %v895_v31 = vld [vmem:[#allocation3 + $0x11c0] sm:$0xff] }
 0x179   :  { %2947 = vmatpush2.bf16.msra.mxu1 %v2063_v52  ;;  %2907 = vmatprep.subr.bf16.mxu0 %v1928_v57  ;;  %v2279_v52 = vunpack.c.l.s8.bf16 %v919_v32  ;;  %v2144_v57 = vunpack.c.h.s8.bf16 %v848_v49  ;;  %v959_v32 = vld [vmem:[#allocation3 + $0x13c0] sm:$0xff] }
 0x17a   :  { %2948 = vmatprep.subr.bf16.mxu1 %v2056_v58  ;;  %v2272_v58 = vunpack.c.h.s8.bf16 %v912_v50 }
 0x17c   :  { %2908 = vmatpush2.bf16.msra.mxu0 %v1927_v53  ;;  %v2143_v53 = vunpack.c.h.s8.bf16 %v847_v61 }
 0x17d   :  { %2949 = vmatpush2.bf16.msra.mxu1 %v2055_v55  ;;  %2959 = vmatprep.subr.bf16.mxu0 %v2176_v7  ;;  %v2271_v55 = vunpack.c.h.s8.bf16 %v911_v62  ;;  %v2136_v7 = vunpack.c.l.s8.bf16 %v848_v49 }
 0x17e   :  { %3000 = vmatprep.subr.bf16.mxu1 %v2304_v8  ;;  %v2264_v8 = vunpack.c.l.s8.bf16 %v912_v50 }
 0x17f   :  { %v2665_v46 = vpop.f32.mrf.mxu0  ;;  %2910 = vmatmul.mubr.bf16.vlgmr.msra.gmra.mxu0 %v6260_v13 }
 0x180   :  { %v2706_v23 = vpop.f32.mrf.mxu1  ;;  %2951 = vmatmul.mubr.bf16.vlgmr.msra.gmra.mxu1 %v6264_v14  ;;  %2960 = vmatpush1.bf16.msra.mxu0 %v2175_v15  ;;  %v2128_v15 = vunpack.c.h.s8.bf16 %v840_v44 }
 0x181   :  { %v6272_v48 = vadd.f32 %v2706_v23, %v2665_v46  ;;  %3001 = vmatpush1.bf16.msra.mxu1 %v2303_v16  ;;  %v2667_v26 = vpop.f32.mrf.mxu0  ;;  %2961 = vmatprep.subr.bf16.mxu0 %v2168_v17  ;;  %v2256_v16 = vunpack.c.h.s8.bf16 %v904_v45  ;;  %v839_v17 = vld [vmem:[#allocation3 + $0x1000] sm:$0xff]  ;;  %v2120_v46 = vunpack.c.l.s8.bf16 %v840_v44  ;;  %v2248_v23 = vunpack.c.l.s8.bf16 %v904_v45 }
 0x182   :  { %v2708_v28 = vpop.f32.mrf.mxu1  ;;  %3002 = vmatprep.subr.bf16.mxu1 %v2296_v18  ;;  %2991 = vmatprep.mubr.bf16.mxu0 %v6266_v21  ;;  %v903_v18 = vld [vmem:[#allocation3 + $0x1200] sm:$0xff]  ;;  %v2127_v19 = vunpack.c.h.s8.bf16 %v839_v17 }
 0x183   :  { %v6274_v33 = vadd.f32 %v2708_v28, %v2667_v26  ;;  %3032 = vmatprep.mubr.bf16.mxu1 %v6268_v22  ;;  %v2669_v34 = vpop.f32.mrf.mxu0  ;;  %v2255_v20 = vunpack.c.h.s8.bf16 %v903_v18  ;;  %v2119_v26 = vunpack.c.l.s8.bf16 %v839_v17  ;;  %v2247_v28 = vunpack.c.l.s8.bf16 %v903_v18 }
 0x184   :  { %v2710_v35 = vpop.f32.mrf.mxu1  ;;  %2962 = vmatpush1.bf16.msra.mxu0 %v2167_v24  ;;  %v896_v24 = vld [vmem:[#allocation3 + $0x11c8] sm:$0xff]  ;;  %v2239_v34 = vunpack.c.h.s8.bf16 %v895_v31 }
 0x185   :  { %3003 = vmatpush1.bf16.msra.mxu1 %v2295_v25  ;;  %v2670_v39 = vpop.f32.mrf.mxu0  ;;  %2963 = vmatprep.subr.bf16.mxu0 %v2160_v29  ;;  %v960_v25 = vld [vmem:[#allocation3 + $0x13c8] sm:$0xff]  ;;  %v2240_v29 = vunpack.c.h.s8.bf16 %v896_v24  ;;  %v2367_v35 = vunpack.c.h.s8.bf16 %v959_v32 }
 0x186   :  { %v2711_v40 = vpop.f32.mrf.mxu1  ;;  %3004 = vmatprep.subr.bf16.mxu1 %v2288_v30  ;;  %v2368_v30 = vunpack.c.h.s8.bf16 %v960_v25  ;;  %v888_v39 = vld [vmem:[#allocation3 + $0x1188] sm:$0xff] }
 0x187   :  { %v952_v40 = vld [vmem:[#allocation3 + $0x1388] sm:$0xff]  ;;  %v2224_v49 = vunpack.c.h.s8.bf16 %v888_v39  ;;  %v2216_v61 = vunpack.c.l.s8.bf16 %v888_v39 }
 0x188   :  { %2964 = vmatpush1.bf16.msra.mxu0 %v2159_v37  ;;  %v2232_v37 = vunpack.c.l.s8.bf16 %v896_v24  ;;  %v2352_v50 = vunpack.c.h.s8.bf16 %v952_v40  ;;  %v2344_v62 = vunpack.c.l.s8.bf16 %v952_v40 }
 0x189   :  { %3005 = vmatpush1.bf16.msra.mxu1 %v2287_v38  ;;  %2965 = vmatprep.subr.bf16.mxu0 %v2152_v41  ;;  %v2360_v38 = vunpack.c.l.s8.bf16 %v960_v25  ;;  %v2231_v41 = vunpack.c.l.s8.bf16 %v895_v31 }
 0x18a   :  { %3006 = vmatprep.subr.bf16.mxu1 %v2280_v43  ;;  %v2359_v43 = vunpack.c.l.s8.bf16 %v959_v32 }
 0x18c   :  { %2966 = vmatpush1.bf16.msra.mxu0 %v2151_v51  ;;  %v887_v51 = vld [vmem:[#allocation3 + $0x1180] sm:$0xff] }
 0x18d   :  { %3007 = vmatpush1.bf16.msra.mxu1 %v2279_v52  ;;  %2967 = vmatprep.subr.bf16.mxu0 %v2144_v57  ;;  %v951_v52 = vld [vmem:[#allocation3 + $0x1380] sm:$0xff]  ;;  %v2223_v57 = vunpack.c.h.s8.bf16 %v887_v51 }
 0x18e   :  { %3008 = vmatprep.subr.bf16.mxu1 %v2272_v58  ;;  %v2351_v58 = vunpack.c.h.s8.bf16 %v951_v52 }
 0x190   :  { %2968 = vmatpush1.bf16.msra.mxu0 %v2143_v53  ;;  %v880_v53 = vld [vmem:[#allocation3 + $0x1148] sm:$0xff] }
 0x191   :  { %3009 = vmatpush1.bf16.msra.mxu1 %v2271_v55  ;;  %2969 = vmatprep.subr.bf16.mxu0 %v2136_v7  ;;  %v944_v55 = vld [vmem:[#allocation3 + $0x1348] sm:$0xff]  ;;  %v2215_v7 = vunpack.c.l.s8.bf16 %v887_v51  ;;  %v2208_v44 = vunpack.c.h.s8.bf16 %v880_v53  ;;  %v2200_v17 = vunpack.c.l.s8.bf16 %v880_v53  ;;  %v991_v51 = vld [vmem:[#allocation3 + $0x14c0] sm:$0xff] }
 0x192   :  { %3010 = vmatprep.subr.bf16.mxu1 %v2264_v8  ;;  %v2343_v8 = vunpack.c.l.s8.bf16 %v951_v52  ;;  %v2336_v45 = vunpack.c.h.s8.bf16 %v944_v55  ;;  %v2328_v18 = vunpack.c.l.s8.bf16 %v944_v55  ;;  %v1055_v52 = vld [vmem:[#allocation3 + $0x16c0] sm:$0xff] }
 0x193   :  { %v2559_v53 = vunpack.c.h.s8.bf16 %v1055_v52 }
 0x194   :  { %2970 = vmatpush1.bf16.msra.mxu0 %v2135_v11  ;;  %v879_v11 = vld [vmem:[#allocation3 + $0x1140] sm:$0xff] }
 0x195   :  { %3011 = vmatpush1.bf16.msra.mxu1 %v2263_v12  ;;  %2971 = vmatprep.subr.bf16.mxu0 %v2128_v15  ;;  %v943_v12 = vld [vmem:[#allocation3 + $0x1340] sm:$0xff]  ;;  %v2207_v15 = vunpack.c.h.s8.bf16 %v879_v11 }
 0x196   :  { %3012 = vmatprep.subr.bf16.mxu1 %v2256_v16  ;;  %v2335_v16 = vunpack.c.h.s8.bf16 %v943_v12  ;;  %v2327_v24 = vunpack.c.l.s8.bf16 %v943_v12 }
 0x198   :  { %2972 = vmatpush1.bf16.msra.mxu0 %v2127_v19  ;;  %v872_v19 = vld [vmem:[#allocation3 + $0x1108] sm:$0xff] }
 0x199   :  { %3013 = vmatpush1.bf16.msra.mxu1 %v2255_v20  ;;  %2973 = vmatprep.subr.bf16.mxu0 %v2120_v46  ;;  %v936_v20 = vld [vmem:[#allocation3 + $0x1308] sm:$0xff]  ;;  %v2192_v25 = vunpack.c.h.s8.bf16 %v872_v19 }
 0x19a   :  { %3014 = vmatprep.subr.bf16.mxu1 %v2248_v23  ;;  %v170_v46 = vld [vmem:[%s6646_s0 + $0x28] sm:$0xff]  ;;  %v2199_v23 = vunpack.c.l.s8.bf16 %v879_v11 }
 0x19b   :  { %v6282_v39 = vrot.slane %v170_v46, %v6137_v36 }
 0x19c   :  { %2974 = vmatpush1.bf16.msra.mxu0 %v2119_v26  ;;  %v2320_v26 = vunpack.c.h.s8.bf16 %v936_v20 }
 0x19d   :  { %3015 = vmatpush1.bf16.msra.mxu1 %v2247_v28  ;;  %2975 = vmatprep.subr.bf16.mxu0 %v2240_v29  ;;  %v871_v28 = vld [vmem:[#allocation3 + $0x1100] sm:$0xff] }
 0x19e   :  { %3016 = vmatprep.subr.bf16.mxu1 %v2368_v30  ;;  %v935_v29 = vld [vmem:[#allocation3 + $0x1300] sm:$0xff]  ;;  %v262_v30 = vcombine.high %v170_v46, %v170_v46  ;;  %v2191_v31 = vunpack.c.h.s8.bf16 %v871_v28 }
 0x19f   :  { %v2319_v32 = vunpack.c.h.s8.bf16 %v935_v29  ;;  %v983_v46 = vld [vmem:[#allocation3 + $0x1480] sm:$0xff] }
 0x1a0   :  { %2976 = vmatpush2.bf16.msra.mxu0 %v2239_v34  ;;  %v2184_v34 = vunpack.c.l.s8.bf16 %v872_v19  ;;  %v6285_v40 = vrot.slane %v262_v30, %v6137_v36  ;;  %v6293_v36 = vpack.c.bf16 %v6249_v3, %v6249_v3 }
 0x1a1   :  { %3017 = vmatpush2.bf16.msra.mxu1 %v2367_v35  ;;  %2977 = vmatprep.subr.bf16.mxu0 %v2232_v37  ;;  %v2312_v35 = vunpack.c.l.s8.bf16 %v936_v20  ;;  %v992_v37 = vld [vmem:[#allocation3 + $0x14c8] sm:$0xff] }
 0x1a2   :  { %3018 = vmatprep.subr.bf16.mxu1 %v2360_v38  ;;  %v1056_v38 = vld [vmem:[#allocation3 + $0x16c8] sm:$0xff]  ;;  %v2424_v55 = vunpack.c.l.s8.bf16 %v992_v37 }
 0x1a4   :  { %2978 = vmatpush2.bf16.msra.mxu0 %v2231_v41  ;;  %v2183_v41 = vunpack.c.l.s8.bf16 %v871_v28 }
 0x1a5   :  { %3019 = vmatpush2.bf16.msra.mxu1 %v2359_v43  ;;  %2979 = vmatprep.subr.bf16.mxu0 %v2224_v49  ;;  %v2311_v43 = vunpack.c.l.s8.bf16 %v935_v29  ;;  %v2432_v49 = vunpack.c.h.s8.bf16 %v992_v37  ;;  %v2415_v29 = vunpack.c.h.s8.bf16 %v983_v46  ;;  %v976_v37 = vld [vmem:[#allocation3 + $0x1448] sm:$0xff] }
 0x1a6   :  { %3020 = vmatprep.subr.bf16.mxu1 %v2352_v50  ;;  %v2560_v50 = vunpack.c.h.s8.bf16 %v1056_v38 }
 0x1a8   :  { %2980 = vmatpush2.bf16.msra.mxu0 %v2223_v57  ;;  %v277_v57 = vcombine.high %v6282_v39, %v6282_v39 }
 0x1a9   :  { %3021 = vmatpush2.bf16.msra.mxu1 %v2351_v58  ;;  %2981 = vmatprep.subr.bf16.mxu0 %v2216_v61  ;;  %v278_v58 = vcombine.high %v6285_v40, %v6285_v40  ;;  %v6297_v61 = vpack.c.bf16 %v6252_v4, %v6252_v4 }
 0x1aa   :  { %3022 = vmatprep.subr.bf16.mxu1 %v2344_v62  ;;  %v2431_v62 = vunpack.c.h.s8.bf16 %v991_v51 }
 0x1ab   :  { %v6301_v11 = vpack.c.bf16 %v278_v58, %v278_v58  ;;  %v2392_v58 = vunpack.c.l.s8.bf16 %v976_v37 }
 0x1ac   :  { %2982 = vmatpush2.bf16.msra.mxu0 %v2215_v7  ;;  %v2552_v7 = vunpack.c.l.s8.bf16 %v1056_v38  ;;  %v2407_v38 = vunpack.c.l.s8.bf16 %v983_v46 }
 0x1ad   :  { %3023 = vmatpush2.bf16.msra.mxu1 %v2343_v8  ;;  %2983 = vmatprep.subr.bf16.mxu0 %v2208_v44  ;;  %v984_v8 = vld [vmem:[#allocation3 + $0x1488] sm:$0xff] }
 0x1ae   :  { %3024 = vmatprep.subr.bf16.mxu1 %v2336_v45  ;;  %v1048_v44 = vld [vmem:[#allocation3 + $0x1688] sm:$0xff]  ;;  %v6299_v45 = vpack.c.bf16 %v277_v57, %v277_v57  ;;  %v2416_v19 = vunpack.c.h.s8.bf16 %v984_v8 }
 0x1af   :  { %v2544_v20 = vunpack.c.h.s8.bf16 %v1048_v44 }
 0x1b0   :  { %2984 = vmatpush2.bf16.msra.mxu0 %v2207_v15  ;;  %v2423_v15 = vunpack.c.l.s8.bf16 %v991_v51  ;;  %v1039_v51 = vld [vmem:[#allocation3 + $0x1640] sm:$0xff] }
 0x1b1   :  { %3025 = vmatpush2.bf16.msra.mxu1 %v2335_v16  ;;  %2985 = vmatprep.subr.bf16.mxu0 %v2200_v17  ;;  %v2551_v16 = vunpack.c.l.s8.bf16 %v1055_v52  ;;  %v2527_v57 = vunpack.c.h.s8.bf16 %v1039_v51 }
 0x1b2   :  { %3026 = vmatprep.subr.bf16.mxu1 %v2328_v18 }
 0x1b4   :  { %2986 = vmatpush2.bf16.msra.mxu0 %v2199_v23  ;;  %v1047_v23 = vld [vmem:[#allocation3 + $0x1680] sm:$0xff] }
 0x1b5   :  { %3027 = vmatpush2.bf16.msra.mxu1 %v2327_v24  ;;  %2987 = vmatprep.subr.bf16.mxu0 %v2192_v25  ;;  %v2543_v30 = vunpack.c.h.s8.bf16 %v1047_v23 }
 0x1b6   :  { %3028 = vmatprep.subr.bf16.mxu1 %v2320_v26 }
 0x1b8   :  { %2988 = vmatpush2.bf16.msra.mxu0 %v2191_v31 }
 0x1b9   :  { %3029 = vmatpush2.bf16.msra.mxu1 %v2319_v32  ;;  %2989 = vmatprep.subr.bf16.mxu0 %v2184_v34  ;;  %v2408_v34 = vunpack.c.l.s8.bf16 %v984_v8  ;;  %v2519_v8 = vunpack.c.l.s8.bf16 %v1039_v51 }
 0x1ba   :  { %3030 = vmatprep.subr.bf16.mxu1 %v2312_v35  ;;  %v2536_v35 = vunpack.c.l.s8.bf16 %v1048_v44 }
 0x1bc   :  { %2990 = vmatpush2.bf16.msra.mxu0 %v2183_v41  ;;  %v2535_v41 = vunpack.c.l.s8.bf16 %v1047_v23 }
 0x1bd   :  { %3031 = vmatpush2.bf16.msra.mxu1 %v2311_v43  ;;  %3041 = vmatprep.subr.bf16.mxu0 %v2432_v49  ;;  %v2400_v43 = vunpack.c.h.s8.bf16 %v976_v37  ;;  %v1080_v37 = vld [vmem:[#allocation3 + $0x1788] sm:$0xff] }
 0x1be   :  { %3082 = vmatprep.subr.bf16.mxu1 %v2560_v50  ;;  %v975_v50 = vld [vmem:[#allocation3 + $0x1440] sm:$0xff] }
 0x1bf   :  { %v2747_v3 = vpop.f32.mrf.mxu0  ;;  %2992 = vmatmul.mubr.bf16.vlgmr.msra.gmra.mxu0 %v6293_v36  ;;  %v2399_v52 = vunpack.c.h.s8.bf16 %v975_v50 }
 0x1c0   :  { %v2788_v12 = vpop.f32.mrf.mxu1  ;;  %3033 = vmatmul.mubr.bf16.vlgmr.msra.gmra.mxu1 %v6297_v61  ;;  %v2748_v4 = vadd.f32 %v2747_v3, %v6272_v48  ;;  %3042 = vmatpush1.bf16.msra.mxu0 %v2431_v62 }
 0x1c1   :  { %3083 = vmatpush1.bf16.msra.mxu1 %v2559_v53  ;;  %v2749_v17 = vpop.f32.mrf.mxu0  ;;  %3043 = vmatprep.subr.bf16.mxu0 %v2424_v55  ;;  %v968_v53 = vld [vmem:[#allocation3 + $0x1408] sm:$0xff] }
 0x1c2   :  { %v2790_v18 = vpop.f32.mrf.mxu1  ;;  %3084 = vmatprep.subr.bf16.mxu1 %v2552_v7  ;;  %v6306_v24 = vadd.f32 %v2788_v12, %v2748_v4  ;;  %v2750_v25 = vadd.f32 %v2749_v17, %v6274_v33  ;;  %3073 = vmatprep.mubr.bf16.mxu0 %v6299_v45  ;;  %v1040_v33 = vld [vmem:[#allocation3 + $0x1648] sm:$0xff]  ;;  %v2391_v7 = vunpack.c.l.s8.bf16 %v975_v50  ;;  %v2384_v44 = vunpack.c.h.s8.bf16 %v968_v53  ;;  %v967_v12 = vld [vmem:[#allocation3 + $0x1400] sm:$0xff] }
 0x1c3   :  { %3114 = vmatprep.mubr.bf16.mxu1 %v6301_v11  ;;  %v2751_v48 = vpop.f32.mrf.mxu0  ;;  %v2528_v49 = vunpack.c.h.s8.bf16 %v1040_v33  ;;  %v2520_v62 = vunpack.c.l.s8.bf16 %v1040_v33  ;;  %v1032_v55 = vld [vmem:[#allocation3 + $0x1608] sm:$0xff]  ;;  %v1031_v4 = vld [vmem:[#allocation3 + $0x1600] sm:$0xff]  ;;  %v2376_v17 = vunpack.c.l.s8.bf16 %v968_v53  ;;  %v2375_v46 = vunpack.c.l.s8.bf16 %v967_v12 }
 0x1c4   :  { %v2792_v26 = vpop.f32.mrf.mxu1  ;;  %v6311_v28 = vadd.f32 %v2790_v18, %v2750_v25  ;;  %3044 = vmatpush1.bf16.msra.mxu0 %v2423_v15  ;;  %v2512_v3 = vunpack.c.h.s8.bf16 %v1032_v55  ;;  %v2383_v15 = vunpack.c.h.s8.bf16 %v967_v12  ;;  %v2504_v18 = vunpack.c.l.s8.bf16 %v1032_v55  ;;  %v1079_v50 = vld [vmem:[#allocation3 + $0x1780] sm:$0xff]  ;;  %v1072_v53 = vld [vmem:[#allocation3 + $0x1748] sm:$0xff] }
 0x1c5   :  { %3085 = vmatpush1.bf16.msra.mxu1 %v2551_v16  ;;  %v2752_v31 = vpop.f32.mrf.mxu0  ;;  %3045 = vmatprep.subr.bf16.mxu0 %v2416_v19  ;;  %v2511_v16 = vunpack.c.h.s8.bf16 %v1031_v4  ;;  %v1024_v19 = vld [vmem:[#allocation3 + $0x15c8] sm:$0xff]  ;;  %v2503_v23 = vunpack.c.l.s8.bf16 %v1031_v4  ;;  %v1023_v26 = vld [vmem:[#allocation3 + $0x15c0] sm:$0xff] }
 0x1c6   :  { %v2793_v32 = vpop.f32.mrf.mxu1  ;;  %3086 = vmatprep.subr.bf16.mxu1 %v2544_v20  ;;  %v1088_v20 = vld [vmem:[#allocation3 + $0x17c8] sm:$0xff]  ;;  %v2496_v25 = vunpack.c.h.s8.bf16 %v1024_v19  ;;  %v2487_v33 = vunpack.c.l.s8.bf16 %v1023_v26  ;;  %v1071_v12 = vld [vmem:[#allocation3 + $0x1740] sm:$0xff] }
 0x1c7   :  { %v2624_v48 = vunpack.c.h.s8.bf16 %v1088_v20  ;;  %v2488_v32 = vunpack.c.l.s8.bf16 %v1024_v19  ;;  %v1064_v19 = vld [vmem:[#allocation3 + $0x1708] sm:$0xff] }
 0x1c8   :  { %3046 = vmatpush1.bf16.msra.mxu0 %v2415_v29  ;;  %v1087_v29 = vld [vmem:[#allocation3 + $0x17c0] sm:$0xff] }
 0x1c9   :  { %3087 = vmatpush1.bf16.msra.mxu1 %v2543_v30  ;;  %3047 = vmatprep.subr.bf16.mxu0 %v2408_v34  ;;  %v2495_v30 = vunpack.c.h.s8.bf16 %v1023_v26  ;;  %v2623_v31 = vunpack.c.h.s8.bf16 %v1087_v29  ;;  %v2616_v34 = vunpack.c.l.s8.bf16 %v1088_v20  ;;  %v1063_v26 = vld [vmem:[#allocation3 + $0x1700] sm:$0xff] }
 0x1ca   :  { %3088 = vmatprep.subr.bf16.mxu1 %v2536_v35  ;;  %v1016_v35 = vld [vmem:[#allocation3 + $0x1588] sm:$0xff] }
 0x1cc   :  { %3048 = vmatpush1.bf16.msra.mxu0 %v2407_v38  ;;  %v2615_v38 = vunpack.c.l.s8.bf16 %v1087_v29 }
 0x1cd   :  { %3089 = vmatpush1.bf16.msra.mxu1 %v2535_v41  ;;  %3049 = vmatprep.subr.bf16.mxu0 %v2400_v43  ;;  %v2480_v41 = vunpack.c.h.s8.bf16 %v1016_v35  ;;  %v2608_v43 = vunpack.c.h.s8.bf16 %v1080_v37 }
 0x1ce   :  { %3090 = vmatprep.subr.bf16.mxu1 %v2528_v49  ;;  %v1015_v49 = vld [vmem:[#allocation3 + $0x1580] sm:$0xff] }
 0x1cf   :  { %v2479_v51 = vunpack.c.h.s8.bf16 %v1015_v49  ;;  %v2471_v55 = vunpack.c.l.s8.bf16 %v1015_v49  ;;  %v417_v49 = vld [vmem:[#allocation3 + $0x2d0] sm:$0xff] }
 0x1d0   :  { %3050 = vmatpush1.bf16.msra.mxu0 %v2399_v52  ;;  %v2607_v52 = vunpack.c.h.s8.bf16 %v1079_v50 }
 0x1d1   :  { %3091 = vmatpush1.bf16.msra.mxu1 %v2527_v57  ;;  %3051 = vmatprep.subr.bf16.mxu0 %v2392_v58  ;;  %v2472_v57 = vunpack.c.l.s8.bf16 %v1016_v35  ;;  %v2600_v58 = vunpack.c.l.s8.bf16 %v1080_v37  ;;  %v418_v35 = vld [vmem:[#allocation3 + $0x2d8] sm:$0xff] }
 0x1d2   :  { %3092 = vmatprep.subr.bf16.mxu1 %v2520_v62  ;;  %v1008_v62 = vld [vmem:[#allocation3 + $0x1548] sm:$0xff] }
 0x1d4   :  { %3052 = vmatpush1.bf16.msra.mxu0 %v2391_v7  ;;  %v2599_v7 = vunpack.c.l.s8.bf16 %v1079_v50  ;;  %v6315_v50 = vpack.c.bf16 %v6282_v39, %v6282_v39 }
 0x1d5   :  { %3093 = vmatpush1.bf16.msra.mxu1 %v2519_v8  ;;  %3053 = vmatprep.subr.bf16.mxu0 %v2384_v44  ;;  %v2464_v8 = vunpack.c.h.s8.bf16 %v1008_v62  ;;  %v2592_v44 = vunpack.c.h.s8.bf16 %v1072_v53 }
 0x1d6   :  { %3094 = vmatprep.subr.bf16.mxu1 %v2512_v3  ;;  %v1007_v3 = vld [vmem:[#allocation3 + $0x1540] sm:$0xff] }
 0x1d7   :  { %v2463_v4 = vunpack.c.h.s8.bf16 %v1007_v3  ;;  %v2455_v20 = vunpack.c.l.s8.bf16 %v1007_v3 }
 0x1d8   :  { %3054 = vmatpush1.bf16.msra.mxu0 %v2383_v15  ;;  %v2591_v15 = vunpack.c.h.s8.bf16 %v1071_v12 }
 0x1d9   :  { %3095 = vmatpush1.bf16.msra.mxu1 %v2511_v16  ;;  %3055 = vmatprep.subr.bf16.mxu0 %v2376_v17  ;;  %v2456_v16 = vunpack.c.l.s8.bf16 %v1008_v62  ;;  %v2584_v17 = vunpack.c.l.s8.bf16 %v1072_v53  ;;  %v1274_v62 = vunpack.c.l.s8.bf16 %v418_v35  ;;  %v346_v53 = vld [vmem:[#allocation3 + $0x98] sm:$0xff] }
 0x1da   :  { %3096 = vmatprep.subr.bf16.mxu1 %v2504_v18  ;;  %v1000_v18 = vld [vmem:[#allocation3 + $0x1508] sm:$0xff] }
 0x1dc   :  { %3056 = vmatpush1.bf16.msra.mxu0 %v2375_v46  ;;  %v2583_v46 = vunpack.c.l.s8.bf16 %v1071_v12 }
 0x1dd   :  { %3097 = vmatpush1.bf16.msra.mxu1 %v2503_v23  ;;  %3057 = vmatprep.subr.bf16.mxu0 %v2496_v25  ;;  %v2448_v23 = vunpack.c.h.s8.bf16 %v1000_v18  ;;  %v2576_v25 = vunpack.c.h.s8.bf16 %v1064_v19 }
 0x1de   :  { %3098 = vmatprep.subr.bf16.mxu1 %v2624_v48  ;;  %v999_v48 = vld [vmem:[#allocation3 + $0x1500] sm:$0xff] }
 0x1df   :  { %v2447_v29 = vunpack.c.h.s8.bf16 %v999_v48  ;;  %v2439_v37 = vunpack.c.l.s8.bf16 %v999_v48 }
 0x1e0   :  { %3058 = vmatpush2.bf16.msra.mxu0 %v2495_v30  ;;  %v2575_v30 = vunpack.c.h.s8.bf16 %v1063_v26 }
 0x1e1   :  { %3099 = vmatpush2.bf16.msra.mxu1 %v2623_v31  ;;  %3059 = vmatprep.subr.bf16.mxu0 %v2488_v32  ;;  %v2440_v31 = vunpack.c.l.s8.bf16 %v1000_v18  ;;  %v2568_v32 = vunpack.c.l.s8.bf16 %v1064_v19 }
 0x1e2   :  { %3100 = vmatprep.subr.bf16.mxu1 %v2616_v34  ;;  %v354_v34 = vld [vmem:[#allocation3 + $0xd8] sm:$0xff] }
 0x1e4   :  { %3060 = vmatpush2.bf16.msra.mxu0 %v2487_v33  ;;  %v2567_v33 = vunpack.c.l.s8.bf16 %v1063_v26 }
 0x1e5   :  { %3101 = vmatpush2.bf16.msra.mxu1 %v2615_v38  ;;  %3061 = vmatprep.subr.bf16.mxu0 %v2480_v41  ;;  %v1154_v38 = vunpack.c.h.s8.bf16 %v354_v34  ;;  %v1282_v41 = vunpack.c.h.s8.bf16 %v418_v35 }
 0x1e6   :  { %3102 = vmatprep.subr.bf16.mxu1 %v2608_v43  ;;  %v353_v43 = vld [vmem:[#allocation3 + $0xd0] sm:$0xff] }
 0x1e8   :  { %3062 = vmatpush2.bf16.msra.mxu0 %v2479_v51  ;;  %v6319_v51 = vpack.c.bf16 %v6285_v40, %v6285_v40  ;;  %v1145_v40 = vunpack.c.l.s8.bf16 %v353_v43 }
 0x1e9   :  { %3103 = vmatpush2.bf16.msra.mxu1 %v2607_v52  ;;  %3063 = vmatprep.subr.bf16.mxu0 %v2472_v57  ;;  %v1153_v52 = vunpack.c.h.s8.bf16 %v353_v43  ;;  %v1281_v57 = vunpack.c.h.s8.bf16 %v417_v49 }
 0x1ea   :  { %3104 = vmatprep.subr.bf16.mxu1 %v2600_v58  ;;  %v1146_v58 = vunpack.c.l.s8.bf16 %v354_v34 }
 0x1ec   :  { %3064 = vmatpush2.bf16.msra.mxu0 %v2471_v55  ;;  %v410_v55 = vld [vmem:[#allocation3 + $0x298] sm:$0xff] }
 0x1ed   :  { %3105 = vmatpush2.bf16.msra.mxu1 %v2599_v7  ;;  %3065 = vmatprep.subr.bf16.mxu0 %v2464_v8 }
 0x1ee   :  { %3106 = vmatprep.subr.bf16.mxu1 %v2592_v44  ;;  %v1273_v44 = vunpack.c.l.s8.bf16 %v417_v49 }
 0x1f0   :  { %3066 = vmatpush2.bf16.msra.mxu0 %v2463_v4  ;;  %v1138_v4 = vunpack.c.h.s8.bf16 %v346_v53 }
 0x1f1   :  { %3107 = vmatpush2.bf16.msra.mxu1 %v2591_v15  ;;  %3067 = vmatprep.subr.bf16.mxu0 %v2456_v16  ;;  %v1266_v15 = vunpack.c.h.s8.bf16 %v410_v55  ;;  %v345_v16 = vld [vmem:[#allocation3 + $0x90] sm:$0xff] }
 0x1f2   :  { %3108 = vmatprep.subr.bf16.mxu1 %v2584_v17  ;;  %v409_v17 = vld [vmem:[#allocation3 + $0x290] sm:$0xff] }
 0x1f3   :  { %v1257_v34 = vunpack.c.l.s8.bf16 %v409_v17 }
 0x1f4   :  { %3068 = vmatpush2.bf16.msra.mxu0 %v2455_v20 }
 0x1f5   :  { %3109 = vmatpush2.bf16.msra.mxu1 %v2583_v46  ;;  %3069 = vmatprep.subr.bf16.mxu0 %v2448_v23  ;;  %v1137_v23 = vunpack.c.h.s8.bf16 %v345_v16 }
 0x1f6   :  { %3110 = vmatprep.subr.bf16.mxu1 %v2576_v25  ;;  %v1265_v25 = vunpack.c.h.s8.bf16 %v409_v17 }
 0x1f8   :  { %3070 = vmatpush2.bf16.msra.mxu0 %v2447_v29  ;;  %v1130_v29 = vunpack.c.l.s8.bf16 %v346_v53 }
 0x1f9   :  { %3111 = vmatpush2.bf16.msra.mxu1 %v2575_v30  ;;  %3071 = vmatprep.subr.bf16.mxu0 %v2440_v31  ;;  %v1258_v30 = vunpack.c.l.s8.bf16 %v410_v55  ;;  %v338_v31 = vld [vmem:[#allocation3 + $0x58] sm:$0xff] }
 0x1fa   :  { %3112 = vmatprep.subr.bf16.mxu1 %v2568_v32  ;;  %v1129_v32 = vunpack.c.l.s8.bf16 %v345_v16  ;;  %v1122_v35 = vunpack.c.h.s8.bf16 %v338_v31  ;;  %v1114_v49 = vunpack.c.l.s8.bf16 %v338_v31  ;;  %v442_v31 = vld [vmem:[#allocation3 + $0x398] sm:$0xff] }
 0x1fc   :  { %3072 = vmatpush2.bf16.msra.mxu0 %v2439_v37 }
 0x1fd   :  { %3113 = vmatpush2.bf16.msra.mxu1 %v2567_v33  ;;  %3123 = vmatprep.subr.bf16.mxu0 %v1154_v38  ;;  %v337_v33 = vld [vmem:[#allocation3 + $0x50] sm:$0xff] }
 0x1fe   :  { %3164 = vmatprep.subr.bf16.mxu1 %v1282_v41  ;;  %v401_v38 = vld [vmem:[#allocation3 + $0x250] sm:$0xff]  ;;  %v1121_v41 = vunpack.c.h.s8.bf16 %v337_v33 }
 0x1ff   :  { %v2829_v7 = vpop.f32.mrf.mxu0  ;;  %3074 = vmatmul.mubr.bf16.vlgmr.msra.gmra.mxu0 %v6315_v50  ;;  %v1249_v43 = vunpack.c.h.s8.bf16 %v401_v38  ;;  %v1241_v53 = vunpack.c.l.s8.bf16 %v401_v38 }
 0x200   :  { %v2870_v8 = vpop.f32.mrf.mxu1  ;;  %3115 = vmatmul.mubr.bf16.vlgmr.msra.gmra.mxu1 %v6319_v51  ;;  %v2830_v39 = vadd.f32 %v2829_v7, %v6306_v24  ;;  %3124 = vmatpush1.bf16.msra.mxu0 %v1153_v52 }
 0x201   :  { %3165 = vmatpush1.bf16.msra.mxu1 %v1281_v57  ;;  %v2831_v3 = vpop.f32.mrf.mxu0  ;;  %3125 = vmatprep.subr.bf16.mxu0 %v1146_v58  ;;  %v330_v57 = vld [vmem:[#allocation3 + $0x18] sm:$0xff] }
 0x202   :  { %v2872_v12 = vpop.f32.mrf.mxu1  ;;  %3166 = vmatprep.subr.bf16.mxu1 %v1274_v62  ;;  %v6324_v18 = vadd.f32 %v2870_v8, %v2830_v39  ;;  %v2832_v19 = vadd.f32 %v2831_v3, %v6311_v28  ;;  %3155 = vmatprep.mubr.bf16.mxu0 %v6150_v54  ;;  %v402_v28 = vld [vmem:[#allocation3 + $0x258] sm:$0xff]  ;;  %v1113_v62 = vunpack.c.l.s8.bf16 %v337_v33  ;;  %v1106_v55 = vunpack.c.h.s8.bf16 %v330_v57  ;;  %v329_v8 = vld [vmem:[#allocation3 + $0x10] sm:$0xff] }
 0x203   :  { %3196 = vmatprep.mubr.bf16.mxu1 %v6155_v56  ;;  %v2833_v24 = vpop.f32.mrf.mxu0  ;;  %v1250_v37 = vunpack.c.h.s8.bf16 %v402_v28  ;;  %v1242_v52 = vunpack.c.l.s8.bf16 %v402_v28  ;;  %v394_v58 = vld [vmem:[#allocation3 + $0x218] sm:$0xff]  ;;  %v393_v39 = vld [vmem:[#allocation3 + $0x210] sm:$0xff]  ;;  %v1098_v3 = vunpack.c.l.s8.bf16 %v330_v57  ;;  %v1097_v16 = vunpack.c.l.s8.bf16 %v329_v8 }
 0x204   :  { %v2874_v20 = vpop.f32.mrf.mxu1  ;;  %v6329_v46 = vadd.f32 %v2872_v12, %v2832_v19  ;;  %3126 = vmatpush1.bf16.msra.mxu0 %v1145_v40  ;;  %v1234_v7 = vunpack.c.h.s8.bf16 %v394_v58  ;;  %v1105_v40 = vunpack.c.h.s8.bf16 %v329_v8  ;;  %v1226_v12 = vunpack.c.l.s8.bf16 %v394_v58  ;;  %v441_v33 = vld [vmem:[#allocation3 + $0x390] sm:$0xff]  ;;  %v434_v57 = vld [vmem:[#allocation3 + $0x358] sm:$0xff] }
 0x205   :  { %3167 = vmatpush1.bf16.msra.mxu1 %v1273_v44  ;;  %v2834_v48 = vpop.f32.mrf.mxu0  ;;  %3127 = vmatprep.subr.bf16.mxu0 %v1138_v4  ;;  %v1233_v44 = vunpack.c.h.s8.bf16 %v393_v39  ;;  %v386_v4 = vld [vmem:[#allocation3 + $0x1d8] sm:$0xff]  ;;  %v1225_v17 = vunpack.c.l.s8.bf16 %v393_v39  ;;  %v385_v20 = vld [vmem:[#allocation3 + $0x1d0] sm:$0xff] }
 0x206   :  { %v2875_v26 = vpop.f32.mrf.mxu1  ;;  %3168 = vmatprep.subr.bf16.mxu1 %v1266_v15  ;;  %v450_v15 = vld [vmem:[#allocation3 + $0x3d8] sm:$0xff]  ;;  %v1218_v19 = vunpack.c.h.s8.bf16 %v386_v4  ;;  %v1209_v28 = vunpack.c.l.s8.bf16 %v385_v20  ;;  %v433_v8 = vld [vmem:[#allocation3 + $0x350] sm:$0xff] }
 0x207   :  { %v1346_v24 = vunpack.c.h.s8.bf16 %v450_v15  ;;  %v1210_v26 = vunpack.c.l.s8.bf16 %v386_v4  ;;  %v426_v4 = vld [vmem:[#allocation3 + $0x318] sm:$0xff] }
 0x208   :  { %3128 = vmatpush1.bf16.msra.mxu0 %v1137_v23  ;;  %v449_v23 = vld [vmem:[#allocation3 + $0x3d0] sm:$0xff] }
 0x209   :  { %3169 = vmatpush1.bf16.msra.mxu1 %v1265_v25  ;;  %3129 = vmatprep.subr.bf16.mxu0 %v1130_v29  ;;  %v1217_v25 = vunpack.c.h.s8.bf16 %v385_v20  ;;  %v1345_v48 = vunpack.c.h.s8.bf16 %v449_v23  ;;  %v1338_v29 = vunpack.c.l.s8.bf16 %v450_v15  ;;  %v425_v20 = vld [vmem:[#allocation3 + $0x310] sm:$0xff] }
 0x20a   :  { %3170 = vmatprep.subr.bf16.mxu1 %v1258_v30  ;;  %v378_v30 = vld [vmem:[#allocation3 + $0x198] sm:$0xff] }
 0x20c   :  { %3130 = vmatpush1.bf16.msra.mxu0 %v1129_v32  ;;  %v1337_v32 = vunpack.c.l.s8.bf16 %v449_v23 }
 0x20d   :  { %3171 = vmatpush1.bf16.msra.mxu1 %v1257_v34  ;;  %3131 = vmatprep.subr.bf16.mxu0 %v1122_v35  ;;  %v1202_v34 = vunpack.c.h.s8.bf16 %v378_v30  ;;  %v1330_v35 = vunpack.c.h.s8.bf16 %v442_v31 }
 0x20e   :  { %3172 = vmatprep.subr.bf16.mxu1 %v1250_v37  ;;  %v377_v37 = vld [vmem:[#allocation3 + $0x190] sm:$0xff] }
 0x20f   :  { %v1201_v38 = vunpack.c.h.s8.bf16 %v377_v37  ;;  %v1193_v58 = vunpack.c.l.s8.bf16 %v377_v37  ;;  %v545_v37 = vld [vmem:[#allocation3 + $0x6d0] sm:$0xff] }
 0x210   :  { %3132 = vmatpush1.bf16.msra.mxu0 %v1121_v41  ;;  %v1329_v41 = vunpack.c.h.s8.bf16 %v441_v33 }
 0x211   :  { %3173 = vmatpush1.bf16.msra.mxu1 %v1249_v43  ;;  %3133 = vmatprep.subr.bf16.mxu0 %v1114_v49  ;;  %v1194_v43 = vunpack.c.l.s8.bf16 %v378_v30  ;;  %v1322_v49 = vunpack.c.l.s8.bf16 %v442_v31  ;;  %v546_v30 = vld [vmem:[#allocation3 + $0x6d8] sm:$0xff] }
 0x212   :  { %3174 = vmatprep.subr.bf16.mxu1 %v1242_v52  ;;  %v370_v52 = vld [vmem:[#allocation3 + $0x158] sm:$0xff] }
 0x214   :  { %3134 = vmatpush1.bf16.msra.mxu0 %v1113_v62  ;;  %v1321_v62 = vunpack.c.l.s8.bf16 %v441_v33 }
 0x215   :  { %3175 = vmatpush1.bf16.msra.mxu1 %v1241_v53  ;;  %3135 = vmatprep.subr.bf16.mxu0 %v1106_v55  ;;  %v1186_v53 = vunpack.c.h.s8.bf16 %v370_v52  ;;  %v1314_v55 = vunpack.c.h.s8.bf16 %v434_v57 }
 0x216   :  { %3176 = vmatprep.subr.bf16.mxu1 %v1234_v7  ;;  %v369_v7 = vld [vmem:[#allocation3 + $0x150] sm:$0xff] }
 0x217   :  { %v1185_v39 = vunpack.c.h.s8.bf16 %v369_v7  ;;  %v1177_v15 = vunpack.c.l.s8.bf16 %v369_v7 }
 0x218   :  { %3136 = vmatpush1.bf16.msra.mxu0 %v1105_v40  ;;  %v1313_v40 = vunpack.c.h.s8.bf16 %v433_v8 }
 0x219   :  { %3177 = vmatpush1.bf16.msra.mxu1 %v1233_v44  ;;  %3137 = vmatprep.subr.bf16.mxu0 %v1098_v3  ;;  %v1178_v44 = vunpack.c.l.s8.bf16 %v370_v52  ;;  %v1306_v3 = vunpack.c.l.s8.bf16 %v434_v57  ;;  %v538_v52 = vld [vmem:[#allocation3 + $0x698] sm:$0xff] }
 0x21a   :  { %3178 = vmatprep.subr.bf16.mxu1 %v1226_v12  ;;  %v362_v12 = vld [vmem:[#allocation3 + $0x118] sm:$0xff] }
 0x21c   :  { %3138 = vmatpush1.bf16.msra.mxu0 %v1097_v16  ;;  %v1305_v16 = vunpack.c.l.s8.bf16 %v433_v8 }
 0x21d   :  { %3179 = vmatpush1.bf16.msra.mxu1 %v1225_v17  ;;  %3139 = vmatprep.subr.bf16.mxu0 %v1218_v19  ;;  %v1170_v17 = vunpack.c.h.s8.bf16 %v362_v12  ;;  %v1298_v19 = vunpack.c.h.s8.bf16 %v426_v4 }
 0x21e   :  { %3180 = vmatprep.subr.bf16.mxu1 %v1346_v24  ;;  %v361_v24 = vld [vmem:[#allocation3 + $0x110] sm:$0xff] }
 0x21f   :  { %v1169_v23 = vunpack.c.h.s8.bf16 %v361_v24  ;;  %v1161_v31 = vunpack.c.l.s8.bf16 %v361_v24 }
 0x220   :  { %3140 = vmatpush2.bf16.msra.mxu0 %v1217_v25  ;;  %v1297_v25 = vunpack.c.h.s8.bf16 %v425_v20 }
 0x221   :  { %3181 = vmatpush2.bf16.msra.mxu1 %v1345_v48  ;;  %3141 = vmatprep.subr.bf16.mxu0 %v1210_v26  ;;  %v1162_v48 = vunpack.c.l.s8.bf16 %v362_v12  ;;  %v1290_v26 = vunpack.c.l.s8.bf16 %v426_v4 }
 0x222   :  { %3182 = vmatprep.subr.bf16.mxu1 %v1338_v29  ;;  %v482_v29 = vld [vmem:[#allocation3 + $0x4d8] sm:$0xff] }
 0x224   :  { %3142 = vmatpush2.bf16.msra.mxu0 %v1209_v28  ;;  %v1289_v28 = vunpack.c.l.s8.bf16 %v425_v20 }
 0x225   :  { %3183 = vmatpush2.bf16.msra.mxu1 %v1337_v32  ;;  %3143 = vmatprep.subr.bf16.mxu0 %v1202_v34  ;;  %v1410_v32 = vunpack.c.h.s8.bf16 %v482_v29  ;;  %v1538_v34 = vunpack.c.h.s8.bf16 %v546_v30 }
 0x226   :  { %3184 = vmatprep.subr.bf16.mxu1 %v1330_v35  ;;  %v481_v35 = vld [vmem:[#allocation3 + $0x4d0] sm:$0xff] }
 0x227   :  { %v1409_v33 = vunpack.c.h.s8.bf16 %v481_v35 }
 0x228   :  { %3144 = vmatpush2.bf16.msra.mxu0 %v1201_v38  ;;  %v1537_v38 = vunpack.c.h.s8.bf16 %v545_v37 }
 0x229   :  { %3185 = vmatpush2.bf16.msra.mxu1 %v1329_v41  ;;  %3145 = vmatprep.subr.bf16.mxu0 %v1194_v43  ;;  %v1402_v41 = vunpack.c.l.s8.bf16 %v482_v29  ;;  %v1530_v43 = vunpack.c.l.s8.bf16 %v546_v30 }
 0x22a   :  { %3186 = vmatprep.subr.bf16.mxu1 %v1322_v49  ;;  %v474_v49 = vld [vmem:[#allocation3 + $0x498] sm:$0xff] }
 0x22c   :  { %3146 = vmatpush2.bf16.msra.mxu0 %v1193_v58 }
 0x22d   :  { %3187 = vmatpush2.bf16.msra.mxu1 %v1321_v62  ;;  %3147 = vmatprep.subr.bf16.mxu0 %v1186_v53  ;;  %v1401_v53 = vunpack.c.l.s8.bf16 %v481_v35 }
 0x22e   :  { %3188 = vmatprep.subr.bf16.mxu1 %v1314_v55  ;;  %v1529_v55 = vunpack.c.l.s8.bf16 %v545_v37 }
 0x230   :  { %3148 = vmatpush2.bf16.msra.mxu0 %v1185_v39  ;;  %v1394_v39 = vunpack.c.h.s8.bf16 %v474_v49 }
 0x231   :  { %3189 = vmatpush2.bf16.msra.mxu1 %v1313_v40  ;;  %3149 = vmatprep.subr.bf16.mxu0 %v1178_v44  ;;  %v1522_v40 = vunpack.c.h.s8.bf16 %v538_v52  ;;  %v473_v44 = vld [vmem:[#allocation3 + $0x490] sm:$0xff] }
 0x232   :  { %3190 = vmatprep.subr.bf16.mxu1 %v1306_v3  ;;  %v537_v3 = vld [vmem:[#allocation3 + $0x690] sm:$0xff] }
 0x233   :  { %v1513_v29 = vunpack.c.l.s8.bf16 %v537_v3 }
 0x234   :  { %3150 = vmatpush2.bf16.msra.mxu0 %v1177_v15 }
 0x235   :  { %3191 = vmatpush2.bf16.msra.mxu1 %v1305_v16  ;;  %3151 = vmatprep.subr.bf16.mxu0 %v1170_v17  ;;  %v1393_v17 = vunpack.c.h.s8.bf16 %v473_v44 }
 0x236   :  { %3192 = vmatprep.subr.bf16.mxu1 %v1298_v19  ;;  %v1521_v19 = vunpack.c.h.s8.bf16 %v537_v3 }
 0x238   :  { %3152 = vmatpush2.bf16.msra.mxu0 %v1169_v23  ;;  %v1386_v23 = vunpack.c.l.s8.bf16 %v474_v49 }
 0x239   :  { %3193 = vmatpush2.bf16.msra.mxu1 %v1297_v25  ;;  %3153 = vmatprep.subr.bf16.mxu0 %v1162_v48  ;;  %v1514_v25 = vunpack.c.l.s8.bf16 %v538_v52  ;;  %v466_v48 = vld [vmem:[#allocation3 + $0x458] sm:$0xff] }
 0x23a   :  { %3194 = vmatprep.subr.bf16.mxu1 %v1290_v26  ;;  %v1385_v26 = vunpack.c.l.s8.bf16 %v473_v44  ;;  %v1378_v30 = vunpack.c.h.s8.bf16 %v466_v48  ;;  %v1370_v37 = vunpack.c.l.s8.bf16 %v466_v48  ;;  %v570_v48 = vld [vmem:[#allocation3 + $0x798] sm:$0xff] }
 0x23c   :  { %3154 = vmatpush2.bf16.msra.mxu0 %v1161_v31 }
 0x23d   :  { %3195 = vmatpush2.bf16.msra.mxu1 %v1289_v28  ;;  %3205 = vmatprep.subr.bf16.mxu0 %v1410_v32  ;;  %v465_v28 = vld [vmem:[#allocation3 + $0x450] sm:$0xff] }
 0x23e   :  { %3246 = vmatprep.subr.bf16.mxu1 %v1538_v34  ;;  %v529_v32 = vld [vmem:[#allocation3 + $0x650] sm:$0xff]  ;;  %v1377_v34 = vunpack.c.h.s8.bf16 %v465_v28 }
 0x23f   :  { %v2911_v57 = vpop.f32.mrf.mxu0  ;;  %3156 = vmatmul.mubr.bf16.vlgmr.msra.gmra.mxu0 %v6173_v1  ;;  %v1505_v35 = vunpack.c.h.s8.bf16 %v529_v32  ;;  %v1497_v49 = vunpack.c.l.s8.bf16 %v529_v32 }
 0x240   :  { %v2952_v58 = vpop.f32.mrf.mxu1  ;;  %3197 = vmatmul.mubr.bf16.vlgmr.msra.gmra.mxu1 %v6177_v2  ;;  %v2912_v62 = vadd.f32 %v2911_v57, %v6324_v18  ;;  %3206 = vmatpush1.bf16.msra.mxu0 %v1409_v33 }
 0x241   :  { %3247 = vmatpush1.bf16.msra.mxu1 %v1537_v38  ;;  %v2913_v7 = vpop.f32.mrf.mxu0  ;;  %3207 = vmatprep.subr.bf16.mxu0 %v1402_v41  ;;  %v458_v38 = vld [vmem:[#allocation3 + $0x418] sm:$0xff] }
 0x242   :  { %v2954_v8 = vpop.f32.mrf.mxu1  ;;  %3248 = vmatprep.subr.bf16.mxu1 %v1530_v43  ;;  %v6334_v12 = vadd.f32 %v2952_v58, %v2912_v62  ;;  %v2914_v4 = vadd.f32 %v2913_v7, %v6329_v46  ;;  %3237 = vmatprep.mubr.bf16.mxu0 %v6179_v9  ;;  %v530_v46 = vld [vmem:[#allocation3 + $0x658] sm:$0xff]  ;;  %v1369_v43 = vunpack.c.l.s8.bf16 %v465_v28  ;;  %v1362_v52 = vunpack.c.h.s8.bf16 %v458_v38  ;;  %v457_v58 = vld [vmem:[#allocation3 + $0x410] sm:$0xff] }
 0x243   :  { %3278 = vmatprep.mubr.bf16.mxu1 %v6181_v10  ;;  %v2915_v18 = vpop.f32.mrf.mxu0  ;;  %v1506_v31 = vunpack.c.h.s8.bf16 %v530_v46  ;;  %v1498_v33 = vunpack.c.l.s8.bf16 %v530_v46  ;;  %v522_v41 = vld [vmem:[#allocation3 + $0x618] sm:$0xff]  ;;  %v521_v62 = vld [vmem:[#allocation3 + $0x610] sm:$0xff]  ;;  %v1354_v7 = vunpack.c.l.s8.bf16 %v458_v38  ;;  %v1353_v44 = vunpack.c.l.s8.bf16 %v457_v58 }
 0x244   :  { %v2956_v15 = vpop.f32.mrf.mxu1  ;;  %v6339_v16 = vadd.f32 %v2954_v8, %v2914_v4  ;;  %3208 = vmatpush1.bf16.msra.mxu0 %v1401_v53  ;;  %v1490_v57 = vunpack.c.h.s8.bf16 %v522_v41  ;;  %v1361_v53 = vunpack.c.h.s8.bf16 %v457_v58  ;;  %v1482_v8 = vunpack.c.l.s8.bf16 %v522_v41  ;;  %v569_v28 = vld [vmem:[#allocation3 + $0x790] sm:$0xff]  ;;  %v562_v38 = vld [vmem:[#allocation3 + $0x758] sm:$0xff] }
 0x245   :  { %3249 = vmatpush1.bf16.msra.mxu1 %v1529_v55  ;;  %v2916_v24 = vpop.f32.mrf.mxu0  ;;  %3209 = vmatprep.subr.bf16.mxu0 %v1394_v39  ;;  %v1489_v55 = vunpack.c.h.s8.bf16 %v521_v62  ;;  %v514_v39 = vld [vmem:[#allocation3 + $0x5d8] sm:$0xff]  ;;  %v1481_v3 = vunpack.c.l.s8.bf16 %v521_v62  ;;  %v513_v15 = vld [vmem:[#allocation3 + $0x5d0] sm:$0xff] }
 0x246   :  { %v2957_v20 = vpop.f32.mrf.mxu1  ;;  %3250 = vmatprep.subr.bf16.mxu1 %v1522_v40  ;;  %v578_v40 = vld [vmem:[#allocation3 + $0x7d8] sm:$0xff]  ;;  %v1474_v4 = vunpack.c.h.s8.bf16 %v514_v39  ;;  %v1465_v46 = vunpack.c.l.s8.bf16 %v513_v15  ;;  %v561_v58 = vld [vmem:[#allocation3 + $0x750] sm:$0xff] }
 0x247   :  { %v1602_v18 = vunpack.c.h.s8.bf16 %v578_v40  ;;  %v1466_v20 = vunpack.c.l.s8.bf16 %v514_v39  ;;  %v554_v39 = vld [vmem:[#allocation3 + $0x718] sm:$0xff] }
 0x248   :  { %3210 = vmatpush1.bf16.msra.mxu0 %v1393_v17  ;;  %v577_v17 = vld [vmem:[#allocation3 + $0x7d0] sm:$0xff] }
 0x249   :  { %3251 = vmatpush1.bf16.msra.mxu1 %v1521_v19  ;;  %3211 = vmatprep.subr.bf16.mxu0 %v1386_v23  ;;  %v1473_v19 = vunpack.c.h.s8.bf16 %v513_v15  ;;  %v1601_v24 = vunpack.c.h.s8.bf16 %v577_v17  ;;  %v1594_v23 = vunpack.c.l.s8.bf16 %v578_v40  ;;  %v553_v15 = vld [vmem:[#allocation3 + $0x710] sm:$0xff] }
 0x24a   :  { %3252 = vmatprep.subr.bf16.mxu1 %v1514_v25  ;;  %v506_v25 = vld [vmem:[#allocation3 + $0x598] sm:$0xff] }
 0x24c   :  { %3212 = vmatpush1.bf16.msra.mxu0 %v1385_v26  ;;  %v1593_v26 = vunpack.c.l.s8.bf16 %v577_v17 }
 0x24d   :  { %3253 = vmatpush1.bf16.msra.mxu1 %v1513_v29  ;;  %3213 = vmatprep.subr.bf16.mxu0 %v1378_v30  ;;  %v1458_v29 = vunpack.c.h.s8.bf16 %v506_v25  ;;  %v1586_v30 = vunpack.c.h.s8.bf16 %v570_v48 }
 0x24e   :  { %3254 = vmatprep.subr.bf16.mxu1 %v1506_v31  ;;  %v505_v31 = vld [vmem:[#allocation3 + $0x590] sm:$0xff] }
 0x24f   :  { %v1457_v32 = vunpack.c.h.s8.bf16 %v505_v31  ;;  %v1449_v41 = vunpack.c.l.s8.bf16 %v505_v31  ;;  %v673_v31 = vld [vmem:[#allocation3 + $0xad0] sm:$0xff] }
 0x250   :  { %3214 = vmatpush1.bf16.msra.mxu0 %v1377_v34  ;;  %v1585_v34 = vunpack.c.h.s8.bf16 %v569_v28 }
 0x251   :  { %3255 = vmatpush1.bf16.msra.mxu1 %v1505_v35  ;;  %3215 = vmatprep.subr.bf16.mxu0 %v1370_v37  ;;  %v1450_v35 = vunpack.c.l.s8.bf16 %v506_v25  ;;  %v1578_v37 = vunpack.c.l.s8.bf16 %v570_v48  ;;  %v674_v25 = vld [vmem:[#allocation3 + $0xad8] sm:$0xff] }
 0x252   :  { %3256 = vmatprep.subr.bf16.mxu1 %v1498_v33  ;;  %v498_v33 = vld [vmem:[#allocation3 + $0x558] sm:$0xff] }
 0x254   :  { %3216 = vmatpush1.bf16.msra.mxu0 %v1369_v43  ;;  %v1577_v43 = vunpack.c.l.s8.bf16 %v569_v28 }
 0x255   :  { %3257 = vmatpush1.bf16.msra.mxu1 %v1497_v49  ;;  %3217 = vmatprep.subr.bf16.mxu0 %v1362_v52  ;;  %v1442_v49 = vunpack.c.h.s8.bf16 %v498_v33  ;;  %v1570_v52 = vunpack.c.h.s8.bf16 %v562_v38 }
 0x256   :  { %3258 = vmatprep.subr.bf16.mxu1 %v1490_v57  ;;  %v497_v57 = vld [vmem:[#allocation3 + $0x550] sm:$0xff] }
 0x257   :  { %v1441_v62 = vunpack.c.h.s8.bf16 %v497_v57  ;;  %v1433_v40 = vunpack.c.l.s8.bf16 %v497_v57 }
 0x258   :  { %3218 = vmatpush1.bf16.msra.mxu0 %v1361_v53  ;;  %v1569_v53 = vunpack.c.h.s8.bf16 %v561_v58 }
 0x259   :  { %3259 = vmatpush1.bf16.msra.mxu1 %v1489_v55  ;;  %3219 = vmatprep.subr.bf16.mxu0 %v1354_v7  ;;  %v1434_v55 = vunpack.c.l.s8.bf16 %v498_v33  ;;  %v1562_v7 = vunpack.c.l.s8.bf16 %v562_v38  ;;  %v666_v33 = vld [vmem:[#allocation3 + $0xa98] sm:$0xff] }
 0x25a   :  { %3260 = vmatprep.subr.bf16.mxu1 %v1482_v8  ;;  %v490_v8 = vld [vmem:[#allocation3 + $0x518] sm:$0xff] }
 0x25c   :  { %3220 = vmatpush1.bf16.msra.mxu0 %v1353_v44  ;;  %v1561_v44 = vunpack.c.l.s8.bf16 %v561_v58 }
 0x25d   :  { %3261 = vmatpush1.bf16.msra.mxu1 %v1481_v3  ;;  %3221 = vmatprep.subr.bf16.mxu0 %v1474_v4  ;;  %v1426_v3 = vunpack.c.h.s8.bf16 %v490_v8  ;;  %v1554_v4 = vunpack.c.h.s8.bf16 %v554_v39 }
 0x25e   :  { %3262 = vmatprep.subr.bf16.mxu1 %v1602_v18  ;;  %v489_v18 = vld [vmem:[#allocation3 + $0x510] sm:$0xff] }
 0x25f   :  { %v1425_v17 = vunpack.c.h.s8.bf16 %v489_v18  ;;  %v1417_v48 = vunpack.c.l.s8.bf16 %v489_v18 }
 0x260   :  { %3222 = vmatpush2.bf16.msra.mxu0 %v1473_v19  ;;  %v1553_v19 = vunpack.c.h.s8.bf16 %v553_v15 }
 0x261   :  { %3263 = vmatpush2.bf16.msra.mxu1 %v1601_v24  ;;  %3223 = vmatprep.subr.bf16.mxu0 %v1466_v20  ;;  %v1418_v24 = vunpack.c.l.s8.bf16 %v490_v8  ;;  %v1546_v20 = vunpack.c.l.s8.bf16 %v554_v39 }
 0x262   :  { %3264 = vmatprep.subr.bf16.mxu1 %v1594_v23  ;;  %v610_v23 = vld [vmem:[#allocation3 + $0x8d8] sm:$0xff] }
 0x264   :  { %3224 = vmatpush2.bf16.msra.mxu0 %v1465_v46  ;;  %v1545_v46 = vunpack.c.l.s8.bf16 %v553_v15 }
 0x265   :  { %3265 = vmatpush2.bf16.msra.mxu1 %v1593_v26  ;;  %3225 = vmatprep.subr.bf16.mxu0 %v1458_v29  ;;  %v1666_v26 = vunpack.c.h.s8.bf16 %v610_v23  ;;  %v1794_v29 = vunpack.c.h.s8.bf16 %v674_v25 }
 0x266   :  { %3266 = vmatprep.subr.bf16.mxu1 %v1586_v30  ;;  %v609_v30 = vld [vmem:[#allocation3 + $0x8d0] sm:$0xff] }
 0x267   :  { %v1665_v28 = vunpack.c.h.s8.bf16 %v609_v30 }
 0x268   :  { %3226 = vmatpush2.bf16.msra.mxu0 %v1457_v32  ;;  %v1793_v32 = vunpack.c.h.s8.bf16 %v673_v31 }
 0x269   :  { %3267 = vmatpush2.bf16.msra.mxu1 %v1585_v34  ;;  %3227 = vmatprep.subr.bf16.mxu0 %v1450_v35  ;;  %v1658_v34 = vunpack.c.l.s8.bf16 %v610_v23  ;;  %v1786_v35 = vunpack.c.l.s8.bf16 %v674_v25 }
 0x26a   :  { %3268 = vmatprep.subr.bf16.mxu1 %v1578_v37  ;;  %v602_v37 = vld [vmem:[#allocation3 + $0x898] sm:$0xff] }
 0x26c   :  { %3228 = vmatpush2.bf16.msra.mxu0 %v1449_v41 }
 0x26d   :  { %3269 = vmatpush2.bf16.msra.mxu1 %v1577_v43  ;;  %3229 = vmatprep.subr.bf16.mxu0 %v1442_v49  ;;  %v1657_v49 = vunpack.c.l.s8.bf16 %v609_v30 }
 0x26e   :  { %3270 = vmatprep.subr.bf16.mxu1 %v1570_v52  ;;  %v1785_v52 = vunpack.c.l.s8.bf16 %v673_v31 }
 0x270   :  { %3230 = vmatpush2.bf16.msra.mxu0 %v1441_v62  ;;  %v1650_v62 = vunpack.c.h.s8.bf16 %v602_v37 }
 0x271   :  { %3271 = vmatpush2.bf16.msra.mxu1 %v1569_v53  ;;  %3231 = vmatprep.subr.bf16.mxu0 %v1434_v55  ;;  %v1778_v53 = vunpack.c.h.s8.bf16 %v666_v33  ;;  %v601_v55 = vld [vmem:[#allocation3 + $0x890] sm:$0xff] }
 0x272   :  { %3272 = vmatprep.subr.bf16.mxu1 %v1562_v7  ;;  %v665_v7 = vld [vmem:[#allocation3 + $0xa90] sm:$0xff] }
 0x273   :  { %v1769_v23 = vunpack.c.l.s8.bf16 %v665_v7 }
 0x274   :  { %3232 = vmatpush2.bf16.msra.mxu0 %v1433_v40 }
 0x275   :  { %3273 = vmatpush2.bf16.msra.mxu1 %v1561_v44  ;;  %3233 = vmatprep.subr.bf16.mxu0 %v1426_v3  ;;  %v1649_v3 = vunpack.c.h.s8.bf16 %v601_v55 }
 0x276   :  { %3274 = vmatprep.subr.bf16.mxu1 %v1554_v4  ;;  %v1777_v4 = vunpack.c.h.s8.bf16 %v665_v7 }
 0x278   :  { %3234 = vmatpush2.bf16.msra.mxu0 %v1425_v17  ;;  %v1642_v17 = vunpack.c.l.s8.bf16 %v602_v37 }
 0x279   :  { %3275 = vmatpush2.bf16.msra.mxu1 %v1553_v19  ;;  %3235 = vmatprep.subr.bf16.mxu0 %v1418_v24  ;;  %v1770_v19 = vunpack.c.l.s8.bf16 %v666_v33  ;;  %v594_v24 = vld [vmem:[#allocation3 + $0x858] sm:$0xff] }
 0x27a   :  { %3276 = vmatprep.subr.bf16.mxu1 %v1546_v20  ;;  %v1641_v20 = vunpack.c.l.s8.bf16 %v601_v55  ;;  %v1634_v25 = vunpack.c.h.s8.bf16 %v594_v24  ;;  %v1626_v31 = vunpack.c.l.s8.bf16 %v594_v24  ;;  %v698_v24 = vld [vmem:[#allocation3 + $0xb98] sm:$0xff] }
 0x27c   :  { %3236 = vmatpush2.bf16.msra.mxu0 %v1417_v48 }
 0x27d   :  { %3277 = vmatpush2.bf16.msra.mxu1 %v1545_v46  ;;  %3287 = vmatprep.subr.bf16.mxu0 %v1666_v26  ;;  %v593_v46 = vld [vmem:[#allocation3 + $0x850] sm:$0xff] }
 0x27e   :  { %3328 = vmatprep.subr.bf16.mxu1 %v1794_v29  ;;  %v657_v26 = vld [vmem:[#allocation3 + $0xa50] sm:$0xff]  ;;  %v1633_v29 = vunpack.c.h.s8.bf16 %v593_v46 }
 0x27f   :  { %v2993_v38 = vpop.f32.mrf.mxu0  ;;  %3238 = vmatmul.mubr.bf16.vlgmr.msra.gmra.mxu0 %v6202_v59  ;;  %v1761_v30 = vunpack.c.h.s8.bf16 %v657_v26  ;;  %v1753_v37 = vunpack.c.l.s8.bf16 %v657_v26 }
 0x280   :  { %v3034_v41 = vpop.f32.mrf.mxu1  ;;  %3279 = vmatmul.mubr.bf16.vlgmr.msra.gmra.mxu1 %v6206_v60  ;;  %v2994_v43 = vadd.f32 %v2993_v38, %v6334_v12  ;;  %3288 = vmatpush1.bf16.msra.mxu0 %v1665_v28 }
 0x281   :  { %3329 = vmatpush1.bf16.msra.mxu1 %v1793_v32  ;;  %v2995_v57 = vpop.f32.mrf.mxu0  ;;  %3289 = vmatprep.subr.bf16.mxu0 %v1658_v34  ;;  %v586_v32 = vld [vmem:[#allocation3 + $0x818] sm:$0xff] }
 0x282   :  { %v3036_v58 = vpop.f32.mrf.mxu1  ;;  %3330 = vmatprep.subr.bf16.mxu1 %v1786_v35  ;;  %v6344_v8 = vadd.f32 %v3034_v41, %v2994_v43  ;;  %v2996_v39 = vadd.f32 %v2995_v57, %v6339_v16  ;;  %3319 = vmatprep.mubr.bf16.mxu0 %v6208_v5  ;;  %v658_v16 = vld [vmem:[#allocation3 + $0xa58] sm:$0xff]  ;;  %v1625_v35 = vunpack.c.l.s8.bf16 %v593_v46  ;;  %v1618_v33 = vunpack.c.h.s8.bf16 %v586_v32  ;;  %v585_v41 = vld [vmem:[#allocation3 + $0x810] sm:$0xff] }
 0x283   :  { %3360 = vmatprep.mubr.bf16.mxu1 %v6210_v6  ;;  %v2997_v12 = vpop.f32.mrf.mxu0  ;;  %v1762_v48 = vunpack.c.h.s8.bf16 %v658_v16  ;;  %v1754_v28 = vunpack.c.l.s8.bf16 %v658_v16  ;;  %v650_v34 = vld [vmem:[#allocation3 + $0xa18] sm:$0xff]  ;;  %v649_v43 = vld [vmem:[#allocation3 + $0xa10] sm:$0xff]  ;;  %v1610_v57 = vunpack.c.l.s8.bf16 %v586_v32  ;;  %v1609_v55 = vunpack.c.l.s8.bf16 %v585_v41 }
 0x284   :  { %v3038_v40 = vpop.f32.mrf.mxu1  ;;  %v6349_v44 = vadd.f32 %v3036_v58, %v2996_v39  ;;  %3290 = vmatpush1.bf16.msra.mxu0 %v1657_v49  ;;  %v1746_v38 = vunpack.c.h.s8.bf16 %v650_v34  ;;  %v1617_v49 = vunpack.c.h.s8.bf16 %v585_v41  ;;  %v1738_v58 = vunpack.c.l.s8.bf16 %v650_v34  ;;  %v697_v46 = vld [vmem:[#allocation3 + $0xb90] sm:$0xff]  ;;  %v690_v32 = vld [vmem:[#allocation3 + $0xb58] sm:$0xff] }
 0x285   :  { %3331 = vmatpush1.bf16.msra.mxu1 %v1785_v52  ;;  %v2998_v18 = vpop.f32.mrf.mxu0  ;;  %3291 = vmatprep.subr.bf16.mxu0 %v1650_v62  ;;  %v1745_v52 = vunpack.c.h.s8.bf16 %v649_v43  ;;  %v642_v62 = vld [vmem:[#allocation3 + $0x9d8] sm:$0xff]  ;;  %v1737_v7 = vunpack.c.l.s8.bf16 %v649_v43  ;;  %v641_v40 = vld [vmem:[#allocation3 + $0x9d0] sm:$0xff] }
 0x286   :  { %v3039_v15 = vpop.f32.mrf.mxu1  ;;  %3332 = vmatprep.subr.bf16.mxu1 %v1778_v53  ;;  %v706_v53 = vld [vmem:[#allocation3 + $0xbd8] sm:$0xff]  ;;  %v1730_v39 = vunpack.c.h.s8.bf16 %v642_v62  ;;  %v1721_v16 = vunpack.c.l.s8.bf16 %v641_v40  ;;  %v689_v41 = vld [vmem:[#allocation3 + $0xb50] sm:$0xff] }
 0x287   :  { %v1858_v12 = vunpack.c.h.s8.bf16 %v706_v53  ;;  %v1722_v15 = vunpack.c.l.s8.bf16 %v642_v62  ;;  %v682_v62 = vld [vmem:[#allocation3 + $0xb18] sm:$0xff] }
 0x288   :  { %3292 = vmatpush1.bf16.msra.mxu0 %v1649_v3  ;;  %v705_v3 = vld [vmem:[#allocation3 + $0xbd0] sm:$0xff] }
 0x289   :  { %3333 = vmatpush1.bf16.msra.mxu1 %v1777_v4  ;;  %3293 = vmatprep.subr.bf16.mxu0 %v1642_v17  ;;  %v1729_v4 = vunpack.c.h.s8.bf16 %v641_v40  ;;  %v1857_v18 = vunpack.c.h.s8.bf16 %v705_v3  ;;  %v1850_v17 = vunpack.c.l.s8.bf16 %v706_v53  ;;  %v681_v40 = vld [vmem:[#allocation3 + $0xb10] sm:$0xff] }
 0x28a   :  { %3334 = vmatprep.subr.bf16.mxu1 %v1770_v19  ;;  %v634_v19 = vld [vmem:[#allocation3 + $0x998] sm:$0xff] }
 0x28c   :  { %3294 = vmatpush1.bf16.msra.mxu0 %v1641_v20  ;;  %v1849_v20 = vunpack.c.l.s8.bf16 %v705_v3 }
 0x28d   :  { %3335 = vmatpush1.bf16.msra.mxu1 %v1769_v23  ;;  %3295 = vmatprep.subr.bf16.mxu0 %v1634_v25  ;;  %v1714_v23 = vunpack.c.h.s8.bf16 %v634_v19  ;;  %v1842_v25 = vunpack.c.h.s8.bf16 %v698_v24 }
 0x28e   :  { %3336 = vmatprep.subr.bf16.mxu1 %v1762_v48  ;;  %v633_v48 = vld [vmem:[#allocation3 + $0x990] sm:$0xff] }
 0x28f   :  { %v1713_v26 = vunpack.c.h.s8.bf16 %v633_v48  ;;  %v1705_v34 = vunpack.c.l.s8.bf16 %v633_v48  ;;  %v801_v48 = vld [vmem:[#allocation3 + $0xed0] sm:$0xff] }
 0x290   :  { %3296 = vmatpush1.bf16.msra.mxu0 %v1633_v29  ;;  %v1841_v29 = vunpack.c.h.s8.bf16 %v697_v46 }
 0x291   :  { %3337 = vmatpush1.bf16.msra.mxu1 %v1761_v30  ;;  %3297 = vmatprep.subr.bf16.mxu0 %v1626_v31  ;;  %v1706_v30 = vunpack.c.l.s8.bf16 %v634_v19  ;;  %v1834_v31 = vunpack.c.l.s8.bf16 %v698_v24  ;;  %v802_v19 = vld [vmem:[#allocation3 + $0xed8] sm:$0xff] }
 0x292   :  { %3338 = vmatprep.subr.bf16.mxu1 %v1754_v28  ;;  %v626_v28 = vld [vmem:[#allocation3 + $0x958] sm:$0xff] }
 0x294   :  { %3298 = vmatpush1.bf16.msra.mxu0 %v1625_v35  ;;  %v1833_v35 = vunpack.c.l.s8.bf16 %v697_v46 }
 0x295   :  { %3339 = vmatpush1.bf16.msra.mxu1 %v1753_v37  ;;  %3299 = vmatprep.subr.bf16.mxu0 %v1618_v33  ;;  %v1698_v37 = vunpack.c.h.s8.bf16 %v626_v28  ;;  %v1826_v33 = vunpack.c.h.s8.bf16 %v690_v32 }
 0x296   :  { %3340 = vmatprep.subr.bf16.mxu1 %v1746_v38  ;;  %v625_v38 = vld [vmem:[#allocation3 + $0x950] sm:$0xff] }
 0x297   :  { %v1697_v43 = vunpack.c.h.s8.bf16 %v625_v38  ;;  %v1689_v53 = vunpack.c.l.s8.bf16 %v625_v38 }
 0x298   :  { %3300 = vmatpush1.bf16.msra.mxu0 %v1617_v49  ;;  %v1825_v49 = vunpack.c.h.s8.bf16 %v689_v41 }
 0x299   :  { %3341 = vmatpush1.bf16.msra.mxu1 %v1745_v52  ;;  %3301 = vmatprep.subr.bf16.mxu0 %v1610_v57  ;;  %v1690_v52 = vunpack.c.l.s8.bf16 %v626_v28  ;;  %v1818_v57 = vunpack.c.l.s8.bf16 %v690_v32  ;;  %v794_v28 = vld [vmem:[#allocation3 + $0xe98] sm:$0xff] }
 0x29a   :  { %3342 = vmatprep.subr.bf16.mxu1 %v1738_v58  ;;  %v618_v58 = vld [vmem:[#allocation3 + $0x918] sm:$0xff] }
 0x29c   :  { %3302 = vmatpush1.bf16.msra.mxu0 %v1609_v55  ;;  %v1817_v55 = vunpack.c.l.s8.bf16 %v689_v41 }
 0x29d   :  { %3343 = vmatpush1.bf16.msra.mxu1 %v1737_v7  ;;  %3303 = vmatprep.subr.bf16.mxu0 %v1730_v39  ;;  %v1682_v7 = vunpack.c.h.s8.bf16 %v618_v58  ;;  %v1810_v39 = vunpack.c.h.s8.bf16 %v682_v62 }
 0x29e   :  { %3344 = vmatprep.subr.bf16.mxu1 %v1858_v12  ;;  %v617_v12 = vld [vmem:[#allocation3 + $0x910] sm:$0xff] }
 0x29f   :  { %v1681_v3 = vunpack.c.h.s8.bf16 %v617_v12  ;;  %v1673_v24 = vunpack.c.l.s8.bf16 %v617_v12 }
 0x2a0   :  { %3304 = vmatpush2.bf16.msra.mxu0 %v1729_v4  ;;  %v1809_v4 = vunpack.c.h.s8.bf16 %v681_v40 }
 0x2a1   :  { %3345 = vmatpush2.bf16.msra.mxu1 %v1857_v18  ;;  %3305 = vmatprep.subr.bf16.mxu0 %v1722_v15  ;;  %v1674_v18 = vunpack.c.l.s8.bf16 %v618_v58  ;;  %v1802_v15 = vunpack.c.l.s8.bf16 %v682_v62 }
 0x2a2   :  { %3346 = vmatprep.subr.bf16.mxu1 %v1850_v17  ;;  %v738_v17 = vld [vmem:[#allocation3 + $0xcd8] sm:$0xff] }
 0x2a4   :  { %3306 = vmatpush2.bf16.msra.mxu0 %v1721_v16  ;;  %v1801_v16 = vunpack.c.l.s8.bf16 %v681_v40 }
 0x2a5   :  { %3347 = vmatpush2.bf16.msra.mxu1 %v1849_v20  ;;  %3307 = vmatprep.subr.bf16.mxu0 %v1714_v23  ;;  %v1922_v20 = vunpack.c.h.s8.bf16 %v738_v17  ;;  %v2050_v23 = vunpack.c.h.s8.bf16 %v802_v19 }
 0x2a6   :  { %3348 = vmatprep.subr.bf16.mxu1 %v1842_v25  ;;  %v737_v25 = vld [vmem:[#allocation3 + $0xcd0] sm:$0xff] }
 0x2a7   :  { %v1921_v46 = vunpack.c.h.s8.bf16 %v737_v25 }
 0x2a8   :  { %3308 = vmatpush2.bf16.msra.mxu0 %v1713_v26  ;;  %v2049_v26 = vunpack.c.h.s8.bf16 %v801_v48 }
 0x2a9   :  { %3349 = vmatpush2.bf16.msra.mxu1 %v1841_v29  ;;  %3309 = vmatprep.subr.bf16.mxu0 %v1706_v30  ;;  %v1914_v29 = vunpack.c.l.s8.bf16 %v738_v17  ;;  %v2042_v30 = vunpack.c.l.s8.bf16 %v802_v19 }
 0x2aa   :  { %3350 = vmatprep.subr.bf16.mxu1 %v1834_v31  ;;  %v730_v31 = vld [vmem:[#allocation3 + $0xc98] sm:$0xff] }
 0x2ac   :  { %3310 = vmatpush2.bf16.msra.mxu0 %v1705_v34 }
 0x2ad   :  { %3351 = vmatpush2.bf16.msra.mxu1 %v1833_v35  ;;  %3311 = vmatprep.subr.bf16.mxu0 %v1698_v37  ;;  %v1913_v37 = vunpack.c.l.s8.bf16 %v737_v25 }
 0x2ae   :  { %3352 = vmatprep.subr.bf16.mxu1 %v1826_v33  ;;  %v2041_v33 = vunpack.c.l.s8.bf16 %v801_v48 }
 0x2b0   :  { %3312 = vmatpush2.bf16.msra.mxu0 %v1697_v43  ;;  %v1906_v43 = vunpack.c.h.s8.bf16 %v730_v31 }
 0x2b1   :  { %3353 = vmatpush2.bf16.msra.mxu1 %v1825_v49  ;;  %3313 = vmatprep.subr.bf16.mxu0 %v1690_v52  ;;  %v2034_v49 = vunpack.c.h.s8.bf16 %v794_v28  ;;  %v729_v52 = vld [vmem:[#allocation3 + $0xc90] sm:$0xff] }
 0x2b2   :  { %3354 = vmatprep.subr.bf16.mxu1 %v1818_v57  ;;  %v793_v57 = vld [vmem:[#allocation3 + $0xe90] sm:$0xff] }
 0x2b3   :  { %v2025_v17 = vunpack.c.l.s8.bf16 %v793_v57 }
 0x2b4   :  { %3314 = vmatpush2.bf16.msra.mxu0 %v1689_v53 }
 0x2b5   :  { %3355 = vmatpush2.bf16.msra.mxu1 %v1817_v55  ;;  %3315 = vmatprep.subr.bf16.mxu0 %v1682_v7  ;;  %v1905_v7 = vunpack.c.h.s8.bf16 %v729_v52 }
 0x2b6   :  { %3356 = vmatprep.subr.bf16.mxu1 %v1810_v39  ;;  %v2033_v39 = vunpack.c.h.s8.bf16 %v793_v57 }
 0x2b8   :  { %3316 = vmatpush2.bf16.msra.mxu0 %v1681_v3  ;;  %v1898_v3 = vunpack.c.l.s8.bf16 %v730_v31 }
 0x2b9   :  { %3357 = vmatpush2.bf16.msra.mxu1 %v1809_v4  ;;  %3317 = vmatprep.subr.bf16.mxu0 %v1674_v18  ;;  %v2026_v4 = vunpack.c.l.s8.bf16 %v794_v28  ;;  %v722_v18 = vld [vmem:[#allocation3 + $0xc58] sm:$0xff] }
 0x2ba   :  { %3358 = vmatprep.subr.bf16.mxu1 %v1802_v15  ;;  %v1897_v15 = vunpack.c.l.s8.bf16 %v729_v52  ;;  %v1890_v19 = vunpack.c.h.s8.bf16 %v722_v18  ;;  %v1882_v48 = vunpack.c.l.s8.bf16 %v722_v18  ;;  %v826_v18 = vld [vmem:[#allocation3 + $0xf98] sm:$0xff] }
 0x2bc   :  { %3318 = vmatpush2.bf16.msra.mxu0 %v1673_v24 }
 0x2bd   :  { %3359 = vmatpush2.bf16.msra.mxu1 %v1801_v16  ;;  %3369 = vmatprep.subr.bf16.mxu0 %v1922_v20  ;;  %v721_v16 = vld [vmem:[#allocation3 + $0xc50] sm:$0xff] }
 0x2be   :  { %3410 = vmatprep.subr.bf16.mxu1 %v2050_v23  ;;  %v785_v20 = vld [vmem:[#allocation3 + $0xe50] sm:$0xff]  ;;  %v1889_v23 = vunpack.c.h.s8.bf16 %v721_v16 }
 0x2bf   :  { %v3075_v32 = vpop.f32.mrf.mxu0  ;;  %3320 = vmatmul.mubr.bf16.vlgmr.msra.gmra.mxu0 %v6231_v63  ;;  %v2017_v25 = vunpack.c.h.s8.bf16 %v785_v20  ;;  %v2009_v31 = vunpack.c.l.s8.bf16 %v785_v20 }
 0x2c0   :  { %v3116_v34 = vpop.f32.mrf.mxu1  ;;  %3361 = vmatmul.mubr.bf16.vlgmr.msra.gmra.mxu1 %v6235_v0  ;;  %v3076_v35 = vadd.f32 %v3075_v32, %v6344_v8  ;;  %3370 = vmatpush1.bf16.msra.mxu0 %v1921_v46 }
 0x2c1   :  { %3411 = vmatpush1.bf16.msra.mxu1 %v2049_v26  ;;  %v3077_v38 = vpop.f32.mrf.mxu0  ;;  %3371 = vmatprep.subr.bf16.mxu0 %v1914_v29  ;;  %v714_v26 = vld [vmem:[#allocation3 + $0xc18] sm:$0xff] }
 0x2c2   :  { %v3118_v41 = vpop.f32.mrf.mxu1  ;;  %3412 = vmatprep.subr.bf16.mxu1 %v2042_v30  ;;  %v6354_v58 = vadd.f32 %v3116_v34, %v3076_v35  ;;  %v3078_v62 = vadd.f32 %v3077_v38, %v6349_v44  ;;  %3401 = vmatprep.mubr.bf16.mxu0 %v6237_v42  ;;  %v786_v44 = vld [vmem:[#allocation3 + $0xe58] sm:$0xff]  ;;  %v1881_v30 = vunpack.c.l.s8.bf16 %v721_v16  ;;  %v1874_v28 = vunpack.c.h.s8.bf16 %v714_v26  ;;  %v713_v34 = vld [vmem:[#allocation3 + $0xc10] sm:$0xff] }
 0x2c3   :  { %3442 = vmatprep.mubr.bf16.mxu1 %v6239_v47  ;;  %v3079_v8 = vpop.f32.mrf.mxu0  ;;  %v2018_v24 = vunpack.c.h.s8.bf16 %v786_v44  ;;  %v2010_v46 = vunpack.c.l.s8.bf16 %v786_v44  ;;  %v778_v29 = vld [vmem:[#allocation3 + $0xe18] sm:$0xff]  ;;  %v777_v35 = vld [vmem:[#allocation3 + $0xe10] sm:$0xff]  ;;  %v1866_v38 = vunpack.c.l.s8.bf16 %v714_v26  ;;  %v1865_v52 = vunpack.c.l.s8.bf16 %v713_v34 }
 0x2c4   :  { %v3120_v53 = vpop.f32.mrf.mxu1  ;;  %v6359_v55 = vadd.f32 %v3118_v41, %v3078_v62  ;;  %3372 = vmatpush1.bf16.msra.mxu0 %v1913_v37  ;;  %v2002_v32 = vunpack.c.h.s8.bf16 %v778_v29  ;;  %v1873_v37 = vunpack.c.h.s8.bf16 %v713_v34  ;;  %v1994_v41 = vunpack.c.l.s8.bf16 %v778_v29  ;;  %v825_v16 = vld [vmem:[#allocation3 + $0xf90] sm:$0xff]  ;;  %v818_v26 = vld [vmem:[#allocation3 + $0xf58] sm:$0xff] }
 0x2c5   :  { %3413 = vmatpush1.bf16.msra.mxu1 %v2041_v33  ;;  %v3080_v12 = vpop.f32.mrf.mxu0  ;;  %3373 = vmatprep.subr.bf16.mxu0 %v1906_v43  ;;  %v2001_v33 = vunpack.c.h.s8.bf16 %v777_v35  ;;  %v770_v43 = vld [vmem:[#allocation3 + $0xdd8] sm:$0xff]  ;;  %v1993_v57 = vunpack.c.l.s8.bf16 %v777_v35  ;;  %v769_v53 = vld [vmem:[#allocation3 + $0xdd0] sm:$0xff] }
 0x2c6   :  { %v3121_v40 = vpop.f32.mrf.mxu1  ;;  %3414 = vmatprep.subr.bf16.mxu1 %v2034_v49  ;;  %v834_v49 = vld [vmem:[#allocation3 + $0xfd8] sm:$0xff]  ;;  %v1986_v62 = vunpack.c.h.s8.bf16 %v770_v43  ;;  %v1977_v44 = vunpack.c.l.s8.bf16 %v769_v53  ;;  %v817_v34 = vld [vmem:[#allocation3 + $0xf50] sm:$0xff] }
 0x2c7   :  { %v2114_v8 = vunpack.c.h.s8.bf16 %v834_v49  ;;  %v1978_v40 = vunpack.c.l.s8.bf16 %v770_v43  ;;  %v810_v43 = vld [vmem:[#allocation3 + $0xf18] sm:$0xff] }
 0x2c8   :  { %3374 = vmatpush1.bf16.msra.mxu0 %v1905_v7  ;;  %v833_v7 = vld [vmem:[#allocation3 + $0xfd0] sm:$0xff] }
 0x2c9   :  { %3415 = vmatpush1.bf16.msra.mxu1 %v2033_v39  ;;  %3375 = vmatprep.subr.bf16.mxu0 %v1898_v3  ;;  %v1985_v39 = vunpack.c.h.s8.bf16 %v769_v53  ;;  %v2113_v12 = vunpack.c.h.s8.bf16 %v833_v7  ;;  %v2106_v3 = vunpack.c.l.s8.bf16 %v834_v49  ;;  %v809_v53 = vld [vmem:[#allocation3 + $0xf10] sm:$0xff] }
 0x2ca   :  { %3416 = vmatprep.subr.bf16.mxu1 %v2026_v4  ;;  %v762_v4 = vld [vmem:[#allocation3 + $0xd98] sm:$0xff] }
 0x2cc   :  { %3376 = vmatpush1.bf16.msra.mxu0 %v1897_v15  ;;  %v2105_v15 = vunpack.c.l.s8.bf16 %v833_v7 }
 0x2cd   :  { %3417 = vmatpush1.bf16.msra.mxu1 %v2025_v17  ;;  %3377 = vmatprep.subr.bf16.mxu0 %v1890_v19  ;;  %v1970_v17 = vunpack.c.h.s8.bf16 %v762_v4  ;;  %v2098_v19 = vunpack.c.h.s8.bf16 %v826_v18 }
 0x2ce   :  { %3418 = vmatprep.subr.bf16.mxu1 %v2018_v24  ;;  %v761_v24 = vld [vmem:[#allocation3 + $0xd90] sm:$0xff] }
 0x2cf   :  { %v1969_v20 = vunpack.c.h.s8.bf16 %v761_v24  ;;  %v1961_v29 = vunpack.c.l.s8.bf16 %v761_v24  ;;  %v929_v24 = vld [vmem:[#allocation3 + $0x12d0] sm:$0xff] }
 0x2d0   :  { %3378 = vmatpush1.bf16.msra.mxu0 %v1889_v23  ;;  %v2097_v23 = vunpack.c.h.s8.bf16 %v825_v16 }
 0x2d1   :  { %3419 = vmatpush1.bf16.msra.mxu1 %v2017_v25  ;;  %3379 = vmatprep.subr.bf16.mxu0 %v1882_v48  ;;  %v1962_v25 = vunpack.c.l.s8.bf16 %v762_v4  ;;  %v2090_v48 = vunpack.c.l.s8.bf16 %v826_v18  ;;  %v930_v4 = vld [vmem:[#allocation3 + $0x12d8] sm:$0xff] }
 0x2d2   :  { %3420 = vmatprep.subr.bf16.mxu1 %v2010_v46  ;;  %v754_v46 = vld [vmem:[#allocation3 + $0xd58] sm:$0xff] }
 0x2d4   :  { %3380 = vmatpush1.bf16.msra.mxu0 %v1881_v30  ;;  %v2089_v30 = vunpack.c.l.s8.bf16 %v825_v16 }
 0x2d5   :  { %3421 = vmatpush1.bf16.msra.mxu1 %v2009_v31  ;;  %3381 = vmatprep.subr.bf16.mxu0 %v1874_v28  ;;  %v1954_v31 = vunpack.c.h.s8.bf16 %v754_v46  ;;  %v2082_v28 = vunpack.c.h.s8.bf16 %v818_v26 }
 0x2d6   :  { %3422 = vmatprep.subr.bf16.mxu1 %v2002_v32  ;;  %v753_v32 = vld [vmem:[#allocation3 + $0xd50] sm:$0xff] }
 0x2d7   :  { %v1953_v35 = vunpack.c.h.s8.bf16 %v753_v32  ;;  %v1945_v49 = vunpack.c.l.s8.bf16 %v753_v32 }
 0x2d8   :  { %3382 = vmatpush1.bf16.msra.mxu0 %v1873_v37  ;;  %v2081_v37 = vunpack.c.h.s8.bf16 %v817_v34 }
 0x2d9   :  { %3423 = vmatpush1.bf16.msra.mxu1 %v2001_v33  ;;  %3383 = vmatprep.subr.bf16.mxu0 %v1866_v38  ;;  %v1946_v33 = vunpack.c.l.s8.bf16 %v754_v46  ;;  %v2074_v38 = vunpack.c.l.s8.bf16 %v818_v26  ;;  %v922_v46 = vld [vmem:[#allocation3 + $0x1298] sm:$0xff] }
 0x2da   :  { %3424 = vmatprep.subr.bf16.mxu1 %v1994_v41  ;;  %v746_v41 = vld [vmem:[#allocation3 + $0xd18] sm:$0xff] }
 0x2dc   :  { %3384 = vmatpush1.bf16.msra.mxu0 %v1865_v52  ;;  %v2073_v52 = vunpack.c.l.s8.bf16 %v817_v34 }
 0x2dd   :  { %3425 = vmatpush1.bf16.msra.mxu1 %v1993_v57  ;;  %3385 = vmatprep.subr.bf16.mxu0 %v1986_v62  ;;  %v1938_v57 = vunpack.c.h.s8.bf16 %v746_v41  ;;  %v2066_v62 = vunpack.c.h.s8.bf16 %v810_v43 }
 0x2de   :  { %3426 = vmatprep.subr.bf16.mxu1 %v2114_v8  ;;  %v745_v8 = vld [vmem:[#allocation3 + $0xd10] sm:$0xff] }
 0x2df   :  { %v1937_v7 = vunpack.c.h.s8.bf16 %v745_v8  ;;  %v1929_v18 = vunpack.c.l.s8.bf16 %v745_v8 }
 0x2e0   :  { %3386 = vmatpush2.bf16.msra.mxu0 %v1985_v39  ;;  %v2065_v39 = vunpack.c.h.s8.bf16 %v809_v53 }
 0x2e1   :  { %3427 = vmatpush2.bf16.msra.mxu1 %v2113_v12  ;;  %3387 = vmatprep.subr.bf16.mxu0 %v1978_v40  ;;  %v1930_v12 = vunpack.c.l.s8.bf16 %v746_v41  ;;  %v2058_v40 = vunpack.c.l.s8.bf16 %v810_v43 }
 0x2e2   :  { %3428 = vmatprep.subr.bf16.mxu1 %v2106_v3  ;;  %v866_v3 = vld [vmem:[#allocation3 + $0x10d8] sm:$0xff] }
 0x2e4   :  { %3388 = vmatpush2.bf16.msra.mxu0 %v1977_v44  ;;  %v2057_v44 = vunpack.c.l.s8.bf16 %v809_v53 }
 0x2e5   :  { %3429 = vmatpush2.bf16.msra.mxu1 %v2105_v15  ;;  %3389 = vmatprep.subr.bf16.mxu0 %v1970_v17  ;;  %v2178_v15 = vunpack.c.h.s8.bf16 %v866_v3  ;;  %v2306_v17 = vunpack.c.h.s8.bf16 %v930_v4 }
 0x2e6   :  { %3430 = vmatprep.subr.bf16.mxu1 %v2098_v19  ;;  %v865_v19 = vld [vmem:[#allocation3 + $0x10d0] sm:$0xff] }
 0x2e7   :  { %v2177_v16 = vunpack.c.h.s8.bf16 %v865_v19 }
 0x2e8   :  { %3390 = vmatpush2.bf16.msra.mxu0 %v1969_v20  ;;  %v2305_v20 = vunpack.c.h.s8.bf16 %v929_v24 }
 0x2e9   :  { %3431 = vmatpush2.bf16.msra.mxu1 %v2097_v23  ;;  %3391 = vmatprep.subr.bf16.mxu0 %v1962_v25  ;;  %v2170_v23 = vunpack.c.l.s8.bf16 %v866_v3  ;;  %v2298_v25 = vunpack.c.l.s8.bf16 %v930_v4 }
 0x2ea   :  { %3432 = vmatprep.subr.bf16.mxu1 %v2090_v48  ;;  %v858_v48 = vld [vmem:[#allocation3 + $0x1098] sm:$0xff] }
 0x2eb   :  { %v2154_v53 = vunpack.c.l.s8.bf16 %v858_v48 }
 0x2ec   :  { %3392 = vmatpush2.bf16.msra.mxu0 %v1961_v29 }
 0x2ed   :  { %3433 = vmatpush2.bf16.msra.mxu1 %v2089_v30  ;;  %3393 = vmatprep.subr.bf16.mxu0 %v1954_v31  ;;  %v2169_v31 = vunpack.c.l.s8.bf16 %v865_v19 }
 0x2ee   :  { %3434 = vmatprep.subr.bf16.mxu1 %v2082_v28  ;;  %v2297_v28 = vunpack.c.l.s8.bf16 %v929_v24 }
 0x2f0   :  { %3394 = vmatpush2.bf16.msra.mxu0 %v1953_v35  ;;  %v2162_v35 = vunpack.c.h.s8.bf16 %v858_v48 }
 0x2f1   :  { %3435 = vmatpush2.bf16.msra.mxu1 %v2081_v37  ;;  %3395 = vmatprep.subr.bf16.mxu0 %v1946_v33  ;;  %v2290_v37 = vunpack.c.h.s8.bf16 %v922_v46  ;;  %v857_v33 = vld [vmem:[#allocation3 + $0x1090] sm:$0xff] }
 0x2f2   :  { %3436 = vmatprep.subr.bf16.mxu1 %v2074_v38  ;;  %v921_v38 = vld [vmem:[#allocation3 + $0x1290] sm:$0xff] }
 0x2f3   :  { %v2281_v3 = vunpack.c.l.s8.bf16 %v921_v38 }
 0x2f4   :  { %3396 = vmatpush2.bf16.msra.mxu0 %v1945_v49 }
 0x2f5   :  { %3437 = vmatpush2.bf16.msra.mxu1 %v2073_v52  ;;  %3397 = vmatprep.subr.bf16.mxu0 %v1938_v57  ;;  %v2161_v52 = vunpack.c.h.s8.bf16 %v857_v33  ;;  %v2289_v57 = vunpack.c.h.s8.bf16 %v921_v38 }
 0x2f6   :  { %3438 = vmatprep.subr.bf16.mxu1 %v2066_v62 }
 0x2f8   :  { %3398 = vmatpush2.bf16.msra.mxu0 %v1937_v7  ;;  %v2282_v7 = vunpack.c.l.s8.bf16 %v922_v46 }
 0x2f9   :  { %3439 = vmatpush2.bf16.msra.mxu1 %v2065_v39  ;;  %3399 = vmatprep.subr.bf16.mxu0 %v1930_v12  ;;  %v850_v39 = vld [vmem:[#allocation3 + $0x1058] sm:$0xff] }
 0x2fa   :  { %3440 = vmatprep.subr.bf16.mxu1 %v2058_v40  ;;  %v914_v12 = vld [vmem:[#allocation3 + $0x1258] sm:$0xff]  ;;  %v2153_v40 = vunpack.c.l.s8.bf16 %v857_v33  ;;  %v2146_v4 = vunpack.c.h.s8.bf16 %v850_v39  ;;  %v2138_v24 = vunpack.c.l.s8.bf16 %v850_v39 }
 0x2fb   :  { %v962_v33 = vld [vmem:[#allocation3 + $0x13d8] sm:$0xff] }
 0x2fc   :  { %3400 = vmatpush2.bf16.msra.mxu0 %v1929_v18  ;;  %v2274_v18 = vunpack.c.h.s8.bf16 %v914_v12  ;;  %v2362_v39 = vunpack.c.l.s8.bf16 %v962_v33 }
 0x2fd   :  { %3441 = vmatpush2.bf16.msra.mxu1 %v2057_v44  ;;  %3451 = vmatprep.subr.bf16.mxu0 %v2178_v15  ;;  %v849_v44 = vld [vmem:[#allocation3 + $0x1050] sm:$0xff] }
 0x2fe   :  { %3492 = vmatprep.subr.bf16.mxu1 %v2306_v17  ;;  %v913_v15 = vld [vmem:[#allocation3 + $0x1250] sm:$0xff]  ;;  %v2145_v17 = vunpack.c.h.s8.bf16 %v849_v44 }
 0x2ff   :  { %v3157_v26 = vpop.f32.mrf.mxu0  ;;  %3402 = vmatmul.mubr.bf16.vlgmr.msra.gmra.mxu0 %v6260_v13  ;;  %v2273_v19 = vunpack.c.h.s8.bf16 %v913_v15  ;;  %v2265_v48 = vunpack.c.l.s8.bf16 %v913_v15  ;;  %v889_v15 = vld [vmem:[#allocation3 + $0x1190] sm:$0xff] }
 0x300   :  { %v3198_v29 = vpop.f32.mrf.mxu1  ;;  %3443 = vmatmul.mubr.bf16.vlgmr.msra.gmra.mxu1 %v6264_v14  ;;  %3452 = vmatpush1.bf16.msra.mxu0 %v2177_v16  ;;  %v2266_v16 = vunpack.c.l.s8.bf16 %v914_v12  ;;  %v890_v12 = vld [vmem:[#allocation3 + $0x1198] sm:$0xff] }
 0x301   :  { %v6363_v30 = vadd.f32 %v3198_v29, %v3157_v26  ;;  %3493 = vmatpush1.bf16.msra.mxu1 %v2305_v20  ;;  %v3159_v32 = vpop.f32.mrf.mxu0  ;;  %3453 = vmatprep.subr.bf16.mxu0 %v2170_v23  ;;  %v842_v20 = vld [vmem:[#allocation3 + $0x1018] sm:$0xff]  ;;  %v841_v29 = vld [vmem:[#allocation3 + $0x1010] sm:$0xff] }
 0x302   :  { %v3200_v34 = vpop.f32.mrf.mxu1  ;;  %3494 = vmatprep.subr.bf16.mxu1 %v2298_v25  ;;  %3483 = vmatprep.mubr.bf16.mxu0 %v6266_v21  ;;  %v906_v23 = vld [vmem:[#allocation3 + $0x1218] sm:$0xff]  ;;  %v2137_v25 = vunpack.c.l.s8.bf16 %v849_v44  ;;  %v2130_v46 = vunpack.c.h.s8.bf16 %v842_v20  ;;  %v2121_v38 = vunpack.c.l.s8.bf16 %v841_v29 }
 0x303   :  { %v6365_v41 = vadd.f32 %v3200_v34, %v3159_v32  ;;  %3524 = vmatprep.mubr.bf16.mxu1 %v6268_v22  ;;  %v3161_v43 = vpop.f32.mrf.mxu0  ;;  %v2258_v26 = vunpack.c.h.s8.bf16 %v906_v23  ;;  %v2122_v34 = vunpack.c.l.s8.bf16 %v842_v20 }
 0x304   :  { %v3202_v49 = vpop.f32.mrf.mxu1  ;;  %3454 = vmatpush1.bf16.msra.mxu0 %v2169_v31  ;;  %v905_v31 = vld [vmem:[#allocation3 + $0x1210] sm:$0xff] }
 0x305   :  { %3495 = vmatpush1.bf16.msra.mxu1 %v2297_v28  ;;  %v3162_v62 = vpop.f32.mrf.mxu0  ;;  %3455 = vmatprep.subr.bf16.mxu0 %v2162_v35  ;;  %v2129_v28 = vunpack.c.h.s8.bf16 %v841_v29  ;;  %v2257_v32 = vunpack.c.h.s8.bf16 %v905_v31  ;;  %v2250_v35 = vunpack.c.l.s8.bf16 %v906_v23  ;;  %v2249_v43 = vunpack.c.l.s8.bf16 %v905_v31  ;;  %v882_v23 = vld [vmem:[#allocation3 + $0x1158] sm:$0xff]  ;;  %v881_v31 = vld [vmem:[#allocation3 + $0x1150] sm:$0xff] }
 0x306   :  { %v3203_v8 = vpop.f32.mrf.mxu1  ;;  %3496 = vmatprep.subr.bf16.mxu1 %v2290_v37  ;;  %v898_v37 = vld [vmem:[#allocation3 + $0x11d8] sm:$0xff]  ;;  %v961_v62 = vld [vmem:[#allocation3 + $0x13d0] sm:$0xff] }
 0x307   :  { %v2242_v49 = vunpack.c.h.s8.bf16 %v898_v37 }
 0x308   :  { %3456 = vmatpush1.bf16.msra.mxu0 %v2161_v52  ;;  %v2370_v52 = vunpack.c.h.s8.bf16 %v962_v33  ;;  %v874_v33 = vld [vmem:[#allocation3 + $0x1118] sm:$0xff] }
 0x309   :  { %3497 = vmatpush1.bf16.msra.mxu1 %v2289_v57  ;;  %3457 = vmatprep.subr.bf16.mxu0 %v2154_v53  ;;  %v897_v57 = vld [vmem:[#allocation3 + $0x11d0] sm:$0xff]  ;;  %v2369_v53 = vunpack.c.h.s8.bf16 %v961_v62 }
 0x30a   :  { %3498 = vmatprep.subr.bf16.mxu1 %v2282_v7  ;;  %v2241_v8 = vunpack.c.h.s8.bf16 %v897_v57  ;;  %v2234_v7 = vunpack.c.l.s8.bf16 %v898_v37 }
 0x30c   :  { %3458 = vmatpush1.bf16.msra.mxu0 %v2153_v40  ;;  %v954_v40 = vld [vmem:[#allocation3 + $0x1398] sm:$0xff] }
 0x30d   :  { %3499 = vmatpush1.bf16.msra.mxu1 %v2281_v3  ;;  %3459 = vmatprep.subr.bf16.mxu0 %v2146_v4  ;;  %v2233_v3 = vunpack.c.l.s8.bf16 %v897_v57  ;;  %v2361_v4 = vunpack.c.l.s8.bf16 %v961_v62  ;;  %v2354_v44 = vunpack.c.h.s8.bf16 %v954_v40  ;;  %v2346_v20 = vunpack.c.l.s8.bf16 %v954_v40  ;;  %v873_v62 = vld [vmem:[#allocation3 + $0x1110] sm:$0xff]  ;;  %v994_v40 = vld [vmem:[#allocation3 + $0x14d8] sm:$0xff] }
 0x30e   :  { %3500 = vmatprep.subr.bf16.mxu1 %v2274_v18  ;;  %v2226_v18 = vunpack.c.h.s8.bf16 %v890_v12 }
 0x310   :  { %3460 = vmatpush1.bf16.msra.mxu0 %v2145_v17  ;;  %v953_v17 = vld [vmem:[#allocation3 + $0x1390] sm:$0xff] }
 0x311   :  { %3501 = vmatpush1.bf16.msra.mxu1 %v2273_v19  ;;  %3461 = vmatprep.subr.bf16.mxu0 %v2138_v24  ;;  %v2225_v19 = vunpack.c.h.s8.bf16 %v889_v15  ;;  %v2353_v24 = vunpack.c.h.s8.bf16 %v953_v17 }
 0x312   :  { %3502 = vmatprep.subr.bf16.mxu1 %v2266_v16  ;;  %v2218_v16 = vunpack.c.l.s8.bf16 %v890_v12 }
 0x314   :  { %3462 = vmatpush1.bf16.msra.mxu0 %v2137_v25  ;;  %v946_v25 = vld [vmem:[#allocation3 + $0x1358] sm:$0xff] }
 0x315   :  { %3503 = vmatpush1.bf16.msra.mxu1 %v2265_v48  ;;  %3463 = vmatprep.subr.bf16.mxu0 %v2130_v46  ;;  %v2217_v48 = vunpack.c.l.s8.bf16 %v889_v15  ;;  %v2345_v46 = vunpack.c.l.s8.bf16 %v953_v17  ;;  %v2338_v29 = vunpack.c.h.s8.bf16 %v946_v25  ;;  %v2330_v37 = vunpack.c.l.s8.bf16 %v946_v25  ;;  %v993_v17 = vld [vmem:[#allocation3 + $0x14d0] sm:$0xff]  ;;  %v986_v25 = vld [vmem:[#allocation3 + $0x1498] sm:$0xff] }
 0x316   :  { %3504 = vmatprep.subr.bf16.mxu1 %v2258_v26  ;;  %v2210_v26 = vunpack.c.h.s8.bf16 %v882_v23 }
 0x318   :  { %3464 = vmatpush1.bf16.msra.mxu0 %v2129_v28  ;;  %v945_v28 = vld [vmem:[#allocation3 + $0x1350] sm:$0xff] }
 0x319   :  { %3505 = vmatpush1.bf16.msra.mxu1 %v2257_v32  ;;  %3465 = vmatprep.subr.bf16.mxu0 %v2122_v34  ;;  %v2209_v32 = vunpack.c.h.s8.bf16 %v881_v31  ;;  %v2337_v34 = vunpack.c.h.s8.bf16 %v945_v28 }
 0x31a   :  { %3506 = vmatprep.subr.bf16.mxu1 %v2250_v35  ;;  %v2202_v35 = vunpack.c.l.s8.bf16 %v882_v23 }
 0x31c   :  { %3466 = vmatpush1.bf16.msra.mxu0 %v2121_v38  ;;  %v938_v38 = vld [vmem:[#allocation3 + $0x1318] sm:$0xff] }
 0x31d   :  { %3507 = vmatpush1.bf16.msra.mxu1 %v2249_v43  ;;  %3467 = vmatprep.subr.bf16.mxu0 %v2242_v49  ;;  %v2201_v43 = vunpack.c.l.s8.bf16 %v881_v31  ;;  %v2329_v49 = vunpack.c.l.s8.bf16 %v945_v28  ;;  %v2322_v57 = vunpack.c.h.s8.bf16 %v938_v38  ;;  %v2314_v12 = vunpack.c.l.s8.bf16 %v938_v38  ;;  %v1049_v38 = vld [vmem:[#allocation3 + $0x1690] sm:$0xff] }
 0x31e   :  { %3508 = vmatprep.subr.bf16.mxu1 %v2370_v52  ;;  %v2194_v52 = vunpack.c.h.s8.bf16 %v874_v33  ;;  %v2425_v31 = vunpack.c.l.s8.bf16 %v993_v17 }
 0x320   :  { %3468 = vmatpush2.bf16.msra.mxu0 %v2241_v8  ;;  %v937_v8 = vld [vmem:[#allocation3 + $0x1310] sm:$0xff] }
 0x321   :  { %3509 = vmatpush2.bf16.msra.mxu1 %v2369_v53  ;;  %3469 = vmatprep.subr.bf16.mxu0 %v2234_v7  ;;  %v2193_v53 = vunpack.c.h.s8.bf16 %v873_v62  ;;  %v2321_v7 = vunpack.c.h.s8.bf16 %v937_v8 }
 0x322   :  { %3510 = vmatprep.subr.bf16.mxu1 %v2362_v39  ;;  %v2186_v39 = vunpack.c.l.s8.bf16 %v874_v33  ;;  %v985_v33 = vld [vmem:[#allocation3 + $0x1490] sm:$0xff] }
 0x324   :  { %3470 = vmatpush2.bf16.msra.mxu0 %v2233_v3  ;;  %v1058_v3 = vld [vmem:[#allocation3 + $0x16d8] sm:$0xff] }
 0x325   :  { %3511 = vmatpush2.bf16.msra.mxu1 %v2361_v4  ;;  %3471 = vmatprep.subr.bf16.mxu0 %v2226_v18  ;;  %v2185_v4 = vunpack.c.l.s8.bf16 %v873_v62  ;;  %v2313_v18 = vunpack.c.l.s8.bf16 %v937_v8  ;;  %v2562_v15 = vunpack.c.h.s8.bf16 %v1058_v3  ;;  %v2554_v23 = vunpack.c.l.s8.bf16 %v1058_v3 }
 0x326   :  { %3512 = vmatprep.subr.bf16.mxu1 %v2354_v44  ;;  %v2434_v44 = vunpack.c.h.s8.bf16 %v994_v40  ;;  %v2417_v62 = vunpack.c.h.s8.bf16 %v985_v33  ;;  %v2545_v8 = vunpack.c.h.s8.bf16 %v1049_v38  ;;  %v2409_v3 = vunpack.c.l.s8.bf16 %v985_v33  ;;  %v1026_v33 = vld [vmem:[#allocation3 + $0x15d8] sm:$0xff] }
 0x328   :  { %3472 = vmatpush2.bf16.msra.mxu0 %v2225_v19  ;;  %v1057_v19 = vld [vmem:[#allocation3 + $0x16d0] sm:$0xff] }
 0x329   :  { %3513 = vmatpush2.bf16.msra.mxu1 %v2353_v24  ;;  %3473 = vmatprep.subr.bf16.mxu0 %v2218_v16  ;;  %v2433_v24 = vunpack.c.h.s8.bf16 %v993_v17  ;;  %v2561_v16 = vunpack.c.h.s8.bf16 %v1057_v19  ;;  %v2553_v28 = vunpack.c.l.s8.bf16 %v1057_v19  ;;  %v1041_v17 = vld [vmem:[#allocation3 + $0x1650] sm:$0xff] }
 0x32a   :  { %3514 = vmatprep.subr.bf16.mxu1 %v2346_v20  ;;  %v2426_v20 = vunpack.c.l.s8.bf16 %v994_v40  ;;  %v978_v40 = vld [vmem:[#allocation3 + $0x1458] sm:$0xff] }
 0x32c   :  { %3474 = vmatpush2.bf16.msra.mxu0 %v2217_v48  ;;  %v1050_v48 = vld [vmem:[#allocation3 + $0x1698] sm:$0xff] }
 0x32d   :  { %3515 = vmatpush2.bf16.msra.mxu1 %v2345_v46  ;;  %3475 = vmatprep.subr.bf16.mxu0 %v2210_v26 }
 0x32e   :  { %3516 = vmatprep.subr.bf16.mxu1 %v2338_v29 }
 0x330   :  { %3476 = vmatpush2.bf16.msra.mxu0 %v2209_v32 }
 0x331   :  { %3517 = vmatpush2.bf16.msra.mxu1 %v2337_v34  ;;  %3477 = vmatprep.subr.bf16.mxu0 %v2202_v35  ;;  %v2418_v35 = vunpack.c.h.s8.bf16 %v986_v25 }
 0x332   :  { %3518 = vmatprep.subr.bf16.mxu1 %v2330_v37  ;;  %v2546_v37 = vunpack.c.h.s8.bf16 %v1050_v48 }
 0x334   :  { %3478 = vmatpush2.bf16.msra.mxu0 %v2201_v43 }
 0x335   :  { %3519 = vmatpush2.bf16.msra.mxu1 %v2329_v49  ;;  %3479 = vmatprep.subr.bf16.mxu0 %v2194_v52 }
 0x336   :  { %3520 = vmatprep.subr.bf16.mxu1 %v2322_v57 }
 0x338   :  { %3480 = vmatpush2.bf16.msra.mxu0 %v2193_v53 }
 0x339   :  { %3521 = vmatpush2.bf16.msra.mxu1 %v2321_v7  ;;  %3481 = vmatprep.subr.bf16.mxu0 %v2186_v39  ;;  %v2410_v39 = vunpack.c.l.s8.bf16 %v986_v25  ;;  %v1034_v25 = vld [vmem:[#allocation3 + $0x1618] sm:$0xff] }
 0x33a   :  { %3522 = vmatprep.subr.bf16.mxu1 %v2314_v12  ;;  %v2538_v12 = vunpack.c.l.s8.bf16 %v1050_v48 }
 0x33c   :  { %3482 = vmatpush2.bf16.msra.mxu0 %v2185_v4  ;;  %v2537_v4 = vunpack.c.l.s8.bf16 %v1049_v38  ;;  %v1090_v38 = vld [vmem:[#allocation3 + $0x17d8] sm:$0xff] }
 0x33d   :  { %3523 = vmatpush2.bf16.msra.mxu1 %v2313_v18  ;;  %3533 = vmatprep.subr.bf16.mxu0 %v2434_v44  ;;  %v2402_v18 = vunpack.c.h.s8.bf16 %v978_v40 }
 0x33e   :  { %3574 = vmatprep.subr.bf16.mxu1 %v2562_v15  ;;  %v977_v15 = vld [vmem:[#allocation3 + $0x1450] sm:$0xff] }
 0x33f   :  { %v3239_v46 = vpop.f32.mrf.mxu0  ;;  %3484 = vmatmul.mubr.bf16.vlgmr.msra.gmra.mxu0 %v6293_v36  ;;  %v2401_v19 = vunpack.c.h.s8.bf16 %v977_v15  ;;  %v2393_v48 = vunpack.c.l.s8.bf16 %v977_v15 }
 0x340   :  { %v3280_v26 = vpop.f32.mrf.mxu1  ;;  %3525 = vmatmul.mubr.bf16.vlgmr.msra.gmra.mxu1 %v6297_v61  ;;  %v3240_v29 = vadd.f32 %v3239_v46, %v6363_v30  ;;  %3534 = vmatpush1.bf16.msra.mxu0 %v2433_v24  ;;  %v2529_v24 = vunpack.c.h.s8.bf16 %v1041_v17  ;;  %v2521_v46 = vunpack.c.l.s8.bf16 %v1041_v17  ;;  %v1017_v17 = vld [vmem:[#allocation3 + $0x1590] sm:$0xff] }
 0x341   :  { %3575 = vmatpush1.bf16.msra.mxu1 %v2561_v16  ;;  %v3241_v32 = vpop.f32.mrf.mxu0  ;;  %3535 = vmatprep.subr.bf16.mxu0 %v2426_v20  ;;  %v2394_v16 = vunpack.c.l.s8.bf16 %v978_v40  ;;  %v2618_v40 = vunpack.c.l.s8.bf16 %v1090_v38 }
 0x342   :  { %v3282_v34 = vpop.f32.mrf.mxu1  ;;  %3576 = vmatprep.subr.bf16.mxu1 %v2554_v23  ;;  %v6372_v43 = vadd.f32 %v3280_v26, %v3240_v29  ;;  %v3242_v49 = vadd.f32 %v3241_v32, %v6365_v41  ;;  %3565 = vmatprep.mubr.bf16.mxu0 %v6299_v45  ;;  %v1042_v41 = vld [vmem:[#allocation3 + $0x1658] sm:$0xff]  ;;  %v2514_v29 = vunpack.c.h.s8.bf16 %v1034_v25 }
 0x343   :  { %3606 = vmatprep.mubr.bf16.mxu1 %v6301_v11  ;;  %v3243_v30 = vpop.f32.mrf.mxu0  ;;  %v2530_v44 = vunpack.c.h.s8.bf16 %v1042_v41  ;;  %v2522_v20 = vunpack.c.l.s8.bf16 %v1042_v41  ;;  %v970_v23 = vld [vmem:[#allocation3 + $0x1418] sm:$0xff] }
 0x344   :  { %v3284_v52 = vpop.f32.mrf.mxu1  ;;  %v6377_v57 = vadd.f32 %v3282_v34, %v3242_v49  ;;  %3536 = vmatpush1.bf16.msra.mxu0 %v2425_v31  ;;  %v2386_v26 = vunpack.c.h.s8.bf16 %v970_v23  ;;  %v969_v31 = vld [vmem:[#allocation3 + $0x1410] sm:$0xff]  ;;  %v1018_v41 = vld [vmem:[#allocation3 + $0x1598] sm:$0xff] }
 0x345   :  { %3577 = vmatpush1.bf16.msra.mxu1 %v2553_v28  ;;  %v3244_v53 = vpop.f32.mrf.mxu0  ;;  %3537 = vmatprep.subr.bf16.mxu0 %v2418_v35  ;;  %v1033_v28 = vld [vmem:[#allocation3 + $0x1610] sm:$0xff]  ;;  %v2385_v32 = vunpack.c.h.s8.bf16 %v969_v31  ;;  %v2378_v35 = vunpack.c.l.s8.bf16 %v970_v23  ;;  %v2377_v49 = vunpack.c.l.s8.bf16 %v969_v31  ;;  %v2498_v52 = vunpack.c.h.s8.bf16 %v1026_v33 }
 0x346   :  { %v3285_v7 = vpop.f32.mrf.mxu1  ;;  %3578 = vmatprep.subr.bf16.mxu1 %v2546_v37  ;;  %v2513_v34 = vunpack.c.h.s8.bf16 %v1033_v28  ;;  %v2506_v37 = vunpack.c.l.s8.bf16 %v1034_v25  ;;  %v2505_v30 = vunpack.c.l.s8.bf16 %v1033_v28  ;;  %v1089_v53 = vld [vmem:[#allocation3 + $0x17d0] sm:$0xff]  ;;  %v1010_v25 = vld [vmem:[#allocation3 + $0x1558] sm:$0xff] }
 0x347   :  { %v1009_v28 = vld [vmem:[#allocation3 + $0x1550] sm:$0xff] }
 0x348   :  { %3538 = vmatpush1.bf16.msra.mxu0 %v2417_v62  ;;  %v2626_v62 = vunpack.c.h.s8.bf16 %v1090_v38  ;;  %v1002_v38 = vld [vmem:[#allocation3 + $0x1518] sm:$0xff] }
 0x349   :  { %3579 = vmatpush1.bf16.msra.mxu1 %v2545_v8  ;;  %3539 = vmatprep.subr.bf16.mxu0 %v2410_v39  ;;  %v1025_v8 = vld [vmem:[#allocation3 + $0x15d0] sm:$0xff]  ;;  %v2625_v39 = vunpack.c.h.s8.bf16 %v1089_v53 }
 0x34a   :  { %3580 = vmatprep.subr.bf16.mxu1 %v2538_v12  ;;  %v2497_v7 = vunpack.c.h.s8.bf16 %v1025_v8  ;;  %v2490_v12 = vunpack.c.l.s8.bf16 %v1026_v33 }
 0x34c   :  { %3540 = vmatpush1.bf16.msra.mxu0 %v2409_v3  ;;  %v1082_v3 = vld [vmem:[#allocation3 + $0x1798] sm:$0xff] }
 0x34d   :  { %3581 = vmatpush1.bf16.msra.mxu1 %v2537_v4  ;;  %3541 = vmatprep.subr.bf16.mxu0 %v2402_v18  ;;  %v2489_v4 = vunpack.c.l.s8.bf16 %v1025_v8  ;;  %v2617_v18 = vunpack.c.l.s8.bf16 %v1089_v53  ;;  %v2610_v15 = vunpack.c.h.s8.bf16 %v1082_v3  ;;  %v2602_v23 = vunpack.c.l.s8.bf16 %v1082_v3  ;;  %v1001_v53 = vld [vmem:[#allocation3 + $0x1510] sm:$0xff]  ;;  %v356_v3 = vld [vmem:[#allocation3 + $0xe8] sm:$0xff] }
 0x34e   :  { %3582 = vmatprep.subr.bf16.mxu1 %v2530_v44  ;;  %v2482_v44 = vunpack.c.h.s8.bf16 %v1018_v41 }
 0x350   :  { %3542 = vmatpush1.bf16.msra.mxu0 %v2401_v19  ;;  %v1081_v19 = vld [vmem:[#allocation3 + $0x1790] sm:$0xff] }
 0x351   :  { %3583 = vmatpush1.bf16.msra.mxu1 %v2529_v24  ;;  %3543 = vmatprep.subr.bf16.mxu0 %v2394_v16  ;;  %v2481_v24 = vunpack.c.h.s8.bf16 %v1017_v17  ;;  %v2609_v16 = vunpack.c.h.s8.bf16 %v1081_v19 }
 0x352   :  { %3584 = vmatprep.subr.bf16.mxu1 %v2522_v20  ;;  %v2474_v20 = vunpack.c.l.s8.bf16 %v1018_v41 }
 0x354   :  { %3544 = vmatpush1.bf16.msra.mxu0 %v2393_v48  ;;  %v1074_v48 = vld [vmem:[#allocation3 + $0x1758] sm:$0xff] }
 0x355   :  { %3585 = vmatpush1.bf16.msra.mxu1 %v2521_v46  ;;  %3545 = vmatprep.subr.bf16.mxu0 %v2386_v26  ;;  %v2473_v46 = vunpack.c.l.s8.bf16 %v1017_v17  ;;  %v2601_v26 = vunpack.c.l.s8.bf16 %v1081_v19  ;;  %v2594_v31 = vunpack.c.h.s8.bf16 %v1074_v48  ;;  %v2586_v33 = vunpack.c.l.s8.bf16 %v1074_v48  ;;  %v355_v19 = vld [vmem:[#allocation3 + $0xe0] sm:$0xff]  ;;  %v348_v48 = vld [vmem:[#allocation3 + $0xa8] sm:$0xff] }
 0x356   :  { %3586 = vmatprep.subr.bf16.mxu1 %v2514_v29  ;;  %v2466_v29 = vunpack.c.h.s8.bf16 %v1010_v25 }
 0x358   :  { %3546 = vmatpush1.bf16.msra.mxu0 %v2385_v32  ;;  %v1073_v32 = vld [vmem:[#allocation3 + $0x1750] sm:$0xff] }
 0x359   :  { %3587 = vmatpush1.bf16.msra.mxu1 %v2513_v34  ;;  %3547 = vmatprep.subr.bf16.mxu0 %v2378_v35  ;;  %v2465_v34 = vunpack.c.h.s8.bf16 %v1009_v28  ;;  %v2593_v35 = vunpack.c.h.s8.bf16 %v1073_v32 }
 0x35a   :  { %3588 = vmatprep.subr.bf16.mxu1 %v2506_v37  ;;  %v2458_v37 = vunpack.c.l.s8.bf16 %v1010_v25 }
 0x35c   :  { %3548 = vmatpush1.bf16.msra.mxu0 %v2377_v49  ;;  %v1066_v49 = vld [vmem:[#allocation3 + $0x1718] sm:$0xff] }
 0x35d   :  { %3589 = vmatpush1.bf16.msra.mxu1 %v2505_v30  ;;  %3549 = vmatprep.subr.bf16.mxu0 %v2498_v52  ;;  %v2457_v30 = vunpack.c.l.s8.bf16 %v1009_v28  ;;  %v2585_v52 = vunpack.c.l.s8.bf16 %v1073_v32  ;;  %v2578_v8 = vunpack.c.h.s8.bf16 %v1066_v49  ;;  %v2570_v41 = vunpack.c.l.s8.bf16 %v1066_v49  ;;  %v411_v49 = vld [vmem:[#allocation3 + $0x2a0] sm:$0xff] }
 0x35e   :  { %3590 = vmatprep.subr.bf16.mxu1 %v2626_v62  ;;  %v2450_v62 = vunpack.c.h.s8.bf16 %v1002_v38  ;;  %v1147_v28 = vunpack.c.l.s8.bf16 %v355_v19 }
 0x360   :  { %3550 = vmatpush2.bf16.msra.mxu0 %v2497_v7  ;;  %v1065_v7 = vld [vmem:[#allocation3 + $0x1710] sm:$0xff] }
 0x361   :  { %3591 = vmatpush2.bf16.msra.mxu1 %v2625_v39  ;;  %3551 = vmatprep.subr.bf16.mxu0 %v2490_v12  ;;  %v2449_v39 = vunpack.c.h.s8.bf16 %v1001_v53  ;;  %v2577_v12 = vunpack.c.h.s8.bf16 %v1065_v7 }
 0x362   :  { %3592 = vmatprep.subr.bf16.mxu1 %v2618_v40  ;;  %v2442_v40 = vunpack.c.l.s8.bf16 %v1002_v38  ;;  %v347_v38 = vld [vmem:[#allocation3 + $0xa0] sm:$0xff] }
 0x364   :  { %3552 = vmatpush2.bf16.msra.mxu0 %v2489_v4  ;;  %v420_v4 = vld [vmem:[#allocation3 + $0x2e8] sm:$0xff] }
 0x365   :  { %3593 = vmatpush2.bf16.msra.mxu1 %v2617_v18  ;;  %3553 = vmatprep.subr.bf16.mxu0 %v2482_v44  ;;  %v2441_v18 = vunpack.c.l.s8.bf16 %v1001_v53  ;;  %v2569_v44 = vunpack.c.l.s8.bf16 %v1065_v7  ;;  %v1284_v17 = vunpack.c.h.s8.bf16 %v420_v4  ;;  %v1276_v25 = vunpack.c.l.s8.bf16 %v420_v4 }
 0x366   :  { %3594 = vmatprep.subr.bf16.mxu1 %v2610_v15  ;;  %v1156_v15 = vunpack.c.h.s8.bf16 %v356_v3  ;;  %v1139_v53 = vunpack.c.h.s8.bf16 %v347_v38  ;;  %v1267_v7 = vunpack.c.h.s8.bf16 %v411_v49  ;;  %v1131_v4 = vunpack.c.l.s8.bf16 %v347_v38  ;;  %v388_v38 = vld [vmem:[#allocation3 + $0x1e8] sm:$0xff] }
 0x368   :  { %3554 = vmatpush2.bf16.msra.mxu0 %v2481_v24  ;;  %v419_v24 = vld [vmem:[#allocation3 + $0x2e0] sm:$0xff] }
 0x369   :  { %3595 = vmatpush2.bf16.msra.mxu1 %v2609_v16  ;;  %3555 = vmatprep.subr.bf16.mxu0 %v2474_v20  ;;  %v1155_v16 = vunpack.c.h.s8.bf16 %v355_v19  ;;  %v1283_v20 = vunpack.c.h.s8.bf16 %v419_v24  ;;  %v1275_v32 = vunpack.c.l.s8.bf16 %v419_v24  ;;  %v403_v19 = vld [vmem:[#allocation3 + $0x260] sm:$0xff] }
 0x36a   :  { %3596 = vmatprep.subr.bf16.mxu1 %v2602_v23  ;;  %v1148_v23 = vunpack.c.l.s8.bf16 %v356_v3  ;;  %v340_v3 = vld [vmem:[#allocation3 + $0x68] sm:$0xff] }
 0x36c   :  { %3556 = vmatpush2.bf16.msra.mxu0 %v2473_v46  ;;  %v412_v46 = vld [vmem:[#allocation3 + $0x2a8] sm:$0xff] }
 0x36d   :  { %3597 = vmatpush2.bf16.msra.mxu1 %v2601_v26  ;;  %3557 = vmatprep.subr.bf16.mxu0 %v2466_v29 }
 0x36e   :  { %3598 = vmatprep.subr.bf16.mxu1 %v2594_v31 }
 0x370   :  { %3558 = vmatpush2.bf16.msra.mxu0 %v2465_v34 }
 0x371   :  { %3599 = vmatpush2.bf16.msra.mxu1 %v2593_v35  ;;  %3559 = vmatprep.subr.bf16.mxu0 %v2458_v37  ;;  %v1140_v37 = vunpack.c.h.s8.bf16 %v348_v48 }
 0x372   :  { %3600 = vmatprep.subr.bf16.mxu1 %v2586_v33  ;;  %v1268_v33 = vunpack.c.h.s8.bf16 %v412_v46 }
 0x374   :  { %3560 = vmatpush2.bf16.msra.mxu0 %v2457_v30 }
 0x375   :  { %3601 = vmatpush2.bf16.msra.mxu1 %v2585_v52  ;;  %3561 = vmatprep.subr.bf16.mxu0 %v2450_v62 }
 0x376   :  { %3602 = vmatprep.subr.bf16.mxu1 %v2578_v8 }
 0x378   :  { %3562 = vmatpush2.bf16.msra.mxu0 %v2449_v39 }
 0x379   :  { %3603 = vmatpush2.bf16.msra.mxu1 %v2577_v12  ;;  %3563 = vmatprep.subr.bf16.mxu0 %v2442_v40  ;;  %v1132_v40 = vunpack.c.l.s8.bf16 %v348_v48  ;;  %v396_v48 = vld [vmem:[#allocation3 + $0x228] sm:$0xff] }
 0x37a   :  { %3604 = vmatprep.subr.bf16.mxu1 %v2570_v41  ;;  %v1260_v41 = vunpack.c.l.s8.bf16 %v412_v46 }
 0x37c   :  { %3564 = vmatpush2.bf16.msra.mxu0 %v2441_v18  ;;  %v1259_v18 = vunpack.c.l.s8.bf16 %v411_v49  ;;  %v452_v49 = vld [vmem:[#allocation3 + $0x3e8] sm:$0xff] }
 0x37d   :  { %3605 = vmatpush2.bf16.msra.mxu1 %v2569_v44  ;;  %3615 = vmatprep.subr.bf16.mxu0 %v1156_v15  ;;  %v1124_v44 = vunpack.c.h.s8.bf16 %v340_v3 }
 0x37e   :  { %3656 = vmatprep.subr.bf16.mxu1 %v1284_v17  ;;  %v339_v17 = vld [vmem:[#allocation3 + $0x60] sm:$0xff] }
 0x37f   :  { %v3321_v26 = vpop.f32.mrf.mxu0  ;;  %3566 = vmatmul.mubr.bf16.vlgmr.msra.gmra.mxu0 %v6315_v50  ;;  %v1123_v24 = vunpack.c.h.s8.bf16 %v339_v17  ;;  %v1115_v46 = vunpack.c.l.s8.bf16 %v339_v17 }
 0x380   :  { %v3362_v29 = vpop.f32.mrf.mxu1  ;;  %3607 = vmatmul.mubr.bf16.vlgmr.msra.gmra.mxu1 %v6319_v51  ;;  %v3322_v31 = vadd.f32 %v3321_v26, %v6372_v43  ;;  %3616 = vmatpush1.bf16.msra.mxu0 %v1155_v16  ;;  %v1251_v16 = vunpack.c.h.s8.bf16 %v403_v19  ;;  %v1243_v26 = vunpack.c.l.s8.bf16 %v403_v19  ;;  %v379_v19 = vld [vmem:[#allocation3 + $0x1a0] sm:$0xff] }
 0x381   :  { %3657 = vmatpush1.bf16.msra.mxu1 %v1283_v20  ;;  %v3323_v34 = vpop.f32.mrf.mxu0  ;;  %3617 = vmatprep.subr.bf16.mxu0 %v1148_v23  ;;  %v1116_v20 = vunpack.c.l.s8.bf16 %v340_v3  ;;  %v1340_v3 = vunpack.c.l.s8.bf16 %v452_v49 }
 0x382   :  { %v3364_v35 = vpop.f32.mrf.mxu1  ;;  %3658 = vmatprep.subr.bf16.mxu1 %v1276_v25  ;;  %v6382_v30 = vadd.f32 %v3362_v29, %v3322_v31  ;;  %v3324_v52 = vadd.f32 %v3323_v34, %v6377_v57  ;;  %3647 = vmatprep.mubr.bf16.mxu0 %v6150_v54  ;;  %v404_v57 = vld [vmem:[#allocation3 + $0x268] sm:$0xff]  ;;  %v1236_v31 = vunpack.c.h.s8.bf16 %v396_v48 }
 0x383   :  { %3688 = vmatprep.mubr.bf16.mxu1 %v6155_v56  ;;  %v3325_v43 = vpop.f32.mrf.mxu0  ;;  %v1252_v15 = vunpack.c.h.s8.bf16 %v404_v57  ;;  %v1244_v23 = vunpack.c.l.s8.bf16 %v404_v57  ;;  %v332_v25 = vld [vmem:[#allocation3 + $0x28] sm:$0xff] }
 0x384   :  { %v3366_v62 = vpop.f32.mrf.mxu1  ;;  %v6387_v8 = vadd.f32 %v3364_v35, %v3324_v52  ;;  %3618 = vmatpush1.bf16.msra.mxu0 %v1147_v28  ;;  %v1108_v29 = vunpack.c.h.s8.bf16 %v332_v25  ;;  %v331_v28 = vld [vmem:[#allocation3 + $0x20] sm:$0xff]  ;;  %v380_v57 = vld [vmem:[#allocation3 + $0x1a8] sm:$0xff] }
 0x385   :  { %3659 = vmatpush1.bf16.msra.mxu1 %v1275_v32  ;;  %v3326_v39 = vpop.f32.mrf.mxu0  ;;  %3619 = vmatprep.subr.bf16.mxu0 %v1140_v37  ;;  %v395_v32 = vld [vmem:[#allocation3 + $0x220] sm:$0xff]  ;;  %v1107_v34 = vunpack.c.h.s8.bf16 %v331_v28  ;;  %v1100_v37 = vunpack.c.l.s8.bf16 %v332_v25  ;;  %v1099_v52 = vunpack.c.l.s8.bf16 %v331_v28  ;;  %v1220_v62 = vunpack.c.h.s8.bf16 %v388_v38 }
 0x386   :  { %v3367_v12 = vpop.f32.mrf.mxu1  ;;  %3660 = vmatprep.subr.bf16.mxu1 %v1268_v33  ;;  %v1235_v35 = vunpack.c.h.s8.bf16 %v395_v32  ;;  %v1228_v33 = vunpack.c.l.s8.bf16 %v396_v48  ;;  %v1227_v43 = vunpack.c.l.s8.bf16 %v395_v32  ;;  %v451_v39 = vld [vmem:[#allocation3 + $0x3e0] sm:$0xff]  ;;  %v372_v48 = vld [vmem:[#allocation3 + $0x168] sm:$0xff] }
 0x387   :  { %v371_v32 = vld [vmem:[#allocation3 + $0x160] sm:$0xff] }
 0x388   :  { %3620 = vmatpush1.bf16.msra.mxu0 %v1139_v53  ;;  %v1348_v53 = vunpack.c.h.s8.bf16 %v452_v49  ;;  %v364_v49 = vld [vmem:[#allocation3 + $0x128] sm:$0xff] }
 0x389   :  { %3661 = vmatpush1.bf16.msra.mxu1 %v1267_v7  ;;  %3621 = vmatprep.subr.bf16.mxu0 %v1132_v40  ;;  %v387_v7 = vld [vmem:[#allocation3 + $0x1e0] sm:$0xff]  ;;  %v1347_v40 = vunpack.c.h.s8.bf16 %v451_v39 }
 0x38a   :  { %3662 = vmatprep.subr.bf16.mxu1 %v1260_v41  ;;  %v1219_v12 = vunpack.c.h.s8.bf16 %v387_v7  ;;  %v1212_v41 = vunpack.c.l.s8.bf16 %v388_v38 }
 0x38c   :  { %3622 = vmatpush1.bf16.msra.mxu0 %v1131_v4  ;;  %v444_v4 = vld [vmem:[#allocation3 + $0x3a8] sm:$0xff] }
 0x38d   :  { %3663 = vmatpush1.bf16.msra.mxu1 %v1259_v18  ;;  %3623 = vmatprep.subr.bf16.mxu0 %v1124_v44  ;;  %v1211_v18 = vunpack.c.l.s8.bf16 %v387_v7  ;;  %v1339_v44 = vunpack.c.l.s8.bf16 %v451_v39  ;;  %v1332_v17 = vunpack.c.h.s8.bf16 %v444_v4  ;;  %v1324_v25 = vunpack.c.l.s8.bf16 %v444_v4  ;;  %v363_v39 = vld [vmem:[#allocation3 + $0x120] sm:$0xff]  ;;  %v484_v4 = vld [vmem:[#allocation3 + $0x4e8] sm:$0xff] }
 0x38e   :  { %3664 = vmatprep.subr.bf16.mxu1 %v1252_v15  ;;  %v1204_v15 = vunpack.c.h.s8.bf16 %v380_v57 }
 0x390   :  { %3624 = vmatpush1.bf16.msra.mxu0 %v1123_v24  ;;  %v443_v24 = vld [vmem:[#allocation3 + $0x3a0] sm:$0xff] }
 0x391   :  { %3665 = vmatpush1.bf16.msra.mxu1 %v1251_v16  ;;  %3625 = vmatprep.subr.bf16.mxu0 %v1116_v20  ;;  %v1203_v16 = vunpack.c.h.s8.bf16 %v379_v19  ;;  %v1331_v20 = vunpack.c.h.s8.bf16 %v443_v24 }
 0x392   :  { %3666 = vmatprep.subr.bf16.mxu1 %v1244_v23  ;;  %v1196_v23 = vunpack.c.l.s8.bf16 %v380_v57 }
 0x394   :  { %3626 = vmatpush1.bf16.msra.mxu0 %v1115_v46  ;;  %v436_v46 = vld [vmem:[#allocation3 + $0x368] sm:$0xff] }
 0x395   :  { %3667 = vmatpush1.bf16.msra.mxu1 %v1243_v26  ;;  %3627 = vmatprep.subr.bf16.mxu0 %v1108_v29  ;;  %v1195_v26 = vunpack.c.l.s8.bf16 %v379_v19  ;;  %v1323_v29 = vunpack.c.l.s8.bf16 %v443_v24  ;;  %v1316_v28 = vunpack.c.h.s8.bf16 %v436_v46  ;;  %v1308_v38 = vunpack.c.l.s8.bf16 %v436_v46  ;;  %v483_v24 = vld [vmem:[#allocation3 + $0x4e0] sm:$0xff]  ;;  %v476_v46 = vld [vmem:[#allocation3 + $0x4a8] sm:$0xff] }
 0x396   :  { %3668 = vmatprep.subr.bf16.mxu1 %v1236_v31  ;;  %v1188_v31 = vunpack.c.h.s8.bf16 %v372_v48 }
 0x398   :  { %3628 = vmatpush1.bf16.msra.mxu0 %v1107_v34  ;;  %v435_v34 = vld [vmem:[#allocation3 + $0x360] sm:$0xff] }
 0x399   :  { %3669 = vmatpush1.bf16.msra.mxu1 %v1235_v35  ;;  %3629 = vmatprep.subr.bf16.mxu0 %v1100_v37  ;;  %v1187_v35 = vunpack.c.h.s8.bf16 %v371_v32  ;;  %v1315_v37 = vunpack.c.h.s8.bf16 %v435_v34 }
 0x39a   :  { %3670 = vmatprep.subr.bf16.mxu1 %v1228_v33  ;;  %v1180_v33 = vunpack.c.l.s8.bf16 %v372_v48 }
 0x39c   :  { %3630 = vmatpush1.bf16.msra.mxu0 %v1099_v52  ;;  %v428_v52 = vld [vmem:[#allocation3 + $0x328] sm:$0xff] }
 0x39d   :  { %3671 = vmatpush1.bf16.msra.mxu1 %v1227_v43  ;;  %3631 = vmatprep.subr.bf16.mxu0 %v1220_v62  ;;  %v1179_v43 = vunpack.c.l.s8.bf16 %v371_v32  ;;  %v1307_v62 = vunpack.c.l.s8.bf16 %v435_v34  ;;  %v1300_v7 = vunpack.c.h.s8.bf16 %v428_v52  ;;  %v1292_v57 = vunpack.c.l.s8.bf16 %v428_v52  ;;  %v539_v52 = vld [vmem:[#allocation3 + $0x6a0] sm:$0xff] }
 0x39e   :  { %3672 = vmatprep.subr.bf16.mxu1 %v1348_v53  ;;  %v1172_v53 = vunpack.c.h.s8.bf16 %v364_v49  ;;  %v1403_v32 = vunpack.c.l.s8.bf16 %v483_v24 }
 0x3a0   :  { %3632 = vmatpush2.bf16.msra.mxu0 %v1219_v12  ;;  %v427_v12 = vld [vmem:[#allocation3 + $0x320] sm:$0xff] }
 0x3a1   :  { %3673 = vmatpush2.bf16.msra.mxu1 %v1347_v40  ;;  %3633 = vmatprep.subr.bf16.mxu0 %v1212_v41  ;;  %v1171_v40 = vunpack.c.h.s8.bf16 %v363_v39  ;;  %v1299_v41 = vunpack.c.h.s8.bf16 %v427_v12 }
 0x3a2   :  { %3674 = vmatprep.subr.bf16.mxu1 %v1340_v3  ;;  %v1164_v3 = vunpack.c.l.s8.bf16 %v364_v49  ;;  %v475_v49 = vld [vmem:[#allocation3 + $0x4a0] sm:$0xff] }
 0x3a4   :  { %3634 = vmatpush2.bf16.msra.mxu0 %v1211_v18  ;;  %v548_v18 = vld [vmem:[#allocation3 + $0x6e8] sm:$0xff] }
 0x3a5   :  { %3675 = vmatpush2.bf16.msra.mxu1 %v1339_v44  ;;  %3635 = vmatprep.subr.bf16.mxu0 %v1204_v15  ;;  %v1163_v44 = vunpack.c.l.s8.bf16 %v363_v39  ;;  %v1291_v15 = vunpack.c.l.s8.bf16 %v427_v12  ;;  %v1540_v19 = vunpack.c.h.s8.bf16 %v548_v18  ;;  %v1532_v48 = vunpack.c.l.s8.bf16 %v548_v18 }
 0x3a6   :  { %3676 = vmatprep.subr.bf16.mxu1 %v1332_v17  ;;  %v1412_v17 = vunpack.c.h.s8.bf16 %v484_v4  ;;  %v1395_v39 = vunpack.c.h.s8.bf16 %v475_v49  ;;  %v1523_v12 = vunpack.c.h.s8.bf16 %v539_v52  ;;  %v1387_v18 = vunpack.c.l.s8.bf16 %v475_v49  ;;  %v516_v49 = vld [vmem:[#allocation3 + $0x5e8] sm:$0xff] }
 0x3a8   :  { %3636 = vmatpush2.bf16.msra.mxu0 %v1203_v16  ;;  %v547_v16 = vld [vmem:[#allocation3 + $0x6e0] sm:$0xff] }
 0x3a9   :  { %3677 = vmatpush2.bf16.msra.mxu1 %v1331_v20  ;;  %3637 = vmatprep.subr.bf16.mxu0 %v1196_v23  ;;  %v1411_v20 = vunpack.c.h.s8.bf16 %v483_v24  ;;  %v1539_v23 = vunpack.c.h.s8.bf16 %v547_v16  ;;  %v1531_v34 = vunpack.c.l.s8.bf16 %v547_v16  ;;  %v531_v24 = vld [vmem:[#allocation3 + $0x660] sm:$0xff] }
 0x3aa   :  { %3678 = vmatprep.subr.bf16.mxu1 %v1324_v25  ;;  %v1404_v25 = vunpack.c.l.s8.bf16 %v484_v4  ;;  %v468_v4 = vld [vmem:[#allocation3 + $0x468] sm:$0xff] }
 0x3ac   :  { %3638 = vmatpush2.bf16.msra.mxu0 %v1195_v26  ;;  %v540_v26 = vld [vmem:[#allocation3 + $0x6a8] sm:$0xff] }
 0x3ad   :  { %3679 = vmatpush2.bf16.msra.mxu1 %v1323_v29  ;;  %3639 = vmatprep.subr.bf16.mxu0 %v1188_v31 }
 0x3ae   :  { %3680 = vmatprep.subr.bf16.mxu1 %v1316_v28 }
 0x3b0   :  { %3640 = vmatpush2.bf16.msra.mxu0 %v1187_v35 }
 0x3b1   :  { %3681 = vmatpush2.bf16.msra.mxu1 %v1315_v37  ;;  %3641 = vmatprep.subr.bf16.mxu0 %v1180_v33  ;;  %v1396_v33 = vunpack.c.h.s8.bf16 %v476_v46 }
 0x3b2   :  { %3682 = vmatprep.subr.bf16.mxu1 %v1308_v38  ;;  %v1524_v38 = vunpack.c.h.s8.bf16 %v540_v26 }
 0x3b4   :  { %3642 = vmatpush2.bf16.msra.mxu0 %v1179_v43 }
 0x3b5   :  { %3683 = vmatpush2.bf16.msra.mxu1 %v1307_v62  ;;  %3643 = vmatprep.subr.bf16.mxu0 %v1172_v53 }
 0x3b6   :  { %3684 = vmatprep.subr.bf16.mxu1 %v1300_v7 }
 0x3b8   :  { %3644 = vmatpush2.bf16.msra.mxu0 %v1171_v40 }
 0x3b9   :  { %3685 = vmatpush2.bf16.msra.mxu1 %v1299_v41  ;;  %3645 = vmatprep.subr.bf16.mxu0 %v1164_v3  ;;  %v1388_v3 = vunpack.c.l.s8.bf16 %v476_v46  ;;  %v524_v46 = vld [vmem:[#allocation3 + $0x628] sm:$0xff] }
 0x3ba   :  { %3686 = vmatprep.subr.bf16.mxu1 %v1292_v57  ;;  %v1516_v57 = vunpack.c.l.s8.bf16 %v540_v26 }
 0x3bc   :  { %3646 = vmatpush2.bf16.msra.mxu0 %v1163_v44  ;;  %v1515_v44 = vunpack.c.l.s8.bf16 %v539_v52  ;;  %v580_v52 = vld [vmem:[#allocation3 + $0x7e8] sm:$0xff] }
 0x3bd   :  { %3687 = vmatpush2.bf16.msra.mxu1 %v1291_v15  ;;  %3697 = vmatprep.subr.bf16.mxu0 %v1412_v17  ;;  %v1380_v15 = vunpack.c.h.s8.bf16 %v468_v4 }
 0x3be   :  { %3738 = vmatprep.subr.bf16.mxu1 %v1540_v19  ;;  %v467_v19 = vld [vmem:[#allocation3 + $0x460] sm:$0xff] }
 0x3bf   :  { %v3403_v29 = vpop.f32.mrf.mxu0  ;;  %3648 = vmatmul.mubr.bf16.vlgmr.msra.gmra.mxu0 %v6173_v1  ;;  %v1379_v16 = vunpack.c.h.s8.bf16 %v467_v19  ;;  %v1371_v26 = vunpack.c.l.s8.bf16 %v467_v19 }
 0x3c0   :  { %v3444_v31 = vpop.f32.mrf.mxu1  ;;  %3689 = vmatmul.mubr.bf16.vlgmr.msra.gmra.mxu1 %v6177_v2  ;;  %v3404_v28 = vadd.f32 %v3403_v29, %v6382_v30  ;;  %3698 = vmatpush1.bf16.msra.mxu0 %v1411_v20  ;;  %v1507_v20 = vunpack.c.h.s8.bf16 %v531_v24  ;;  %v1499_v29 = vunpack.c.l.s8.bf16 %v531_v24  ;;  %v507_v24 = vld [vmem:[#allocation3 + $0x5a0] sm:$0xff] }
 0x3c1   :  { %3739 = vmatpush1.bf16.msra.mxu1 %v1539_v23  ;;  %v3405_v35 = vpop.f32.mrf.mxu0  ;;  %3699 = vmatprep.subr.bf16.mxu0 %v1404_v25  ;;  %v1372_v23 = vunpack.c.l.s8.bf16 %v468_v4  ;;  %v1596_v4 = vunpack.c.l.s8.bf16 %v580_v52 }
 0x3c2   :  { %v3446_v37 = vpop.f32.mrf.mxu1  ;;  %3740 = vmatprep.subr.bf16.mxu1 %v1532_v48  ;;  %v6392_v43 = vadd.f32 %v3444_v31, %v3404_v28  ;;  %v3406_v62 = vadd.f32 %v3405_v35, %v6387_v8  ;;  %3729 = vmatprep.mubr.bf16.mxu0 %v6179_v9  ;;  %v532_v8 = vld [vmem:[#allocation3 + $0x668] sm:$0xff]  ;;  %v1492_v28 = vunpack.c.h.s8.bf16 %v524_v46 }
 0x3c3   :  { %3770 = vmatprep.mubr.bf16.mxu1 %v6181_v10  ;;  %v3407_v30 = vpop.f32.mrf.mxu0  ;;  %v1508_v17 = vunpack.c.h.s8.bf16 %v532_v8  ;;  %v1500_v25 = vunpack.c.l.s8.bf16 %v532_v8  ;;  %v460_v48 = vld [vmem:[#allocation3 + $0x428] sm:$0xff] }
 0x3c4   :  { %v3448_v53 = vpop.f32.mrf.mxu1  ;;  %v6397_v7 = vadd.f32 %v3446_v37, %v3406_v62  ;;  %3700 = vmatpush1.bf16.msra.mxu0 %v1403_v32  ;;  %v1364_v31 = vunpack.c.h.s8.bf16 %v460_v48  ;;  %v459_v32 = vld [vmem:[#allocation3 + $0x420] sm:$0xff]  ;;  %v508_v8 = vld [vmem:[#allocation3 + $0x5a8] sm:$0xff] }
 0x3c5   :  { %3741 = vmatpush1.bf16.msra.mxu1 %v1531_v34  ;;  %v3408_v40 = vpop.f32.mrf.mxu0  ;;  %3701 = vmatprep.subr.bf16.mxu0 %v1396_v33  ;;  %v523_v34 = vld [vmem:[#allocation3 + $0x620] sm:$0xff]  ;;  %v1363_v35 = vunpack.c.h.s8.bf16 %v459_v32  ;;  %v1356_v33 = vunpack.c.l.s8.bf16 %v460_v48  ;;  %v1355_v62 = vunpack.c.l.s8.bf16 %v459_v32  ;;  %v1476_v53 = vunpack.c.h.s8.bf16 %v516_v49 }
 0x3c6   :  { %v3449_v41 = vpop.f32.mrf.mxu1  ;;  %3742 = vmatprep.subr.bf16.mxu1 %v1524_v38  ;;  %v1491_v37 = vunpack.c.h.s8.bf16 %v523_v34  ;;  %v1484_v38 = vunpack.c.l.s8.bf16 %v524_v46  ;;  %v1483_v30 = vunpack.c.l.s8.bf16 %v523_v34  ;;  %v579_v40 = vld [vmem:[#allocation3 + $0x7e0] sm:$0xff]  ;;  %v500_v46 = vld [vmem:[#allocation3 + $0x568] sm:$0xff] }
 0x3c7   :  { %v499_v34 = vld [vmem:[#allocation3 + $0x560] sm:$0xff] }
 0x3c8   :  { %3702 = vmatpush1.bf16.msra.mxu0 %v1395_v39  ;;  %v1604_v39 = vunpack.c.h.s8.bf16 %v580_v52  ;;  %v492_v52 = vld [vmem:[#allocation3 + $0x528] sm:$0xff] }
 0x3c9   :  { %3743 = vmatpush1.bf16.msra.mxu1 %v1523_v12  ;;  %3703 = vmatprep.subr.bf16.mxu0 %v1388_v3  ;;  %v515_v12 = vld [vmem:[#allocation3 + $0x5e0] sm:$0xff]  ;;  %v1603_v3 = vunpack.c.h.s8.bf16 %v579_v40 }
 0x3ca   :  { %3744 = vmatprep.subr.bf16.mxu1 %v1516_v57  ;;  %v1475_v41 = vunpack.c.h.s8.bf16 %v515_v12  ;;  %v1468_v57 = vunpack.c.l.s8.bf16 %v516_v49 }
 0x3cc   :  { %3704 = vmatpush1.bf16.msra.mxu0 %v1387_v18  ;;  %v572_v18 = vld [vmem:[#allocation3 + $0x7a8] sm:$0xff] }
 0x3cd   :  { %3745 = vmatpush1.bf16.msra.mxu1 %v1515_v44  ;;  %3705 = vmatprep.subr.bf16.mxu0 %v1380_v15  ;;  %v1467_v44 = vunpack.c.l.s8.bf16 %v515_v12  ;;  %v1595_v15 = vunpack.c.l.s8.bf16 %v579_v40  ;;  %v1588_v19 = vunpack.c.h.s8.bf16 %v572_v18  ;;  %v1580_v48 = vunpack.c.l.s8.bf16 %v572_v18  ;;  %v491_v40 = vld [vmem:[#allocation3 + $0x520] sm:$0xff]  ;;  %v612_v18 = vld [vmem:[#allocation3 + $0x8e8] sm:$0xff] }
 0x3ce   :  { %3746 = vmatprep.subr.bf16.mxu1 %v1508_v17  ;;  %v1460_v17 = vunpack.c.h.s8.bf16 %v508_v8 }
 0x3d0   :  { %3706 = vmatpush1.bf16.msra.mxu0 %v1379_v16  ;;  %v571_v16 = vld [vmem:[#allocation3 + $0x7a0] sm:$0xff] }
 0x3d1   :  { %3747 = vmatpush1.bf16.msra.mxu1 %v1507_v20  ;;  %3707 = vmatprep.subr.bf16.mxu0 %v1372_v23  ;;  %v1459_v20 = vunpack.c.h.s8.bf16 %v507_v24  ;;  %v1587_v23 = vunpack.c.h.s8.bf16 %v571_v16 }
 0x3d2   :  { %3748 = vmatprep.subr.bf16.mxu1 %v1500_v25  ;;  %v1452_v25 = vunpack.c.l.s8.bf16 %v508_v8 }
 0x3d4   :  { %3708 = vmatpush1.bf16.msra.mxu0 %v1371_v26  ;;  %v564_v26 = vld [vmem:[#allocation3 + $0x768] sm:$0xff] }
 0x3d5   :  { %3749 = vmatpush1.bf16.msra.mxu1 %v1499_v29  ;;  %3709 = vmatprep.subr.bf16.mxu0 %v1364_v31  ;;  %v1451_v29 = vunpack.c.l.s8.bf16 %v507_v24  ;;  %v1579_v31 = vunpack.c.l.s8.bf16 %v571_v16  ;;  %v1572_v32 = vunpack.c.h.s8.bf16 %v564_v26  ;;  %v1564_v49 = vunpack.c.l.s8.bf16 %v564_v26  ;;  %v611_v16 = vld [vmem:[#allocation3 + $0x8e0] sm:$0xff]  ;;  %v604_v26 = vld [vmem:[#allocation3 + $0x8a8] sm:$0xff] }
 0x3d6   :  { %3750 = vmatprep.subr.bf16.mxu1 %v1492_v28  ;;  %v1444_v28 = vunpack.c.h.s8.bf16 %v500_v46 }
 0x3d8   :  { %3710 = vmatpush1.bf16.msra.mxu0 %v1363_v35  ;;  %v563_v35 = vld [vmem:[#allocation3 + $0x760] sm:$0xff] }
 0x3d9   :  { %3751 = vmatpush1.bf16.msra.mxu1 %v1491_v37  ;;  %3711 = vmatprep.subr.bf16.mxu0 %v1356_v33  ;;  %v1443_v37 = vunpack.c.h.s8.bf16 %v499_v34  ;;  %v1571_v33 = vunpack.c.h.s8.bf16 %v563_v35 }
 0x3da   :  { %3752 = vmatprep.subr.bf16.mxu1 %v1484_v38  ;;  %v1436_v38 = vunpack.c.l.s8.bf16 %v500_v46 }
 0x3dc   :  { %3712 = vmatpush1.bf16.msra.mxu0 %v1355_v62  ;;  %v556_v62 = vld [vmem:[#allocation3 + $0x728] sm:$0xff] }
 0x3dd   :  { %3753 = vmatpush1.bf16.msra.mxu1 %v1483_v30  ;;  %3713 = vmatprep.subr.bf16.mxu0 %v1476_v53  ;;  %v1435_v30 = vunpack.c.l.s8.bf16 %v499_v34  ;;  %v1563_v53 = vunpack.c.l.s8.bf16 %v563_v35  ;;  %v1556_v12 = vunpack.c.h.s8.bf16 %v556_v62  ;;  %v1548_v8 = vunpack.c.l.s8.bf16 %v556_v62  ;;  %v667_v62 = vld [vmem:[#allocation3 + $0xaa0] sm:$0xff] }
 0x3de   :  { %3754 = vmatprep.subr.bf16.mxu1 %v1604_v39  ;;  %v1428_v39 = vunpack.c.h.s8.bf16 %v492_v52  ;;  %v1659_v34 = vunpack.c.l.s8.bf16 %v611_v16 }
 0x3e0   :  { %3714 = vmatpush2.bf16.msra.mxu0 %v1475_v41  ;;  %v555_v41 = vld [vmem:[#allocation3 + $0x720] sm:$0xff] }
 0x3e1   :  { %3755 = vmatpush2.bf16.msra.mxu1 %v1603_v3  ;;  %3715 = vmatprep.subr.bf16.mxu0 %v1468_v57  ;;  %v1427_v3 = vunpack.c.h.s8.bf16 %v491_v40  ;;  %v1555_v57 = vunpack.c.h.s8.bf16 %v555_v41 }
 0x3e2   :  { %3756 = vmatprep.subr.bf16.mxu1 %v1596_v4  ;;  %v1420_v4 = vunpack.c.l.s8.bf16 %v492_v52  ;;  %v603_v52 = vld [vmem:[#allocation3 + $0x8a0] sm:$0xff] }
 0x3e4   :  { %3716 = vmatpush2.bf16.msra.mxu0 %v1467_v44  ;;  %v676_v44 = vld [vmem:[#allocation3 + $0xae8] sm:$0xff] }
 0x3e5   :  { %3757 = vmatpush2.bf16.msra.mxu1 %v1595_v15  ;;  %3717 = vmatprep.subr.bf16.mxu0 %v1460_v17  ;;  %v1419_v15 = vunpack.c.l.s8.bf16 %v491_v40  ;;  %v1547_v17 = vunpack.c.l.s8.bf16 %v555_v41  ;;  %v1796_v24 = vunpack.c.h.s8.bf16 %v676_v44  ;;  %v1788_v46 = vunpack.c.l.s8.bf16 %v676_v44 }
 0x3e6   :  { %3758 = vmatprep.subr.bf16.mxu1 %v1588_v19  ;;  %v1668_v19 = vunpack.c.h.s8.bf16 %v612_v18  ;;  %v1651_v40 = vunpack.c.h.s8.bf16 %v603_v52  ;;  %v1779_v41 = vunpack.c.h.s8.bf16 %v667_v62  ;;  %v1643_v44 = vunpack.c.l.s8.bf16 %v603_v52  ;;  %v644_v52 = vld [vmem:[#allocation3 + $0x9e8] sm:$0xff] }
 0x3e8   :  { %3718 = vmatpush2.bf16.msra.mxu0 %v1459_v20  ;;  %v675_v20 = vld [vmem:[#allocation3 + $0xae0] sm:$0xff] }
 0x3e9   :  { %3759 = vmatpush2.bf16.msra.mxu1 %v1587_v23  ;;  %3719 = vmatprep.subr.bf16.mxu0 %v1452_v25  ;;  %v1667_v23 = vunpack.c.h.s8.bf16 %v611_v16  ;;  %v1795_v25 = vunpack.c.h.s8.bf16 %v675_v20  ;;  %v1787_v35 = vunpack.c.l.s8.bf16 %v675_v20  ;;  %v659_v16 = vld [vmem:[#allocation3 + $0xa60] sm:$0xff] }
 0x3ea   :  { %3760 = vmatprep.subr.bf16.mxu1 %v1580_v48  ;;  %v1660_v48 = vunpack.c.l.s8.bf16 %v612_v18  ;;  %v596_v18 = vld [vmem:[#allocation3 + $0x868] sm:$0xff] }
 0x3ec   :  { %3720 = vmatpush2.bf16.msra.mxu0 %v1451_v29  ;;  %v668_v29 = vld [vmem:[#allocation3 + $0xaa8] sm:$0xff] }
 0x3ed   :  { %3761 = vmatpush2.bf16.msra.mxu1 %v1579_v31  ;;  %3721 = vmatprep.subr.bf16.mxu0 %v1444_v28 }
 0x3ee   :  { %3762 = vmatprep.subr.bf16.mxu1 %v1572_v32 }
 0x3f0   :  { %3722 = vmatpush2.bf16.msra.mxu0 %v1443_v37 }
 0x3f1   :  { %3763 = vmatpush2.bf16.msra.mxu1 %v1571_v33  ;;  %3723 = vmatprep.subr.bf16.mxu0 %v1436_v38  ;;  %v1652_v38 = vunpack.c.h.s8.bf16 %v604_v26 }
 0x3f2   :  { %3764 = vmatprep.subr.bf16.mxu1 %v1564_v49  ;;  %v1780_v49 = vunpack.c.h.s8.bf16 %v668_v29 }
 0x3f4   :  { %3724 = vmatpush2.bf16.msra.mxu0 %v1435_v30 }
 0x3f5   :  { %3765 = vmatpush2.bf16.msra.mxu1 %v1563_v53  ;;  %3725 = vmatprep.subr.bf16.mxu0 %v1428_v39 }
 0x3f6   :  { %3766 = vmatprep.subr.bf16.mxu1 %v1556_v12 }
 0x3f8   :  { %3726 = vmatpush2.bf16.msra.mxu0 %v1427_v3 }
 0x3f9   :  { %3767 = vmatpush2.bf16.msra.mxu1 %v1555_v57  ;;  %3727 = vmatprep.subr.bf16.mxu0 %v1420_v4  ;;  %v1644_v4 = vunpack.c.l.s8.bf16 %v604_v26  ;;  %v652_v26 = vld [vmem:[#allocation3 + $0xa28] sm:$0xff] }
 0x3fa   :  { %3768 = vmatprep.subr.bf16.mxu1 %v1548_v8  ;;  %v1772_v8 = vunpack.c.l.s8.bf16 %v668_v29 }
 0x3fc   :  { %3728 = vmatpush2.bf16.msra.mxu0 %v1419_v15  ;;  %v1771_v15 = vunpack.c.l.s8.bf16 %v667_v62  ;;  %v708_v62 = vld [vmem:[#allocation3 + $0xbe8] sm:$0xff] }
 0x3fd   :  { %3769 = vmatpush2.bf16.msra.mxu1 %v1547_v17  ;;  %3779 = vmatprep.subr.bf16.mxu0 %v1668_v19  ;;  %v1636_v17 = vunpack.c.h.s8.bf16 %v596_v18 }
 0x3fe   :  { %3820 = vmatprep.subr.bf16.mxu1 %v1796_v24  ;;  %v595_v24 = vld [vmem:[#allocation3 + $0x860] sm:$0xff] }
 0x3ff   :  { %v3485_v31 = vpop.f32.mrf.mxu0  ;;  %3730 = vmatmul.mubr.bf16.vlgmr.msra.gmra.mxu0 %v6202_v59  ;;  %v1635_v20 = vunpack.c.h.s8.bf16 %v595_v24  ;;  %v1627_v29 = vunpack.c.l.s8.bf16 %v595_v24 }
 0x400   :  { %v3526_v28 = vpop.f32.mrf.mxu1  ;;  %3771 = vmatmul.mubr.bf16.vlgmr.msra.gmra.mxu1 %v6206_v60  ;;  %v3486_v32 = vadd.f32 %v3485_v31, %v6392_v43  ;;  %3780 = vmatpush1.bf16.msra.mxu0 %v1667_v23  ;;  %v1763_v23 = vunpack.c.h.s8.bf16 %v659_v16  ;;  %v1755_v31 = vunpack.c.l.s8.bf16 %v659_v16  ;;  %v635_v16 = vld [vmem:[#allocation3 + $0x9a0] sm:$0xff] }
 0x401   :  { %3821 = vmatpush1.bf16.msra.mxu1 %v1795_v25  ;;  %v3487_v37 = vpop.f32.mrf.mxu0  ;;  %3781 = vmatprep.subr.bf16.mxu0 %v1660_v48  ;;  %v1628_v25 = vunpack.c.l.s8.bf16 %v596_v18  ;;  %v1852_v18 = vunpack.c.l.s8.bf16 %v708_v62 }
 0x402   :  { %v3528_v33 = vpop.f32.mrf.mxu1  ;;  %3822 = vmatprep.subr.bf16.mxu1 %v1788_v46  ;;  %v6402_v30 = vadd.f32 %v3526_v28, %v3486_v32  ;;  %v3488_v53 = vadd.f32 %v3487_v37, %v6397_v7  ;;  %3811 = vmatprep.mubr.bf16.mxu0 %v6208_v5  ;;  %v660_v7 = vld [vmem:[#allocation3 + $0xa68] sm:$0xff]  ;;  %v1748_v32 = vunpack.c.h.s8.bf16 %v652_v26 }
 0x403   :  { %3852 = vmatprep.mubr.bf16.mxu1 %v6210_v6  ;;  %v3489_v43 = vpop.f32.mrf.mxu0  ;;  %v1764_v19 = vunpack.c.h.s8.bf16 %v660_v7  ;;  %v1756_v48 = vunpack.c.l.s8.bf16 %v660_v7  ;;  %v588_v46 = vld [vmem:[#allocation3 + $0x828] sm:$0xff] }
 0x404   :  { %v3530_v39 = vpop.f32.mrf.mxu1  ;;  %v6407_v12 = vadd.f32 %v3528_v33, %v3488_v53  ;;  %3782 = vmatpush1.bf16.msra.mxu0 %v1659_v34  ;;  %v1620_v28 = vunpack.c.h.s8.bf16 %v588_v46  ;;  %v587_v34 = vld [vmem:[#allocation3 + $0x820] sm:$0xff]  ;;  %v636_v7 = vld [vmem:[#allocation3 + $0x9a8] sm:$0xff] }
 0x405   :  { %3823 = vmatpush1.bf16.msra.mxu1 %v1787_v35  ;;  %v3490_v3 = vpop.f32.mrf.mxu0  ;;  %3783 = vmatprep.subr.bf16.mxu0 %v1652_v38  ;;  %v651_v35 = vld [vmem:[#allocation3 + $0xa20] sm:$0xff]  ;;  %v1619_v37 = vunpack.c.h.s8.bf16 %v587_v34  ;;  %v1612_v38 = vunpack.c.l.s8.bf16 %v588_v46  ;;  %v1611_v53 = vunpack.c.l.s8.bf16 %v587_v34  ;;  %v1732_v39 = vunpack.c.h.s8.bf16 %v644_v52 }
 0x406   :  { %v3531_v57 = vpop.f32.mrf.mxu1  ;;  %3824 = vmatprep.subr.bf16.mxu1 %v1780_v49  ;;  %v1747_v33 = vunpack.c.h.s8.bf16 %v651_v35  ;;  %v1740_v49 = vunpack.c.l.s8.bf16 %v652_v26  ;;  %v1739_v43 = vunpack.c.l.s8.bf16 %v651_v35  ;;  %v707_v3 = vld [vmem:[#allocation3 + $0xbe0] sm:$0xff]  ;;  %v628_v26 = vld [vmem:[#allocation3 + $0x968] sm:$0xff] }
 0x407   :  { %v627_v35 = vld [vmem:[#allocation3 + $0x960] sm:$0xff] }
 0x408   :  { %3784 = vmatpush1.bf16.msra.mxu0 %v1651_v40  ;;  %v1860_v40 = vunpack.c.h.s8.bf16 %v708_v62  ;;  %v620_v62 = vld [vmem:[#allocation3 + $0x928] sm:$0xff] }
 0x409   :  { %3825 = vmatpush1.bf16.msra.mxu1 %v1779_v41  ;;  %3785 = vmatprep.subr.bf16.mxu0 %v1644_v4  ;;  %v643_v41 = vld [vmem:[#allocation3 + $0x9e0] sm:$0xff]  ;;  %v1859_v4 = vunpack.c.h.s8.bf16 %v707_v3 }
 0x40a   :  { %3826 = vmatprep.subr.bf16.mxu1 %v1772_v8  ;;  %v1731_v57 = vunpack.c.h.s8.bf16 %v643_v41  ;;  %v1724_v8 = vunpack.c.l.s8.bf16 %v644_v52 }
 0x40c   :  { %3786 = vmatpush1.bf16.msra.mxu0 %v1643_v44  ;;  %v700_v44 = vld [vmem:[#allocation3 + $0xba8] sm:$0xff] }
 0x40d   :  { %3827 = vmatpush1.bf16.msra.mxu1 %v1771_v15  ;;  %3787 = vmatprep.subr.bf16.mxu0 %v1636_v17  ;;  %v1723_v15 = vunpack.c.l.s8.bf16 %v643_v41  ;;  %v1851_v17 = vunpack.c.l.s8.bf16 %v707_v3  ;;  %v1844_v24 = vunpack.c.h.s8.bf16 %v700_v44  ;;  %v1836_v46 = vunpack.c.l.s8.bf16 %v700_v44  ;;  %v619_v3 = vld [vmem:[#allocation3 + $0x920] sm:$0xff]  ;;  %v740_v44 = vld [vmem:[#allocation3 + $0xce8] sm:$0xff] }
 0x40e   :  { %3828 = vmatprep.subr.bf16.mxu1 %v1764_v19  ;;  %v1716_v19 = vunpack.c.h.s8.bf16 %v636_v7 }
 0x410   :  { %3788 = vmatpush1.bf16.msra.mxu0 %v1635_v20  ;;  %v699_v20 = vld [vmem:[#allocation3 + $0xba0] sm:$0xff] }
 0x411   :  { %3829 = vmatpush1.bf16.msra.mxu1 %v1763_v23  ;;  %3789 = vmatprep.subr.bf16.mxu0 %v1628_v25  ;;  %v1715_v23 = vunpack.c.h.s8.bf16 %v635_v16  ;;  %v1843_v25 = vunpack.c.h.s8.bf16 %v699_v20 }
 0x412   :  { %3830 = vmatprep.subr.bf16.mxu1 %v1756_v48  ;;  %v1708_v48 = vunpack.c.l.s8.bf16 %v636_v7 }
 0x414   :  { %3790 = vmatpush1.bf16.msra.mxu0 %v1627_v29  ;;  %v692_v29 = vld [vmem:[#allocation3 + $0xb68] sm:$0xff] }
 0x415   :  { %3831 = vmatpush1.bf16.msra.mxu1 %v1755_v31  ;;  %3791 = vmatprep.subr.bf16.mxu0 %v1620_v28  ;;  %v1707_v31 = vunpack.c.l.s8.bf16 %v635_v16  ;;  %v1835_v28 = vunpack.c.l.s8.bf16 %v699_v20  ;;  %v1828_v34 = vunpack.c.h.s8.bf16 %v692_v29  ;;  %v1820_v52 = vunpack.c.l.s8.bf16 %v692_v29  ;;  %v739_v20 = vld [vmem:[#allocation3 + $0xce0] sm:$0xff]  ;;  %v732_v29 = vld [vmem:[#allocation3 + $0xca8] sm:$0xff] }
 0x416   :  { %3832 = vmatprep.subr.bf16.mxu1 %v1748_v32  ;;  %v1700_v32 = vunpack.c.h.s8.bf16 %v628_v26 }
 0x418   :  { %3792 = vmatpush1.bf16.msra.mxu0 %v1619_v37  ;;  %v691_v37 = vld [vmem:[#allocation3 + $0xb60] sm:$0xff] }
 0x419   :  { %3833 = vmatpush1.bf16.msra.mxu1 %v1747_v33  ;;  %3793 = vmatprep.subr.bf16.mxu0 %v1612_v38  ;;  %v1699_v33 = vunpack.c.h.s8.bf16 %v627_v35  ;;  %v1827_v38 = vunpack.c.h.s8.bf16 %v691_v37 }
 0x41a   :  { %3834 = vmatprep.subr.bf16.mxu1 %v1740_v49  ;;  %v1692_v49 = vunpack.c.l.s8.bf16 %v628_v26 }
 0x41c   :  { %3794 = vmatpush1.bf16.msra.mxu0 %v1611_v53  ;;  %v684_v53 = vld [vmem:[#allocation3 + $0xb28] sm:$0xff] }
 0x41d   :  { %3835 = vmatpush1.bf16.msra.mxu1 %v1739_v43  ;;  %3795 = vmatprep.subr.bf16.mxu0 %v1732_v39  ;;  %v1691_v43 = vunpack.c.l.s8.bf16 %v627_v35  ;;  %v1819_v39 = vunpack.c.l.s8.bf16 %v691_v37  ;;  %v1812_v41 = vunpack.c.h.s8.bf16 %v684_v53  ;;  %v1804_v7 = vunpack.c.l.s8.bf16 %v684_v53  ;;  %v795_v53 = vld [vmem:[#allocation3 + $0xea0] sm:$0xff] }
 0x41e   :  { %3836 = vmatprep.subr.bf16.mxu1 %v1860_v40  ;;  %v1684_v40 = vunpack.c.h.s8.bf16 %v620_v62  ;;  %v1915_v35 = vunpack.c.l.s8.bf16 %v739_v20 }
 0x420   :  { %3796 = vmatpush2.bf16.msra.mxu0 %v1731_v57  ;;  %v683_v57 = vld [vmem:[#allocation3 + $0xb20] sm:$0xff] }
 0x421   :  { %3837 = vmatpush2.bf16.msra.mxu1 %v1859_v4  ;;  %3797 = vmatprep.subr.bf16.mxu0 %v1724_v8  ;;  %v1683_v4 = vunpack.c.h.s8.bf16 %v619_v3  ;;  %v1811_v8 = vunpack.c.h.s8.bf16 %v683_v57 }
 0x422   :  { %3838 = vmatprep.subr.bf16.mxu1 %v1852_v18  ;;  %v1676_v18 = vunpack.c.l.s8.bf16 %v620_v62  ;;  %v731_v62 = vld [vmem:[#allocation3 + $0xca0] sm:$0xff] }
 0x424   :  { %3798 = vmatpush2.bf16.msra.mxu0 %v1723_v15  ;;  %v804_v15 = vld [vmem:[#allocation3 + $0xee8] sm:$0xff] }
 0x425   :  { %3839 = vmatpush2.bf16.msra.mxu1 %v1851_v17  ;;  %3799 = vmatprep.subr.bf16.mxu0 %v1716_v19  ;;  %v1675_v17 = vunpack.c.l.s8.bf16 %v619_v3  ;;  %v1803_v19 = vunpack.c.l.s8.bf16 %v683_v57  ;;  %v2052_v16 = vunpack.c.h.s8.bf16 %v804_v15  ;;  %v2044_v26 = vunpack.c.l.s8.bf16 %v804_v15 }
 0x426   :  { %3840 = vmatprep.subr.bf16.mxu1 %v1844_v24  ;;  %v1924_v24 = vunpack.c.h.s8.bf16 %v740_v44  ;;  %v1907_v3 = vunpack.c.h.s8.bf16 %v731_v62  ;;  %v2035_v57 = vunpack.c.h.s8.bf16 %v795_v53  ;;  %v1899_v15 = vunpack.c.l.s8.bf16 %v731_v62  ;;  %v772_v62 = vld [vmem:[#allocation3 + $0xde8] sm:$0xff] }
 0x428   :  { %3800 = vmatpush2.bf16.msra.mxu0 %v1715_v23  ;;  %v803_v23 = vld [vmem:[#allocation3 + $0xee0] sm:$0xff] }
 0x429   :  { %3841 = vmatpush2.bf16.msra.mxu1 %v1843_v25  ;;  %3801 = vmatprep.subr.bf16.mxu0 %v1708_v48  ;;  %v1923_v25 = vunpack.c.h.s8.bf16 %v739_v20  ;;  %v2051_v48 = vunpack.c.h.s8.bf16 %v803_v23  ;;  %v2043_v37 = vunpack.c.l.s8.bf16 %v803_v23  ;;  %v787_v20 = vld [vmem:[#allocation3 + $0xe60] sm:$0xff] }
 0x42a   :  { %3842 = vmatprep.subr.bf16.mxu1 %v1836_v46  ;;  %v1916_v46 = vunpack.c.l.s8.bf16 %v740_v44  ;;  %v724_v44 = vld [vmem:[#allocation3 + $0xc68] sm:$0xff] }
 0x42c   :  { %3802 = vmatpush2.bf16.msra.mxu0 %v1707_v31  ;;  %v796_v31 = vld [vmem:[#allocation3 + $0xea8] sm:$0xff] }
 0x42d   :  { %3843 = vmatpush2.bf16.msra.mxu1 %v1835_v28  ;;  %3803 = vmatprep.subr.bf16.mxu0 %v1700_v32 }
 0x42e   :  { %3844 = vmatprep.subr.bf16.mxu1 %v1828_v34 }
 0x430   :  { %3804 = vmatpush2.bf16.msra.mxu0 %v1699_v33 }
 0x431   :  { %3845 = vmatpush2.bf16.msra.mxu1 %v1827_v38  ;;  %3805 = vmatprep.subr.bf16.mxu0 %v1692_v49  ;;  %v1908_v49 = vunpack.c.h.s8.bf16 %v732_v29 }
 0x432   :  { %3846 = vmatprep.subr.bf16.mxu1 %v1820_v52  ;;  %v2036_v52 = vunpack.c.h.s8.bf16 %v796_v31 }
 0x434   :  { %3806 = vmatpush2.bf16.msra.mxu0 %v1691_v43 }
 0x435   :  { %3847 = vmatpush2.bf16.msra.mxu1 %v1819_v39  ;;  %3807 = vmatprep.subr.bf16.mxu0 %v1684_v40 }
 0x436   :  { %3848 = vmatprep.subr.bf16.mxu1 %v1812_v41 }
 0x438   :  { %3808 = vmatpush2.bf16.msra.mxu0 %v1683_v4 }
 0x439   :  { %3849 = vmatpush2.bf16.msra.mxu1 %v1811_v8  ;;  %3809 = vmatprep.subr.bf16.mxu0 %v1676_v18  ;;  %v1900_v18 = vunpack.c.l.s8.bf16 %v732_v29  ;;  %v780_v29 = vld [vmem:[#allocation3 + $0xe28] sm:$0xff] }
 0x43a   :  { %3850 = vmatprep.subr.bf16.mxu1 %v1804_v7  ;;  %v2028_v7 = vunpack.c.l.s8.bf16 %v796_v31 }
 0x43c   :  { %3810 = vmatpush2.bf16.msra.mxu0 %v1675_v17  ;;  %v2027_v17 = vunpack.c.l.s8.bf16 %v795_v53  ;;  %v836_v53 = vld [vmem:[#allocation3 + $0xfe8] sm:$0xff] }
 0x43d   :  { %3851 = vmatpush2.bf16.msra.mxu1 %v1803_v19  ;;  %3861 = vmatprep.subr.bf16.mxu0 %v1924_v24  ;;  %v1892_v19 = vunpack.c.h.s8.bf16 %v724_v44 }
 0x43e   :  { %3902 = vmatprep.subr.bf16.mxu1 %v2052_v16  ;;  %v723_v16 = vld [vmem:[#allocation3 + $0xc60] sm:$0xff] }
 0x43f   :  { %v3567_v28 = vpop.f32.mrf.mxu0  ;;  %3812 = vmatmul.mubr.bf16.vlgmr.msra.gmra.mxu0 %v6231_v63  ;;  %v1891_v23 = vunpack.c.h.s8.bf16 %v723_v16  ;;  %v1883_v31 = vunpack.c.l.s8.bf16 %v723_v16 }
 0x440   :  { %v3608_v32 = vpop.f32.mrf.mxu1  ;;  %3853 = vmatmul.mubr.bf16.vlgmr.msra.gmra.mxu1 %v6235_v0  ;;  %v3568_v34 = vadd.f32 %v3567_v28, %v6402_v30  ;;  %3862 = vmatpush1.bf16.msra.mxu0 %v1923_v25  ;;  %v2019_v25 = vunpack.c.h.s8.bf16 %v787_v20  ;;  %v2011_v28 = vunpack.c.l.s8.bf16 %v787_v20  ;;  %v763_v20 = vld [vmem:[#allocation3 + $0xda0] sm:$0xff] }
 0x441   :  { %3903 = vmatpush1.bf16.msra.mxu1 %v2051_v48  ;;  %v3569_v33 = vpop.f32.mrf.mxu0  ;;  %3863 = vmatprep.subr.bf16.mxu0 %v1916_v46  ;;  %v1884_v48 = vunpack.c.l.s8.bf16 %v724_v44  ;;  %v2108_v44 = vunpack.c.l.s8.bf16 %v836_v53 }
 0x442   :  { %v3610_v38 = vpop.f32.mrf.mxu1  ;;  %3904 = vmatprep.subr.bf16.mxu1 %v2044_v26  ;;  %v6412_v43 = vadd.f32 %v3608_v32, %v3568_v34  ;;  %v3570_v39 = vadd.f32 %v3569_v33, %v6407_v12  ;;  %3893 = vmatprep.mubr.bf16.mxu0 %v6237_v42  ;;  %v788_v12 = vld [vmem:[#allocation3 + $0xe68] sm:$0xff]  ;;  %v2004_v34 = vunpack.c.h.s8.bf16 %v780_v29 }
 0x443   :  { %3934 = vmatprep.mubr.bf16.mxu1 %v6239_v47  ;;  %v3571_v30 = vpop.f32.mrf.mxu0  ;;  %v2020_v24 = vunpack.c.h.s8.bf16 %v788_v12  ;;  %v2012_v46 = vunpack.c.l.s8.bf16 %v788_v12  ;;  %v716_v26 = vld [vmem:[#allocation3 + $0xc28] sm:$0xff] }
 0x444   :  { %v3612_v40 = vpop.f32.mrf.mxu1  ;;  %v6417_v41 = vadd.f32 %v3610_v38, %v3570_v39  ;;  %3864 = vmatpush1.bf16.msra.mxu0 %v1915_v35  ;;  %v1876_v32 = vunpack.c.h.s8.bf16 %v716_v26  ;;  %v715_v35 = vld [vmem:[#allocation3 + $0xc20] sm:$0xff]  ;;  %v764_v12 = vld [vmem:[#allocation3 + $0xda8] sm:$0xff] }
 0x445   :  { %3905 = vmatpush1.bf16.msra.mxu1 %v2043_v37  ;;  %v3572_v4 = vpop.f32.mrf.mxu0  ;;  %3865 = vmatprep.subr.bf16.mxu0 %v1908_v49  ;;  %v779_v37 = vld [vmem:[#allocation3 + $0xe20] sm:$0xff]  ;;  %v1875_v33 = vunpack.c.h.s8.bf16 %v715_v35  ;;  %v1868_v49 = vunpack.c.l.s8.bf16 %v716_v26  ;;  %v1867_v39 = vunpack.c.l.s8.bf16 %v715_v35  ;;  %v1988_v40 = vunpack.c.h.s8.bf16 %v772_v62 }
 0x446   :  { %v3613_v8 = vpop.f32.mrf.mxu1  ;;  %3906 = vmatprep.subr.bf16.mxu1 %v2036_v52  ;;  %v2003_v38 = vunpack.c.h.s8.bf16 %v779_v37  ;;  %v1996_v52 = vunpack.c.l.s8.bf16 %v780_v29  ;;  %v1995_v30 = vunpack.c.l.s8.bf16 %v779_v37  ;;  %v835_v4 = vld [vmem:[#allocation3 + $0xfe0] sm:$0xff]  ;;  %v756_v29 = vld [vmem:[#allocation3 + $0xd68] sm:$0xff] }
 0x447   :  { %v755_v37 = vld [vmem:[#allocation3 + $0xd60] sm:$0xff] }
 0x448   :  { %3866 = vmatpush1.bf16.msra.mxu0 %v1907_v3  ;;  %v2116_v3 = vunpack.c.h.s8.bf16 %v836_v53  ;;  %v748_v53 = vld [vmem:[#allocation3 + $0xd28] sm:$0xff] }
 0x449   :  { %3907 = vmatpush1.bf16.msra.mxu1 %v2035_v57  ;;  %3867 = vmatprep.subr.bf16.mxu0 %v1900_v18  ;;  %v771_v57 = vld [vmem:[#allocation3 + $0xde0] sm:$0xff]  ;;  %v2115_v18 = vunpack.c.h.s8.bf16 %v835_v4 }
 0x44a   :  { %3908 = vmatprep.subr.bf16.mxu1 %v2028_v7  ;;  %v1987_v8 = vunpack.c.h.s8.bf16 %v771_v57  ;;  %v1980_v7 = vunpack.c.l.s8.bf16 %v772_v62 }
 0x44c   :  { %3868 = vmatpush1.bf16.msra.mxu0 %v1899_v15  ;;  %v828_v15 = vld [vmem:[#allocation3 + $0xfa8] sm:$0xff] }
 0x44d   :  { %3909 = vmatpush1.bf16.msra.mxu1 %v2027_v17  ;;  %3869 = vmatprep.subr.bf16.mxu0 %v1892_v19  ;;  %v1979_v17 = vunpack.c.l.s8.bf16 %v771_v57  ;;  %v2107_v19 = vunpack.c.l.s8.bf16 %v835_v4  ;;  %v2100_v16 = vunpack.c.h.s8.bf16 %v828_v15  ;;  %v2092_v26 = vunpack.c.l.s8.bf16 %v828_v15  ;;  %v747_v4 = vld [vmem:[#allocation3 + $0xd20] sm:$0xff]  ;;  %v868_v15 = vld [vmem:[#allocation3 + $0x10e8] sm:$0xff] }
 0x44e   :  { %3910 = vmatprep.subr.bf16.mxu1 %v2020_v24  ;;  %v1972_v24 = vunpack.c.h.s8.bf16 %v764_v12 }
 0x450   :  { %3870 = vmatpush1.bf16.msra.mxu0 %v1891_v23  ;;  %v827_v23 = vld [vmem:[#allocation3 + $0xfa0] sm:$0xff] }
 0x451   :  { %3911 = vmatpush1.bf16.msra.mxu1 %v2019_v25  ;;  %3871 = vmatprep.subr.bf16.mxu0 %v1884_v48  ;;  %v1971_v25 = vunpack.c.h.s8.bf16 %v763_v20  ;;  %v2099_v48 = vunpack.c.h.s8.bf16 %v827_v23 }
 0x452   :  { %3912 = vmatprep.subr.bf16.mxu1 %v2012_v46  ;;  %v1964_v46 = vunpack.c.l.s8.bf16 %v764_v12 }
 0x454   :  { %3872 = vmatpush1.bf16.msra.mxu0 %v1883_v31  ;;  %v820_v31 = vld [vmem:[#allocation3 + $0xf68] sm:$0xff] }
 0x455   :  { %3913 = vmatpush1.bf16.msra.mxu1 %v2011_v28  ;;  %3873 = vmatprep.subr.bf16.mxu0 %v1876_v32  ;;  %v1963_v28 = vunpack.c.l.s8.bf16 %v763_v20  ;;  %v2091_v32 = vunpack.c.l.s8.bf16 %v827_v23  ;;  %v2084_v35 = vunpack.c.h.s8.bf16 %v820_v31  ;;  %v2076_v62 = vunpack.c.l.s8.bf16 %v820_v31  ;;  %v867_v23 = vld [vmem:[#allocation3 + $0x10e0] sm:$0xff]  ;;  %v860_v31 = vld [vmem:[#allocation3 + $0x10a8] sm:$0xff] }
 0x456   :  { %3914 = vmatprep.subr.bf16.mxu1 %v2004_v34  ;;  %v1956_v34 = vunpack.c.h.s8.bf16 %v756_v29 }
 0x458   :  { %3874 = vmatpush1.bf16.msra.mxu0 %v1875_v33  ;;  %v819_v33 = vld [vmem:[#allocation3 + $0xf60] sm:$0xff] }
 0x459   :  { %3915 = vmatpush1.bf16.msra.mxu1 %v2003_v38  ;;  %3875 = vmatprep.subr.bf16.mxu0 %v1868_v49  ;;  %v1955_v38 = vunpack.c.h.s8.bf16 %v755_v37  ;;  %v2083_v49 = vunpack.c.h.s8.bf16 %v819_v33 }
 0x45a   :  { %3916 = vmatprep.subr.bf16.mxu1 %v1996_v52  ;;  %v1948_v52 = vunpack.c.l.s8.bf16 %v756_v29 }
 0x45c   :  { %3876 = vmatpush1.bf16.msra.mxu0 %v1867_v39  ;;  %v812_v39 = vld [vmem:[#allocation3 + $0xf28] sm:$0xff] }
 0x45d   :  { %3917 = vmatpush1.bf16.msra.mxu1 %v1995_v30  ;;  %3877 = vmatprep.subr.bf16.mxu0 %v1988_v40  ;;  %v1947_v30 = vunpack.c.l.s8.bf16 %v755_v37  ;;  %v2075_v40 = vunpack.c.l.s8.bf16 %v819_v33  ;;  %v2068_v57 = vunpack.c.h.s8.bf16 %v812_v39  ;;  %v2060_v12 = vunpack.c.l.s8.bf16 %v812_v39  ;;  %v923_v39 = vld [vmem:[#allocation3 + $0x12a0] sm:$0xff] }
 0x45e   :  { %3918 = vmatprep.subr.bf16.mxu1 %v2116_v3  ;;  %v1940_v3 = vunpack.c.h.s8.bf16 %v748_v53  ;;  %v2171_v37 = vunpack.c.l.s8.bf16 %v867_v23 }
 0x460   :  { %3878 = vmatpush2.bf16.msra.mxu0 %v1987_v8  ;;  %v811_v8 = vld [vmem:[#allocation3 + $0xf20] sm:$0xff] }
 0x461   :  { %3919 = vmatpush2.bf16.msra.mxu1 %v2115_v18  ;;  %3879 = vmatprep.subr.bf16.mxu0 %v1980_v7  ;;  %v1939_v18 = vunpack.c.h.s8.bf16 %v747_v4  ;;  %v2067_v7 = vunpack.c.h.s8.bf16 %v811_v8 }
 0x462   :  { %3920 = vmatprep.subr.bf16.mxu1 %v2108_v44  ;;  %v1932_v44 = vunpack.c.l.s8.bf16 %v748_v53  ;;  %v859_v53 = vld [vmem:[#allocation3 + $0x10a0] sm:$0xff] }
 0x464   :  { %3880 = vmatpush2.bf16.msra.mxu0 %v1979_v17  ;;  %v932_v17 = vld [vmem:[#allocation3 + $0x12e8] sm:$0xff] }
 0x465   :  { %3921 = vmatpush2.bf16.msra.mxu1 %v2107_v19  ;;  %3881 = vmatprep.subr.bf16.mxu0 %v1972_v24  ;;  %v1931_v19 = vunpack.c.l.s8.bf16 %v747_v4  ;;  %v2059_v24 = vunpack.c.l.s8.bf16 %v811_v8  ;;  %v2308_v20 = vunpack.c.h.s8.bf16 %v932_v17  ;;  %v2300_v29 = vunpack.c.l.s8.bf16 %v932_v17 }
 0x466   :  { %3922 = vmatprep.subr.bf16.mxu1 %v2100_v16  ;;  %v2180_v16 = vunpack.c.h.s8.bf16 %v868_v15  ;;  %v2291_v4 = vunpack.c.h.s8.bf16 %v923_v39  ;;  %v2155_v17 = vunpack.c.l.s8.bf16 %v859_v53 }
 0x468   :  { %3882 = vmatpush2.bf16.msra.mxu0 %v1971_v25  ;;  %v931_v25 = vld [vmem:[#allocation3 + $0x12e0] sm:$0xff] }
 0x469   :  { %3923 = vmatpush2.bf16.msra.mxu1 %v2099_v48  ;;  %3883 = vmatprep.subr.bf16.mxu0 %v1964_v46  ;;  %v2179_v48 = vunpack.c.h.s8.bf16 %v867_v23  ;;  %v2307_v46 = vunpack.c.h.s8.bf16 %v931_v25  ;;  %v2299_v33 = vunpack.c.l.s8.bf16 %v931_v25  ;;  %v915_v23 = vld [vmem:[#allocation3 + $0x1260] sm:$0xff] }
 0x46a   :  { %3924 = vmatprep.subr.bf16.mxu1 %v2092_v26  ;;  %v2172_v26 = vunpack.c.l.s8.bf16 %v868_v15  ;;  %v916_v15 = vld [vmem:[#allocation3 + $0x1268] sm:$0xff] }
 0x46c   :  { %3884 = vmatpush2.bf16.msra.mxu0 %v1963_v28  ;;  %v924_v28 = vld [vmem:[#allocation3 + $0x12a8] sm:$0xff] }
 0x46d   :  { %3925 = vmatpush2.bf16.msra.mxu1 %v2091_v32  ;;  %3885 = vmatprep.subr.bf16.mxu0 %v1956_v34 }
 0x46e   :  { %3926 = vmatprep.subr.bf16.mxu1 %v2084_v35 }
 0x470   :  { %3886 = vmatpush2.bf16.msra.mxu0 %v1955_v38 }
 0x471   :  { %3927 = vmatpush2.bf16.msra.mxu1 %v2083_v49  ;;  %3887 = vmatprep.subr.bf16.mxu0 %v1948_v52  ;;  %v2164_v52 = vunpack.c.h.s8.bf16 %v860_v31 }
 0x472   :  { %3928 = vmatprep.subr.bf16.mxu1 %v2076_v62  ;;  %v2292_v62 = vunpack.c.h.s8.bf16 %v924_v28 }
 0x474   :  { %3888 = vmatpush2.bf16.msra.mxu0 %v1947_v30 }
 0x475   :  { %3929 = vmatpush2.bf16.msra.mxu1 %v2075_v40  ;;  %3889 = vmatprep.subr.bf16.mxu0 %v1940_v3 }
 0x476   :  { %3930 = vmatprep.subr.bf16.mxu1 %v2068_v57  ;;  %v2163_v57 = vunpack.c.h.s8.bf16 %v859_v53 }
 0x478   :  { %3890 = vmatpush2.bf16.msra.mxu0 %v1939_v18 }
 0x479   :  { %3931 = vmatpush2.bf16.msra.mxu1 %v2067_v7  ;;  %3891 = vmatprep.subr.bf16.mxu0 %v1932_v44  ;;  %v2156_v7 = vunpack.c.l.s8.bf16 %v860_v31  ;;  %v2284_v44 = vunpack.c.l.s8.bf16 %v924_v28  ;;  %v908_v31 = vld [vmem:[#allocation3 + $0x1228] sm:$0xff] }
 0x47a   :  { %3932 = vmatprep.subr.bf16.mxu1 %v2060_v12  ;;  %v852_v12 = vld [vmem:[#allocation3 + $0x1068] sm:$0xff]  ;;  %v2252_v53 = vunpack.c.l.s8.bf16 %v908_v31 }
 0x47c   :  { %3892 = vmatpush2.bf16.msra.mxu0 %v1931_v19  ;;  %v2283_v19 = vunpack.c.l.s8.bf16 %v923_v39  ;;  %v900_v39 = vld [vmem:[#allocation3 + $0x11e8] sm:$0xff] }
 0x47d   :  { %3933 = vmatpush2.bf16.msra.mxu1 %v2059_v24  ;;  %3943 = vmatprep.subr.bf16.mxu0 %v2180_v16  ;;  %v2148_v24 = vunpack.c.h.s8.bf16 %v852_v12  ;;  %v2276_v16 = vunpack.c.h.s8.bf16 %v916_v15 }
 0x47e   :  { %3984 = vmatprep.subr.bf16.mxu1 %v2308_v20  ;;  %v851_v20 = vld [vmem:[#allocation3 + $0x1060] sm:$0xff] }
 0x47f   :  { %v3649_v32 = vpop.f32.mrf.mxu0  ;;  %3894 = vmatmul.mubr.bf16.vlgmr.msra.gmra.mxu0 %v6260_v13  ;;  %v2147_v25 = vunpack.c.h.s8.bf16 %v851_v20  ;;  %v2139_v28 = vunpack.c.l.s8.bf16 %v851_v20 }
 0x480   :  { %v3690_v34 = vpop.f32.mrf.mxu1  ;;  %3935 = vmatmul.mubr.bf16.vlgmr.msra.gmra.mxu1 %v6264_v14  ;;  %3944 = vmatpush1.bf16.msra.mxu0 %v2179_v48  ;;  %v2275_v48 = vunpack.c.h.s8.bf16 %v915_v23 }
 0x481   :  { %v6421_v35 = vadd.f32 %v3690_v34, %v3649_v32  ;;  %3985 = vmatpush1.bf16.msra.mxu1 %v2307_v46  ;;  %v3651_v38 = vpop.f32.mrf.mxu0  ;;  %3945 = vmatprep.subr.bf16.mxu0 %v2172_v26  ;;  %v2140_v46 = vunpack.c.l.s8.bf16 %v852_v12  ;;  %v2268_v26 = vunpack.c.l.s8.bf16 %v916_v15  ;;  %v2267_v32 = vunpack.c.l.s8.bf16 %v915_v23 }
 0x482   :  { %v3692_v49 = vpop.f32.mrf.mxu1  ;;  %3986 = vmatprep.subr.bf16.mxu1 %v2300_v29  ;;  %3975 = vmatprep.mubr.bf16.mxu0 %v6266_v21  ;;  %v844_v29 = vld [vmem:[#allocation3 + $0x1028] sm:$0xff]  ;;  %v2236_v15 = vunpack.c.l.s8.bf16 %v900_v39 }
 0x483   :  { %v6423_v30 = vadd.f32 %v3692_v49, %v3651_v38  ;;  %4016 = vmatprep.mubr.bf16.mxu1 %v6268_v22  ;;  %v3653_v40 = vpop.f32.mrf.mxu0  ;;  %v2132_v34 = vunpack.c.h.s8.bf16 %v844_v29  ;;  %v907_v38 = vld [vmem:[#allocation3 + $0x1220] sm:$0xff] }
 0x484   :  { %v3694_v3 = vpop.f32.mrf.mxu1  ;;  %3946 = vmatpush1.bf16.msra.mxu0 %v2171_v37  ;;  %v2260_v37 = vunpack.c.h.s8.bf16 %v908_v31  ;;  %v964_v40 = vld [vmem:[#allocation3 + $0x13e8] sm:$0xff] }
 0x485   :  { %3987 = vmatpush1.bf16.msra.mxu1 %v2299_v33  ;;  %v3654_v8 = vpop.f32.mrf.mxu0  ;;  %3947 = vmatprep.subr.bf16.mxu0 %v2164_v52  ;;  %v843_v33 = vld [vmem:[#allocation3 + $0x1020] sm:$0xff]  ;;  %v2259_v52 = vunpack.c.h.s8.bf16 %v907_v38 }
 0x486   :  { %v3695_v18 = vpop.f32.mrf.mxu1  ;;  %3988 = vmatprep.subr.bf16.mxu1 %v2292_v62  ;;  %v2131_v49 = vunpack.c.h.s8.bf16 %v843_v33  ;;  %v2124_v62 = vunpack.c.l.s8.bf16 %v844_v29  ;;  %v2123_v3 = vunpack.c.l.s8.bf16 %v843_v33  ;;  %v2372_v8 = vunpack.c.h.s8.bf16 %v964_v40 }
 0x487   :  { %v899_v18 = vld [vmem:[#allocation3 + $0x11e0] sm:$0xff] }
 0x488   :  { %3948 = vmatpush1.bf16.msra.mxu0 %v2163_v57  ;;  %v2251_v57 = vunpack.c.l.s8.bf16 %v907_v38 }
 0x489   :  { %3989 = vmatpush1.bf16.msra.mxu1 %v2291_v4  ;;  %3949 = vmatprep.subr.bf16.mxu0 %v2156_v7  ;;  %v2244_v4 = vunpack.c.h.s8.bf16 %v900_v39  ;;  %v963_v7 = vld [vmem:[#allocation3 + $0x13e0] sm:$0xff] }
 0x48a   :  { %3990 = vmatprep.subr.bf16.mxu1 %v2284_v44  ;;  %v2243_v44 = vunpack.c.h.s8.bf16 %v899_v18  ;;  %v2371_v12 = vunpack.c.h.s8.bf16 %v963_v7  ;;  %v2363_v20 = vunpack.c.l.s8.bf16 %v963_v7 }
 0x48c   :  { %3950 = vmatpush1.bf16.msra.mxu0 %v2155_v17  ;;  %v2364_v17 = vunpack.c.l.s8.bf16 %v964_v40 }
 0x48d   :  { %3991 = vmatpush1.bf16.msra.mxu1 %v2283_v19  ;;  %3951 = vmatprep.subr.bf16.mxu0 %v2148_v24  ;;  %v892_v19 = vld [vmem:[#allocation3 + $0x11a8] sm:$0xff] }
 0x48e   :  { %3992 = vmatprep.subr.bf16.mxu1 %v2276_v16  ;;  %v956_v24 = vld [vmem:[#allocation3 + $0x13a8] sm:$0xff]  ;;  %v2235_v16 = vunpack.c.l.s8.bf16 %v899_v18  ;;  %v2228_v23 = vunpack.c.h.s8.bf16 %v892_v19  ;;  %v2220_v31 = vunpack.c.l.s8.bf16 %v892_v19 }
 0x490   :  { %3952 = vmatpush1.bf16.msra.mxu0 %v2147_v25  ;;  %v2356_v25 = vunpack.c.h.s8.bf16 %v956_v24 }
 0x491   :  { %3993 = vmatpush1.bf16.msra.mxu1 %v2275_v48  ;;  %3953 = vmatprep.subr.bf16.mxu0 %v2140_v46  ;;  %v891_v48 = vld [vmem:[#allocation3 + $0x11a0] sm:$0xff] }
 0x492   :  { %3994 = vmatprep.subr.bf16.mxu1 %v2268_v26  ;;  %v955_v46 = vld [vmem:[#allocation3 + $0x13a0] sm:$0xff]  ;;  %v2227_v26 = vunpack.c.h.s8.bf16 %v891_v48 }
 0x493   :  { %v2355_v29 = vunpack.c.h.s8.bf16 %v955_v46  ;;  %v2347_v33 = vunpack.c.l.s8.bf16 %v955_v46 }
 0x494   :  { %3954 = vmatpush1.bf16.msra.mxu0 %v2139_v28  ;;  %v2348_v28 = vunpack.c.l.s8.bf16 %v956_v24 }
 0x495   :  { %3995 = vmatpush1.bf16.msra.mxu1 %v2267_v32  ;;  %3955 = vmatprep.subr.bf16.mxu0 %v2132_v34  ;;  %v884_v32 = vld [vmem:[#allocation3 + $0x1168] sm:$0xff] }
 0x496   :  { %3996 = vmatprep.subr.bf16.mxu1 %v2260_v37  ;;  %v948_v34 = vld [vmem:[#allocation3 + $0x1368] sm:$0xff]  ;;  %v2219_v37 = vunpack.c.l.s8.bf16 %v891_v48  ;;  %v2212_v38 = vunpack.c.h.s8.bf16 %v884_v32  ;;  %v2204_v40 = vunpack.c.l.s8.bf16 %v884_v32 }
 0x498   :  { %3956 = vmatpush1.bf16.msra.mxu0 %v2131_v49  ;;  %v2340_v49 = vunpack.c.h.s8.bf16 %v948_v34 }
 0x499   :  { %3997 = vmatpush1.bf16.msra.mxu1 %v2259_v52  ;;  %3957 = vmatprep.subr.bf16.mxu0 %v2124_v62  ;;  %v883_v52 = vld [vmem:[#allocation3 + $0x1160] sm:$0xff] }
 0x49a   :  { %3998 = vmatprep.subr.bf16.mxu1 %v2252_v53  ;;  %v947_v62 = vld [vmem:[#allocation3 + $0x1360] sm:$0xff]  ;;  %v2211_v53 = vunpack.c.h.s8.bf16 %v883_v52 }
 0x49b   :  { %v2339_v39 = vunpack.c.h.s8.bf16 %v947_v62  ;;  %v2331_v18 = vunpack.c.l.s8.bf16 %v947_v62 }
 0x49c   :  { %3958 = vmatpush1.bf16.msra.mxu0 %v2123_v3  ;;  %v2332_v3 = vunpack.c.l.s8.bf16 %v948_v34 }
 0x49d   :  { %3999 = vmatpush1.bf16.msra.mxu1 %v2251_v57  ;;  %3959 = vmatprep.subr.bf16.mxu0 %v2244_v4  ;;  %v876_v57 = vld [vmem:[#allocation3 + $0x1128] sm:$0xff] }
 0x49e   :  { %4000 = vmatprep.subr.bf16.mxu1 %v2372_v8  ;;  %v940_v4 = vld [vmem:[#allocation3 + $0x1328] sm:$0xff]  ;;  %v2203_v8 = vunpack.c.l.s8.bf16 %v883_v52  ;;  %v2196_v7 = vunpack.c.h.s8.bf16 %v876_v57  ;;  %v2188_v24 = vunpack.c.l.s8.bf16 %v876_v57 }
 0x4a0   :  { %3960 = vmatpush2.bf16.msra.mxu0 %v2243_v44  ;;  %v2324_v44 = vunpack.c.h.s8.bf16 %v940_v4 }
 0x4a1   :  { %4001 = vmatpush2.bf16.msra.mxu1 %v2371_v12  ;;  %3961 = vmatprep.subr.bf16.mxu0 %v2236_v15  ;;  %v875_v12 = vld [vmem:[#allocation3 + $0x1120] sm:$0xff] }
 0x4a2   :  { %4002 = vmatprep.subr.bf16.mxu1 %v2364_v17  ;;  %v939_v15 = vld [vmem:[#allocation3 + $0x1320] sm:$0xff]  ;;  %v2195_v17 = vunpack.c.h.s8.bf16 %v875_v12 }
 0x4a3   :  { %v2323_v19 = vunpack.c.h.s8.bf16 %v939_v15  ;;  %v2315_v48 = vunpack.c.l.s8.bf16 %v939_v15 }
 0x4a4   :  { %3962 = vmatpush2.bf16.msra.mxu0 %v2235_v16  ;;  %v2316_v16 = vunpack.c.l.s8.bf16 %v940_v4 }
 0x4a5   :  { %4003 = vmatpush2.bf16.msra.mxu1 %v2363_v20  ;;  %3963 = vmatprep.subr.bf16.mxu0 %v2228_v23  ;;  %v996_v20 = vld [vmem:[#allocation3 + $0x14e8] sm:$0xff] }
 0x4a6   :  { %4004 = vmatprep.subr.bf16.mxu1 %v2356_v25  ;;  %v1060_v23 = vld [vmem:[#allocation3 + $0x16e8] sm:$0xff]  ;;  %v2187_v25 = vunpack.c.l.s8.bf16 %v875_v12  ;;  %v2436_v46 = vunpack.c.h.s8.bf16 %v996_v20  ;;  %v2428_v34 = vunpack.c.l.s8.bf16 %v996_v20 }
 0x4a8   :  { %3964 = vmatpush2.bf16.msra.mxu0 %v2227_v26  ;;  %v2564_v26 = vunpack.c.h.s8.bf16 %v1060_v23 }
 0x4a9   :  { %4005 = vmatpush2.bf16.msra.mxu1 %v2355_v29  ;;  %3965 = vmatprep.subr.bf16.mxu0 %v2220_v31  ;;  %v995_v29 = vld [vmem:[#allocation3 + $0x14e0] sm:$0xff] }
 0x4aa   :  { %4006 = vmatprep.subr.bf16.mxu1 %v2348_v28  ;;  %v1059_v31 = vld [vmem:[#allocation3 + $0x16e0] sm:$0xff]  ;;  %v2435_v28 = vunpack.c.h.s8.bf16 %v995_v29 }
 0x4ab   :  { %v2563_v32 = vunpack.c.h.s8.bf16 %v1059_v31 }
 0x4ac   :  { %3966 = vmatpush2.bf16.msra.mxu0 %v2219_v37  ;;  %v2556_v37 = vunpack.c.l.s8.bf16 %v1060_v23 }
 0x4ad   :  { %4007 = vmatpush2.bf16.msra.mxu1 %v2347_v33  ;;  %3967 = vmatprep.subr.bf16.mxu0 %v2212_v38  ;;  %v988_v33 = vld [vmem:[#allocation3 + $0x14a8] sm:$0xff] }
 0x4ae   :  { %4008 = vmatprep.subr.bf16.mxu1 %v2340_v49  ;;  %v1052_v38 = vld [vmem:[#allocation3 + $0x16a8] sm:$0xff]  ;;  %v2420_v57 = vunpack.c.h.s8.bf16 %v988_v33  ;;  %v2412_v20 = vunpack.c.l.s8.bf16 %v988_v33 }
 0x4af   :  { %v2548_v4 = vunpack.c.h.s8.bf16 %v1052_v38  ;;  %v2540_v23 = vunpack.c.l.s8.bf16 %v1052_v38  ;;  %v972_v38 = vld [vmem:[#allocation3 + $0x1428] sm:$0xff] }
 0x4b0   :  { %3968 = vmatpush2.bf16.msra.mxu0 %v2211_v53  ;;  %v2427_v53 = vunpack.c.l.s8.bf16 %v995_v29 }
 0x4b1   :  { %4009 = vmatpush2.bf16.msra.mxu1 %v2339_v39  ;;  %3969 = vmatprep.subr.bf16.mxu0 %v2204_v40  ;;  %v2555_v39 = vunpack.c.l.s8.bf16 %v1059_v31  ;;  %v979_v31 = vld [vmem:[#allocation3 + $0x1460] sm:$0xff] }
 0x4b2   :  { %4010 = vmatprep.subr.bf16.mxu1 %v2332_v3 }
 0x4b4   :  { %3970 = vmatpush2.bf16.msra.mxu0 %v2203_v8  ;;  %v987_v8 = vld [vmem:[#allocation3 + $0x14a0] sm:$0xff] }
 0x4b5   :  { %4011 = vmatpush2.bf16.msra.mxu1 %v2331_v18  ;;  %3971 = vmatprep.subr.bf16.mxu0 %v2196_v7  ;;  %v1051_v18 = vld [vmem:[#allocation3 + $0x16a0] sm:$0xff] }
 0x4b6   :  { %4012 = vmatprep.subr.bf16.mxu1 %v2324_v44 }
 0x4b8   :  { %3972 = vmatpush2.bf16.msra.mxu0 %v2195_v17  ;;  %v2419_v17 = vunpack.c.h.s8.bf16 %v987_v8 }
 0x4b9   :  { %4013 = vmatpush2.bf16.msra.mxu1 %v2323_v19  ;;  %3973 = vmatprep.subr.bf16.mxu0 %v2188_v24  ;;  %v2547_v19 = vunpack.c.h.s8.bf16 %v1051_v18 }
 0x4ba   :  { %4014 = vmatprep.subr.bf16.mxu1 %v2316_v16 }
 0x4bc   :  { %3974 = vmatpush2.bf16.msra.mxu0 %v2187_v25  ;;  %v980_v25 = vld [vmem:[#allocation3 + $0x1468] sm:$0xff] }
 0x4bd   :  { %4015 = vmatpush2.bf16.msra.mxu1 %v2315_v48  ;;  %4025 = vmatprep.subr.bf16.mxu0 %v2436_v46  ;;  %v2411_v48 = vunpack.c.l.s8.bf16 %v987_v8  ;;  %v2539_v46 = vunpack.c.l.s8.bf16 %v1051_v18  ;;  %v2380_v8 = vunpack.c.l.s8.bf16 %v972_v38 }
 0x4be   :  { %4066 = vmatprep.subr.bf16.mxu1 %v2564_v26  ;;  %v2404_v26 = vunpack.c.h.s8.bf16 %v980_v25 }
 0x4bf   :  { %v3731_v49 = vpop.f32.mrf.mxu0  ;;  %3976 = vmatmul.mubr.bf16.vlgmr.msra.gmra.mxu0 %v6293_v36 }
 0x4c0   :  { %v3772_v52 = vpop.f32.mrf.mxu1  ;;  %4017 = vmatmul.mubr.bf16.vlgmr.msra.gmra.mxu1 %v6297_v61  ;;  %v3732_v62 = vadd.f32 %v3731_v49, %v6421_v35  ;;  %4026 = vmatpush1.bf16.msra.mxu0 %v2435_v28  ;;  %v1043_v28 = vld [vmem:[#allocation3 + $0x1660] sm:$0xff]  ;;  %v1036_v49 = vld [vmem:[#allocation3 + $0x1628] sm:$0xff] }
 0x4c1   :  { %4067 = vmatpush1.bf16.msra.mxu1 %v2563_v32  ;;  %v3733_v40 = vpop.f32.mrf.mxu0  ;;  %4027 = vmatprep.subr.bf16.mxu0 %v2428_v34  ;;  %v2403_v32 = vunpack.c.h.s8.bf16 %v979_v31  ;;  %v2531_v34 = vunpack.c.h.s8.bf16 %v1043_v28  ;;  %v2508_v18 = vunpack.c.l.s8.bf16 %v1036_v49 }
 0x4c2   :  { %v3774_v3 = vpop.f32.mrf.mxu1  ;;  %4068 = vmatprep.subr.bf16.mxu1 %v2556_v37  ;;  %v6430_v7 = vadd.f32 %v3772_v52, %v3732_v62  ;;  %v3734_v44 = vadd.f32 %v3733_v40, %v6423_v30  ;;  %4057 = vmatprep.mubr.bf16.mxu0 %v6299_v45  ;;  %v1044_v30 = vld [vmem:[#allocation3 + $0x1668] sm:$0xff]  ;;  %v2396_v37 = vunpack.c.l.s8.bf16 %v980_v25  ;;  %v2395_v52 = vunpack.c.l.s8.bf16 %v979_v31  ;;  %v971_v40 = vld [vmem:[#allocation3 + $0x1420] sm:$0xff] }
 0x4c3   :  { %4098 = vmatprep.mubr.bf16.mxu1 %v6301_v11  ;;  %v3735_v35 = vpop.f32.mrf.mxu0  ;;  %v2532_v29 = vunpack.c.h.s8.bf16 %v1044_v30  ;;  %v2524_v33 = vunpack.c.l.s8.bf16 %v1044_v30  ;;  %v2523_v62 = vunpack.c.l.s8.bf16 %v1043_v28 }
 0x4c4   :  { %v3776_v12 = vpop.f32.mrf.mxu1  ;;  %v6435_v15 = vadd.f32 %v3774_v3, %v3734_v44  ;;  %4028 = vmatpush1.bf16.msra.mxu0 %v2427_v53  ;;  %v2388_v53 = vunpack.c.h.s8.bf16 %v972_v38  ;;  %v1035_v3 = vld [vmem:[#allocation3 + $0x1620] sm:$0xff]  ;;  %v1028_v44 = vld [vmem:[#allocation3 + $0x15e8] sm:$0xff] }
 0x4c5   :  { %4069 = vmatpush1.bf16.msra.mxu1 %v2555_v39  ;;  %v3736_v24 = vpop.f32.mrf.mxu0  ;;  %4029 = vmatprep.subr.bf16.mxu0 %v2420_v57  ;;  %v2516_v39 = vunpack.c.h.s8.bf16 %v1036_v49  ;;  %v2387_v57 = vunpack.c.h.s8.bf16 %v971_v40  ;;  %v1092_v35 = vld [vmem:[#allocation3 + $0x17e8] sm:$0xff]  ;;  %v2379_v12 = vunpack.c.l.s8.bf16 %v971_v40  ;;  %v2492_v30 = vunpack.c.l.s8.bf16 %v1028_v44 }
 0x4c6   :  { %v3777_v16 = vpop.f32.mrf.mxu1  ;;  %4070 = vmatprep.subr.bf16.mxu1 %v2548_v4  ;;  %v2515_v4 = vunpack.c.h.s8.bf16 %v1035_v3  ;;  %v2628_v24 = vunpack.c.h.s8.bf16 %v1092_v35 }
 0x4c7   :  { %v1027_v16 = vld [vmem:[#allocation3 + $0x15e0] sm:$0xff] }
 0x4c8   :  { %4030 = vmatpush1.bf16.msra.mxu0 %v2419_v17  ;;  %v2507_v17 = vunpack.c.l.s8.bf16 %v1035_v3 }
 0x4c9   :  { %4071 = vmatpush1.bf16.msra.mxu1 %v2547_v19  ;;  %4031 = vmatprep.subr.bf16.mxu0 %v2412_v20  ;;  %v2500_v19 = vunpack.c.h.s8.bf16 %v1028_v44  ;;  %v1091_v20 = vld [vmem:[#allocation3 + $0x17e0] sm:$0xff] }
 0x4ca   :  { %4072 = vmatprep.subr.bf16.mxu1 %v2540_v23  ;;  %v2499_v23 = vunpack.c.h.s8.bf16 %v1027_v16  ;;  %v2627_v25 = vunpack.c.h.s8.bf16 %v1091_v20  ;;  %v2619_v31 = vunpack.c.l.s8.bf16 %v1091_v20 }
 0x4cc   :  { %4032 = vmatpush1.bf16.msra.mxu0 %v2411_v48  ;;  %v2620_v48 = vunpack.c.l.s8.bf16 %v1092_v35 }
 0x4cd   :  { %4073 = vmatpush1.bf16.msra.mxu1 %v2539_v46  ;;  %4033 = vmatprep.subr.bf16.mxu0 %v2404_v26  ;;  %v1020_v46 = vld [vmem:[#allocation3 + $0x15a8] sm:$0xff] }
 0x4ce   :  { %4074 = vmatprep.subr.bf16.mxu1 %v2532_v29  ;;  %v1084_v26 = vld [vmem:[#allocation3 + $0x17a8] sm:$0xff]  ;;  %v2491_v29 = vunpack.c.l.s8.bf16 %v1027_v16  ;;  %v2484_v28 = vunpack.c.h.s8.bf16 %v1020_v46  ;;  %v2476_v49 = vunpack.c.l.s8.bf16 %v1020_v46 }
 0x4d0   :  { %4034 = vmatpush1.bf16.msra.mxu0 %v2403_v32  ;;  %v2612_v32 = vunpack.c.h.s8.bf16 %v1084_v26 }
 0x4d1   :  { %4075 = vmatpush1.bf16.msra.mxu1 %v2531_v34  ;;  %4035 = vmatprep.subr.bf16.mxu0 %v2396_v37  ;;  %v1019_v34 = vld [vmem:[#allocation3 + $0x15a0] sm:$0xff] }
 0x4d2   :  { %4076 = vmatprep.subr.bf16.mxu1 %v2524_v33  ;;  %v1083_v37 = vld [vmem:[#allocation3 + $0x17a0] sm:$0xff]  ;;  %v2483_v33 = vunpack.c.h.s8.bf16 %v1019_v34 }
 0x4d3   :  { %v2611_v38 = vunpack.c.h.s8.bf16 %v1083_v37  ;;  %v2603_v40 = vunpack.c.l.s8.bf16 %v1083_v37 }
 0x4d4   :  { %4036 = vmatpush1.bf16.msra.mxu0 %v2395_v52  ;;  %v2604_v52 = vunpack.c.l.s8.bf16 %v1084_v26 }
 0x4d5   :  { %4077 = vmatpush1.bf16.msra.mxu1 %v2523_v62  ;;  %4037 = vmatprep.subr.bf16.mxu0 %v2388_v53  ;;  %v1012_v62 = vld [vmem:[#allocation3 + $0x1568] sm:$0xff] }
 0x4d6   :  { %4078 = vmatprep.subr.bf16.mxu1 %v2516_v39  ;;  %v1076_v53 = vld [vmem:[#allocation3 + $0x1768] sm:$0xff]  ;;  %v2475_v39 = vunpack.c.l.s8.bf16 %v1019_v34  ;;  %v2468_v3 = vunpack.c.h.s8.bf16 %v1012_v62  ;;  %v2460_v35 = vunpack.c.l.s8.bf16 %v1012_v62 }
 0x4d8   :  { %4038 = vmatpush1.bf16.msra.mxu0 %v2387_v57  ;;  %v2596_v57 = vunpack.c.h.s8.bf16 %v1076_v53 }
 0x4d9   :  { %4079 = vmatpush1.bf16.msra.mxu1 %v2515_v4  ;;  %4039 = vmatprep.subr.bf16.mxu0 %v2380_v8  ;;  %v1011_v4 = vld [vmem:[#allocation3 + $0x1560] sm:$0xff] }
 0x4da   :  { %4080 = vmatprep.subr.bf16.mxu1 %v2508_v18  ;;  %v1075_v8 = vld [vmem:[#allocation3 + $0x1760] sm:$0xff]  ;;  %v2467_v18 = vunpack.c.h.s8.bf16 %v1011_v4 }
 0x4db   :  { %v2595_v44 = vunpack.c.h.s8.bf16 %v1075_v8  ;;  %v2587_v16 = vunpack.c.l.s8.bf16 %v1075_v8 }
 0x4dc   :  { %4040 = vmatpush1.bf16.msra.mxu0 %v2379_v12  ;;  %v2588_v12 = vunpack.c.l.s8.bf16 %v1076_v53 }
 0x4dd   :  { %4081 = vmatpush1.bf16.msra.mxu1 %v2507_v17  ;;  %4041 = vmatprep.subr.bf16.mxu0 %v2500_v19  ;;  %v1004_v17 = vld [vmem:[#allocation3 + $0x1528] sm:$0xff] }
 0x4de   :  { %4082 = vmatprep.subr.bf16.mxu1 %v2628_v24  ;;  %v1068_v19 = vld [vmem:[#allocation3 + $0x1728] sm:$0xff]  ;;  %v2459_v24 = vunpack.c.l.s8.bf16 %v1011_v4  ;;  %v2452_v20 = vunpack.c.h.s8.bf16 %v1004_v17  ;;  %v2444_v26 = vunpack.c.l.s8.bf16 %v1004_v17 }
 0x4e0   :  { %4042 = vmatpush2.bf16.msra.mxu0 %v2499_v23  ;;  %v2580_v23 = vunpack.c.h.s8.bf16 %v1068_v19 }
 0x4e1   :  { %4083 = vmatpush2.bf16.msra.mxu1 %v2627_v25  ;;  %4043 = vmatprep.subr.bf16.mxu0 %v2492_v30  ;;  %v1003_v25 = vld [vmem:[#allocation3 + $0x1520] sm:$0xff] }
 0x4e2   :  { %4084 = vmatprep.subr.bf16.mxu1 %v2620_v48  ;;  %v1067_v30 = vld [vmem:[#allocation3 + $0x1720] sm:$0xff]  ;;  %v2451_v48 = vunpack.c.h.s8.bf16 %v1003_v25 }
 0x4e3   :  { %v2579_v46 = vunpack.c.h.s8.bf16 %v1067_v30  ;;  %v2571_v34 = vunpack.c.l.s8.bf16 %v1067_v30 }
 0x4e4   :  { %4044 = vmatpush2.bf16.msra.mxu0 %v2491_v29  ;;  %v2572_v29 = vunpack.c.l.s8.bf16 %v1068_v19 }
 0x4e5   :  { %4085 = vmatpush2.bf16.msra.mxu1 %v2619_v31  ;;  %4045 = vmatprep.subr.bf16.mxu0 %v2484_v28  ;;  %v358_v31 = vld [vmem:[#allocation3 + $0xf8] sm:$0xff] }
 0x4e6   :  { %4086 = vmatprep.subr.bf16.mxu1 %v2612_v32  ;;  %v422_v28 = vld [vmem:[#allocation3 + $0x2f8] sm:$0xff]  ;;  %v2443_v32 = vunpack.c.l.s8.bf16 %v1003_v25  ;;  %v1158_v37 = vunpack.c.h.s8.bf16 %v358_v31  ;;  %v1150_v53 = vunpack.c.l.s8.bf16 %v358_v31 }
 0x4e8   :  { %4046 = vmatpush2.bf16.msra.mxu0 %v2483_v33  ;;  %v1286_v33 = vunpack.c.h.s8.bf16 %v422_v28 }
 0x4e9   :  { %4087 = vmatpush2.bf16.msra.mxu1 %v2611_v38  ;;  %4047 = vmatprep.subr.bf16.mxu0 %v2476_v49  ;;  %v357_v38 = vld [vmem:[#allocation3 + $0xf0] sm:$0xff] }
 0x4ea   :  { %4088 = vmatprep.subr.bf16.mxu1 %v2604_v52  ;;  %v421_v49 = vld [vmem:[#allocation3 + $0x2f0] sm:$0xff]  ;;  %v1157_v52 = vunpack.c.h.s8.bf16 %v357_v38 }
 0x4eb   :  { %v1285_v62 = vunpack.c.h.s8.bf16 %v421_v49 }
 0x4ec   :  { %4048 = vmatpush2.bf16.msra.mxu0 %v2475_v39  ;;  %v1278_v39 = vunpack.c.l.s8.bf16 %v422_v28 }
 0x4ed   :  { %4089 = vmatpush2.bf16.msra.mxu1 %v2603_v40  ;;  %4049 = vmatprep.subr.bf16.mxu0 %v2468_v3  ;;  %v350_v40 = vld [vmem:[#allocation3 + $0xb8] sm:$0xff] }
 0x4ee   :  { %4090 = vmatprep.subr.bf16.mxu1 %v2596_v57  ;;  %v414_v3 = vld [vmem:[#allocation3 + $0x2b8] sm:$0xff]  ;;  %v1142_v17 = vunpack.c.h.s8.bf16 %v350_v40  ;;  %v1134_v31 = vunpack.c.l.s8.bf16 %v350_v40 }
 0x4ef   :  { %v1270_v19 = vunpack.c.h.s8.bf16 %v414_v3  ;;  %v1262_v28 = vunpack.c.l.s8.bf16 %v414_v3  ;;  %v398_v40 = vld [vmem:[#allocation3 + $0x238] sm:$0xff] }
 0x4f0   :  { %4050 = vmatpush2.bf16.msra.mxu0 %v2467_v18  ;;  %v1149_v18 = vunpack.c.l.s8.bf16 %v357_v38  ;;  %v405_v38 = vld [vmem:[#allocation3 + $0x270] sm:$0xff] }
 0x4f1   :  { %4091 = vmatpush2.bf16.msra.mxu1 %v2595_v44  ;;  %4051 = vmatprep.subr.bf16.mxu0 %v2460_v35  ;;  %v1277_v44 = vunpack.c.l.s8.bf16 %v421_v49 }
 0x4f2   :  { %4092 = vmatprep.subr.bf16.mxu1 %v2588_v12 }
 0x4f4   :  { %4052 = vmatpush2.bf16.msra.mxu0 %v2459_v24  ;;  %v349_v24 = vld [vmem:[#allocation3 + $0xb0] sm:$0xff] }
 0x4f5   :  { %4093 = vmatpush2.bf16.msra.mxu1 %v2587_v16  ;;  %4053 = vmatprep.subr.bf16.mxu0 %v2452_v20  ;;  %v413_v16 = vld [vmem:[#allocation3 + $0x2b0] sm:$0xff] }
 0x4f6   :  { %4094 = vmatprep.subr.bf16.mxu1 %v2580_v23 }
 0x4f8   :  { %4054 = vmatpush2.bf16.msra.mxu0 %v2451_v48  ;;  %v1141_v48 = vunpack.c.h.s8.bf16 %v349_v24 }
 0x4f9   :  { %4095 = vmatpush2.bf16.msra.mxu1 %v2579_v46  ;;  %4055 = vmatprep.subr.bf16.mxu0 %v2444_v26  ;;  %v1269_v46 = vunpack.c.h.s8.bf16 %v413_v16 }
 0x4fa   :  { %4096 = vmatprep.subr.bf16.mxu1 %v2572_v29 }
 0x4fc   :  { %4056 = vmatpush2.bf16.msra.mxu0 %v2443_v32  ;;  %v342_v32 = vld [vmem:[#allocation3 + $0x78] sm:$0xff] }
 0x4fd   :  { %4097 = vmatpush2.bf16.msra.mxu1 %v2571_v34  ;;  %4107 = vmatprep.subr.bf16.mxu0 %v1158_v37  ;;  %v1126_v34 = vunpack.c.h.s8.bf16 %v342_v32 }
 0x4fe   :  { %4148 = vmatprep.subr.bf16.mxu1 %v1286_v33  ;;  %v341_v33 = vld [vmem:[#allocation3 + $0x70] sm:$0xff] }
 0x4ff   :  { %v3813_v57 = vpop.f32.mrf.mxu0  ;;  %4058 = vmatmul.mubr.bf16.vlgmr.msra.gmra.mxu0 %v6315_v50  ;;  %v1125_v49 = vunpack.c.h.s8.bf16 %v341_v33  ;;  %v1117_v3 = vunpack.c.l.s8.bf16 %v341_v33 }
 0x500   :  { %v3854_v4 = vpop.f32.mrf.mxu1  ;;  %4099 = vmatmul.mubr.bf16.vlgmr.msra.gmra.mxu1 %v6319_v51  ;;  %v3814_v8 = vadd.f32 %v3813_v57, %v6430_v7  ;;  %4108 = vmatpush1.bf16.msra.mxu0 %v1157_v52  ;;  %v1253_v52 = vunpack.c.h.s8.bf16 %v405_v38  ;;  %v1245_v57 = vunpack.c.l.s8.bf16 %v405_v38  ;;  %v381_v38 = vld [vmem:[#allocation3 + $0x1b0] sm:$0xff] }
 0x501   :  { %4149 = vmatpush1.bf16.msra.mxu1 %v1285_v62  ;;  %v3815_v35 = vpop.f32.mrf.mxu0  ;;  %4109 = vmatprep.subr.bf16.mxu0 %v1150_v53  ;;  %v1118_v62 = vunpack.c.l.s8.bf16 %v342_v32 }
 0x502   :  { %v3856_v12 = vpop.f32.mrf.mxu1  ;;  %4150 = vmatprep.subr.bf16.mxu1 %v1278_v39  ;;  %v6440_v20 = vadd.f32 %v3854_v4, %v3814_v8  ;;  %v3816_v23 = vadd.f32 %v3815_v35, %v6435_v15  ;;  %4139 = vmatprep.mubr.bf16.mxu0 %v6150_v54  ;;  %v406_v15 = vld [vmem:[#allocation3 + $0x278] sm:$0xff]  ;;  %v1133_v54 = vunpack.c.l.s8.bf16 %v349_v24  ;;  %v1238_v8 = vunpack.c.h.s8.bf16 %v398_v40 }
 0x503   :  { %4180 = vmatprep.mubr.bf16.mxu1 %v6155_v56  ;;  %v3817_v7 = vpop.f32.mrf.mxu0  ;;  %v1261_v56 = vunpack.c.l.s8.bf16 %v413_v16  ;;  %v1254_v37 = vunpack.c.h.s8.bf16 %v406_v15  ;;  %v1246_v53 = vunpack.c.l.s8.bf16 %v406_v15  ;;  %v334_v39 = vld [vmem:[#allocation3 + $0x38] sm:$0xff] }
 0x504   :  { %v3858_v25 = vpop.f32.mrf.mxu1  ;;  %v6445_v30 = vadd.f32 %v3856_v12, %v3816_v23  ;;  %4110 = vmatpush1.bf16.msra.mxu0 %v1149_v18  ;;  %v1110_v4 = vunpack.c.h.s8.bf16 %v334_v39  ;;  %v333_v18 = vld [vmem:[#allocation3 + $0x30] sm:$0xff]  ;;  %v390_v24 = vld [vmem:[#allocation3 + $0x1f8] sm:$0xff] }
 0x505   :  { %4151 = vmatpush1.bf16.msra.mxu1 %v1277_v44  ;;  %v3818_v26 = vpop.f32.mrf.mxu0  ;;  %4111 = vmatprep.subr.bf16.mxu0 %v1142_v17  ;;  %v397_v44 = vld [vmem:[#allocation3 + $0x230] sm:$0xff]  ;;  %v1109_v35 = vunpack.c.h.s8.bf16 %v333_v18  ;;  %v1102_v17 = vunpack.c.l.s8.bf16 %v334_v39  ;;  %v454_v16 = vld [vmem:[#allocation3 + $0x3f8] sm:$0xff]  ;;  %v1101_v23 = vunpack.c.l.s8.bf16 %v333_v18  ;;  %v1222_v25 = vunpack.c.h.s8.bf16 %v390_v24 }
 0x506   :  { %v3859_v29 = vpop.f32.mrf.mxu1  ;;  %4152 = vmatprep.subr.bf16.mxu1 %v1270_v19  ;;  %v1237_v12 = vunpack.c.h.s8.bf16 %v397_v44  ;;  %v1230_v19 = vunpack.c.l.s8.bf16 %v398_v40  ;;  %v1229_v7 = vunpack.c.l.s8.bf16 %v397_v44  ;;  %v453_v26 = vld [vmem:[#allocation3 + $0x3f0] sm:$0xff]  ;;  %v1342_v32 = vunpack.c.l.s8.bf16 %v454_v16  ;;  %v382_v15 = vld [vmem:[#allocation3 + $0x1b8] sm:$0xff] }
 0x507   :  { %v374_v40 = vld [vmem:[#allocation3 + $0x178] sm:$0xff]  ;;  %v373_v44 = vld [vmem:[#allocation3 + $0x170] sm:$0xff] }
 0x508   :  { %4112 = vmatpush1.bf16.msra.mxu0 %v1141_v48  ;;  %v1350_v48 = vunpack.c.h.s8.bf16 %v454_v16  ;;  %v366_v16 = vld [vmem:[#allocation3 + $0x138] sm:$0xff] }
 0x509   :  { %4153 = vmatpush1.bf16.msra.mxu1 %v1269_v46  ;;  %4113 = vmatprep.subr.bf16.mxu0 %v1134_v31  ;;  %v389_v46 = vld [vmem:[#allocation3 + $0x1f0] sm:$0xff]  ;;  %v1349_v31 = vunpack.c.h.s8.bf16 %v453_v26 }
 0x50a   :  { %4154 = vmatprep.subr.bf16.mxu1 %v1262_v28  ;;  %v1221_v29 = vunpack.c.h.s8.bf16 %v389_v46  ;;  %v1214_v28 = vunpack.c.l.s8.bf16 %v390_v24 }
 0x50c   :  { %4114 = vmatpush1.bf16.msra.mxu0 %v1133_v54  ;;  %v446_v54 = vld [vmem:[#allocation3 + $0x3b8] sm:$0xff] }
 0x50d   :  { %4155 = vmatpush1.bf16.msra.mxu1 %v1261_v56  ;;  %4115 = vmatprep.subr.bf16.mxu0 %v1126_v34  ;;  %v1213_v56 = vunpack.c.l.s8.bf16 %v389_v46  ;;  %v1341_v34 = vunpack.c.l.s8.bf16 %v453_v26  ;;  %v1334_v33 = vunpack.c.h.s8.bf16 %v446_v54  ;;  %v1326_v39 = vunpack.c.l.s8.bf16 %v446_v54  ;;  %v365_v26 = vld [vmem:[#allocation3 + $0x130] sm:$0xff]  ;;  %v486_v54 = vld [vmem:[#allocation3 + $0x4f8] sm:$0xff] }
 0x50e   :  { %4156 = vmatprep.subr.bf16.mxu1 %v1254_v37  ;;  %v1206_v37 = vunpack.c.h.s8.bf16 %v382_v15 }
 0x510   :  { %4116 = vmatpush1.bf16.msra.mxu0 %v1125_v49  ;;  %v445_v49 = vld [vmem:[#allocation3 + $0x3b0] sm:$0xff] }
 0x511   :  { %4157 = vmatpush1.bf16.msra.mxu1 %v1253_v52  ;;  %4117 = vmatprep.subr.bf16.mxu0 %v1118_v62  ;;  %v1205_v52 = vunpack.c.h.s8.bf16 %v381_v38  ;;  %v1333_v62 = vunpack.c.h.s8.bf16 %v445_v49 }
 0x512   :  { %4158 = vmatprep.subr.bf16.mxu1 %v1246_v53  ;;  %v1198_v53 = vunpack.c.l.s8.bf16 %v382_v15 }
 0x514   :  { %4118 = vmatpush1.bf16.msra.mxu0 %v1117_v3  ;;  %v438_v3 = vld [vmem:[#allocation3 + $0x378] sm:$0xff] }
 0x515   :  { %4159 = vmatpush1.bf16.msra.mxu1 %v1245_v57  ;;  %4119 = vmatprep.subr.bf16.mxu0 %v1110_v4  ;;  %v1197_v57 = vunpack.c.l.s8.bf16 %v381_v38  ;;  %v1325_v4 = vunpack.c.l.s8.bf16 %v445_v49  ;;  %v1318_v18 = vunpack.c.h.s8.bf16 %v438_v3  ;;  %v1310_v24 = vunpack.c.l.s8.bf16 %v438_v3  ;;  %v485_v49 = vld [vmem:[#allocation3 + $0x4f0] sm:$0xff]  ;;  %v478_v3 = vld [vmem:[#allocation3 + $0x4b8] sm:$0xff] }
 0x516   :  { %4160 = vmatprep.subr.bf16.mxu1 %v1238_v8  ;;  %v1190_v8 = vunpack.c.h.s8.bf16 %v374_v40 }
 0x518   :  { %4120 = vmatpush1.bf16.msra.mxu0 %v1109_v35  ;;  %v437_v35 = vld [vmem:[#allocation3 + $0x370] sm:$0xff] }
 0x519   :  { %4161 = vmatpush1.bf16.msra.mxu1 %v1237_v12  ;;  %4121 = vmatprep.subr.bf16.mxu0 %v1102_v17  ;;  %v1189_v12 = vunpack.c.h.s8.bf16 %v373_v44  ;;  %v1317_v17 = vunpack.c.h.s8.bf16 %v437_v35 }
 0x51a   :  { %4162 = vmatprep.subr.bf16.mxu1 %v1230_v19  ;;  %v1182_v19 = vunpack.c.l.s8.bf16 %v374_v40 }
 0x51c   :  { %4122 = vmatpush1.bf16.msra.mxu0 %v1101_v23  ;;  %v430_v23 = vld [vmem:[#allocation3 + $0x338] sm:$0xff] }
 0x51d   :  { %4163 = vmatpush1.bf16.msra.mxu1 %v1229_v7  ;;  %4123 = vmatprep.subr.bf16.mxu0 %v1222_v25  ;;  %v1181_v7 = vunpack.c.l.s8.bf16 %v373_v44  ;;  %v1309_v25 = vunpack.c.l.s8.bf16 %v437_v35  ;;  %v1302_v46 = vunpack.c.h.s8.bf16 %v430_v23  ;;  %v1294_v15 = vunpack.c.l.s8.bf16 %v430_v23  ;;  %v541_v23 = vld [vmem:[#allocation3 + $0x6b0] sm:$0xff] }
 0x51e   :  { %4164 = vmatprep.subr.bf16.mxu1 %v1350_v48  ;;  %v1174_v48 = vunpack.c.h.s8.bf16 %v366_v16  ;;  %v1405_v44 = vunpack.c.l.s8.bf16 %v485_v49 }
 0x520   :  { %4124 = vmatpush2.bf16.msra.mxu0 %v1221_v29  ;;  %v429_v29 = vld [vmem:[#allocation3 + $0x330] sm:$0xff] }
 0x521   :  { %4165 = vmatpush2.bf16.msra.mxu1 %v1349_v31  ;;  %4125 = vmatprep.subr.bf16.mxu0 %v1214_v28  ;;  %v1173_v31 = vunpack.c.h.s8.bf16 %v365_v26  ;;  %v1301_v28 = vunpack.c.h.s8.bf16 %v429_v29 }
 0x522   :  { %4166 = vmatprep.subr.bf16.mxu1 %v1342_v32  ;;  %v1166_v32 = vunpack.c.l.s8.bf16 %v366_v16  ;;  %v477_v16 = vld [vmem:[#allocation3 + $0x4b0] sm:$0xff] }
 0x524   :  { %4126 = vmatpush2.bf16.msra.mxu0 %v1213_v56  ;;  %v550_v56 = vld [vmem:[#allocation3 + $0x6f8] sm:$0xff] }
 0x525   :  { %4167 = vmatpush2.bf16.msra.mxu1 %v1341_v34  ;;  %4127 = vmatprep.subr.bf16.mxu0 %v1206_v37  ;;  %v1165_v34 = vunpack.c.l.s8.bf16 %v365_v26  ;;  %v1293_v37 = vunpack.c.l.s8.bf16 %v429_v29  ;;  %v1542_v38 = vunpack.c.h.s8.bf16 %v550_v56  ;;  %v1534_v40 = vunpack.c.l.s8.bf16 %v550_v56  ;;  %v469_v56 = vld [vmem:[#allocation3 + $0x470] sm:$0xff] }
 0x526   :  { %4168 = vmatprep.subr.bf16.mxu1 %v1334_v33  ;;  %v1414_v33 = vunpack.c.h.s8.bf16 %v486_v54 }
 0x528   :  { %4128 = vmatpush2.bf16.msra.mxu0 %v1205_v52  ;;  %v549_v52 = vld [vmem:[#allocation3 + $0x6f0] sm:$0xff] }
 0x529   :  { %4169 = vmatpush2.bf16.msra.mxu1 %v1333_v62  ;;  %4129 = vmatprep.subr.bf16.mxu0 %v1198_v53  ;;  %v1413_v62 = vunpack.c.h.s8.bf16 %v485_v49  ;;  %v1541_v53 = vunpack.c.h.s8.bf16 %v549_v52  ;;  %v1533_v35 = vunpack.c.l.s8.bf16 %v549_v52  ;;  %v462_v52 = vld [vmem:[#allocation3 + $0x438] sm:$0xff] }
 0x52a   :  { %4170 = vmatprep.subr.bf16.mxu1 %v1326_v39  ;;  %v1406_v39 = vunpack.c.l.s8.bf16 %v486_v54 }
 0x52c   :  { %4130 = vmatpush2.bf16.msra.mxu0 %v1197_v57  ;;  %v542_v57 = vld [vmem:[#allocation3 + $0x6b8] sm:$0xff] }
 0x52d   :  { %4171 = vmatpush2.bf16.msra.mxu1 %v1325_v4  ;;  %4131 = vmatprep.subr.bf16.mxu0 %v1190_v8 }
 0x52e   :  { %4172 = vmatprep.subr.bf16.mxu1 %v1318_v18 }
 0x530   :  { %4132 = vmatpush2.bf16.msra.mxu0 %v1189_v12 }
 0x531   :  { %4173 = vmatpush2.bf16.msra.mxu1 %v1317_v17  ;;  %4133 = vmatprep.subr.bf16.mxu0 %v1182_v19  ;;  %v1398_v19 = vunpack.c.h.s8.bf16 %v478_v3 }
 0x532   :  { %4174 = vmatprep.subr.bf16.mxu1 %v1310_v24  ;;  %v1526_v24 = vunpack.c.h.s8.bf16 %v542_v57 }
 0x534   :  { %4134 = vmatpush2.bf16.msra.mxu0 %v1181_v7 }
 0x535   :  { %4175 = vmatpush2.bf16.msra.mxu1 %v1309_v25  ;;  %4135 = vmatprep.subr.bf16.mxu0 %v1174_v48  ;;  %v1397_v48 = vunpack.c.h.s8.bf16 %v477_v16 }
 0x536   :  { %4176 = vmatprep.subr.bf16.mxu1 %v1302_v46  ;;  %v1525_v46 = vunpack.c.h.s8.bf16 %v541_v23 }
 0x538   :  { %4136 = vmatpush2.bf16.msra.mxu0 %v1173_v31  ;;  %v1390_v31 = vunpack.c.l.s8.bf16 %v478_v3 }
 0x539   :  { %4177 = vmatpush2.bf16.msra.mxu1 %v1301_v28  ;;  %4137 = vmatprep.subr.bf16.mxu0 %v1166_v32  ;;  %v1518_v28 = vunpack.c.l.s8.bf16 %v542_v57  ;;  %v470_v32 = vld [vmem:[#allocation3 + $0x478] sm:$0xff]  ;;  %v461_v57 = vld [vmem:[#allocation3 + $0x430] sm:$0xff] }
 0x53a   :  { %4178 = vmatprep.subr.bf16.mxu1 %v1294_v15  ;;  %v1382_v15 = vunpack.c.h.s8.bf16 %v470_v32 }
 0x53c   :  { %4138 = vmatpush2.bf16.msra.mxu0 %v1165_v34  ;;  %v533_v34 = vld [vmem:[#allocation3 + $0x670] sm:$0xff] }
 0x53d   :  { %4179 = vmatpush2.bf16.msra.mxu1 %v1293_v37  ;;  %4189 = vmatprep.subr.bf16.mxu0 %v1414_v33  ;;  %v1381_v37 = vunpack.c.h.s8.bf16 %v469_v56  ;;  %v1509_v33 = vunpack.c.h.s8.bf16 %v533_v34 }
 0x53e   :  { %4230 = vmatprep.subr.bf16.mxu1 %v1542_v38  ;;  %v1374_v38 = vunpack.c.l.s8.bf16 %v470_v32 }
 0x53f   :  { %v3895_v4 = vpop.f32.mrf.mxu0  ;;  %4140 = vmatmul.mubr.bf16.vlgmr.msra.gmra.mxu0 %v6173_v1 }
 0x540   :  { %v3936_v8 = vpop.f32.mrf.mxu1  ;;  %4181 = vmatmul.mubr.bf16.vlgmr.msra.gmra.mxu1 %v6177_v2  ;;  %v3896_v18 = vadd.f32 %v3895_v4, %v6440_v20  ;;  %4190 = vmatpush1.bf16.msra.mxu0 %v1413_v62  ;;  %v526_v62 = vld [vmem:[#allocation3 + $0x638] sm:$0xff]  ;;  %v525_v4 = vld [vmem:[#allocation3 + $0x630] sm:$0xff] }
 0x541   :  { %4231 = vmatpush1.bf16.msra.mxu1 %v1541_v53  ;;  %v3897_v12 = vpop.f32.mrf.mxu0  ;;  %4191 = vmatprep.subr.bf16.mxu0 %v1406_v39  ;;  %v1373_v53 = vunpack.c.l.s8.bf16 %v469_v56  ;;  %v1501_v39 = vunpack.c.l.s8.bf16 %v533_v34  ;;  %v1494_v3 = vunpack.c.h.s8.bf16 %v526_v62 }
 0x542   :  { %v3938_v17 = vpop.f32.mrf.mxu1  ;;  %4232 = vmatprep.subr.bf16.mxu1 %v1534_v40  ;;  %v6450_v7 = vadd.f32 %v3936_v8, %v3896_v18  ;;  %v3898_v1 = vadd.f32 %v3897_v12, %v6445_v30  ;;  %4221 = vmatprep.mubr.bf16.mxu0 %v6179_v9  ;;  %v534_v30 = vld [vmem:[#allocation3 + $0x678] sm:$0xff]  ;;  %v1389_v9 = vunpack.c.l.s8.bf16 %v477_v16  ;;  %v1366_v40 = vunpack.c.h.s8.bf16 %v462_v52 }
 0x543   :  { %4262 = vmatprep.mubr.bf16.mxu1 %v6181_v10  ;;  %v3899_v2 = vpop.f32.mrf.mxu0  ;;  %v1517_v10 = vunpack.c.l.s8.bf16 %v541_v23  ;;  %v1510_v54 = vunpack.c.h.s8.bf16 %v534_v30  ;;  %v1502_v49 = vunpack.c.l.s8.bf16 %v534_v30  ;;  %v1365_v8 = vunpack.c.h.s8.bf16 %v461_v57  ;;  %v518_v12 = vld [vmem:[#allocation3 + $0x5f8] sm:$0xff] }
 0x544   :  { %v3940_v20 = vpop.f32.mrf.mxu1  ;;  %v6455_v25 = vadd.f32 %v3938_v17, %v3898_v1  ;;  %4192 = vmatpush1.bf16.msra.mxu0 %v1405_v44  ;;  %v1493_v18 = vunpack.c.h.s8.bf16 %v525_v4  ;;  %v1358_v44 = vunpack.c.l.s8.bf16 %v462_v52  ;;  %v582_v17 = vld [vmem:[#allocation3 + $0x7f8] sm:$0xff]  ;;  %v1478_v16 = vunpack.c.h.s8.bf16 %v518_v12  ;;  %v517_v1 = vld [vmem:[#allocation3 + $0x5f0] sm:$0xff] }
 0x545   :  { %4233 = vmatpush1.bf16.msra.mxu1 %v1533_v35  ;;  %v3900_v26 = vpop.f32.mrf.mxu0  ;;  %4193 = vmatprep.subr.bf16.mxu0 %v1398_v19  ;;  %v1486_v35 = vunpack.c.l.s8.bf16 %v526_v62  ;;  %v1357_v19 = vunpack.c.l.s8.bf16 %v461_v57  ;;  %v1606_v23 = vunpack.c.h.s8.bf16 %v582_v17  ;;  %v581_v2 = vld [vmem:[#allocation3 + $0x7f0] sm:$0xff]  ;;  %v1477_v20 = vunpack.c.h.s8.bf16 %v517_v1 }
 0x546   :  { %v3941_v29 = vpop.f32.mrf.mxu1  ;;  %4234 = vmatprep.subr.bf16.mxu1 %v1526_v24  ;;  %v1485_v24 = vunpack.c.l.s8.bf16 %v525_v4  ;;  %v1598_v26 = vunpack.c.l.s8.bf16 %v582_v17  ;;  %v1597_v32 = vunpack.c.l.s8.bf16 %v581_v2 }
 0x547   :  { %v510_v29 = vld [vmem:[#allocation3 + $0x5b8] sm:$0xff] }
 0x548   :  { %4194 = vmatpush1.bf16.msra.mxu0 %v1397_v48  ;;  %v1605_v48 = vunpack.c.h.s8.bf16 %v581_v2  ;;  %v1462_v30 = vunpack.c.h.s8.bf16 %v510_v29  ;;  %v1454_v34 = vunpack.c.l.s8.bf16 %v510_v29 }
 0x549   :  { %4235 = vmatpush1.bf16.msra.mxu1 %v1525_v46  ;;  %4195 = vmatprep.subr.bf16.mxu0 %v1390_v31  ;;  %v1470_v46 = vunpack.c.l.s8.bf16 %v518_v12  ;;  %v574_v31 = vld [vmem:[#allocation3 + $0x7b8] sm:$0xff] }
 0x54a   :  { %4236 = vmatprep.subr.bf16.mxu1 %v1518_v28  ;;  %v1469_v28 = vunpack.c.l.s8.bf16 %v517_v1 }
 0x54c   :  { %4196 = vmatpush1.bf16.msra.mxu0 %v1389_v9  ;;  %v1590_v9 = vunpack.c.h.s8.bf16 %v574_v31 }
 0x54d   :  { %4237 = vmatpush1.bf16.msra.mxu1 %v1517_v10  ;;  %4197 = vmatprep.subr.bf16.mxu0 %v1382_v15  ;;  %v509_v10 = vld [vmem:[#allocation3 + $0x5b0] sm:$0xff] }
 0x54e   :  { %4238 = vmatprep.subr.bf16.mxu1 %v1510_v54  ;;  %v573_v15 = vld [vmem:[#allocation3 + $0x7b0] sm:$0xff]  ;;  %v1461_v54 = vunpack.c.h.s8.bf16 %v509_v10 }
 0x54f   :  { %v1589_v56 = vunpack.c.h.s8.bf16 %v573_v15  ;;  %v1581_v52 = vunpack.c.l.s8.bf16 %v573_v15 }
 0x550   :  { %4198 = vmatpush1.bf16.msra.mxu0 %v1381_v37  ;;  %v1582_v37 = vunpack.c.l.s8.bf16 %v574_v31 }
 0x551   :  { %4239 = vmatpush1.bf16.msra.mxu1 %v1509_v33  ;;  %4199 = vmatprep.subr.bf16.mxu0 %v1374_v38  ;;  %v502_v33 = vld [vmem:[#allocation3 + $0x578] sm:$0xff] }
 0x552   :  { %4240 = vmatprep.subr.bf16.mxu1 %v1502_v49  ;;  %v566_v38 = vld [vmem:[#allocation3 + $0x778] sm:$0xff]  ;;  %v1453_v49 = vunpack.c.l.s8.bf16 %v509_v10  ;;  %v1446_v62 = vunpack.c.h.s8.bf16 %v502_v33  ;;  %v1438_v4 = vunpack.c.l.s8.bf16 %v502_v33 }
 0x554   :  { %4200 = vmatpush1.bf16.msra.mxu0 %v1373_v53  ;;  %v1574_v53 = vunpack.c.h.s8.bf16 %v566_v38 }
 0x555   :  { %4241 = vmatpush1.bf16.msra.mxu1 %v1501_v39  ;;  %4201 = vmatprep.subr.bf16.mxu0 %v1366_v40  ;;  %v501_v39 = vld [vmem:[#allocation3 + $0x570] sm:$0xff] }
 0x556   :  { %4242 = vmatprep.subr.bf16.mxu1 %v1494_v3  ;;  %v565_v40 = vld [vmem:[#allocation3 + $0x770] sm:$0xff]  ;;  %v1445_v3 = vunpack.c.h.s8.bf16 %v501_v39 }
 0x557   :  { %v1573_v57 = vunpack.c.h.s8.bf16 %v565_v40  ;;  %v1565_v12 = vunpack.c.l.s8.bf16 %v565_v40 }
 0x558   :  { %4202 = vmatpush1.bf16.msra.mxu0 %v1365_v8  ;;  %v1566_v8 = vunpack.c.l.s8.bf16 %v566_v38 }
 0x559   :  { %4243 = vmatpush1.bf16.msra.mxu1 %v1493_v18  ;;  %4203 = vmatprep.subr.bf16.mxu0 %v1358_v44  ;;  %v494_v18 = vld [vmem:[#allocation3 + $0x538] sm:$0xff] }
 0x55a   :  { %4244 = vmatprep.subr.bf16.mxu1 %v1486_v35  ;;  %v558_v44 = vld [vmem:[#allocation3 + $0x738] sm:$0xff]  ;;  %v1437_v35 = vunpack.c.l.s8.bf16 %v501_v39  ;;  %v1430_v17 = vunpack.c.h.s8.bf16 %v494_v18  ;;  %v1422_v2 = vunpack.c.l.s8.bf16 %v494_v18 }
 0x55c   :  { %4204 = vmatpush1.bf16.msra.mxu0 %v1357_v19  ;;  %v1558_v19 = vunpack.c.h.s8.bf16 %v558_v44 }
 0x55d   :  { %4245 = vmatpush1.bf16.msra.mxu1 %v1485_v24  ;;  %4205 = vmatprep.subr.bf16.mxu0 %v1478_v16  ;;  %v493_v24 = vld [vmem:[#allocation3 + $0x530] sm:$0xff] }
 0x55e   :  { %4246 = vmatprep.subr.bf16.mxu1 %v1606_v23  ;;  %v557_v16 = vld [vmem:[#allocation3 + $0x730] sm:$0xff]  ;;  %v1429_v23 = vunpack.c.h.s8.bf16 %v493_v24 }
 0x55f   :  { %v1557_v1 = vunpack.c.h.s8.bf16 %v557_v16  ;;  %v1549_v29 = vunpack.c.l.s8.bf16 %v557_v16 }
 0x560   :  { %4206 = vmatpush2.bf16.msra.mxu0 %v1477_v20  ;;  %v1550_v20 = vunpack.c.l.s8.bf16 %v558_v44 }
 0x561   :  { %4247 = vmatpush2.bf16.msra.mxu1 %v1605_v48  ;;  %4207 = vmatprep.subr.bf16.mxu0 %v1470_v46  ;;  %v614_v48 = vld [vmem:[#allocation3 + $0x8f8] sm:$0xff] }
 0x562   :  { %4248 = vmatprep.subr.bf16.mxu1 %v1598_v26  ;;  %v678_v46 = vld [vmem:[#allocation3 + $0xaf8] sm:$0xff]  ;;  %v1421_v26 = vunpack.c.l.s8.bf16 %v493_v24  ;;  %v1670_v31 = vunpack.c.h.s8.bf16 %v614_v48  ;;  %v1662_v15 = vunpack.c.l.s8.bf16 %v614_v48 }
 0x563   :  { %v598_v24 = vld [vmem:[#allocation3 + $0x878] sm:$0xff] }
 0x564   :  { %4208 = vmatpush2.bf16.msra.mxu0 %v1469_v28  ;;  %v1798_v28 = vunpack.c.h.s8.bf16 %v678_v46  ;;  %v1638_v16 = vunpack.c.h.s8.bf16 %v598_v24 }
 0x565   :  { %4249 = vmatpush2.bf16.msra.mxu1 %v1597_v32  ;;  %4209 = vmatprep.subr.bf16.mxu0 %v1462_v30  ;;  %v613_v32 = vld [vmem:[#allocation3 + $0x8f0] sm:$0xff] }
 0x566   :  { %4250 = vmatprep.subr.bf16.mxu1 %v1590_v9  ;;  %v677_v30 = vld [vmem:[#allocation3 + $0xaf0] sm:$0xff]  ;;  %v1669_v9 = vunpack.c.h.s8.bf16 %v613_v32 }
 0x567   :  { %v1797_v10 = vunpack.c.h.s8.bf16 %v677_v30 }
 0x568   :  { %4210 = vmatpush2.bf16.msra.mxu0 %v1461_v54  ;;  %v1790_v54 = vunpack.c.l.s8.bf16 %v678_v46  ;;  %v1630_v46 = vunpack.c.l.s8.bf16 %v598_v24  ;;  %v701_v24 = vld [vmem:[#allocation3 + $0xbb0] sm:$0xff] }
 0x569   :  { %4251 = vmatpush2.bf16.msra.mxu1 %v1589_v56  ;;  %4211 = vmatprep.subr.bf16.mxu0 %v1454_v34  ;;  %v606_v56 = vld [vmem:[#allocation3 + $0x8b8] sm:$0xff] }
 0x56a   :  { %4252 = vmatprep.subr.bf16.mxu1 %v1582_v37  ;;  %v670_v34 = vld [vmem:[#allocation3 + $0xab8] sm:$0xff]  ;;  %v1654_v39 = vunpack.c.h.s8.bf16 %v606_v56 }
 0x56b   :  { %v1782_v40 = vunpack.c.h.s8.bf16 %v670_v34 }
 0x56c   :  { %4212 = vmatpush2.bf16.msra.mxu0 %v1453_v49  ;;  %v1661_v49 = vunpack.c.l.s8.bf16 %v613_v32 }
 0x56d   :  { %4253 = vmatpush2.bf16.msra.mxu1 %v1581_v52  ;;  %4213 = vmatprep.subr.bf16.mxu0 %v1446_v62  ;;  %v1789_v52 = vunpack.c.l.s8.bf16 %v677_v30 }
 0x56e   :  { %4254 = vmatprep.subr.bf16.mxu1 %v1574_v53 }
 0x570   :  { %4214 = vmatpush2.bf16.msra.mxu0 %v1445_v3  ;;  %v605_v3 = vld [vmem:[#allocation3 + $0x8b0] sm:$0xff] }
 0x571   :  { %4255 = vmatpush2.bf16.msra.mxu1 %v1573_v57  ;;  %4215 = vmatprep.subr.bf16.mxu0 %v1438_v4  ;;  %v669_v57 = vld [vmem:[#allocation3 + $0xab0] sm:$0xff]  ;;  %v1653_v18 = vunpack.c.h.s8.bf16 %v605_v3 }
 0x572   :  { %4256 = vmatprep.subr.bf16.mxu1 %v1566_v8  ;;  %v1781_v44 = vunpack.c.h.s8.bf16 %v669_v57 }
 0x574   :  { %4216 = vmatpush2.bf16.msra.mxu0 %v1437_v35 }
 0x575   :  { %4257 = vmatpush2.bf16.msra.mxu1 %v1565_v12  ;;  %4217 = vmatprep.subr.bf16.mxu0 %v1430_v17  ;;  %v1646_v17 = vunpack.c.l.s8.bf16 %v606_v56 }
 0x576   :  { %4258 = vmatprep.subr.bf16.mxu1 %v1558_v19  ;;  %v1774_v19 = vunpack.c.l.s8.bf16 %v670_v34 }
 0x578   :  { %4218 = vmatpush2.bf16.msra.mxu0 %v1429_v23 }
 0x579   :  { %4259 = vmatpush2.bf16.msra.mxu1 %v1557_v1  ;;  %4219 = vmatprep.subr.bf16.mxu0 %v1422_v2  ;;  %v597_v1 = vld [vmem:[#allocation3 + $0x870] sm:$0xff] }
 0x57a   :  { %4260 = vmatprep.subr.bf16.mxu1 %v1550_v20  ;;  %v661_v2 = vld [vmem:[#allocation3 + $0xa70] sm:$0xff]  ;;  %v1637_v20 = vunpack.c.h.s8.bf16 %v597_v1 }
 0x57b   :  { %v1765_v48 = vunpack.c.h.s8.bf16 %v661_v2  ;;  %v1757_v32 = vunpack.c.l.s8.bf16 %v661_v2 }
 0x57c   :  { %4220 = vmatpush2.bf16.msra.mxu0 %v1421_v26 }
 0x57d   :  { %4261 = vmatpush2.bf16.msra.mxu1 %v1549_v29  ;;  %4271 = vmatprep.subr.bf16.mxu0 %v1670_v31  ;;  %v590_v29 = vld [vmem:[#allocation3 + $0x838] sm:$0xff] }
 0x57e   :  { %4312 = vmatprep.subr.bf16.mxu1 %v1798_v28  ;;  %v654_v31 = vld [vmem:[#allocation3 + $0xa38] sm:$0xff]  ;;  %v1629_v28 = vunpack.c.l.s8.bf16 %v597_v1  ;;  %v1622_v30 = vunpack.c.h.s8.bf16 %v590_v29  ;;  %v1614_v34 = vunpack.c.l.s8.bf16 %v590_v29  ;;  %v693_v29 = vld [vmem:[#allocation3 + $0xb70] sm:$0xff] }
 0x57f   :  { %v3977_v37 = vpop.f32.mrf.mxu0  ;;  %4222 = vmatmul.mubr.bf16.vlgmr.msra.gmra.mxu0 %v6202_v59  ;;  %v694_v1 = vld [vmem:[#allocation3 + $0xb78] sm:$0xff] }
 0x580   :  { %v4018_v33 = vpop.f32.mrf.mxu1  ;;  %4263 = vmatmul.mubr.bf16.vlgmr.msra.gmra.mxu1 %v6206_v60  ;;  %v3978_v38 = vadd.f32 %v3977_v37, %v6450_v7  ;;  %4272 = vmatpush1.bf16.msra.mxu0 %v1669_v9  ;;  %v1750_v9 = vunpack.c.h.s8.bf16 %v654_v31  ;;  %v1742_v37 = vunpack.c.l.s8.bf16 %v654_v31 }
 0x581   :  { %4313 = vmatpush1.bf16.msra.mxu1 %v1797_v10  ;;  %v3979_v62 = vpop.f32.mrf.mxu0  ;;  %4273 = vmatprep.subr.bf16.mxu0 %v1662_v15  ;;  %v589_v10 = vld [vmem:[#allocation3 + $0x830] sm:$0xff] }
 0x582   :  { %v4020_v53 = vpop.f32.mrf.mxu1  ;;  %4314 = vmatprep.subr.bf16.mxu1 %v1790_v54  ;;  %v6460_v4 = vadd.f32 %v4018_v33, %v3978_v38  ;;  %v3980_v59 = vadd.f32 %v3979_v62, %v6455_v25  ;;  %4303 = vmatprep.mubr.bf16.mxu0 %v6208_v5  ;;  %v662_v25 = vld [vmem:[#allocation3 + $0xa78] sm:$0xff]  ;;  %v1645_v5 = vunpack.c.l.s8.bf16 %v605_v3  ;;  %v653_v15 = vld [vmem:[#allocation3 + $0xa30] sm:$0xff]  ;;  %v1621_v54 = vunpack.c.h.s8.bf16 %v589_v10 }
 0x583   :  { %4344 = vmatprep.mubr.bf16.mxu1 %v6210_v6  ;;  %v3981_v60 = vpop.f32.mrf.mxu0  ;;  %v1773_v6 = vunpack.c.l.s8.bf16 %v669_v57  ;;  %v1766_v23 = vunpack.c.h.s8.bf16 %v662_v25  ;;  %v1758_v26 = vunpack.c.l.s8.bf16 %v662_v25  ;;  %v1749_v56 = vunpack.c.h.s8.bf16 %v653_v15  ;;  %v646_v33 = vld [vmem:[#allocation3 + $0x9f8] sm:$0xff] }
 0x584   :  { %v4022_v7 = vpop.f32.mrf.mxu1  ;;  %v6465_v8 = vadd.f32 %v4020_v53, %v3980_v59  ;;  %4274 = vmatpush1.bf16.msra.mxu0 %v1661_v49  ;;  %v710_v38 = vld [vmem:[#allocation3 + $0xbf8] sm:$0xff]  ;;  %v1613_v49 = vunpack.c.l.s8.bf16 %v589_v10  ;;  %v1734_v62 = vunpack.c.h.s8.bf16 %v646_v33  ;;  %v1726_v59 = vunpack.c.l.s8.bf16 %v646_v33  ;;  %v685_v33 = vld [vmem:[#allocation3 + $0xb30] sm:$0xff] }
 0x585   :  { %4315 = vmatpush1.bf16.msra.mxu1 %v1789_v52  ;;  %v3982_v35 = vpop.f32.mrf.mxu0  ;;  %4275 = vmatprep.subr.bf16.mxu0 %v1654_v39  ;;  %v1741_v52 = vunpack.c.l.s8.bf16 %v653_v15  ;;  %v1862_v53 = vunpack.c.h.s8.bf16 %v710_v38  ;;  %v645_v39 = vld [vmem:[#allocation3 + $0x9f0] sm:$0xff]  ;;  %v1854_v60 = vunpack.c.l.s8.bf16 %v710_v38  ;;  %v638_v7 = vld [vmem:[#allocation3 + $0x9b8] sm:$0xff] }
 0x586   :  { %v4023_v12 = vpop.f32.mrf.mxu1  ;;  %4316 = vmatprep.subr.bf16.mxu1 %v1782_v40  ;;  %v709_v40 = vld [vmem:[#allocation3 + $0xbf0] sm:$0xff]  ;;  %v1733_v3 = vunpack.c.h.s8.bf16 %v645_v39  ;;  %v686_v10 = vld [vmem:[#allocation3 + $0xb38] sm:$0xff] }
 0x587   :  { %v1861_v57 = vunpack.c.h.s8.bf16 %v709_v40  ;;  %v1853_v35 = vunpack.c.l.s8.bf16 %v709_v40  ;;  %v1718_v12 = vunpack.c.h.s8.bf16 %v638_v7 }
 0x588   :  { %4276 = vmatpush1.bf16.msra.mxu0 %v1653_v18  ;;  %v702_v18 = vld [vmem:[#allocation3 + $0xbb8] sm:$0xff] }
 0x589   :  { %4317 = vmatpush1.bf16.msra.mxu1 %v1781_v44  ;;  %4277 = vmatprep.subr.bf16.mxu0 %v1646_v17  ;;  %v1725_v44 = vunpack.c.l.s8.bf16 %v645_v39  ;;  %v1846_v17 = vunpack.c.h.s8.bf16 %v702_v18  ;;  %v806_v39 = vld [vmem:[#allocation3 + $0xef8] sm:$0xff] }
 0x58a   :  { %4318 = vmatprep.subr.bf16.mxu1 %v1774_v19  ;;  %v637_v19 = vld [vmem:[#allocation3 + $0x9b0] sm:$0xff] }
 0x58b   :  { %v1717_v25 = vunpack.c.h.s8.bf16 %v637_v19  ;;  %v1709_v2 = vunpack.c.l.s8.bf16 %v637_v19  ;;  %v798_v19 = vld [vmem:[#allocation3 + $0xeb8] sm:$0xff] }
 0x58c   :  { %4278 = vmatpush1.bf16.msra.mxu0 %v1645_v5  ;;  %v1845_v5 = vunpack.c.h.s8.bf16 %v701_v24 }
 0x58d   :  { %4319 = vmatpush1.bf16.msra.mxu1 %v1773_v6  ;;  %4279 = vmatprep.subr.bf16.mxu0 %v1638_v16  ;;  %v1710_v6 = vunpack.c.l.s8.bf16 %v638_v7  ;;  %v1838_v16 = vunpack.c.l.s8.bf16 %v702_v18  ;;  %v805_v7 = vld [vmem:[#allocation3 + $0xef0] sm:$0xff] }
 0x58e   :  { %4320 = vmatprep.subr.bf16.mxu1 %v1766_v23  ;;  %v630_v23 = vld [vmem:[#allocation3 + $0x978] sm:$0xff] }
 0x590   :  { %4280 = vmatpush1.bf16.msra.mxu0 %v1637_v20  ;;  %v1837_v20 = vunpack.c.l.s8.bf16 %v701_v24 }
 0x591   :  { %4321 = vmatpush1.bf16.msra.mxu1 %v1765_v48  ;;  %4281 = vmatprep.subr.bf16.mxu0 %v1630_v46  ;;  %v1702_v48 = vunpack.c.h.s8.bf16 %v630_v23  ;;  %v1830_v46 = vunpack.c.h.s8.bf16 %v694_v1 }
 0x592   :  { %4322 = vmatprep.subr.bf16.mxu1 %v1758_v26  ;;  %v629_v26 = vld [vmem:[#allocation3 + $0x970] sm:$0xff] }
 0x593   :  { %v1701_v31 = vunpack.c.h.s8.bf16 %v629_v26  ;;  %v1693_v15 = vunpack.c.l.s8.bf16 %v629_v26 }
 0x594   :  { %4282 = vmatpush1.bf16.msra.mxu0 %v1629_v28  ;;  %v1829_v28 = vunpack.c.h.s8.bf16 %v693_v29 }
 0x595   :  { %4323 = vmatpush1.bf16.msra.mxu1 %v1757_v32  ;;  %4283 = vmatprep.subr.bf16.mxu0 %v1622_v30  ;;  %v1694_v32 = vunpack.c.l.s8.bf16 %v630_v23  ;;  %v1822_v30 = vunpack.c.l.s8.bf16 %v694_v1 }
 0x596   :  { %4324 = vmatprep.subr.bf16.mxu1 %v1750_v9  ;;  %v622_v9 = vld [vmem:[#allocation3 + $0x938] sm:$0xff] }
 0x598   :  { %4284 = vmatpush1.bf16.msra.mxu0 %v1621_v54  ;;  %v1821_v54 = vunpack.c.l.s8.bf16 %v693_v29 }
 0x599   :  { %4325 = vmatpush1.bf16.msra.mxu1 %v1749_v56  ;;  %4285 = vmatprep.subr.bf16.mxu0 %v1614_v34  ;;  %v1686_v56 = vunpack.c.h.s8.bf16 %v622_v9  ;;  %v1814_v34 = vunpack.c.h.s8.bf16 %v686_v10 }
 0x59a   :  { %4326 = vmatprep.subr.bf16.mxu1 %v1742_v37  ;;  %v621_v37 = vld [vmem:[#allocation3 + $0x930] sm:$0xff] }
 0x59b   :  { %v1685_v38 = vunpack.c.h.s8.bf16 %v621_v37  ;;  %v1677_v40 = vunpack.c.l.s8.bf16 %v621_v37  ;;  %v789_v37 = vld [vmem:[#allocation3 + $0xe70] sm:$0xff] }
 0x59c   :  { %4286 = vmatpush1.bf16.msra.mxu0 %v1613_v49  ;;  %v1813_v49 = vunpack.c.h.s8.bf16 %v685_v33 }
 0x59d   :  { %4327 = vmatpush1.bf16.msra.mxu1 %v1741_v52  ;;  %4287 = vmatprep.subr.bf16.mxu0 %v1734_v62  ;;  %v1678_v52 = vunpack.c.l.s8.bf16 %v622_v9  ;;  %v1806_v62 = vunpack.c.l.s8.bf16 %v686_v10  ;;  %v2030_v10 = vunpack.c.l.s8.bf16 %v798_v19 }
 0x59e   :  { %4328 = vmatprep.subr.bf16.mxu1 %v1862_v53  ;;  %v742_v53 = vld [vmem:[#allocation3 + $0xcf8] sm:$0xff] }
 0x5a0   :  { %4288 = vmatpush2.bf16.msra.mxu0 %v1733_v3  ;;  %v1805_v3 = vunpack.c.l.s8.bf16 %v685_v33 }
 0x5a1   :  { %4329 = vmatpush2.bf16.msra.mxu1 %v1861_v57  ;;  %4289 = vmatprep.subr.bf16.mxu0 %v1726_v59  ;;  %v1926_v57 = vunpack.c.h.s8.bf16 %v742_v53  ;;  %v2054_v59 = vunpack.c.h.s8.bf16 %v806_v39 }
 0x5a2   :  { %4330 = vmatprep.subr.bf16.mxu1 %v1854_v60  ;;  %v741_v60 = vld [vmem:[#allocation3 + $0xcf0] sm:$0xff] }
 0x5a3   :  { %v1925_v18 = vunpack.c.h.s8.bf16 %v741_v60 }
 0x5a4   :  { %4290 = vmatpush2.bf16.msra.mxu0 %v1725_v44  ;;  %v2053_v44 = vunpack.c.h.s8.bf16 %v805_v7 }
 0x5a5   :  { %4331 = vmatpush2.bf16.msra.mxu1 %v1853_v35  ;;  %4291 = vmatprep.subr.bf16.mxu0 %v1718_v12  ;;  %v1918_v35 = vunpack.c.l.s8.bf16 %v742_v53  ;;  %v2046_v12 = vunpack.c.l.s8.bf16 %v806_v39  ;;  %v782_v53 = vld [vmem:[#allocation3 + $0xe38] sm:$0xff] }
 0x5a6   :  { %4332 = vmatprep.subr.bf16.mxu1 %v1846_v17  ;;  %v734_v17 = vld [vmem:[#allocation3 + $0xcb8] sm:$0xff] }
 0x5a7   :  { %v1902_v9 = vunpack.c.l.s8.bf16 %v734_v17 }
 0x5a8   :  { %4292 = vmatpush2.bf16.msra.mxu0 %v1717_v25 }
 0x5a9   :  { %4333 = vmatpush2.bf16.msra.mxu1 %v1845_v5  ;;  %4293 = vmatprep.subr.bf16.mxu0 %v1710_v6  ;;  %v1917_v6 = vunpack.c.l.s8.bf16 %v741_v60  ;;  %v781_v60 = vld [vmem:[#allocation3 + $0xe30] sm:$0xff] }
 0x5aa   :  { %4334 = vmatprep.subr.bf16.mxu1 %v1838_v16  ;;  %v2045_v16 = vunpack.c.l.s8.bf16 %v805_v7 }
 0x5ac   :  { %4294 = vmatpush2.bf16.msra.mxu0 %v1709_v2  ;;  %v1910_v2 = vunpack.c.h.s8.bf16 %v734_v17  ;;  %v838_v17 = vld [vmem:[#allocation3 + $0xff8] sm:$0xff] }
 0x5ad   :  { %4335 = vmatpush2.bf16.msra.mxu1 %v1837_v20  ;;  %4295 = vmatprep.subr.bf16.mxu0 %v1702_v48  ;;  %v2038_v20 = vunpack.c.h.s8.bf16 %v798_v19  ;;  %v733_v48 = vld [vmem:[#allocation3 + $0xcb0] sm:$0xff] }
 0x5ae   :  { %4336 = vmatprep.subr.bf16.mxu1 %v1830_v46  ;;  %v797_v46 = vld [vmem:[#allocation3 + $0xeb0] sm:$0xff] }
 0x5b0   :  { %4296 = vmatpush2.bf16.msra.mxu0 %v1701_v31  ;;  %v1909_v31 = vunpack.c.h.s8.bf16 %v733_v48 }
 0x5b1   :  { %4337 = vmatpush2.bf16.msra.mxu1 %v1829_v28  ;;  %4297 = vmatprep.subr.bf16.mxu0 %v1694_v32  ;;  %v2037_v28 = vunpack.c.h.s8.bf16 %v797_v46 }
 0x5b2   :  { %4338 = vmatprep.subr.bf16.mxu1 %v1822_v30 }
 0x5b4   :  { %4298 = vmatpush2.bf16.msra.mxu0 %v1693_v15  ;;  %v726_v15 = vld [vmem:[#allocation3 + $0xc78] sm:$0xff] }
 0x5b5   :  { %4339 = vmatpush2.bf16.msra.mxu1 %v1821_v54  ;;  %4299 = vmatprep.subr.bf16.mxu0 %v1686_v56  ;;  %v1894_v54 = vunpack.c.h.s8.bf16 %v726_v15 }
 0x5b6   :  { %4340 = vmatprep.subr.bf16.mxu1 %v1814_v34  ;;  %v725_v34 = vld [vmem:[#allocation3 + $0xc70] sm:$0xff] }
 0x5b7   :  { %v1893_v33 = vunpack.c.h.s8.bf16 %v725_v34  ;;  %v1885_v39 = vunpack.c.l.s8.bf16 %v725_v34 }
 0x5b8   :  { %4300 = vmatpush2.bf16.msra.mxu0 %v1685_v38  ;;  %v2021_v38 = vunpack.c.h.s8.bf16 %v789_v37 }
 0x5b9   :  { %4341 = vmatpush2.bf16.msra.mxu1 %v1813_v49  ;;  %4301 = vmatprep.subr.bf16.mxu0 %v1678_v52  ;;  %v1886_v49 = vunpack.c.l.s8.bf16 %v726_v15 }
 0x5ba   :  { %4342 = vmatprep.subr.bf16.mxu1 %v1806_v62  ;;  %v718_v62 = vld [vmem:[#allocation3 + $0xc38] sm:$0xff] }
 0x5bc   :  { %4302 = vmatpush2.bf16.msra.mxu0 %v1677_v40  ;;  %v2013_v40 = vunpack.c.l.s8.bf16 %v789_v37  ;;  %v757_v37 = vld [vmem:[#allocation3 + $0xd70] sm:$0xff] }
 0x5bd   :  { %4343 = vmatpush2.bf16.msra.mxu1 %v1805_v3  ;;  %4353 = vmatprep.subr.bf16.mxu0 %v1926_v57  ;;  %v1878_v3 = vunpack.c.h.s8.bf16 %v718_v62  ;;  %v2006_v57 = vunpack.c.h.s8.bf16 %v782_v53 }
 0x5be   :  { %4394 = vmatprep.subr.bf16.mxu1 %v2054_v59  ;;  %v717_v59 = vld [vmem:[#allocation3 + $0xc30] sm:$0xff] }
 0x5bf   :  { %v4059_v24 = vpop.f32.mrf.mxu0  ;;  %4304 = vmatmul.mubr.bf16.vlgmr.msra.gmra.mxu0 %v6231_v63  ;;  %v1877_v7 = vunpack.c.h.s8.bf16 %v717_v59  ;;  %v1869_v19 = vunpack.c.l.s8.bf16 %v717_v59 }
 0x5c0   :  { %v4100_v25 = vpop.f32.mrf.mxu1  ;;  %4345 = vmatmul.mubr.bf16.vlgmr.msra.gmra.mxu1 %v6235_v0  ;;  %v4060_v5 = vadd.f32 %v4059_v24, %v6460_v4  ;;  %4354 = vmatpush1.bf16.msra.mxu0 %v1925_v18  ;;  %v2005_v18 = vunpack.c.h.s8.bf16 %v781_v60  ;;  %v1997_v24 = vunpack.c.l.s8.bf16 %v781_v60  ;;  %v749_v60 = vld [vmem:[#allocation3 + $0xd30] sm:$0xff] }
 0x5c1   :  { %4395 = vmatpush1.bf16.msra.mxu1 %v2053_v44  ;;  %v4061_v23 = vpop.f32.mrf.mxu0  ;;  %4355 = vmatprep.subr.bf16.mxu0 %v1918_v35  ;;  %v1870_v44 = vunpack.c.l.s8.bf16 %v718_v62  ;;  %v1998_v35 = vunpack.c.l.s8.bf16 %v782_v53  ;;  %v750_v53 = vld [vmem:[#allocation3 + $0xd38] sm:$0xff] }
 0x5c2   :  { %v4102_v1 = vpop.f32.mrf.mxu1  ;;  %4396 = vmatprep.subr.bf16.mxu1 %v2046_v12  ;;  %v6470_v26 = vadd.f32 %v4100_v25, %v4060_v5  ;;  %v4062_v63 = vadd.f32 %v4061_v23, %v6465_v8  ;;  %4385 = vmatprep.mubr.bf16.mxu0 %v6237_v42  ;;  %v790_v8 = vld [vmem:[#allocation3 + $0xe78] sm:$0xff]  ;;  %v1901_v42 = vunpack.c.l.s8.bf16 %v733_v48  ;;  %v2118_v5 = vunpack.c.h.s8.bf16 %v838_v17 }
 0x5c3   :  { %4426 = vmatprep.mubr.bf16.mxu1 %v6239_v47  ;;  %v4063_v0 = vpop.f32.mrf.mxu0  ;;  %v2029_v47 = vunpack.c.l.s8.bf16 %v797_v46  ;;  %v2022_v56 = vunpack.c.h.s8.bf16 %v790_v8  ;;  %v2014_v52 = vunpack.c.l.s8.bf16 %v790_v8  ;;  %v774_v12 = vld [vmem:[#allocation3 + $0xdf8] sm:$0xff] }
 0x5c4   :  { %v4104_v4 = vpop.f32.mrf.mxu1  ;;  %v6475_v29 = vadd.f32 %v4102_v1, %v4062_v63  ;;  %4356 = vmatpush1.bf16.msra.mxu0 %v1917_v6  ;;  %v1990_v25 = vunpack.c.h.s8.bf16 %v774_v12  ;;  %v773_v6 = vld [vmem:[#allocation3 + $0xdf0] sm:$0xff]  ;;  %v766_v48 = vld [vmem:[#allocation3 + $0xdb8] sm:$0xff] }
 0x5c5   :  { %4397 = vmatpush1.bf16.msra.mxu1 %v2045_v16  ;;  %v4064_v32 = vpop.f32.mrf.mxu0  ;;  %4357 = vmatprep.subr.bf16.mxu0 %v1910_v2  ;;  %v837_v16 = vld [vmem:[#allocation3 + $0xff0] sm:$0xff]  ;;  %v1989_v23 = vunpack.c.h.s8.bf16 %v773_v6  ;;  %v1982_v2 = vunpack.c.l.s8.bf16 %v774_v12  ;;  %v830_v46 = vld [vmem:[#allocation3 + $0xfb8] sm:$0xff]  ;;  %v1981_v63 = vunpack.c.l.s8.bf16 %v773_v6  ;;  %v1974_v4 = vunpack.c.h.s8.bf16 %v766_v48 }
 0x5c6   :  { %v4105_v30 = vpop.f32.mrf.mxu1  ;;  %4398 = vmatprep.subr.bf16.mxu1 %v2038_v20  ;;  %v2117_v1 = vunpack.c.h.s8.bf16 %v837_v16  ;;  %v2110_v20 = vunpack.c.l.s8.bf16 %v838_v17  ;;  %v2109_v0 = vunpack.c.l.s8.bf16 %v837_v16  ;;  %v829_v32 = vld [vmem:[#allocation3 + $0xfb0] sm:$0xff]  ;;  %v2094_v15 = vunpack.c.l.s8.bf16 %v830_v46  ;;  %v758_v8 = vld [vmem:[#allocation3 + $0xd78] sm:$0xff] }
 0x5c7   :  { %v870_v17 = vld [vmem:[#allocation3 + $0x10f8] sm:$0xff]  ;;  %v869_v16 = vld [vmem:[#allocation3 + $0x10f0] sm:$0xff] }
 0x5c8   :  { %4358 = vmatpush1.bf16.msra.mxu0 %v1909_v31  ;;  %v2102_v31 = vunpack.c.h.s8.bf16 %v830_v46  ;;  %v862_v46 = vld [vmem:[#allocation3 + $0x10b8] sm:$0xff] }
 0x5c9   :  { %4399 = vmatpush1.bf16.msra.mxu1 %v2037_v28  ;;  %4359 = vmatprep.subr.bf16.mxu0 %v1902_v9  ;;  %v765_v28 = vld [vmem:[#allocation3 + $0xdb0] sm:$0xff]  ;;  %v2101_v9 = vunpack.c.h.s8.bf16 %v829_v32 }
 0x5ca   :  { %4400 = vmatprep.subr.bf16.mxu1 %v2030_v10  ;;  %v1973_v30 = vunpack.c.h.s8.bf16 %v765_v28  ;;  %v1966_v10 = vunpack.c.l.s8.bf16 %v766_v48 }
 0x5cc   :  { %4360 = vmatpush1.bf16.msra.mxu0 %v1901_v42  ;;  %v822_v42 = vld [vmem:[#allocation3 + $0xf78] sm:$0xff] }
 0x5cd   :  { %4401 = vmatpush1.bf16.msra.mxu1 %v2029_v47  ;;  %4361 = vmatprep.subr.bf16.mxu0 %v1894_v54  ;;  %v1965_v47 = vunpack.c.l.s8.bf16 %v765_v28  ;;  %v2093_v54 = vunpack.c.l.s8.bf16 %v829_v32  ;;  %v2086_v34 = vunpack.c.h.s8.bf16 %v822_v42  ;;  %v2078_v62 = vunpack.c.l.s8.bf16 %v822_v42  ;;  %v925_v42 = vld [vmem:[#allocation3 + $0x12b0] sm:$0xff] }
 0x5ce   :  { %4402 = vmatprep.subr.bf16.mxu1 %v2022_v56  ;;  %v1958_v56 = vunpack.c.h.s8.bf16 %v758_v8  ;;  %v2173_v28 = vunpack.c.l.s8.bf16 %v869_v16 }
 0x5d0   :  { %4362 = vmatpush1.bf16.msra.mxu0 %v1893_v33  ;;  %v821_v33 = vld [vmem:[#allocation3 + $0xf70] sm:$0xff] }
 0x5d1   :  { %4403 = vmatpush1.bf16.msra.mxu1 %v2021_v38  ;;  %4363 = vmatprep.subr.bf16.mxu0 %v1886_v49  ;;  %v1957_v38 = vunpack.c.h.s8.bf16 %v757_v37  ;;  %v2085_v49 = vunpack.c.h.s8.bf16 %v821_v33 }
 0x5d2   :  { %4404 = vmatprep.subr.bf16.mxu1 %v2014_v52  ;;  %v1950_v52 = vunpack.c.l.s8.bf16 %v758_v8  ;;  %v861_v8 = vld [vmem:[#allocation3 + $0x10b0] sm:$0xff] }
 0x5d4   :  { %4364 = vmatpush1.bf16.msra.mxu0 %v1885_v39  ;;  %v814_v39 = vld [vmem:[#allocation3 + $0xf38] sm:$0xff] }
 0x5d5   :  { %4405 = vmatpush1.bf16.msra.mxu1 %v2013_v40  ;;  %4365 = vmatprep.subr.bf16.mxu0 %v1878_v3  ;;  %v1949_v40 = vunpack.c.l.s8.bf16 %v757_v37  ;;  %v2077_v3 = vunpack.c.l.s8.bf16 %v821_v33  ;;  %v2070_v59 = vunpack.c.h.s8.bf16 %v814_v39  ;;  %v2062_v12 = vunpack.c.l.s8.bf16 %v814_v39  ;;  %v853_v39 = vld [vmem:[#allocation3 + $0x1070] sm:$0xff] }
 0x5d6   :  { %4406 = vmatprep.subr.bf16.mxu1 %v2006_v57  ;;  %v1942_v57 = vunpack.c.h.s8.bf16 %v750_v53  ;;  %v2158_v33 = vunpack.c.l.s8.bf16 %v862_v46 }
 0x5d8   :  { %4366 = vmatpush1.bf16.msra.mxu0 %v1877_v7  ;;  %v813_v7 = vld [vmem:[#allocation3 + $0xf30] sm:$0xff] }
 0x5d9   :  { %4407 = vmatpush1.bf16.msra.mxu1 %v2005_v18  ;;  %4367 = vmatprep.subr.bf16.mxu0 %v1870_v44  ;;  %v1941_v18 = vunpack.c.h.s8.bf16 %v749_v60  ;;  %v2069_v44 = vunpack.c.h.s8.bf16 %v813_v7 }
 0x5da   :  { %4408 = vmatprep.subr.bf16.mxu1 %v1998_v35  ;;  %v1934_v35 = vunpack.c.l.s8.bf16 %v750_v53 }
 0x5dc   :  { %4368 = vmatpush1.bf16.msra.mxu0 %v1869_v19  ;;  %v934_v19 = vld [vmem:[#allocation3 + $0x12f8] sm:$0xff] }
 0x5dd   :  { %4409 = vmatpush1.bf16.msra.mxu1 %v1997_v24  ;;  %4369 = vmatprep.subr.bf16.mxu0 %v1990_v25  ;;  %v1933_v24 = vunpack.c.l.s8.bf16 %v749_v60  ;;  %v2061_v25 = vunpack.c.l.s8.bf16 %v813_v7  ;;  %v2310_v6 = vunpack.c.h.s8.bf16 %v934_v19  ;;  %v2302_v48 = vunpack.c.l.s8.bf16 %v934_v19  ;;  %v846_v7 = vld [vmem:[#allocation3 + $0x1038] sm:$0xff]  ;;  %v845_v19 = vld [vmem:[#allocation3 + $0x1030] sm:$0xff] }
 0x5de   :  { %4410 = vmatprep.subr.bf16.mxu1 %v2118_v5  ;;  %v2182_v5 = vunpack.c.h.s8.bf16 %v870_v17 }
 0x5e0   :  { %4370 = vmatpush2.bf16.msra.mxu0 %v1989_v23  ;;  %v933_v23 = vld [vmem:[#allocation3 + $0x12f0] sm:$0xff] }
 0x5e1   :  { %4411 = vmatpush2.bf16.msra.mxu1 %v2117_v1  ;;  %4371 = vmatprep.subr.bf16.mxu0 %v1982_v2  ;;  %v2181_v1 = vunpack.c.h.s8.bf16 %v869_v16  ;;  %v2309_v2 = vunpack.c.h.s8.bf16 %v933_v23  ;;  %v2301_v32 = vunpack.c.l.s8.bf16 %v933_v23  ;;  %v902_v23 = vld [vmem:[#allocation3 + $0x11f8] sm:$0xff] }
 0x5e2   :  { %4412 = vmatprep.subr.bf16.mxu1 %v2110_v20  ;;  %v2174_v20 = vunpack.c.l.s8.bf16 %v870_v17 }
 0x5e4   :  { %4372 = vmatpush2.bf16.msra.mxu0 %v1981_v63  ;;  %v926_v63 = vld [vmem:[#allocation3 + $0x12b8] sm:$0xff] }
 0x5e5   :  { %4413 = vmatpush2.bf16.msra.mxu1 %v2109_v0  ;;  %4373 = vmatprep.subr.bf16.mxu0 %v1974_v4 }
 0x5e6   :  { %4414 = vmatprep.subr.bf16.mxu1 %v2102_v31 }
 0x5e8   :  { %4374 = vmatpush2.bf16.msra.mxu0 %v1973_v30 }
 0x5e9   :  { %4415 = vmatpush2.bf16.msra.mxu1 %v2101_v9  ;;  %4375 = vmatprep.subr.bf16.mxu0 %v1966_v10  ;;  %v2166_v10 = vunpack.c.h.s8.bf16 %v862_v46 }
 0x5ea   :  { %4416 = vmatprep.subr.bf16.mxu1 %v2094_v15  ;;  %v2294_v15 = vunpack.c.h.s8.bf16 %v926_v63 }
 0x5ec   :  { %4376 = vmatpush2.bf16.msra.mxu0 %v1965_v47 }
 0x5ed   :  { %4417 = vmatpush2.bf16.msra.mxu1 %v2093_v54  ;;  %4377 = vmatprep.subr.bf16.mxu0 %v1958_v56  ;;  %v2165_v54 = vunpack.c.h.s8.bf16 %v861_v8  ;;  %v2293_v56 = vunpack.c.h.s8.bf16 %v925_v42 }
 0x5ee   :  { %4418 = vmatprep.subr.bf16.mxu1 %v2086_v34 }
 0x5f0   :  { %4378 = vmatpush2.bf16.msra.mxu0 %v1957_v38  ;;  %v2286_v38 = vunpack.c.l.s8.bf16 %v926_v63  ;;  %v901_v63 = vld [vmem:[#allocation3 + $0x11f0] sm:$0xff] }
 0x5f1   :  { %4419 = vmatpush2.bf16.msra.mxu1 %v2085_v49  ;;  %4379 = vmatprep.subr.bf16.mxu0 %v1950_v52  ;;  %v854_v49 = vld [vmem:[#allocation3 + $0x1078] sm:$0xff] }
 0x5f2   :  { %4420 = vmatprep.subr.bf16.mxu1 %v2078_v62  ;;  %v918_v52 = vld [vmem:[#allocation3 + $0x1278] sm:$0xff]  ;;  %v2157_v62 = vunpack.c.l.s8.bf16 %v861_v8 }
 0x5f3   :  { %v2278_v53 = vunpack.c.h.s8.bf16 %v918_v52  ;;  %v2270_v60 = vunpack.c.l.s8.bf16 %v918_v52 }
 0x5f4   :  { %4380 = vmatpush2.bf16.msra.mxu0 %v1949_v40  ;;  %v917_v40 = vld [vmem:[#allocation3 + $0x1270] sm:$0xff] }
 0x5f5   :  { %4421 = vmatpush2.bf16.msra.mxu1 %v2077_v3  ;;  %4381 = vmatprep.subr.bf16.mxu0 %v1942_v57  ;;  %v2149_v3 = vunpack.c.h.s8.bf16 %v853_v39  ;;  %v2277_v57 = vunpack.c.h.s8.bf16 %v917_v40 }
 0x5f6   :  { %4422 = vmatprep.subr.bf16.mxu1 %v2070_v59  ;;  %v2142_v59 = vunpack.c.l.s8.bf16 %v854_v49 }
 0x5f8   :  { %4382 = vmatpush2.bf16.msra.mxu0 %v1941_v18  ;;  %v910_v18 = vld [vmem:[#allocation3 + $0x1238] sm:$0xff] }
 0x5f9   :  { %4423 = vmatpush2.bf16.msra.mxu1 %v2069_v44  ;;  %4383 = vmatprep.subr.bf16.mxu0 %v1934_v35  ;;  %v2141_v44 = vunpack.c.l.s8.bf16 %v853_v39  ;;  %v2269_v35 = vunpack.c.l.s8.bf16 %v917_v40  ;;  %v2262_v17 = vunpack.c.h.s8.bf16 %v910_v18  ;;  %v2254_v16 = vunpack.c.l.s8.bf16 %v910_v18  ;;  %v949_v39 = vld [vmem:[#allocation3 + $0x1370] sm:$0xff] }
 0x5fa   :  { %4424 = vmatprep.subr.bf16.mxu1 %v2062_v12  ;;  %v2134_v12 = vunpack.c.h.s8.bf16 %v846_v7 }
 0x5fc   :  { %4384 = vmatpush2.bf16.msra.mxu0 %v1933_v24  ;;  %v909_v24 = vld [vmem:[#allocation3 + $0x1230] sm:$0xff] }
 0x5fd   :  { %4425 = vmatpush2.bf16.msra.mxu1 %v2061_v25  ;;  %4435 = vmatprep.subr.bf16.mxu0 %v2182_v5  ;;  %v2133_v25 = vunpack.c.h.s8.bf16 %v845_v19  ;;  %v2261_v5 = vunpack.c.h.s8.bf16 %v909_v24 }
 0x5fe   :  { %4476 = vmatprep.subr.bf16.mxu1 %v2310_v6  ;;  %v2126_v6 = vunpack.c.l.s8.bf16 %v846_v7  ;;  %v942_v7 = vld [vmem:[#allocation3 + $0x1338] sm:$0xff] }
 0x5ff   :  { %v4141_v0 = vpop.f32.mrf.mxu0  ;;  %4386 = vmatmul.mubr.bf16.vlgmr.msra.gmra.mxu0 %v6260_v13 }
 0x600   :  { %v4182_v4 = vpop.f32.mrf.mxu1  ;;  %4427 = vmatmul.mubr.bf16.vlgmr.msra.gmra.mxu1 %v6264_v14  ;;  %4436 = vmatpush1.bf16.msra.mxu0 %v2181_v1  ;;  %v966_v1 = vld [vmem:[#allocation3 + $0x13f8] sm:$0xff] }
 0x601   :  { %v6479_v31 = vadd.f32 %v4182_v4, %v4141_v0  ;;  %4477 = vmatpush1.bf16.msra.mxu1 %v2309_v2  ;;  %v4143_v30 = vpop.f32.mrf.mxu0  ;;  %4437 = vmatprep.subr.bf16.mxu0 %v2174_v20  ;;  %v2125_v2 = vunpack.c.l.s8.bf16 %v845_v19  ;;  %v2253_v20 = vunpack.c.l.s8.bf16 %v909_v24  ;;  %v2374_v46 = vunpack.c.h.s8.bf16 %v966_v1  ;;  %v965_v0 = vld [vmem:[#allocation3 + $0x13f0] sm:$0xff] }
 0x602   :  { %v4184_v9 = vpop.f32.mrf.mxu1  ;;  %4478 = vmatprep.subr.bf16.mxu1 %v2302_v48  ;;  %4467 = vmatprep.mubr.bf16.mxu0 %v6266_v21  ;;  %v2285_v21 = vunpack.c.l.s8.bf16 %v925_v42  ;;  %v2246_v48 = vunpack.c.h.s8.bf16 %v902_v23  ;;  %v2245_v4 = vunpack.c.h.s8.bf16 %v901_v63  ;;  %v2365_v8 = vunpack.c.l.s8.bf16 %v965_v0  ;;  %v941_v19 = vld [vmem:[#allocation3 + $0x1330] sm:$0xff] }
 0x603   :  { %v6481_v47 = vadd.f32 %v4184_v9, %v4143_v30  ;;  %4508 = vmatprep.mubr.bf16.mxu1 %v6268_v22  ;;  %v4145_v13 = vpop.f32.mrf.mxu0  ;;  %v2150_v22 = vunpack.c.h.s8.bf16 %v854_v49  ;;  %v2366_v30 = vunpack.c.l.s8.bf16 %v966_v1  ;;  %v894_v9 = vld [vmem:[#allocation3 + $0x11b8] sm:$0xff] }
 0x604   :  { %v4186_v14 = vpop.f32.mrf.mxu1  ;;  %4438 = vmatpush1.bf16.msra.mxu0 %v2173_v28  ;;  %v2373_v28 = vunpack.c.h.s8.bf16 %v965_v0  ;;  %v2230_v42 = vunpack.c.h.s8.bf16 %v894_v9  ;;  %v950_v49 = vld [vmem:[#allocation3 + $0x1378] sm:$0xff] }
 0x605   :  { %4479 = vmatpush1.bf16.msra.mxu1 %v2301_v32  ;;  %v4146_v34 = vpop.f32.mrf.mxu0  ;;  %4439 = vmatprep.subr.bf16.mxu0 %v2166_v10  ;;  %v2238_v32 = vunpack.c.l.s8.bf16 %v902_v23  ;;  %v958_v10 = vld [vmem:[#allocation3 + $0x13b8] sm:$0xff]  ;;  %v893_v14 = vld [vmem:[#allocation3 + $0x11b0] sm:$0xff] }
 0x606   :  { %v4187_v37 = vpop.f32.mrf.mxu1  ;;  %4480 = vmatprep.subr.bf16.mxu1 %v2294_v15  ;;  %v2237_v15 = vunpack.c.l.s8.bf16 %v901_v63  ;;  %v2358_v13 = vunpack.c.h.s8.bf16 %v958_v10  ;;  %v2221_v52 = vunpack.c.l.s8.bf16 %v893_v14  ;;  %v1062_v23 = vld [vmem:[#allocation3 + $0x16f8] sm:$0xff]  ;;  %v1061_v63 = vld [vmem:[#allocation3 + $0x16f0] sm:$0xff] }
 0x607   :  { %v2222_v37 = vunpack.c.l.s8.bf16 %v894_v9  ;;  %v1054_v9 = vld [vmem:[#allocation3 + $0x16b8] sm:$0xff] }
 0x608   :  { %4440 = vmatpush1.bf16.msra.mxu0 %v2165_v54  ;;  %v957_v54 = vld [vmem:[#allocation3 + $0x13b0] sm:$0xff] }
 0x609   :  { %4481 = vmatpush1.bf16.msra.mxu1 %v2293_v56  ;;  %4441 = vmatprep.subr.bf16.mxu0 %v2158_v33  ;;  %v2229_v56 = vunpack.c.h.s8.bf16 %v893_v14  ;;  %v2357_v34 = vunpack.c.h.s8.bf16 %v957_v54  ;;  %v2350_v33 = vunpack.c.l.s8.bf16 %v958_v10 }
 0x60a   :  { %4482 = vmatprep.subr.bf16.mxu1 %v2286_v38  ;;  %v886_v38 = vld [vmem:[#allocation3 + $0x1178] sm:$0xff] }
 0x60c   :  { %4442 = vmatpush1.bf16.msra.mxu0 %v2157_v62  ;;  %v2349_v62 = vunpack.c.l.s8.bf16 %v957_v54 }
 0x60d   :  { %4483 = vmatpush1.bf16.msra.mxu1 %v2285_v21  ;;  %4443 = vmatprep.subr.bf16.mxu0 %v2150_v22  ;;  %v2214_v21 = vunpack.c.h.s8.bf16 %v886_v38  ;;  %v2342_v22 = vunpack.c.h.s8.bf16 %v950_v49 }
 0x60e   :  { %4484 = vmatprep.subr.bf16.mxu1 %v2278_v53  ;;  %v885_v53 = vld [vmem:[#allocation3 + $0x1170] sm:$0xff] }
 0x60f   :  { %v2213_v40 = vunpack.c.h.s8.bf16 %v885_v53  ;;  %v2205_v18 = vunpack.c.l.s8.bf16 %v885_v53 }
 0x610   :  { %4444 = vmatpush1.bf16.msra.mxu0 %v2149_v3  ;;  %v2341_v3 = vunpack.c.h.s8.bf16 %v949_v39 }
 0x611   :  { %4485 = vmatpush1.bf16.msra.mxu1 %v2277_v57  ;;  %4445 = vmatprep.subr.bf16.mxu0 %v2142_v59  ;;  %v2206_v57 = vunpack.c.l.s8.bf16 %v886_v38  ;;  %v2334_v59 = vunpack.c.l.s8.bf16 %v950_v49 }
 0x612   :  { %4486 = vmatprep.subr.bf16.mxu1 %v2270_v60  ;;  %v878_v60 = vld [vmem:[#allocation3 + $0x1138] sm:$0xff] }
 0x614   :  { %4446 = vmatpush1.bf16.msra.mxu0 %v2141_v44  ;;  %v2333_v44 = vunpack.c.l.s8.bf16 %v949_v39  ;;  %v2542_v39 = vunpack.c.l.s8.bf16 %v1054_v9 }
 0x615   :  { %4487 = vmatpush1.bf16.msra.mxu1 %v2269_v35  ;;  %4447 = vmatprep.subr.bf16.mxu0 %v2134_v12  ;;  %v2198_v35 = vunpack.c.h.s8.bf16 %v878_v60  ;;  %v2326_v12 = vunpack.c.h.s8.bf16 %v942_v7 }
 0x616   :  { %4488 = vmatprep.subr.bf16.mxu1 %v2262_v17  ;;  %v877_v17 = vld [vmem:[#allocation3 + $0x1130] sm:$0xff] }
 0x617   :  { %v2197_v24 = vunpack.c.h.s8.bf16 %v877_v17  ;;  %v2189_v1 = vunpack.c.l.s8.bf16 %v877_v17  ;;  %v1038_v17 = vld [vmem:[#allocation3 + $0x1638] sm:$0xff] }
 0x618   :  { %4448 = vmatpush1.bf16.msra.mxu0 %v2133_v25  ;;  %v2325_v25 = vunpack.c.h.s8.bf16 %v941_v19 }
 0x619   :  { %4489 = vmatpush1.bf16.msra.mxu1 %v2261_v5  ;;  %4449 = vmatprep.subr.bf16.mxu0 %v2126_v6  ;;  %v2190_v5 = vunpack.c.l.s8.bf16 %v878_v60  ;;  %v2318_v6 = vunpack.c.l.s8.bf16 %v942_v7  ;;  %v1045_v60 = vld [vmem:[#allocation3 + $0x1670] sm:$0xff] }
 0x61a   :  { %4490 = vmatprep.subr.bf16.mxu1 %v2254_v16  ;;  %v998_v16 = vld [vmem:[#allocation3 + $0x14f8] sm:$0xff] }
 0x61c   :  { %4450 = vmatpush1.bf16.msra.mxu0 %v2125_v2  ;;  %v2317_v2 = vunpack.c.l.s8.bf16 %v941_v19 }
 0x61d   :  { %4491 = vmatpush1.bf16.msra.mxu1 %v2253_v20  ;;  %4451 = vmatprep.subr.bf16.mxu0 %v2246_v48  ;;  %v2438_v20 = vunpack.c.h.s8.bf16 %v998_v16  ;;  %v2566_v48 = vunpack.c.h.s8.bf16 %v1062_v23 }
 0x61e   :  { %4492 = vmatprep.subr.bf16.mxu1 %v2374_v46  ;;  %v997_v46 = vld [vmem:[#allocation3 + $0x14f0] sm:$0xff] }
 0x61f   :  { %v2437_v0 = vunpack.c.h.s8.bf16 %v997_v46 }
 0x620   :  { %4452 = vmatpush2.bf16.msra.mxu0 %v2245_v4  ;;  %v2565_v4 = vunpack.c.h.s8.bf16 %v1061_v63 }
 0x621   :  { %4493 = vmatpush2.bf16.msra.mxu1 %v2373_v28  ;;  %4453 = vmatprep.subr.bf16.mxu0 %v2238_v32  ;;  %v2430_v28 = vunpack.c.l.s8.bf16 %v998_v16  ;;  %v2558_v32 = vunpack.c.l.s8.bf16 %v1062_v23  ;;  %v1037_v16 = vld [vmem:[#allocation3 + $0x1630] sm:$0xff] }
 0x622   :  { %4494 = vmatprep.subr.bf16.mxu1 %v2366_v30  ;;  %v990_v30 = vld [vmem:[#allocation3 + $0x14b8] sm:$0xff] }
 0x623   :  { %v2414_v53 = vunpack.c.l.s8.bf16 %v990_v30 }
 0x624   :  { %4454 = vmatpush2.bf16.msra.mxu0 %v2237_v15 }
 0x625   :  { %4495 = vmatpush2.bf16.msra.mxu1 %v2365_v8  ;;  %4455 = vmatprep.subr.bf16.mxu0 %v2230_v42  ;;  %v2429_v42 = vunpack.c.l.s8.bf16 %v997_v46  ;;  %v1094_v46 = vld [vmem:[#allocation3 + $0x17f8] sm:$0xff] }
 0x626   :  { %4496 = vmatprep.subr.bf16.mxu1 %v2358_v13  ;;  %v2557_v13 = vunpack.c.l.s8.bf16 %v1061_v63 }
 0x628   :  { %4456 = vmatpush2.bf16.msra.mxu0 %v2229_v56  ;;  %v2422_v56 = vunpack.c.h.s8.bf16 %v990_v30  ;;  %v1093_v30 = vld [vmem:[#allocation3 + $0x17f0] sm:$0xff] }
 0x629   :  { %4497 = vmatpush2.bf16.msra.mxu1 %v2357_v34  ;;  %4457 = vmatprep.subr.bf16.mxu0 %v2222_v37  ;;  %v2550_v34 = vunpack.c.h.s8.bf16 %v1054_v9  ;;  %v989_v37 = vld [vmem:[#allocation3 + $0x14b0] sm:$0xff] }
 0x62a   :  { %4498 = vmatprep.subr.bf16.mxu1 %v2350_v33  ;;  %v1053_v33 = vld [vmem:[#allocation3 + $0x16b0] sm:$0xff] }
 0x62c   :  { %4458 = vmatpush2.bf16.msra.mxu0 %v2221_v52  ;;  %v2421_v52 = vunpack.c.h.s8.bf16 %v989_v37 }
 0x62d   :  { %4499 = vmatpush2.bf16.msra.mxu1 %v2349_v62  ;;  %4459 = vmatprep.subr.bf16.mxu0 %v2214_v21  ;;  %v2549_v62 = vunpack.c.h.s8.bf16 %v1053_v33 }
 0x62e   :  { %4500 = vmatprep.subr.bf16.mxu1 %v2342_v22 }
 0x630   :  { %4460 = vmatpush2.bf16.msra.mxu0 %v2213_v40  ;;  %v982_v40 = vld [vmem:[#allocation3 + $0x1478] sm:$0xff] }
 0x631   :  { %4501 = vmatpush2.bf16.msra.mxu1 %v2341_v3  ;;  %4461 = vmatprep.subr.bf16.mxu0 %v2206_v57  ;;  %v2406_v3 = vunpack.c.h.s8.bf16 %v982_v40 }
 0x632   :  { %4502 = vmatprep.subr.bf16.mxu1 %v2334_v59  ;;  %v981_v59 = vld [vmem:[#allocation3 + $0x1470] sm:$0xff] }
 0x633   :  { %v2405_v7 = vunpack.c.h.s8.bf16 %v981_v59  ;;  %v2397_v19 = vunpack.c.l.s8.bf16 %v981_v59 }
 0x634   :  { %4462 = vmatpush2.bf16.msra.mxu0 %v2205_v18  ;;  %v2533_v18 = vunpack.c.h.s8.bf16 %v1045_v60 }
 0x635   :  { %4503 = vmatpush2.bf16.msra.mxu1 %v2333_v44  ;;  %4463 = vmatprep.subr.bf16.mxu0 %v2198_v35  ;;  %v2398_v44 = vunpack.c.l.s8.bf16 %v982_v40 }
 0x636   :  { %4504 = vmatprep.subr.bf16.mxu1 %v2326_v12  ;;  %v974_v12 = vld [vmem:[#allocation3 + $0x1438] sm:$0xff] }
 0x638   :  { %4464 = vmatpush2.bf16.msra.mxu0 %v2197_v24  ;;  %v2525_v24 = vunpack.c.l.s8.bf16 %v1045_v60 }
 0x639   :  { %4505 = vmatpush2.bf16.msra.mxu1 %v2325_v25  ;;  %4465 = vmatprep.subr.bf16.mxu0 %v2190_v5  ;;  %v2390_v25 = vunpack.c.h.s8.bf16 %v974_v12  ;;  %v2518_v5 = vunpack.c.h.s8.bf16 %v1038_v17 }
 0x63a   :  { %4506 = vmatprep.subr.bf16.mxu1 %v2318_v6  ;;  %v973_v6 = vld [vmem:[#allocation3 + $0x1430] sm:$0xff] }
 0x63b   :  { %v2389_v23 = vunpack.c.h.s8.bf16 %v973_v6  ;;  %v2381_v63 = vunpack.c.l.s8.bf16 %v973_v6 }
 0x63c   :  { %4466 = vmatpush2.bf16.msra.mxu0 %v2189_v1  ;;  %v2517_v1 = vunpack.c.h.s8.bf16 %v1037_v16 }
 0x63d   :  { %4507 = vmatpush2.bf16.msra.mxu1 %v2317_v2  ;;  %4517 = vmatprep.subr.bf16.mxu0 %v2438_v20  ;;  %v2382_v2 = vunpack.c.l.s8.bf16 %v974_v12  ;;  %v2510_v20 = vunpack.c.l.s8.bf16 %v1038_v17  ;;  %v6507_v12 = vld [vmem:[#allocation7] sm:$0xff]  ;;  %v1006_v17 = vld [vmem:[#allocation3 + $0x1538] sm:$0xff] }
 0x63e   :  { %4558 = vmatprep.subr.bf16.mxu1 %v2566_v48  ;;  %v1030_v48 = vld [vmem:[#allocation3 + $0x15f8] sm:$0xff] }
 0x63f   :  { %v4223_v10 = vpop.f32.mrf.mxu0  ;;  %4468 = vmatmul.mubr.bf16.vlgmr.msra.gmra.mxu0 %v6293_v36 }
 0x640   :  { %v4264_v15 = vpop.f32.mrf.mxu1  ;;  %4509 = vmatmul.mubr.bf16.vlgmr.msra.gmra.mxu1 %v6297_v61  ;;  %v4224_v8 = vadd.f32 %v4223_v10, %v6479_v31  ;;  %4518 = vmatpush1.bf16.msra.mxu0 %v2437_v0  ;;  %v2509_v0 = vunpack.c.l.s8.bf16 %v1037_v16  ;;  %v2629_v10 = vunpack.c.h.s8.bf16 %v1093_v30 }
 0x641   :  { %4559 = vmatpush1.bf16.msra.mxu1 %v2565_v4  ;;  %v4225_v14 = vpop.f32.mrf.mxu0  ;;  %4519 = vmatprep.subr.bf16.mxu0 %v2430_v28  ;;  %v2502_v4 = vunpack.c.h.s8.bf16 %v1030_v48  ;;  %v2630_v28 = vunpack.c.h.s8.bf16 %v1094_v46 }
 0x642   :  { %v4266_v54 = vpop.f32.mrf.mxu1  ;;  %4560 = vmatprep.subr.bf16.mxu1 %v2558_v32  ;;  %v6488_v38 = vadd.f32 %v4264_v15, %v4224_v8  ;;  %v4226_v36 = vadd.f32 %v4225_v14, %v6481_v47  ;;  %4549 = vmatprep.mubr.bf16.mxu0 %v6299_v45  ;;  %v1046_v47 = vld [vmem:[#allocation3 + $0x1678] sm:$0xff]  ;;  %v2413_v45 = vunpack.c.l.s8.bf16 %v989_v37  ;;  %v1029_v32 = vld [vmem:[#allocation3 + $0x15f0] sm:$0xff]  ;;  %v2494_v15 = vunpack.c.l.s8.bf16 %v1030_v48 }
 0x643   :  { %4590 = vmatprep.mubr.bf16.mxu1 %v6301_v11  ;;  %v4227_v61 = vpop.f32.mrf.mxu0  ;;  %v2541_v11 = vunpack.c.l.s8.bf16 %v1053_v33  ;;  %v2534_v57 = vunpack.c.h.s8.bf16 %v1046_v47  ;;  %v2526_v35 = vunpack.c.l.s8.bf16 %v1046_v47  ;;  %v2501_v9 = vunpack.c.h.s8.bf16 %v1029_v32  ;;  %v1021_v37 = vld [vmem:[#allocation3 + $0x15b0] sm:$0xff] }
 0x644   :  { %v4268_v31 = vpop.f32.mrf.mxu1  ;;  %v6493_v49 = vadd.f32 %v4266_v54, %v4226_v36  ;;  %4520 = vmatpush1.bf16.msra.mxu0 %v2429_v42  ;;  %v2622_v8 = vunpack.c.l.s8.bf16 %v1094_v46  ;;  %v1022_v42 = vld [vmem:[#allocation3 + $0x15b8] sm:$0xff]  ;;  %v2493_v14 = vunpack.c.l.s8.bf16 %v1029_v32  ;;  %v2621_v54 = vunpack.c.l.s8.bf16 %v1093_v30  ;;  %v1085_v33 = vld [vmem:[#allocation3 + $0x17b0] sm:$0xff] }
 0x645   :  { %4561 = vmatpush1.bf16.msra.mxu1 %v2557_v13  ;;  %v4228_v21 = vpop.f32.mrf.mxu0  ;;  %4521 = vmatprep.subr.bf16.mxu0 %v2422_v56  ;;  %v1086_v13 = vld [vmem:[#allocation3 + $0x17b8] sm:$0xff]  ;;  %v2486_v56 = vunpack.c.h.s8.bf16 %v1022_v42  ;;  %v2485_v36 = vunpack.c.h.s8.bf16 %v1021_v37  ;;  %v2613_v61 = vunpack.c.h.s8.bf16 %v1085_v33  ;;  %v2478_v31 = vunpack.c.l.s8.bf16 %v1022_v42  ;;  %v1069_v48 = vld [vmem:[#allocation3 + $0x1730] sm:$0xff] }
 0x646   :  { %v4269_v22 = vpop.f32.mrf.mxu1  ;;  %4562 = vmatprep.subr.bf16.mxu1 %v2550_v34  ;;  %v2614_v34 = vunpack.c.h.s8.bf16 %v1086_v13  ;;  %v1078_v21 = vld [vmem:[#allocation3 + $0x1778] sm:$0xff]  ;;  %v2605_v40 = vunpack.c.l.s8.bf16 %v1085_v33 }
 0x647   :  { %v6496_v22 = vsub.s32 1, %v6134_v27  ;;  %v4776_v32 = vld [vmem:[#allocation8 + $0x168] sm:$0xff] }
 0x648   :  { %4522 = vmatpush1.bf16.msra.mxu0 %v2421_v52  ;;  %v2606_v52 = vunpack.c.l.s8.bf16 %v1086_v13  ;;  %v4952_v42 = vunpack.c.h.s8.bf16 %v4776_v32  ;;  %v4743_v13 = vld [vmem:[#allocation8 + $0x60] sm:$0xff] }
 0x649   :  { %4563 = vmatpush1.bf16.msra.mxu1 %v2549_v62  ;;  %4523 = vmatprep.subr.bf16.mxu0 %v2414_v53  ;;  %v1014_v62 = vld [vmem:[#allocation3 + $0x1578] sm:$0xff]  ;;  %v6499_v53 = vsub.s32 3, %v6134_v27 }
 0x64a   :  { %4564 = vmatprep.subr.bf16.mxu1 %v2542_v39  ;;  %v2477_v39 = vunpack.c.l.s8.bf16 %v1021_v37  ;;  %v2470_v47 = vunpack.c.h.s8.bf16 %v1014_v62 }
 0x64b   :  { %v4666_v6 = vrot.slane %v6507_v12, %v6499_v53 }
 0x64c   :  { %4524 = vmatpush1.bf16.msra.mxu0 %v2413_v45  ;;  %v2598_v45 = vunpack.c.h.s8.bf16 %v1078_v21 }
 0x64d   :  { %4565 = vmatpush1.bf16.msra.mxu1 %v2541_v11  ;;  %4525 = vmatprep.subr.bf16.mxu0 %v2406_v3  ;;  %v1013_v11 = vld [vmem:[#allocation3 + $0x1570] sm:$0xff] }
 0x64e   :  { %4566 = vmatprep.subr.bf16.mxu1 %v2534_v57  ;;  %v1077_v3 = vld [vmem:[#allocation3 + $0x1770] sm:$0xff]  ;;  %v6501_v57 = vld [vmem:[#allocation5] sm:$0xff]  ;;  %v2461_v16 = vunpack.c.l.s8.bf16 %v1013_v11 }
 0x64f   :  { %v4608_v59 = vrot.slane %v6501_v57, %v6496_v22  ;;  %v4616_v60 = vrot.slane %v6501_v57, %v6499_v53 }
 0x650   :  { %4526 = vmatpush1.bf16.msra.mxu0 %v2405_v7  ;;  %v2469_v7 = vunpack.c.h.s8.bf16 %v1013_v11 }
 0x651   :  { %4567 = vmatpush1.bf16.msra.mxu1 %v2533_v18  ;;  %4527 = vmatprep.subr.bf16.mxu0 %v2398_v44  ;;  %v2597_v18 = vunpack.c.h.s8.bf16 %v1077_v3  ;;  %v2462_v44 = vunpack.c.l.s8.bf16 %v1014_v62 }
 0x652   :  { %4568 = vmatprep.subr.bf16.mxu1 %v2526_v35  ;;  %v2590_v35 = vunpack.c.l.s8.bf16 %v1078_v21 }
 0x654   :  { %4528 = vmatpush1.bf16.msra.mxu0 %v2397_v19  ;;  %v1070_v19 = vld [vmem:[#allocation3 + $0x1738] sm:$0xff] }
 0x655   :  { %4569 = vmatpush1.bf16.msra.mxu1 %v2525_v24  ;;  %4529 = vmatprep.subr.bf16.mxu0 %v2390_v25  ;;  %v4642_v24 = vmul.f32 %v4608_v59, %v6359_v55  ;;  %v4658_v25 = vrot.slane %v6507_v12, %v6496_v22 }
 0x656   :  { %4570 = vmatprep.subr.bf16.mxu1 %v2518_v5  ;;  %v4644_v5 = vmul.f32 %v4616_v60, %v6417_v41  ;;  %v2446_v41 = vunpack.c.l.s8.bf16 %v1006_v17  ;;  %v4739_v60 = vld [vmem:[#allocation8 + $0x40] sm:$0xff] }
 0x657   :  { %v4692_v46 = vadd.f32 %v4658_v25, %v4642_v24 }
 0x658   :  { %4530 = vmatpush1.bf16.msra.mxu0 %v2389_v23  ;;  %v2589_v23 = vunpack.c.l.s8.bf16 %v1077_v3  ;;  %v4694_v55 = vadd.f32 %v4666_v6, %v4644_v5 }
 0x659   :  { %4571 = vmatpush1.bf16.msra.mxu1 %v2517_v1  ;;  %4531 = vmatprep.subr.bf16.mxu0 %v2382_v2  ;;  %v2454_v1 = vunpack.c.h.s8.bf16 %v1006_v17  ;;  %v2582_v2 = vunpack.c.h.s8.bf16 %v1070_v19  ;;  %v4708_v30 = vmul.f32 0.2, %v4692_v46  ;;  %vm4700_vm0 = vcmp.gt.f32.partialorder %v4692_v46, 0.0 }
 0x65a   :  { %4572 = vmatprep.subr.bf16.mxu1 %v2510_v20  ;;  %v1005_v20 = vld [vmem:[#allocation3 + $0x1530] sm:$0xff]  ;;  %vm4702_vm1 = vcmp.gt.f32.partialorder %v4694_v55, 0.0  ;;  %v4879_v17 = vunpack.c.h.s8.bf16 %v4739_v60 }
 0x65c   :  { %4532 = vmatpush1.bf16.msra.mxu0 %v2381_v63  ;;  %v2453_v63 = vunpack.c.h.s8.bf16 %v1005_v20 }
 0x65d   :  { %4573 = vmatpush1.bf16.msra.mxu1 %v2509_v0  ;;  %4533 = vmatprep.subr.bf16.mxu0 %v2502_v4  ;;  %v2581_v0 = vunpack.c.h.s8.bf16 %v1069_v48  ;;  %v2574_v4 = vunpack.c.l.s8.bf16 %v1070_v19 }
 0x65e   :  { %4574 = vmatprep.subr.bf16.mxu1 %v2630_v28  ;;  %v4744_v28 = vld [vmem:[#allocation8 + $0x68] sm:$0xff] }
 0x660   :  { %4534 = vmatpush2.bf16.msra.mxu0 %v2501_v9  ;;  %v2445_v9 = vunpack.c.l.s8.bf16 %v1005_v20  ;;  %v4735_v20 = vld [vmem:[#allocation8 + $0x20] sm:$0xff] }
 0x661   :  { %4575 = vmatpush2.bf16.msra.mxu1 %v2629_v10  ;;  %4535 = vmatprep.subr.bf16.mxu0 %v2494_v15  ;;  %v2573_v10 = vunpack.c.l.s8.bf16 %v1069_v48  ;;  %v4710_v15 = vmul.f32 0.2, %v4694_v55 }
 0x662   :  { %4576 = vmatprep.subr.bf16.mxu1 %v2622_v8  ;;  %v4888_v8 = vunpack.c.h.s8.bf16 %v4744_v28 }
 0x664   :  { %4536 = vmatpush2.bf16.msra.mxu0 %v2493_v14  ;;  %v4775_v14 = vld [vmem:[#allocation8 + $0x160] sm:$0xff] }
 0x665   :  { %4577 = vmatpush2.bf16.msra.mxu1 %v2621_v54  ;;  %4537 = vmatprep.subr.bf16.mxu0 %v2486_v56  ;;  %v4716_v54 = vsel %vm4700_vm0, %v4692_v46, %v4708_v30  ;;  %v4887_v56 = vunpack.c.h.s8.bf16 %v4743_v13  ;;  %v4951_v37 = vunpack.c.h.s8.bf16 %v4775_v14  ;;  %v4947_v3 = vunpack.c.l.s8.bf16 %v4775_v14  ;;  %v4767_v46 = vld [vmem:[#allocation8 + $0x120] sm:$0xff] }
 0x666   :  { %4578 = vmatprep.subr.bf16.mxu1 %v2614_v34  ;;  %v4718_v34 = vsel %vm4702_vm1, %v4694_v55, %v4710_v15  ;;  %v6515_v33 = vpack.c.bf16 %v4716_v54, %v4716_v54  ;;  %v4871_v55 = vunpack.c.h.s8.bf16 %v4735_v20  ;;  %v4931_v30 = vunpack.c.l.s8.bf16 %v4767_v46 }
 0x667   :  { %v6519_v21 = vpack.c.bf16 %v4718_v34, %v4718_v34  ;;  %v4792_v34 = vld [vmem:[#allocation8 + $0x1e8] sm:$0xff] }
 0x668   :  { %4538 = vmatpush2.bf16.msra.mxu0 %v2485_v36  ;;  %v4884_v36 = vunpack.c.l.s8.bf16 %v4744_v28  ;;  %v4764_v28 = vld [vmem:[#allocation8 + $0x108] sm:$0xff] }
 0x669   :  { %4579 = vmatpush2.bf16.msra.mxu1 %v2613_v61  ;;  %4539 = vmatprep.subr.bf16.mxu0 %v2478_v31  ;;  %v4948_v61 = vunpack.c.l.s8.bf16 %v4776_v32  ;;  %v4740_v31 = vld [vmem:[#allocation8 + $0x48] sm:$0xff]  ;;  %v4867_v32 = vunpack.c.l.s8.bf16 %v4735_v20  ;;  %v4928_v15 = vunpack.c.h.s8.bf16 %v4764_v28  ;;  %v4924_v54 = vunpack.c.l.s8.bf16 %v4764_v28  ;;  %v4751_v20 = vld [vmem:[#allocation8 + $0xa0] sm:$0xff] }
 0x66a   :  { %4580 = vmatprep.subr.bf16.mxu1 %v2606_v52  ;;  %v4880_v59 = vunpack.c.h.s8.bf16 %v4740_v31  ;;  %v4876_v5 = vunpack.c.l.s8.bf16 %v4740_v31  ;;  %v4759_v31 = vld [vmem:[#allocation8 + $0xe0] sm:$0xff] }
 0x66c   :  { %4540 = vmatpush2.bf16.msra.mxu0 %v2477_v39  ;;  %v4772_v39 = vld [vmem:[#allocation8 + $0x148] sm:$0xff] }
 0x66d   :  { %4581 = vmatpush2.bf16.msra.mxu1 %v2605_v40  ;;  %4541 = vmatprep.subr.bf16.mxu0 %v2470_v47  ;;  %v4883_v47 = vunpack.c.l.s8.bf16 %v4743_v13  ;;  %v4940_v6 = vunpack.c.l.s8.bf16 %v4772_v39 }
 0x66e   :  { %4582 = vmatprep.subr.bf16.mxu1 %v2598_v45 }
 0x670   :  { %4542 = vmatpush2.bf16.msra.mxu0 %v2469_v7  ;;  %v4944_v7 = vunpack.c.h.s8.bf16 %v4772_v39  ;;  %v4919_v39 = vunpack.c.h.s8.bf16 %v4759_v31 }
 0x671   :  { %4583 = vmatpush2.bf16.msra.mxu1 %v2597_v18  ;;  %4543 = vmatprep.subr.bf16.mxu0 %v2462_v44 }
 0x672   :  { %4584 = vmatprep.subr.bf16.mxu1 %v2590_v35 }
 0x674   :  { %4544 = vmatpush2.bf16.msra.mxu0 %v2461_v16  ;;  %v4736_v16 = vld [vmem:[#allocation8 + $0x28] sm:$0xff] }
 0x675   :  { %4585 = vmatpush2.bf16.msra.mxu1 %v2589_v23  ;;  %4545 = vmatprep.subr.bf16.mxu0 %v2454_v1  ;;  %v4875_v23 = vunpack.c.l.s8.bf16 %v4739_v60 }
 0x676   :  { %4586 = vmatprep.subr.bf16.mxu1 %v2582_v2  ;;  %v4872_v2 = vunpack.c.h.s8.bf16 %v4736_v16 }
 0x678   :  { %4546 = vmatpush2.bf16.msra.mxu0 %v2453_v63  ;;  %v4935_v63 = vunpack.c.h.s8.bf16 %v4767_v46 }
 0x679   :  { %4587 = vmatpush2.bf16.msra.mxu1 %v2581_v0  ;;  %4547 = vmatprep.subr.bf16.mxu0 %v2446_v41  ;;  %v4868_v0 = vunpack.c.l.s8.bf16 %v4736_v16  ;;  %v4784_v16 = vld [vmem:[#allocation8 + $0x1a8] sm:$0xff] }
 0x67a   :  { %4588 = vmatprep.subr.bf16.mxu1 %v2574_v4  ;;  %v4732_v4 = vld [vmem:[#allocation8 + $0x8] sm:$0xff]  ;;  %v4968_v46 = vunpack.c.h.s8.bf16 %v4784_v16 }
 0x67b   :  { %v4860_v14 = vunpack.c.l.s8.bf16 %v4732_v4 }
 0x67c   :  { %4548 = vmatpush2.bf16.msra.mxu0 %v2445_v9  ;;  %v4864_v9 = vunpack.c.h.s8.bf16 %v4732_v4 }
 0x67d   :  { %4589 = vmatpush2.bf16.msra.mxu1 %v2573_v10  ;;  %5115 = vmatprep.subr.bf16.mxu0 %v4888_v8  ;;  %v4731_v10 = vld [vmem:[#allocation8] sm:$0xff] }
 0x67e   :  { %5156 = vmatprep.subr.bf16.mxu1 %v4952_v42  ;;  %v4763_v8 = vld [vmem:[#allocation8 + $0x100] sm:$0xff]  ;;  %v4863_v42 = vunpack.c.h.s8.bf16 %v4731_v10 }
 0x67f   :  { %v4305_v52 = vpop.f32.mrf.mxu0  ;;  %4550 = vmatmul.mubr.bf16.vlgmr.msra.gmra.mxu0 %v6315_v50  ;;  %v4927_v13 = vunpack.c.h.s8.bf16 %v4763_v8 }
 0x680   :  { %v4346_v62 = vpop.f32.mrf.mxu1  ;;  %4591 = vmatmul.mubr.bf16.vlgmr.msra.gmra.mxu1 %v6319_v51  ;;  %v4306_v40 = vadd.f32 %v4305_v52, %v6488_v38  ;;  %5116 = vmatpush1.bf16.msra.mxu0 %v4887_v56  ;;  %v4771_v38 = vld [vmem:[#allocation8 + $0x140] sm:$0xff]  ;;  %v4760_v56 = vld [vmem:[#allocation8 + $0xe8] sm:$0xff]  ;;  %v4984_v52 = vunpack.c.h.s8.bf16 %v4792_v34 }
 0x681   :  { %5147 = vmatprep.mubr.bf16.mxu0 %v6515_v33  ;;  %5157 = vmatpush1.bf16.msra.mxu1 %v4951_v37  ;;  %v4307_v45 = vpop.f32.mrf.mxu0  ;;  %v4943_v25 = vunpack.c.h.s8.bf16 %v4771_v38  ;;  %v4939_v1 = vunpack.c.l.s8.bf16 %v4771_v38  ;;  %v4859_v37 = vunpack.c.l.s8.bf16 %v4731_v10  ;;  %v4748_v10 = vld [vmem:[#allocation8 + $0x88] sm:$0xff] }
 0x682   :  { %5188 = vmatprep.mubr.bf16.mxu1 %v6519_v21  ;;  %v4348_v11 = vpop.f32.mrf.mxu1  ;;  %v6524_v50 = vadd.f32 %v4346_v62, %v4306_v40  ;;  %v4308_v51 = vadd.f32 %v4307_v45, %v6493_v49  ;;  %5117 = vmatprep.subr.bf16.mxu0 %v4884_v36  ;;  %v4768_v49 = vld [vmem:[#allocation8 + $0x128] sm:$0xff]  ;;  %v4923_v36 = vunpack.c.l.s8.bf16 %v4763_v8  ;;  %v4791_v62 = vld [vmem:[#allocation8 + $0x1e0] sm:$0xff]  ;;  %v4980_v45 = vunpack.c.l.s8.bf16 %v4792_v34 }
 0x683   :  { %5158 = vmatprep.subr.bf16.mxu1 %v4948_v61  ;;  %v4309_v18 = vpop.f32.mrf.mxu0  ;;  %v4936_v48 = vunpack.c.h.s8.bf16 %v4768_v49  ;;  %v4932_v41 = vunpack.c.l.s8.bf16 %v4768_v49  ;;  %v4920_v61 = vunpack.c.h.s8.bf16 %v4760_v56  ;;  %v4983_v40 = vunpack.c.h.s8.bf16 %v4791_v62  ;;  %v4747_v34 = vld [vmem:[#allocation8 + $0x80] sm:$0xff] }
 0x684   :  { %v4350_v44 = vpop.f32.mrf.mxu1  ;;  %v6527_v35 = vadd.f32 %v4348_v11, %v4308_v51  ;;  %5118 = vmatpush1.bf16.msra.mxu0 %v4883_v47  ;;  %v4916_v47 = vunpack.c.l.s8.bf16 %v4760_v56  ;;  %v4756_v11 = vld [vmem:[#allocation8 + $0xc8] sm:$0xff]  ;;  %v4979_v60 = vunpack.c.l.s8.bf16 %v4791_v62  ;;  %v4787_v18 = vld [vmem:[#allocation8 + $0x1c0] sm:$0xff]  ;;  %v4623_v49 = vsub.s32 5, %v6134_v27 }
 0x685   :  { %5159 = vmatpush1.bf16.msra.mxu1 %v4947_v3  ;;  %v4310_v19 = vpop.f32.mrf.mxu0  ;;  %5119 = vmatprep.subr.bf16.mxu0 %v4880_v59  ;;  %v4788_v3 = vld [vmem:[#allocation8 + $0x1c8] sm:$0xff]  ;;  %v4915_v59 = vunpack.c.l.s8.bf16 %v4759_v31  ;;  %v4912_v51 = vunpack.c.h.s8.bf16 %v4756_v11  ;;  %v4896_v56 = vunpack.c.h.s8.bf16 %v4748_v10  ;;  %v4892_v62 = vunpack.c.l.s8.bf16 %v4748_v10 }
 0x686   :  { %v4351_v24 = vpop.f32.mrf.mxu1  ;;  %5160 = vmatprep.subr.bf16.mxu1 %v4944_v7  ;;  %v4755_v7 = vld [vmem:[#allocation8 + $0xc0] sm:$0xff]  ;;  %v4976_v38 = vunpack.c.h.s8.bf16 %v4788_v3  ;;  %v4908_v19 = vunpack.c.l.s8.bf16 %v4756_v11  ;;  %v4840_v11 = vld [vmem:[#allocation8 + $0x368] sm:$0xff] }
 0x687   :  { %v4911_v44 = vunpack.c.h.s8.bf16 %v4755_v7  ;;  %v6530_v24 = vsub.s32 0, %v6134_v27 }
 0x688   :  { %5120 = vmatpush1.bf16.msra.mxu0 %v4879_v17  ;;  %v4975_v17 = vunpack.c.h.s8.bf16 %v4787_v18 }
 0x689   :  { %5161 = vmatpush1.bf16.msra.mxu1 %v4943_v25  ;;  %5121 = vmatprep.subr.bf16.mxu0 %v4876_v5  ;;  %v4972_v25 = vunpack.c.l.s8.bf16 %v4788_v3  ;;  %v4752_v5 = vld [vmem:[#allocation8 + $0xa8] sm:$0xff]  ;;  %v4891_v3 = vunpack.c.l.s8.bf16 %v4747_v34 }
 0x68a   :  { %5162 = vmatprep.subr.bf16.mxu1 %v4940_v6  ;;  %v6533_v6 = vsub.s32 2, %v6134_v27  ;;  %v4900_v28 = vunpack.c.l.s8.bf16 %v4752_v5 }
 0x68c   :  { %5122 = vmatpush1.bf16.msra.mxu0 %v4875_v23  ;;  %v4907_v23 = vunpack.c.l.s8.bf16 %v4755_v7  ;;  %v4662_v8 = vrot.slane %v6507_v12, %v6533_v6  ;;  %v4807_v7 = vld [vmem:[#allocation8 + $0x260] sm:$0xff] }
 0x68d   :  { %5163 = vmatpush1.bf16.msra.mxu1 %v4939_v1  ;;  %5123 = vmatprep.subr.bf16.mxu0 %v4872_v2  ;;  %v4971_v1 = vunpack.c.l.s8.bf16 %v4787_v18  ;;  %v4904_v2 = vunpack.c.h.s8.bf16 %v4752_v5  ;;  %v5080_v18 = vunpack.c.h.s8.bf16 %v4840_v11 }
 0x68e   :  { %5164 = vmatprep.subr.bf16.mxu1 %v4936_v48  ;;  %v4604_v48 = vrot.slane %v6501_v57, %v6530_v24 }
 0x690   :  { %5124 = vmatpush1.bf16.msra.mxu0 %v4871_v55  ;;  %v4783_v55 = vld [vmem:[#allocation8 + $0x1a0] sm:$0xff] }
 0x691   :  { %5165 = vmatpush1.bf16.msra.mxu1 %v4935_v63  ;;  %5125 = vmatprep.subr.bf16.mxu0 %v4868_v0  ;;  %v4612_v63 = vrot.slane %v6501_v57, %v6533_v6  ;;  %v4624_v0 = vrot.slane %v6501_v57, %v4623_v49  ;;  %v4967_v4 = vunpack.c.h.s8.bf16 %v4783_v55 }
 0x692   :  { %5166 = vmatprep.subr.bf16.mxu1 %v4932_v41  ;;  %v4903_v41 = vunpack.c.h.s8.bf16 %v4751_v20 }
 0x694   :  { %5126 = vmatpush1.bf16.msra.mxu0 %v4867_v32  ;;  %v4641_v32 = vmul.f32 %v4604_v48, %v6354_v58  ;;  %v4963_v58 = vunpack.c.l.s8.bf16 %v4783_v55 }
 0x695   :  { %5167 = vmatpush1.bf16.msra.mxu1 %v4931_v30  ;;  %5127 = vmatprep.subr.bf16.mxu0 %v4864_v9  ;;  %v4654_v30 = vrot.slane %v6507_v12, %v6530_v24  ;;  %v4964_v9 = vunpack.c.l.s8.bf16 %v4784_v16 }
 0x696   :  { %5168 = vmatprep.subr.bf16.mxu1 %v4928_v15  ;;  %v4643_v15 = vmul.f32 %v4612_v63, %v6412_v43  ;;  %v5011_v63 = vunpack.c.l.s8.bf16 %v4807_v7 }
 0x698   :  { %5128 = vmatpush1.bf16.msra.mxu0 %v4863_v42  ;;  %v4780_v42 = vld [vmem:[#allocation8 + $0x188] sm:$0xff]  ;;  %v4693_v43 = vadd.f32 %v4662_v8, %v4643_v15 }
 0x699   :  { %5169 = vmatpush1.bf16.msra.mxu1 %v4927_v13  ;;  %5129 = vmatprep.subr.bf16.mxu0 %v4860_v14  ;;  %v4646_v13 = vmul.f32 %v4624_v0, %v6475_v29  ;;  %v4674_v14 = vrot.slane %v6507_v12, %v4623_v49  ;;  %v4836_v0 = vld [vmem:[#allocation8 + $0x348] sm:$0xff] }
 0x69a   :  { %5170 = vmatprep.subr.bf16.mxu1 %v4924_v54  ;;  %v4899_v54 = vunpack.c.l.s8.bf16 %v4751_v20  ;;  %vm4701_vm3 = vcmp.gt.f32.partialorder %v4693_v43, 0.0  ;;  %v5072_v8 = vunpack.c.h.s8.bf16 %v4836_v0 }
 0x69b   :  { %v4696_v31 = vadd.f32 %v4674_v14, %v4646_v13 }
 0x69c   :  { %5130 = vmatpush1.bf16.msra.mxu0 %v4859_v37  ;;  %v4691_v37 = vadd.f32 %v4654_v30, %v4641_v32  ;;  %v4803_v32 = vld [vmem:[#allocation8 + $0x240] sm:$0xff] }
 0x69d   :  { %5171 = vmatpush1.bf16.msra.mxu1 %v4923_v36  ;;  %5131 = vmatprep.subr.bf16.mxu0 %v4920_v61  ;;  %v4960_v36 = vunpack.c.h.s8.bf16 %v4780_v42  ;;  %v4779_v61 = vld [vmem:[#allocation8 + $0x180] sm:$0xff]  ;;  %vm4704_vm4 = vcmp.gt.f32.partialorder %v4696_v31, 0.0  ;;  %v5007_v14 = vunpack.c.h.s8.bf16 %v4803_v32 }
 0x69e   :  { %5172 = vmatprep.subr.bf16.mxu1 %v4984_v52  ;;  %v4895_v52 = vunpack.c.h.s8.bf16 %v4747_v34  ;;  %v4959_v29 = vunpack.c.h.s8.bf16 %v4779_v61  ;;  %vm4699_vm2 = vcmp.gt.f32.partialorder %v4691_v37, 0.0  ;;  %v4800_v34 = vld [vmem:[#allocation8 + $0x228] sm:$0xff] }
 0x6a0   :  { %5132 = vmatpush2.bf16.msra.mxu0 %v4919_v39  ;;  %v4707_v39 = vmul.f32 0.2, %v4691_v37 }
 0x6a1   :  { %5173 = vmatpush2.bf16.msra.mxu1 %v4983_v40  ;;  %5133 = vmatprep.subr.bf16.mxu0 %v4916_v47  ;;  %v4956_v40 = vunpack.c.l.s8.bf16 %v4780_v42  ;;  %v4808_v47 = vld [vmem:[#allocation8 + $0x268] sm:$0xff]  ;;  %v4835_v42 = vld [vmem:[#allocation8 + $0x340] sm:$0xff] }
 0x6a2   :  { %5174 = vmatprep.subr.bf16.mxu1 %v4980_v45  ;;  %v4709_v45 = vmul.f32 0.2, %v4693_v43  ;;  %v5012_v16 = vunpack.c.l.s8.bf16 %v4808_v47 }
 0x6a4   :  { %5134 = vmatpush2.bf16.msra.mxu0 %v4915_v59  ;;  %v4712_v59 = vmul.f32 0.2, %v4696_v31 }
 0x6a5   :  { %5175 = vmatpush2.bf16.msra.mxu1 %v4979_v60  ;;  %5135 = vmatprep.subr.bf16.mxu0 %v4912_v51  ;;  %v4955_v60 = vunpack.c.l.s8.bf16 %v4779_v61  ;;  %v5016_v51 = vunpack.c.h.s8.bf16 %v4808_v47  ;;  %v4832_v61 = vld [vmem:[#allocation8 + $0x328] sm:$0xff] }
 0x6a6   :  { %5176 = vmatprep.subr.bf16.mxu1 %v4976_v38  ;;  %v4715_v38 = vsel %vm4699_vm2, %v4691_v37, %v4707_v39  ;;  %v5071_v37 = vunpack.c.h.s8.bf16 %v4835_v42  ;;  %v4796_v47 = vld [vmem:[#allocation8 + $0x208] sm:$0xff] }
 0x6a7   :  { %v6549_v5 = vpack.c.bf16 %v4715_v38, %v4715_v38 }
 0x6a8   :  { %5136 = vmatpush2.bf16.msra.mxu0 %v4911_v44  ;;  %v4717_v44 = vsel %vm4701_vm3, %v4693_v43, %v4709_v45  ;;  %v5000_v43 = vunpack.c.h.s8.bf16 %v4800_v34 }
 0x6a9   :  { %5177 = vmatpush2.bf16.msra.mxu1 %v4975_v17  ;;  %5137 = vmatprep.subr.bf16.mxu0 %v4908_v19  ;;  %v4839_v17 = vld [vmem:[#allocation8 + $0x360] sm:$0xff]  ;;  %v5015_v19 = vunpack.c.h.s8.bf16 %v4807_v7  ;;  %v6551_v49 = vpack.c.bf16 %v4717_v44, %v4717_v44 }
 0x6aa   :  { %5178 = vmatprep.subr.bf16.mxu1 %v4972_v25  ;;  %v4720_v25 = vsel %vm4704_vm4, %v4696_v31, %v4712_v59  ;;  %v5075_v10 = vunpack.c.l.s8.bf16 %v4839_v17  ;;  %v4799_v31 = vld [vmem:[#allocation8 + $0x220] sm:$0xff]  ;;  %v4828_v59 = vld [vmem:[#allocation8 + $0x308] sm:$0xff] }
 0x6ab   :  { %v6554_v48 = vpack.c.bf16 %v4720_v25, %v4720_v25  ;;  %v4999_v39 = vunpack.c.h.s8.bf16 %v4799_v31  ;;  %v5056_v38 = vunpack.c.h.s8.bf16 %v4828_v59 }
 0x6ac   :  { %5138 = vmatpush2.bf16.msra.mxu0 %v4907_v23  ;;  %v4804_v23 = vld [vmem:[#allocation8 + $0x248] sm:$0xff] }
 0x6ad   :  { %5179 = vmatpush2.bf16.msra.mxu1 %v4971_v1  ;;  %5139 = vmatprep.subr.bf16.mxu0 %v4904_v2  ;;  %v5079_v1 = vunpack.c.h.s8.bf16 %v4839_v17  ;;  %v4988_v17 = vunpack.c.l.s8.bf16 %v4796_v47 }
 0x6ae   :  { %5180 = vmatprep.subr.bf16.mxu1 %v4968_v46  ;;  %v5076_v46 = vunpack.c.l.s8.bf16 %v4840_v11  ;;  %v5060_v11 = vunpack.c.l.s8.bf16 %v4832_v61 }
 0x6b0   :  { %5140 = vmatpush2.bf16.msra.mxu0 %v4903_v41 }
 0x6b1   :  { %5181 = vmatpush2.bf16.msra.mxu1 %v4967_v4  ;;  %5141 = vmatprep.subr.bf16.mxu0 %v4900_v28  ;;  %v5008_v28 = vunpack.c.h.s8.bf16 %v4804_v23 }
 0x6b2   :  { %5182 = vmatprep.subr.bf16.mxu1 %v4964_v9 }
 0x6b4   :  { %5142 = vmatpush2.bf16.msra.mxu0 %v4899_v54 }
 0x6b5   :  { %5183 = vmatpush2.bf16.msra.mxu1 %v4963_v58  ;;  %5143 = vmatprep.subr.bf16.mxu0 %v4896_v56  ;;  %v5004_v56 = vunpack.c.l.s8.bf16 %v4804_v23 }
 0x6b6   :  { %5184 = vmatprep.subr.bf16.mxu1 %v4960_v36  ;;  %v5003_v36 = vunpack.c.l.s8.bf16 %v4803_v32 }
 0x6b8   :  { %5144 = vmatpush2.bf16.msra.mxu0 %v4895_v52  ;;  %v5067_v52 = vunpack.c.l.s8.bf16 %v4835_v42 }
 0x6b9   :  { %5185 = vmatpush2.bf16.msra.mxu1 %v4959_v29  ;;  %5145 = vmatprep.subr.bf16.mxu0 %v4892_v62  ;;  %v5064_v29 = vunpack.c.h.s8.bf16 %v4832_v61  ;;  %v4831_v62 = vld [vmem:[#allocation8 + $0x320] sm:$0xff]  ;;  %v4848_v61 = vld [vmem:[#allocation8 + $0x3a8] sm:$0xff] }
 0x6ba   :  { %5186 = vmatprep.subr.bf16.mxu1 %v4956_v40  ;;  %v4996_v40 = vunpack.c.l.s8.bf16 %v4800_v34  ;;  %v5063_v45 = vunpack.c.h.s8.bf16 %v4831_v62  ;;  %v5059_v7 = vunpack.c.l.s8.bf16 %v4831_v62  ;;  %v4816_v34 = vld [vmem:[#allocation8 + $0x2a8] sm:$0xff]  ;;  %v5096_v62 = vunpack.c.h.s8.bf16 %v4848_v61 }
 0x6bc   :  { %5146 = vmatpush2.bf16.msra.mxu0 %v4891_v3  ;;  %v4995_v3 = vunpack.c.l.s8.bf16 %v4799_v31  ;;  %v4815_v31 = vld [vmem:[#allocation8 + $0x2a0] sm:$0xff] }
 0x6bd   :  { %5187 = vmatpush2.bf16.msra.mxu1 %v4955_v60  ;;  %5197 = vmatprep.subr.bf16.mxu0 %v5016_v51  ;;  %v4992_v60 = vunpack.c.h.s8.bf16 %v4796_v47  ;;  %v4795_v51 = vld [vmem:[#allocation8 + $0x200] sm:$0xff]  ;;  %v5028_v47 = vunpack.c.l.s8.bf16 %v4816_v34 }
 0x6be   :  { %5238 = vmatprep.subr.bf16.mxu1 %v5080_v18  ;;  %v4827_v18 = vld [vmem:[#allocation8 + $0x300] sm:$0xff]  ;;  %v4991_v44 = vunpack.c.h.s8.bf16 %v4795_v51  ;;  %v4987_v23 = vunpack.c.l.s8.bf16 %v4795_v51  ;;  %v4844_v51 = vld [vmem:[#allocation8 + $0x388] sm:$0xff] }
 0x6bf   :  { %v4387_v2 = vpop.f32.mrf.mxu0  ;;  %5148 = vmatmul.mubr.bf16.vlgmr.msra.gmra.mxu0 %v6549_v5  ;;  %v5055_v25 = vunpack.c.h.s8.bf16 %v4827_v18 }
 0x6c0   :  { %v4428_v20 = vpop.f32.mrf.mxu1  ;;  %v4388_v55 = vadd.f32 %v4387_v2, %v6524_v50  ;;  %5189 = vmatmul.mubr.bf16.vlgmr.msra.gmra.mxu1 %v6551_v49  ;;  %5198 = vmatpush1.bf16.msra.mxu0 %v5015_v19  ;;  %v4824_v19 = vld [vmem:[#allocation8 + $0x2e8] sm:$0xff] }
 0x6c1   :  { %5229 = vmatprep.mubr.bf16.mxu0 %v6554_v48  ;;  %v4389_v41 = vpop.f32.mrf.mxu0  ;;  %5199 = vmatprep.subr.bf16.mxu0 %v5012_v16  ;;  %v5052_v16 = vunpack.c.l.s8.bf16 %v4828_v59  ;;  %v5048_v2 = vunpack.c.h.s8.bf16 %v4824_v19 }
 0x6c2   :  { %v4430_v4 = vpop.f32.mrf.mxu1  ;;  %v6559_v30 = vadd.f32 %v4428_v20, %v4388_v55  ;;  %v4390_v9 = vadd.f32 %v4389_v41, %v6527_v35  ;;  %5239 = vmatpush1.bf16.msra.mxu1 %v5079_v1  ;;  %v5068_v35 = vunpack.c.l.s8.bf16 %v4836_v0  ;;  %v4856_v1 = vld [vmem:[#allocation8 + $0x3e8] sm:$0xff]  ;;  %v4823_v20 = vld [vmem:[#allocation8 + $0x2e0] sm:$0xff]  ;;  %v5044_v41 = vunpack.c.l.s8.bf16 %v4824_v19 }
 0x6c3   :  { %v4391_v15 = vpop.f32.mrf.mxu0  ;;  %5240 = vmatprep.subr.bf16.mxu1 %v5076_v46  ;;  %v5051_v46 = vunpack.c.l.s8.bf16 %v4827_v18  ;;  %v5112_v55 = vunpack.c.h.s8.bf16 %v4856_v1  ;;  %v5047_v0 = vunpack.c.h.s8.bf16 %v4823_v20  ;;  %v5108_v32 = vunpack.c.l.s8.bf16 %v4856_v1  ;;  %v4843_v19 = vld [vmem:[#allocation8 + $0x380] sm:$0xff] }
 0x6c4   :  { %v4432_v50 = vpop.f32.mrf.mxu1  ;;  %v6562_v13 = vadd.f32 %v4430_v4, %v4390_v9  ;;  %5200 = vmatpush1.bf16.msra.mxu0 %v5011_v63  ;;  %v4855_v63 = vld [vmem:[#allocation8 + $0x3e0] sm:$0xff]  ;;  %v4820_v4 = vld [vmem:[#allocation8 + $0x2c8] sm:$0xff]  ;;  %v5043_v9 = vunpack.c.l.s8.bf16 %v4823_v20  ;;  %v5084_v1 = vunpack.c.l.s8.bf16 %v4844_v51  ;;  %v6568_v20 = vld [vmem:[#allocation8 + $0x178] sm:$0xff] }
 0x6c5   :  { %v4392_v54 = vpop.f32.mrf.mxu0  ;;  %5201 = vmatprep.subr.bf16.mxu0 %v5008_v28  ;;  %v5111_v28 = vunpack.c.h.s8.bf16 %v4855_v63  ;;  %v5040_v15 = vunpack.c.h.s8.bf16 %v4820_v4  ;;  %v4819_v50 = vld [vmem:[#allocation8 + $0x2c0] sm:$0xff] }
 0x6c6   :  { %v4433_v58 = vpop.f32.mrf.mxu1  ;;  %5241 = vmatpush1.bf16.msra.mxu1 %v5075_v10  ;;  %v4852_v10 = vld [vmem:[#allocation8 + $0x3c8] sm:$0xff]  ;;  %v5039_v54 = vunpack.c.h.s8.bf16 %v4819_v50 }
 0x6c7   :  { %5242 = vmatprep.subr.bf16.mxu1 %v5072_v8  ;;  %v5107_v8 = vunpack.c.l.s8.bf16 %v4855_v63  ;;  %v5104_v42 = vunpack.c.h.s8.bf16 %v4852_v10  ;;  %v5036_v58 = vunpack.c.l.s8.bf16 %v4820_v4 }
 0x6c8   :  { %5202 = vmatpush1.bf16.msra.mxu0 %v5007_v14  ;;  %v4851_v14 = vld [vmem:[#allocation8 + $0x3c0] sm:$0xff] }
 0x6c9   :  { %5203 = vmatprep.subr.bf16.mxu0 %v5004_v56  ;;  %v4619_v56 = vsub.s32 4, %v6134_v27 }
 0x6ca   :  { %5243 = vmatpush1.bf16.msra.mxu1 %v5071_v37  ;;  %v5103_v37 = vunpack.c.h.s8.bf16 %v4851_v14 }
 0x6cb   :  { %5244 = vmatprep.subr.bf16.mxu1 %v5068_v35  ;;  %v5100_v35 = vunpack.c.l.s8.bf16 %v4852_v10 }
 0x6cc   :  { %5204 = vmatpush1.bf16.msra.mxu0 %v5003_v36  ;;  %v5035_v36 = vunpack.c.l.s8.bf16 %v4819_v50 }
 0x6cd   :  { %5205 = vmatprep.subr.bf16.mxu0 %v5000_v43  ;;  %v5032_v43 = vunpack.c.h.s8.bf16 %v4816_v34 }
 0x6ce   :  { %5245 = vmatpush1.bf16.msra.mxu1 %v5067_v52  ;;  %v4620_v52 = vrot.slane %v6501_v57, %v4619_v56  ;;  %v5027_v57 = vunpack.c.l.s8.bf16 %v4815_v31 }
 0x6cf   :  { %5246 = vmatprep.subr.bf16.mxu1 %v5064_v29  ;;  %v5099_v29 = vunpack.c.l.s8.bf16 %v4851_v14 }
 0x6d0   :  { %5206 = vmatpush1.bf16.msra.mxu0 %v4999_v39  ;;  %v4847_v39 = vld [vmem:[#allocation8 + $0x3a0] sm:$0xff] }
 0x6d1   :  { %5207 = vmatprep.subr.bf16.mxu0 %v4996_v40  ;;  %v5031_v40 = vunpack.c.h.s8.bf16 %v4815_v31  ;;  %v5095_v59 = vunpack.c.h.s8.bf16 %v4847_v39 }
 0x6d2   :  { %5247 = vmatpush1.bf16.msra.mxu1 %v5063_v45  ;;  %v4645_v45 = vmul.f32 %v4620_v52, %v6470_v26  ;;  %v4737_v52 = vld [vmem:[#allocation8 + $0x30] sm:$0xff] }
 0x6d3   :  { %5248 = vmatprep.subr.bf16.mxu1 %v5060_v11  ;;  %v4670_v11 = vrot.slane %v6507_v12, %v4619_v56 }
 0x6d4   :  { %5208 = vmatpush1.bf16.msra.mxu0 %v4995_v3  ;;  %v4812_v3 = vld [vmem:[#allocation8 + $0x288] sm:$0xff] }
 0x6d5   :  { %5209 = vmatprep.subr.bf16.mxu0 %v4992_v60  ;;  %v5092_v60 = vunpack.c.l.s8.bf16 %v4848_v61  ;;  %v4695_v18 = vadd.f32 %v4670_v11, %v4645_v45  ;;  %v5020_v12 = vunpack.c.l.s8.bf16 %v4812_v3  ;;  %v4733_v45 = vld [vmem:[#allocation8 + $0x10] sm:$0xff] }
 0x6d6   :  { %5249 = vmatpush1.bf16.msra.mxu1 %v5059_v7  ;;  %v5024_v7 = vunpack.c.h.s8.bf16 %v4812_v3  ;;  %v4865_v11 = vunpack.c.h.s8.bf16 %v4733_v45 }
 0x6d7   :  { %5250 = vmatprep.subr.bf16.mxu1 %v5056_v38  ;;  %v4811_v38 = vld [vmem:[#allocation8 + $0x280] sm:$0xff]  ;;  %vm4703_vm5 = vcmp.gt.f32.partialorder %v4695_v18, 0.0 }
 0x6d8   :  { %5210 = vmatpush1.bf16.msra.mxu0 %v4991_v44  ;;  %v5091_v44 = vunpack.c.l.s8.bf16 %v4847_v39  ;;  %v5023_v26 = vunpack.c.h.s8.bf16 %v4811_v38  ;;  %v4734_v39 = vld [vmem:[#allocation8 + $0x18] sm:$0xff] }
 0x6d9   :  { %5211 = vmatprep.subr.bf16.mxu0 %v4988_v17  ;;  %v5088_v17 = vunpack.c.h.s8.bf16 %v4844_v51  ;;  %v4862_v3 = vunpack.c.l.s8.bf16 %v4734_v39  ;;  %v4761_v51 = vld [vmem:[#allocation8 + $0xf0] sm:$0xff] }
 0x6da   :  { %5251 = vmatpush1.bf16.msra.mxu1 %v5055_v25  ;;  %v4711_v25 = vmul.f32 0.2, %v4695_v18 }
 0x6db   :  { %5252 = vmatprep.subr.bf16.mxu1 %v5052_v16  ;;  %v4746_v16 = vld [vmem:[#allocation8 + $0x78] sm:$0xff] }
 0x6dc   :  { %5212 = vmatpush1.bf16.msra.mxu0 %v4987_v23  ;;  %v5087_v23 = vunpack.c.h.s8.bf16 %v4843_v19  ;;  %v4719_v63 = vsel %vm4703_vm5, %v4695_v18, %v4711_v25  ;;  %v4758_v18 = vld [vmem:[#allocation8 + $0xd8] sm:$0xff] }
 0x6dd   :  { %5213 = vmatprep.subr.bf16.mxu0 %v5048_v2  ;;  %v5019_v2 = vunpack.c.l.s8.bf16 %v4811_v38  ;;  %v4754_v25 = vld [vmem:[#allocation8 + $0xb8] sm:$0xff] }
 0x6de   :  { %5253 = vmatpush1.bf16.msra.mxu1 %v5051_v46  ;;  %v4890_v46 = vunpack.c.h.s8.bf16 %v4746_v16 }
 0x6df   :  { %5254 = vmatprep.subr.bf16.mxu1 %v5112_v55  ;;  %v4745_v55 = vld [vmem:[#allocation8 + $0x70] sm:$0xff] }
 0x6e0   :  { %5214 = vmatpush2.bf16.msra.mxu0 %v5047_v0  ;;  %v5083_v0 = vunpack.c.l.s8.bf16 %v4843_v19  ;;  %v4889_v4 = vunpack.c.h.s8.bf16 %v4745_v55  ;;  %v4757_v19 = vld [vmem:[#allocation8 + $0xd0] sm:$0xff] }
 0x6e1   :  { %5215 = vmatprep.subr.bf16.mxu0 %v5044_v41  ;;  %v4954_v41 = vunpack.c.h.s8.bf16 %v6568_v20 }
 0x6e2   :  { %5255 = vmatpush2.bf16.msra.mxu1 %v5111_v28  ;;  %v6571_v28 = vpack.c.bf16 %v4719_v63, %v4719_v63 }
 0x6e3   :  { %5256 = vmatprep.subr.bf16.mxu1 %v5108_v32  ;;  %v4886_v32 = vunpack.c.l.s8.bf16 %v4746_v16  ;;  %v4909_v16 = vunpack.c.l.s8.bf16 %v4757_v19 }
 0x6e4   :  { %5216 = vmatpush2.bf16.msra.mxu0 %v5043_v9  ;;  %v4742_v9 = vld [vmem:[#allocation8 + $0x58] sm:$0xff] }
 0x6e5   :  { %5217 = vmatprep.subr.bf16.mxu0 %v5040_v15 }
 0x6e6   :  { %5257 = vmatpush2.bf16.msra.mxu1 %v5107_v8  ;;  %v4885_v8 = vunpack.c.l.s8.bf16 %v4745_v55  ;;  %v4750_v55 = vld [vmem:[#allocation8 + $0x98] sm:$0xff] }
 0x6e7   :  { %5258 = vmatprep.subr.bf16.mxu1 %v5104_v42 }
 0x6e8   :  { %5218 = vmatpush2.bf16.msra.mxu0 %v5039_v54  ;;  %v4882_v54 = vunpack.c.h.s8.bf16 %v4742_v9 }
 0x6e9   :  { %5219 = vmatprep.subr.bf16.mxu0 %v5036_v58  ;;  %v4741_v58 = vld [vmem:[#allocation8 + $0x50] sm:$0xff] }
 0x6ea   :  { %5259 = vmatpush2.bf16.msra.mxu1 %v5103_v37 }
 0x6eb   :  { %5260 = vmatprep.subr.bf16.mxu1 %v5100_v35  ;;  %v4881_v35 = vunpack.c.h.s8.bf16 %v4741_v58 }
 0x6ec   :  { %5220 = vmatpush2.bf16.msra.mxu0 %v5035_v36 }
 0x6ed   :  { %5221 = vmatprep.subr.bf16.mxu0 %v5032_v43  ;;  %v4738_v43 = vld [vmem:[#allocation8 + $0x38] sm:$0xff] }
 0x6ee   :  { %5261 = vmatpush2.bf16.msra.mxu1 %v5099_v29  ;;  %v4874_v31 = vunpack.c.h.s8.bf16 %v4738_v43  ;;  %v4873_v29 = vunpack.c.h.s8.bf16 %v4737_v52 }
 0x6ef   :  { %5262 = vmatprep.subr.bf16.mxu1 %v5096_v62  ;;  %v4870_v62 = vunpack.c.l.s8.bf16 %v4738_v43 }
 0x6f0   :  { %5222 = vmatpush2.bf16.msra.mxu0 %v5031_v40  ;;  %v4869_v40 = vunpack.c.l.s8.bf16 %v4737_v52 }
 0x6f1   :  { %5223 = vmatprep.subr.bf16.mxu0 %v5028_v47  ;;  %v4866_v47 = vunpack.c.h.s8.bf16 %v4734_v39  ;;  %v5805_v39 = vld [vmem:[#allocation7] sm:$0xff] }
 0x6f2   :  { %5263 = vmatpush2.bf16.msra.mxu1 %v5095_v59  ;;  %v4762_v59 = vld [vmem:[#allocation8 + $0xf8] sm:$0xff] }
 0x6f3   :  { %5264 = vmatprep.subr.bf16.mxu1 %v5092_v60  ;;  %v4861_v60 = vunpack.c.l.s8.bf16 %v4733_v45  ;;  %v4918_v38 = vunpack.c.l.s8.bf16 %v4762_v59 }
 0x6f4   :  { %5224 = vmatpush2.bf16.msra.mxu0 %v5027_v57  ;;  %v4922_v57 = vunpack.c.h.s8.bf16 %v4762_v59 }
 0x6f5   :  { %5225 = vmatprep.subr.bf16.mxu0 %v5024_v7  ;;  %v4921_v7 = vunpack.c.h.s8.bf16 %v4761_v51 }
 0x6f6   :  { %5265 = vmatpush2.bf16.msra.mxu1 %v5091_v44  ;;  %v4917_v44 = vunpack.c.l.s8.bf16 %v4761_v51 }
 0x6f7   :  { %5266 = vmatprep.subr.bf16.mxu1 %v5088_v17  ;;  %v4914_v17 = vunpack.c.h.s8.bf16 %v4758_v18 }
 0x6f8   :  { %5226 = vmatpush2.bf16.msra.mxu0 %v5023_v26  ;;  %v4913_v26 = vunpack.c.h.s8.bf16 %v4757_v19 }
 0x6f9   :  { %5227 = vmatprep.subr.bf16.mxu0 %v5020_v12  ;;  %v4910_v12 = vunpack.c.l.s8.bf16 %v4758_v18 }
 0x6fa   :  { %5267 = vmatpush2.bf16.msra.mxu1 %v5087_v23  ;;  %v4906_v23 = vunpack.c.h.s8.bf16 %v4754_v25 }
 0x6fb   :  { %5268 = vmatprep.subr.bf16.mxu1 %v5084_v1  ;;  %v4753_v1 = vld [vmem:[#allocation8 + $0xb0] sm:$0xff] }
 0x6fc   :  { %5228 = vmatpush2.bf16.msra.mxu0 %v5019_v2  ;;  %v4905_v2 = vunpack.c.h.s8.bf16 %v4753_v1  ;;  %v4901_v63 = vunpack.c.l.s8.bf16 %v4753_v1 }
 0x6fd   :  { %5279 = vmatprep.subr.bf16.mxu0 %v4890_v46  ;;  %v4902_v46 = vunpack.c.l.s8.bf16 %v4754_v25  ;;  %v4777_v25 = vld [vmem:[#allocation8 + $0x170] sm:$0xff] }
 0x6fe   :  { %5269 = vmatpush2.bf16.msra.mxu1 %v5083_v0  ;;  %v4898_v0 = vunpack.c.h.s8.bf16 %v4750_v55 }
 0x6ff   :  { %v4469_v10 = vpop.f32.mrf.mxu0  ;;  %5230 = vmatmul.mubr.bf16.vlgmr.msra.gmra.mxu0 %v6571_v28  ;;  %5320 = vmatprep.subr.bf16.mxu1 %v4954_v41  ;;  %v4749_v41 = vld [vmem:[#allocation8 + $0x90] sm:$0xff] }
 0x700   :  { %v4510_v15 = vpop.f32.mrf.mxu1  ;;  %v4470_v50 = vadd.f32 %v4469_v10, %v6559_v30  ;;  %5280 = vmatpush1.bf16.msra.mxu0 %v4889_v4  ;;  %5311 = vmatprep.mubr.bf16.mxu0 %v6515_v33  ;;  %v4878_v30 = vunpack.c.l.s8.bf16 %v4742_v9  ;;  %v4877_v33 = vunpack.c.l.s8.bf16 %v4741_v58  ;;  %v4897_v4 = vunpack.c.h.s8.bf16 %v4749_v41  ;;  %v4810_v9 = vld [vmem:[#allocation8 + $0x278] sm:$0xff] }
 0x701   :  { %v6576_v42 = vpop.f32.mrf.mxu0  ;;  %5281 = vmatprep.subr.bf16.mxu0 %v4886_v32  ;;  %v4894_v32 = vunpack.c.l.s8.bf16 %v4750_v55  ;;  %v4893_v10 = vunpack.c.l.s8.bf16 %v4749_v41  ;;  %v4798_v41 = vld [vmem:[#allocation8 + $0x218] sm:$0xff] }
 0x702   :  { %v6578_v14 = vpop.f32.mrf.mxu1  ;;  %v6580_v56 = vadd.f32 %v4510_v15, %v4470_v50  ;;  %v5018_v15 = vunpack.c.h.s8.bf16 %v4810_v9  ;;  %v4809_v50 = vld [vmem:[#allocation8 + $0x270] sm:$0xff] }
 0x703   :  { %v4473_v34 = vpop.f32.mrf.mxu0  ;;  %v5017_v58 = vunpack.c.h.s8.bf16 %v4809_v50 }
 0x704   :  { %v4514_v37 = vpop.f32.mrf.mxu1  ;;  %5282 = vmatpush1.bf16.msra.mxu0 %v4885_v8  ;;  %v4472_v8 = vadd.f32 %v6576_v42, %v6562_v13  ;;  %v5014_v34 = vunpack.c.l.s8.bf16 %v4810_v9  ;;  %v5013_v13 = vunpack.c.l.s8.bf16 %v4809_v50  ;;  %v4949_v9 = vunpack.c.l.s8.bf16 %v4777_v25 }
 0x705   :  { %v4474_v36 = vpop.f32.mrf.mxu0  ;;  %5283 = vmatprep.subr.bf16.mxu0 %v4882_v54  ;;  %v4627_v54 = vsub.s32 6, %v6134_v27  ;;  %v4631_v37 = vsub.s32 7, %v6134_v27  ;;  %v4805_v27 = vld [vmem:[#allocation8 + $0x250] sm:$0xff] }
 0x706   :  { %v4515_v61 = vpop.f32.mrf.mxu1  ;;  %v5009_v59 = vunpack.c.h.s8.bf16 %v4805_v27 }
 0x708   :  { %5284 = vmatpush1.bf16.msra.mxu0 %v4881_v35  ;;  %v4806_v35 = vld [vmem:[#allocation8 + $0x258] sm:$0xff] }
 0x709   :  { %5285 = vmatprep.subr.bf16.mxu0 %v4878_v30  ;;  %v4513_v30 = vadd.f32 %v6578_v14, %v4472_v8  ;;  %v4773_v8 = vld [vmem:[#allocation8 + $0x150] sm:$0xff] }
 0x70c   :  { %5286 = vmatpush1.bf16.msra.mxu0 %v4877_v33  ;;  %v5804_v33 = vld [vmem:[#allocation5] sm:$0xff] }
 0x70d   :  { %5287 = vmatprep.subr.bf16.mxu0 %v4874_v31  ;;  %v4628_v31 = vrot.slane %v5804_v33, %v4627_v54 }
 0x710   :  { %5288 = vmatpush1.bf16.msra.mxu0 %v4873_v29  ;;  %v5010_v29 = vunpack.c.h.s8.bf16 %v4806_v35 }
 0x711   :  { %5289 = vmatprep.subr.bf16.mxu0 %v4870_v62 }
 0x714   :  { %5290 = vmatpush1.bf16.msra.mxu0 %v4869_v40  ;;  %v4678_v40 = vrot.slane %v5805_v39, %v4627_v54  ;;  %v4945_v54 = vunpack.c.h.s8.bf16 %v4773_v8 }
 0x715   :  { %5291 = vmatprep.subr.bf16.mxu0 %v4866_v47 }
 0x718   :  { %5292 = vmatpush1.bf16.msra.mxu0 %v4865_v11 }
 0x719   :  { %5293 = vmatprep.subr.bf16.mxu0 %v4862_v3  ;;  %v4682_v3 = vrot.slane %v5805_v39, %v4631_v37 }
 0x71c   :  { %5294 = vmatpush1.bf16.msra.mxu0 %v4861_v60 }
 0x71d   :  { %5295 = vmatprep.subr.bf16.mxu0 %v4922_v57  ;;  %v5006_v57 = vunpack.c.l.s8.bf16 %v4806_v35  ;;  %v4770_v35 = vld [vmem:[#allocation8 + $0x138] sm:$0xff] }
 0x720   :  { %5296 = vmatpush2.bf16.msra.mxu0 %v4921_v7 }
 0x721   :  { %5297 = vmatprep.subr.bf16.mxu0 %v4918_v38  ;;  %v4802_v38 = vld [vmem:[#allocation8 + $0x238] sm:$0xff] }
 0x722   :  { %v5002_v19 = vunpack.c.h.s8.bf16 %v4802_v38 }
 0x724   :  { %5298 = vmatpush2.bf16.msra.mxu0 %v4917_v44 }
 0x725   :  { %5299 = vmatprep.subr.bf16.mxu0 %v4914_v17  ;;  %v5005_v17 = vunpack.c.l.s8.bf16 %v4805_v27  ;;  %v4766_v27 = vld [vmem:[#allocation8 + $0x118] sm:$0xff] }
 0x728   :  { %5300 = vmatpush2.bf16.msra.mxu0 %v4913_v26  ;;  %v4801_v26 = vld [vmem:[#allocation8 + $0x230] sm:$0xff] }
 0x729   :  { %5301 = vmatprep.subr.bf16.mxu0 %v4910_v12  ;;  %v5001_v1 = vunpack.c.h.s8.bf16 %v4801_v26 }
 0x72c   :  { %5302 = vmatpush2.bf16.msra.mxu0 %v4909_v16 }
 0x72d   :  { %5303 = vmatprep.subr.bf16.mxu0 %v4906_v23 }
 0x730   :  { %5304 = vmatpush2.bf16.msra.mxu0 %v4905_v2 }
 0x731   :  { %5305 = vmatprep.subr.bf16.mxu0 %v4902_v46  ;;  %v4953_v46 = vunpack.c.h.s8.bf16 %v4777_v25  ;;  %v4790_v25 = vld [vmem:[#allocation8 + $0x1d8] sm:$0xff] }
 0x734   :  { %5306 = vmatpush2.bf16.msra.mxu0 %v4901_v63  ;;  %v4950_v63 = vunpack.c.l.s8.bf16 %v6568_v20 }
 0x735   :  { %5307 = vmatprep.subr.bf16.mxu0 %v4898_v0  ;;  %v4998_v0 = vunpack.c.l.s8.bf16 %v4802_v38 }
 0x738   :  { %5308 = vmatpush2.bf16.msra.mxu0 %v4897_v4  ;;  %v4774_v4 = vld [vmem:[#allocation8 + $0x158] sm:$0xff] }
 0x739   :  { %5309 = vmatprep.subr.bf16.mxu0 %v4894_v32  ;;  %v4997_v32 = vunpack.c.l.s8.bf16 %v4801_v26  ;;  %v4946_v50 = vunpack.c.h.s8.bf16 %v4774_v4 }
 0x73c   :  { %5310 = vmatpush2.bf16.msra.mxu0 %v4893_v10  ;;  %v4994_v10 = vunpack.c.h.s8.bf16 %v4798_v41 }
 0x73d   :  { %5361 = vmatprep.subr.bf16.mxu0 %v5018_v15  ;;  %v4797_v15 = vld [vmem:[#allocation8 + $0x210] sm:$0xff] }
 0x73e   :  { %v4993_v20 = vunpack.c.h.s8.bf16 %v4797_v15 }
 0x73f   :  { %v4551_v36 = vpop.f32.mrf.mxu0  ;;  %5312 = vmatmul.mubr.bf16.vlgmr.msra.gmra.mxu0 %v6549_v5  ;;  %v4632_v5 = vrot.slane %v5804_v33, %v4631_v37  ;;  %v4826_v37 = vld [vmem:[#allocation8 + $0x2f8] sm:$0xff]  ;;  %v4769_v33 = vld [vmem:[#allocation8 + $0x130] sm:$0xff] }
 0x740   :  { %v4592_v61 = vpop.f32.mrf.mxu1  ;;  %v4552_v43 = vadd.f32 %v4551_v36, %v6580_v56  ;;  %5362 = vmatpush1.bf16.msra.mxu0 %v5017_v58  ;;  %5393 = vmatprep.mubr.bf16.mxu0 %v6554_v48  ;;  %v4990_v58 = vunpack.c.l.s8.bf16 %v4798_v41  ;;  %v4989_v36 = vunpack.c.l.s8.bf16 %v4797_v15  ;;  %v4933_v39 = vunpack.c.l.s8.bf16 %v4769_v33  ;;  %v4786_v15 = vld [vmem:[#allocation8 + $0x1b8] sm:$0xff] }
 0x741   :  { %v4553_v42 = vpop.f32.mrf.mxu0  ;;  %5363 = vmatprep.subr.bf16.mxu0 %v5014_v34  ;;  %v4942_v34 = vunpack.c.l.s8.bf16 %v4774_v4 }
 0x742   :  { %v4594_v52 = vpop.f32.mrf.mxu1  ;;  %v4593_v62 = vadd.f32 %v4592_v61, %v4552_v43  ;;  %v4554_v47 = vadd.f32 %v4553_v42, %v4513_v30  ;;  %v5050_v61 = vunpack.c.h.s8.bf16 %v4826_v37  ;;  %v4825_v30 = vld [vmem:[#allocation8 + $0x2f0] sm:$0xff]  ;;  %v4938_v43 = vunpack.c.h.s8.bf16 %v4770_v35 }
 0x743   :  { %v4555_v45 = vpop.f32.mrf.mxu0  ;;  %v5046_v42 = vunpack.c.l.s8.bf16 %v4826_v37 }
 0x744   :  { %v4596_v14 = vpop.f32.mrf.mxu1  ;;  %v4647_v11 = vmul.f32 %v4628_v31, %v4593_v62  ;;  %v4595_v56 = vadd.f32 %v4594_v52, %v4554_v47  ;;  %5364 = vmatpush1.bf16.msra.mxu0 %v5013_v13  ;;  %v5049_v31 = vunpack.c.h.s8.bf16 %v4825_v30  ;;  %v4937_v13 = vunpack.c.h.s8.bf16 %v4769_v33  ;;  %v4821_v47 = vld [vmem:[#allocation8 + $0x2d0] sm:$0xff] }
 0x745   :  { %v4556_v60 = vpop.f32.mrf.mxu0  ;;  %5365 = vmatprep.subr.bf16.mxu0 %v5010_v29  ;;  %v4934_v52 = vunpack.c.l.s8.bf16 %v4770_v35  ;;  %v4822_v29 = vld [vmem:[#allocation8 + $0x2d8] sm:$0xff]  ;;  %v5045_v62 = vunpack.c.l.s8.bf16 %v4825_v30  ;;  %v4765_v45 = vld [vmem:[#allocation8 + $0x110] sm:$0xff]  ;;  %v5041_v14 = vunpack.c.h.s8.bf16 %v4821_v47 }
 0x746   :  { %v4597_v48 = vpop.f32.mrf.mxu1  ;;  %v4697_v51 = vadd.f32 %v4678_v40, %v4647_v11  ;;  %v4648_v7 = vmul.f32 %v4632_v5, %v4595_v56  ;;  %v5042_v40 = vunpack.c.h.s8.bf16 %v4822_v29  ;;  %v4930_v5 = vunpack.c.h.s8.bf16 %v4766_v27  ;;  %v4794_v60 = vld [vmem:[#allocation8 + $0x1f8] sm:$0xff] }
 0x747   :  { %v4929_v11 = vunpack.c.h.s8.bf16 %v4765_v45  ;;  %v5038_v56 = vunpack.c.l.s8.bf16 %v4822_v29  ;;  %v5037_v48 = vunpack.c.l.s8.bf16 %v4821_v47  ;;  %v4986_v38 = vunpack.c.h.s8.bf16 %v4794_v60 }
 0x748   :  { %vm4705_vm6 = vcmp.gt.f32.partialorder %v4697_v51, 0.0  ;;  %v4713_v18 = vmul.f32 0.2, %v4697_v51  ;;  %v4698_v44 = vadd.f32 %v4682_v3, %v4648_v7  ;;  %5366 = vmatpush1.bf16.msra.mxu0 %v5009_v59  ;;  %v4926_v3 = vunpack.c.l.s8.bf16 %v4766_v27  ;;  %v4818_v59 = vld [vmem:[#allocation8 + $0x2b8] sm:$0xff]  ;;  %v4817_v7 = vld [vmem:[#allocation8 + $0x2b0] sm:$0xff]  ;;  %v5515_v27 = vld [vmem:[#allocation13 + $0x20] sm:$0xff] }
 0x749   :  { %5367 = vmatprep.subr.bf16.mxu0 %v5006_v57  ;;  %v4925_v57 = vunpack.c.l.s8.bf16 %v4765_v45  ;;  %v4982_v26 = vunpack.c.l.s8.bf16 %v4794_v60  ;;  %v5553_v45 = vunpack.c.h.s8.bf16 %v5515_v27  ;;  %v5514_v60 = vld [vmem:[#allocation13 + $0x18] sm:$0xff] }
 0x74a   :  { %vm4706_vm7 = vcmp.gt.f32.partialorder %v4698_v44, 0.0  ;;  %v4714_v12 = vmul.f32 0.2, %v4698_v44  ;;  %v4721_v16 = vsel %vm4705_vm6, %v4697_v51, %v4713_v18  ;;  %v5034_v51 = vunpack.c.h.s8.bf16 %v4818_v59  ;;  %v4793_v18 = vld [vmem:[#allocation8 + $0x1f0] sm:$0xff] }
 0x74b   :  { %v6592_v55 = vpack.c.bf16 %v4721_v16, %v4721_v16  ;;  %v5029_v16 = vunpack.c.l.s8.bf16 %v4817_v7 }
 0x74c   :  { %5368 = vmatpush1.bf16.msra.mxu0 %v5005_v17  ;;  %v4722_v23 = vsel %vm4706_vm7, %v4698_v44, %v4714_v12  ;;  %v5033_v44 = vunpack.c.h.s8.bf16 %v4817_v7  ;;  %v4985_v17 = vunpack.c.h.s8.bf16 %v4793_v18  ;;  %v4814_v12 = vld [vmem:[#allocation8 + $0x298] sm:$0xff]  ;;  %v5550_v7 = vunpack.c.h.s8.bf16 %v5514_v60 }
 0x74d   :  { %v6590_v2 = vpack.c.bf16 %v4722_v23, %v4722_v23  ;;  %5369 = vmatprep.subr.bf16.mxu0 %v5002_v19  ;;  %v5030_v19 = vunpack.c.l.s8.bf16 %v4818_v59  ;;  %v4981_v23 = vunpack.c.l.s8.bf16 %v4793_v18 }
 0x74f   :  { %5270 = vmatprep.mubr.bf16.mxu1 %v6590_v2 }
 0x750   :  { %5271 = vmatmul.mubr.bf16.vlgmr.msra.gmra.mxu1 %v6592_v55  ;;  %5370 = vmatpush1.bf16.msra.mxu0 %v5001_v1  ;;  %v5026_v1 = vunpack.c.h.s8.bf16 %v4814_v12 }
 0x751   :  { %5321 = vmatpush1.bf16.msra.mxu1 %v4953_v46  ;;  %5352 = vmatprep.mubr.bf16.mxu1 %v6519_v21  ;;  %v4941_v21 = vunpack.c.l.s8.bf16 %v4773_v8  ;;  %v4813_v46 = vld [vmem:[#allocation8 + $0x290] sm:$0xff] }
 0x752   :  { %5322 = vmatprep.subr.bf16.mxu1 %v4950_v63  ;;  %5371 = vmatprep.subr.bf16.mxu0 %v4998_v0  ;;  %v4978_v63 = vunpack.c.h.s8.bf16 %v4790_v25  ;;  %v4789_v0 = vld [vmem:[#allocation8 + $0x1d0] sm:$0xff]  ;;  %v5025_v41 = vunpack.c.h.s8.bf16 %v4813_v46 }
 0x753   :  { %v4977_v4 = vunpack.c.h.s8.bf16 %v4789_v0  ;;  %v4973_v8 = vunpack.c.l.s8.bf16 %v4789_v0 }
 0x754   :  { %5372 = vmatpush1.bf16.msra.mxu0 %v4997_v32  ;;  %v5022_v32 = vunpack.c.l.s8.bf16 %v4814_v12  ;;  %v5548_v12 = vunpack.c.l.s8.bf16 %v5514_v60 }
 0x755   :  { %5323 = vmatpush1.bf16.msra.mxu1 %v4949_v9  ;;  %5373 = vmatprep.subr.bf16.mxu0 %v4994_v10  ;;  %v4974_v9 = vunpack.c.l.s8.bf16 %v4790_v25  ;;  %v5518_v10 = vld [vmem:[#allocation13 + $0x38] sm:$0xff]  ;;  %v5512_v25 = vld [vmem:[#allocation13 + $0x8] sm:$0xff] }
 0x756   :  { %5324 = vmatprep.subr.bf16.mxu1 %v4946_v50  ;;  %v5021_v50 = vunpack.c.l.s8.bf16 %v4813_v46  ;;  %v5546_v46 = vunpack.c.h.s8.bf16 %v5512_v25 }
 0x758   :  { %5374 = vmatpush1.bf16.msra.mxu0 %v4993_v20  ;;  %v5558_v20 = vunpack.c.h.s8.bf16 %v5518_v10 }
 0x759   :  { %5325 = vmatpush1.bf16.msra.mxu1 %v4945_v54  ;;  %5375 = vmatprep.subr.bf16.mxu0 %v4990_v58  ;;  %v5517_v54 = vld [vmem:[#allocation13 + $0x30] sm:$0xff]  ;;  %v4970_v58 = vunpack.c.h.s8.bf16 %v4786_v15 }
 0x75a   :  { %5326 = vmatprep.subr.bf16.mxu1 %v4942_v34  ;;  %v4785_v34 = vld [vmem:[#allocation8 + $0x1b0] sm:$0xff]  ;;  %v5557_v37 = vunpack.c.h.s8.bf16 %v5517_v54 }
 0x75b   :  { %v4969_v35 = vunpack.c.h.s8.bf16 %v4785_v34 }
 0x75c   :  { %5376 = vmatpush1.bf16.msra.mxu0 %v4989_v36  ;;  %v5556_v36 = vunpack.c.l.s8.bf16 %v5518_v10  ;;  %v5526_v10 = vld [vmem:[#allocation13 + $0x78] sm:$0xff] }
 0x75d   :  { %5327 = vmatpush1.bf16.msra.mxu1 %v4941_v21  ;;  %5377 = vmatprep.subr.bf16.mxu0 %v5050_v61  ;;  %v4966_v21 = vunpack.c.l.s8.bf16 %v4786_v15  ;;  %v5516_v61 = vld [vmem:[#allocation13 + $0x28] sm:$0xff]  ;;  %v4834_v15 = vld [vmem:[#allocation8 + $0x338] sm:$0xff] }
 0x75e   :  { %5328 = vmatprep.subr.bf16.mxu1 %v4938_v43  ;;  %v4782_v43 = vld [vmem:[#allocation8 + $0x198] sm:$0xff]  ;;  %v5554_v29 = vunpack.c.h.s8.bf16 %v5516_v61 }
 0x75f   :  { %v4958_v59 = vunpack.c.l.s8.bf16 %v4782_v43 }
 0x760   :  { %5378 = vmatpush2.bf16.msra.mxu0 %v5049_v31  ;;  %v5555_v31 = vunpack.c.l.s8.bf16 %v5517_v54  ;;  %v5066_v54 = vunpack.c.h.s8.bf16 %v4834_v15 }
 0x761   :  { %5329 = vmatpush1.bf16.msra.mxu1 %v4937_v13  ;;  %5379 = vmatprep.subr.bf16.mxu0 %v5046_v42 }
 0x762   :  { %5330 = vmatprep.subr.bf16.mxu1 %v4934_v52  ;;  %v4965_v52 = vunpack.c.l.s8.bf16 %v4785_v34 }
 0x764   :  { %5380 = vmatpush2.bf16.msra.mxu0 %v5045_v62 }
 0x765   :  { %5331 = vmatpush1.bf16.msra.mxu1 %v4933_v39  ;;  %5381 = vmatprep.subr.bf16.mxu0 %v5042_v40  ;;  %v4962_v39 = vunpack.c.h.s8.bf16 %v4782_v43  ;;  %v4781_v40 = vld [vmem:[#allocation8 + $0x190] sm:$0xff] }
 0x766   :  { %5332 = vmatprep.subr.bf16.mxu1 %v4930_v5 }
 0x768   :  { %5382 = vmatpush2.bf16.msra.mxu0 %v5041_v14 }
 0x769   :  { %5333 = vmatpush1.bf16.msra.mxu1 %v4929_v11  ;;  %5383 = vmatprep.subr.bf16.mxu0 %v5038_v56  ;;  %v4961_v11 = vunpack.c.h.s8.bf16 %v4781_v40  ;;  %v5552_v56 = vunpack.c.l.s8.bf16 %v5516_v61  ;;  %v4830_v61 = vld [vmem:[#allocation8 + $0x318] sm:$0xff] }
 0x76a   :  { %5334 = vmatprep.subr.bf16.mxu1 %v4926_v3 }
 0x76c   :  { %5384 = vmatpush2.bf16.msra.mxu0 %v5037_v48  ;;  %v4842_v48 = vld [vmem:[#allocation8 + $0x378] sm:$0xff] }
 0x76d   :  { %5335 = vmatpush1.bf16.msra.mxu1 %v4925_v57  ;;  %5385 = vmatprep.subr.bf16.mxu0 %v5034_v51  ;;  %v5551_v57 = vunpack.c.l.s8.bf16 %v5515_v27  ;;  %v4957_v51 = vunpack.c.l.s8.bf16 %v4781_v40  ;;  %v5082_v18 = vunpack.c.h.s8.bf16 %v4842_v48  ;;  %v5522_v40 = vld [vmem:[#allocation13 + $0x58] sm:$0xff] }
 0x76e   :  { %5336 = vmatprep.subr.bf16.mxu1 %v4986_v38  ;;  %v5513_v38 = vld [vmem:[#allocation13 + $0x10] sm:$0xff] }
 0x770   :  { %5386 = vmatpush2.bf16.msra.mxu0 %v5033_v44  ;;  %v4841_v44 = vld [vmem:[#allocation8 + $0x370] sm:$0xff] }
 0x771   :  { %5337 = vmatpush2.bf16.msra.mxu1 %v4985_v17  ;;  %5387 = vmatprep.subr.bf16.mxu0 %v5030_v19  ;;  %v5549_v17 = vunpack.c.h.s8.bf16 %v5513_v38  ;;  %v5081_v19 = vunpack.c.h.s8.bf16 %v4841_v44 }
 0x772   :  { %5338 = vmatprep.subr.bf16.mxu1 %v4982_v26  ;;  %v5078_v26 = vunpack.c.l.s8.bf16 %v4842_v48  ;;  %v5564_v48 = vunpack.c.l.s8.bf16 %v5522_v40 }
 0x774   :  { %5388 = vmatpush2.bf16.msra.mxu0 %v5029_v16  ;;  %v4838_v16 = vld [vmem:[#allocation8 + $0x358] sm:$0xff] }
 0x775   :  { %5339 = vmatpush2.bf16.msra.mxu1 %v4981_v23  ;;  %5389 = vmatprep.subr.bf16.mxu0 %v5026_v1  ;;  %v5547_v23 = vunpack.c.l.s8.bf16 %v5513_v38  ;;  %v5077_v1 = vunpack.c.l.s8.bf16 %v4841_v44  ;;  %v5074_v0 = vunpack.c.h.s8.bf16 %v4838_v16 }
 0x776   :  { %5340 = vmatprep.subr.bf16.mxu1 %v4978_v63  ;;  %v5511_v63 = vld [vmem:[#allocation13] sm:$0xff] }
 0x778   :  { %5390 = vmatpush2.bf16.msra.mxu0 %v5025_v41  ;;  %v4837_v41 = vld [vmem:[#allocation8 + $0x350] sm:$0xff] }
 0x779   :  { %5341 = vmatpush2.bf16.msra.mxu1 %v4977_v4  ;;  %5391 = vmatprep.subr.bf16.mxu0 %v5022_v32  ;;  %v5545_v4 = vunpack.c.h.s8.bf16 %v5511_v63  ;;  %v5073_v32 = vunpack.c.h.s8.bf16 %v4837_v41 }
 0x77a   :  { %5342 = vmatprep.subr.bf16.mxu1 %v4974_v9  ;;  %v5544_v9 = vunpack.c.l.s8.bf16 %v5512_v25 }
 0x77c   :  { %5392 = vmatpush2.bf16.msra.mxu0 %v5021_v50  ;;  %v5543_v50 = vunpack.c.l.s8.bf16 %v5511_v63 }
 0x77d   :  { %5343 = vmatpush2.bf16.msra.mxu1 %v4973_v8  ;;  %5607 = vmatprep.subr.bf16.mxu0 %v5558_v20  ;;  %v5574_v8 = vunpack.c.h.s8.bf16 %v5526_v10  ;;  %v5525_v20 = vld [vmem:[#allocation13 + $0x70] sm:$0xff] }
 0x77e   :  { %5344 = vmatprep.subr.bf16.mxu1 %v4970_v58  ;;  %v4833_v58 = vld [vmem:[#allocation8 + $0x330] sm:$0xff]  ;;  %v5573_v34 = vunpack.c.h.s8.bf16 %v5525_v20 }
 0x77f   :  { %v5149_v30 = vpop.f32.mrf.mxu0  ;;  %5394 = vmatmul.mubr.bf16.vlgmr.msra.gmra.mxu0 %v6571_v28  ;;  %v5061_v43 = vunpack.c.l.s8.bf16 %v4833_v58 }
 0x780   :  { %v5190_v33 = vpop.f32.mrf.mxu1  ;;  %5608 = vmatpush1.bf16.msra.mxu0 %v5557_v37  ;;  %v5065_v37 = vunpack.c.h.s8.bf16 %v4833_v58 }
 0x781   :  { %v6599_v13 = vadd.f32 %v5190_v33, %v5149_v30  ;;  %5345 = vmatpush2.bf16.msra.mxu1 %v4969_v35  ;;  %v5151_v42 = vpop.f32.mrf.mxu0  ;;  %5609 = vmatprep.subr.bf16.mxu0 %v5556_v36  ;;  %v5572_v35 = vunpack.c.l.s8.bf16 %v5526_v10  ;;  %v5062_v36 = vunpack.c.l.s8.bf16 %v4834_v15  ;;  %v5571_v30 = vunpack.c.l.s8.bf16 %v5525_v20  ;;  %v4845_v20 = vld [vmem:[#allocation8 + $0x390] sm:$0xff] }
 0x782   :  { %v5192_v62 = vpop.f32.mrf.mxu1  ;;  %5346 = vmatprep.subr.bf16.mxu1 %v4966_v21  ;;  %v5524_v21 = vld [vmem:[#allocation13 + $0x68] sm:$0xff] }
 0x783   :  { %v6601_v47 = vadd.f32 %v5192_v62, %v5151_v42  ;;  %v5153_v5 = vpop.f32.mrf.mxu0  ;;  %v5570_v33 = vunpack.c.h.s8.bf16 %v5524_v21  ;;  %v5058_v42 = vunpack.c.h.s8.bf16 %v4830_v61  ;;  %v5568_v62 = vunpack.c.l.s8.bf16 %v5524_v21 }
 0x784   :  { %v5194_v28 = vpop.f32.mrf.mxu1  ;;  %5610 = vmatpush1.bf16.msra.mxu0 %v5555_v31  ;;  %v5523_v31 = vld [vmem:[#allocation13 + $0x60] sm:$0xff]  ;;  %v4858_v5 = vld [vmem:[#allocation8 + $0x3f8] sm:$0xff] }
 0x785   :  { %5347 = vmatpush2.bf16.msra.mxu1 %v4965_v52  ;;  %v5154_v14 = vpop.f32.mrf.mxu0  ;;  %5611 = vmatprep.subr.bf16.mxu0 %v5554_v29  ;;  %v4829_v52 = vld [vmem:[#allocation8 + $0x310] sm:$0xff]  ;;  %v5569_v29 = vunpack.c.h.s8.bf16 %v5523_v31  ;;  %v5567_v28 = vunpack.c.l.s8.bf16 %v5523_v31  ;;  %v5531_v31 = vld [vmem:[#allocation13 + $0xa0] sm:$0xff] }
 0x786   :  { %v5195_v3 = vpop.f32.mrf.mxu1  ;;  %5348 = vmatprep.subr.bf16.mxu1 %v4962_v39  ;;  %v5057_v27 = vunpack.c.h.s8.bf16 %v4829_v52  ;;  %v5054_v39 = vunpack.c.l.s8.bf16 %v4830_v61  ;;  %v5566_v14 = vunpack.c.h.s8.bf16 %v5522_v40 }
 0x787   :  { %v4857_v3 = vld [vmem:[#allocation8 + $0x3f0] sm:$0xff] }
 0x788   :  { %5612 = vmatpush1.bf16.msra.mxu0 %v5553_v45  ;;  %v5053_v45 = vunpack.c.l.s8.bf16 %v4829_v52  ;;  %v5113_v60 = vunpack.c.h.s8.bf16 %v4857_v3 }
 0x789   :  { %5349 = vmatpush2.bf16.msra.mxu1 %v4961_v11  ;;  %5613 = vmatprep.subr.bf16.mxu0 %v5552_v56  ;;  %v5521_v11 = vld [vmem:[#allocation13 + $0x50] sm:$0xff]  ;;  %v5114_v56 = vunpack.c.h.s8.bf16 %v4858_v5 }
 0x78a   :  { %5350 = vmatprep.subr.bf16.mxu1 %v4958_v59  ;;  %v5565_v59 = vunpack.c.h.s8.bf16 %v5521_v11  ;;  %v5563_v38 = vunpack.c.l.s8.bf16 %v5521_v11 }
 0x78c   :  { %5614 = vmatpush1.bf16.msra.mxu0 %v5551_v57  ;;  %v5110_v57 = vunpack.c.l.s8.bf16 %v4858_v5  ;;  %v5528_v5 = vld [vmem:[#allocation13 + $0x88] sm:$0xff] }
 0x78d   :  { %5351 = vmatpush2.bf16.msra.mxu1 %v4957_v51  ;;  %5615 = vmatprep.subr.bf16.mxu0 %v5550_v7  ;;  %v5520_v51 = vld [vmem:[#allocation13 + $0x48] sm:$0xff]  ;;  %v4854_v7 = vld [vmem:[#allocation8 + $0x3d8] sm:$0xff] }
 0x78e   :  { %5402 = vmatprep.subr.bf16.mxu1 %v5082_v18  ;;  %v5109_v18 = vunpack.c.l.s8.bf16 %v4857_v3  ;;  %v5562_v44 = vunpack.c.h.s8.bf16 %v5520_v51  ;;  %v5542_v3 = vld [vmem:[#allocation13 + $0xf8] sm:$0xff] }
 0x790   :  { %5353 = vmatmul.mubr.bf16.vlgmr.msra.gmra.mxu1 %v6551_v49  ;;  %5616 = vmatpush1.bf16.msra.mxu0 %v5549_v17  ;;  %v5070_v49 = vunpack.c.l.s8.bf16 %v4838_v16  ;;  %v5519_v17 = vld [vmem:[#allocation13 + $0x40] sm:$0xff]  ;;  %v5560_v16 = vunpack.c.l.s8.bf16 %v5520_v51  ;;  %v5604_v51 = vunpack.c.l.s8.bf16 %v5542_v3 }
 0x791   :  { %5403 = vmatpush1.bf16.msra.mxu1 %v5081_v19  ;;  %5434 = vmatprep.mubr.bf16.mxu1 %v6590_v2  ;;  %v5069_v2 = vunpack.c.l.s8.bf16 %v4837_v41  ;;  %v5106_v19 = vunpack.c.h.s8.bf16 %v4854_v7  ;;  %v4849_v41 = vld [vmem:[#allocation8 + $0x3b0] sm:$0xff] }
 0x792   :  { %5404 = vmatprep.subr.bf16.mxu1 %v5078_v26  ;;  %5617 = vmatprep.subr.bf16.mxu0 %v5548_v12  ;;  %v4853_v26 = vld [vmem:[#allocation8 + $0x3d0] sm:$0xff]  ;;  %v5561_v12 = vunpack.c.h.s8.bf16 %v5519_v17 }
 0x793   :  { %v5105_v25 = vunpack.c.h.s8.bf16 %v4853_v26  ;;  %v5101_v63 = vunpack.c.l.s8.bf16 %v4853_v26 }
 0x794   :  { %5618 = vmatpush1.bf16.msra.mxu0 %v5547_v23  ;;  %v5102_v23 = vunpack.c.l.s8.bf16 %v4854_v7  ;;  %v5540_v7 = vld [vmem:[#allocation13 + $0xe8] sm:$0xff] }
 0x795   :  { %5405 = vmatpush1.bf16.msra.mxu1 %v5077_v1  ;;  %5619 = vmatprep.subr.bf16.mxu0 %v5546_v46  ;;  %v4850_v1 = vld [vmem:[#allocation8 + $0x3b8] sm:$0xff]  ;;  %v5559_v46 = vunpack.c.l.s8.bf16 %v5519_v17  ;;  %v5600_v26 = vunpack.c.l.s8.bf16 %v5540_v7 }
 0x796   :  { %5406 = vmatprep.subr.bf16.mxu1 %v5074_v0  ;;  %v5098_v0 = vunpack.c.h.s8.bf16 %v4850_v1 }
 0x798   :  { %5620 = vmatpush1.bf16.msra.mxu0 %v5545_v4  ;;  %v5097_v4 = vunpack.c.h.s8.bf16 %v4849_v41 }
 0x799   :  { %5407 = vmatpush1.bf16.msra.mxu1 %v5073_v32  ;;  %5621 = vmatprep.subr.bf16.mxu0 %v5544_v9  ;;  %v5094_v32 = vunpack.c.l.s8.bf16 %v4850_v1 }
 0x79a   :  { %5408 = vmatprep.subr.bf16.mxu1 %v5070_v49  ;;  %v4846_v49 = vld [vmem:[#allocation8 + $0x398] sm:$0xff] }
 0x79c   :  { %5622 = vmatpush1.bf16.msra.mxu0 %v5543_v50  ;;  %v5093_v50 = vunpack.c.l.s8.bf16 %v4849_v41  ;;  %v6616_v41 = vld [vmem:[#allocation11] sm:$0xf] }
 0x79d   :  { %5409 = vmatpush1.bf16.msra.mxu1 %v5069_v2  ;;  %5623 = vmatprep.subr.bf16.mxu0 %v5574_v8  ;;  %v5090_v8 = vunpack.c.h.s8.bf16 %v4846_v49 }
 0x79e   :  { %5410 = vmatprep.subr.bf16.mxu1 %v5066_v54 }
 0x7a0   :  { %5624 = vmatpush2.bf16.msra.mxu0 %v5573_v34  ;;  %v5089_v34 = vunpack.c.h.s8.bf16 %v4845_v20 }
 0x7a1   :  { %5411 = vmatpush1.bf16.msra.mxu1 %v5065_v37  ;;  %5625 = vmatprep.subr.bf16.mxu0 %v5572_v35  ;;  %v5086_v37 = vunpack.c.l.s8.bf16 %v4846_v49  ;;  %v5085_v35 = vunpack.c.l.s8.bf16 %v4845_v20 }
 0x7a2   :  { %5412 = vmatprep.subr.bf16.mxu1 %v5062_v36  ;;  %v5533_v36 = vld [vmem:[#allocation13 + $0xb0] sm:$0xff] }
 0x7a4   :  { %5626 = vmatpush2.bf16.msra.mxu0 %v5571_v30  ;;  %v5532_v30 = vld [vmem:[#allocation13 + $0xa8] sm:$0xff] }
 0x7a5   :  { %5413 = vmatpush1.bf16.msra.mxu1 %v5061_v43  ;;  %5627 = vmatprep.subr.bf16.mxu0 %v5570_v33  ;;  %v5587_v43 = vunpack.c.l.s8.bf16 %v5533_v36  ;;  %v5586_v33 = vunpack.c.h.s8.bf16 %v5532_v30  ;;  %v5584_v52 = vunpack.c.l.s8.bf16 %v5532_v30 }
 0x7a6   :  { %5414 = vmatprep.subr.bf16.mxu1 %v5058_v42  ;;  %v5585_v42 = vunpack.c.h.s8.bf16 %v5531_v31 }
 0x7a8   :  { %5628 = vmatpush2.bf16.msra.mxu0 %v5569_v29  ;;  %v5530_v29 = vld [vmem:[#allocation13 + $0x98] sm:$0xff] }
 0x7a9   :  { %5415 = vmatpush1.bf16.msra.mxu1 %v5057_v27  ;;  %5629 = vmatprep.subr.bf16.mxu0 %v5568_v62  ;;  %v5583_v27 = vunpack.c.l.s8.bf16 %v5531_v31  ;;  %v5529_v62 = vld [vmem:[#allocation13 + $0x90] sm:$0xff]  ;;  %v5580_v40 = vunpack.c.l.s8.bf16 %v5530_v29 }
 0x7aa   :  { %5416 = vmatprep.subr.bf16.mxu1 %v5054_v39  ;;  %v5581_v39 = vunpack.c.h.s8.bf16 %v5529_v62 }
 0x7ac   :  { %5630 = vmatpush2.bf16.msra.mxu0 %v5567_v28  ;;  %v5579_v28 = vunpack.c.l.s8.bf16 %v5529_v62 }
 0x7ad   :  { %5417 = vmatpush1.bf16.msra.mxu1 %v5053_v45  ;;  %5631 = vmatprep.subr.bf16.mxu0 %v5566_v14  ;;  %v5578_v45 = vunpack.c.h.s8.bf16 %v5528_v5  ;;  %v5527_v14 = vld [vmem:[#allocation13 + $0x80] sm:$0xff] }
 0x7ae   :  { %5418 = vmatprep.subr.bf16.mxu1 %v5114_v56  ;;  %v5577_v11 = vunpack.c.h.s8.bf16 %v5527_v14  ;;  %v5576_v56 = vunpack.c.l.s8.bf16 %v5528_v5 }
 0x7b0   :  { %5632 = vmatpush2.bf16.msra.mxu0 %v5565_v59  ;;  %v5575_v59 = vunpack.c.l.s8.bf16 %v5527_v14 }
 0x7b1   :  { %5419 = vmatpush2.bf16.msra.mxu1 %v5113_v60  ;;  %5633 = vmatprep.subr.bf16.mxu0 %v5564_v48  ;;  %v5606_v60 = vunpack.c.h.s8.bf16 %v5542_v3  ;;  %v5541_v48 = vld [vmem:[#allocation13 + $0xf0] sm:$0xff] }
 0x7b2   :  { %5420 = vmatprep.subr.bf16.mxu1 %v5110_v57  ;;  %v5605_v57 = vunpack.c.h.s8.bf16 %v5541_v48 }
 0x7b4   :  { %5634 = vmatpush2.bf16.msra.mxu0 %v5563_v38  ;;  %v5603_v38 = vunpack.c.l.s8.bf16 %v5541_v48 }
 0x7b5   :  { %5421 = vmatpush2.bf16.msra.mxu1 %v5109_v18  ;;  %5635 = vmatprep.subr.bf16.mxu0 %v5562_v44  ;;  %v5602_v18 = vunpack.c.h.s8.bf16 %v5540_v7  ;;  %v5539_v44 = vld [vmem:[#allocation13 + $0xe0] sm:$0xff] }
 0x7b6   :  { %5422 = vmatprep.subr.bf16.mxu1 %v5106_v19  ;;  %v5601_v17 = vunpack.c.h.s8.bf16 %v5539_v44 }
 0x7b8   :  { %5636 = vmatpush2.bf16.msra.mxu0 %v5561_v12  ;;  %v5538_v12 = vld [vmem:[#allocation13 + $0xd8] sm:$0xff] }
 0x7b9   :  { %5423 = vmatpush2.bf16.msra.mxu1 %v5105_v25  ;;  %5637 = vmatprep.subr.bf16.mxu0 %v5560_v16  ;;  %v5599_v16 = vunpack.c.l.s8.bf16 %v5539_v44  ;;  %v5598_v1 = vunpack.c.h.s8.bf16 %v5538_v12 }
 0x7ba   :  { %5424 = vmatprep.subr.bf16.mxu1 %v5102_v23 }
 0x7bc   :  { %5638 = vmatpush2.bf16.msra.mxu0 %v5559_v46 }
 0x7bd   :  { %5425 = vmatpush2.bf16.msra.mxu1 %v5101_v63  ;;  %v6614_v63 = vld [vmem:[#allocation10] sm:$0xf] }
 0x7be   :  { %5426 = vmatprep.subr.bf16.mxu1 %v5098_v0  ;;  %v5537_v0 = vld [vmem:[#allocation13 + $0xd0] sm:$0xff] }
 0x7bf   :  { %v5231_v9 = vpop.f32.mrf.mxu0 }
 0x7c0   :  { %v6606_v10 = vadd.f32 %v5231_v9, %v6599_v13  ;;  %v5534_v13 = vld [vmem:[#allocation13 + $0xb8] sm:$0xff] }
 0x7c1   :  { %5427 = vmatpush2.bf16.msra.mxu1 %v5097_v4  ;;  %v5233_v15 = vpop.f32.mrf.mxu0  ;;  %v5590_v21 = vunpack.c.h.s8.bf16 %v5534_v13  ;;  %v5588_v61 = vunpack.c.l.s8.bf16 %v5534_v13  ;;  %v5597_v4 = vunpack.c.h.s8.bf16 %v5537_v0  ;;  %v5536_v13 = vld [vmem:[#allocation13 + $0xc8] sm:$0xff] }
 0x7c2   :  { %v6609_v2 = vadd.f32 %v5233_v15, %v6601_v47  ;;  %5428 = vmatprep.subr.bf16.mxu1 %v5094_v32  ;;  %v5589_v47 = vunpack.c.h.s8.bf16 %v5533_v36  ;;  %v5448_v32 = vrot.slane %v6614_v63, %v6530_v24  ;;  %v5474_v15 = vrot.slane %v6616_v41, %v6530_v24 }
 0x7c3   :  { %v5235_v54 = vpop.f32.mrf.mxu0  ;;  %v5592_v31 = vunpack.c.l.s8.bf16 %v5536_v13 }
 0x7c4   :  { %v5595_v54 = vunpack.c.l.s8.bf16 %v5537_v0 }
 0x7c5   :  { %5429 = vmatpush2.bf16.msra.mxu1 %v5093_v50  ;;  %v5236_v58 = vpop.f32.mrf.mxu0  ;;  %v5452_v50 = vrot.slane %v6614_v63, %v6496_v22 }
 0x7c6   :  { %5430 = vmatprep.subr.bf16.mxu1 %v5090_v8  ;;  %v5596_v8 = vunpack.c.l.s8.bf16 %v5538_v12 }
 0x7c9   :  { %5431 = vmatpush2.bf16.msra.mxu1 %v5089_v34 }
 0x7ca   :  { %5432 = vmatprep.subr.bf16.mxu1 %v5086_v37  ;;  %v5478_v37 = vrot.slane %v6616_v41, %v6496_v22 }
 0x7cd   :  { %5433 = vmatpush2.bf16.msra.mxu1 %v5085_v35 }
 0x7ce   :  { %5648 = vmatprep.subr.bf16.mxu1 %v5590_v21  ;;  %v5594_v21 = vunpack.c.h.s8.bf16 %v5536_v13 }
 0x7d0   :  { %5435 = vmatmul.mubr.bf16.vlgmr.msra.gmra.mxu1 %v6592_v55  ;;  %v5582_v55 = vunpack.c.h.s8.bf16 %v5530_v29 }
 0x7d1   :  { %5649 = vmatpush1.bf16.msra.mxu1 %v5589_v47  ;;  %v5535_v47 = vld [vmem:[#allocation13 + $0xc0] sm:$0xff] }
 0x7d2   :  { %5650 = vmatprep.subr.bf16.mxu1 %v5588_v61  ;;  %v5593_v30 = vunpack.c.h.s8.bf16 %v5535_v47 }
 0x7d5   :  { %5651 = vmatpush1.bf16.msra.mxu1 %v5587_v43 }
 0x7d6   :  { %5652 = vmatprep.subr.bf16.mxu1 %v5586_v33 }
 0x7d9   :  { %5653 = vmatpush1.bf16.msra.mxu1 %v5585_v42 }
 0x7da   :  { %5654 = vmatprep.subr.bf16.mxu1 %v5584_v52  ;;  %v5591_v52 = vunpack.c.l.s8.bf16 %v5535_v47 }
 0x7dd   :  { %5655 = vmatpush1.bf16.msra.mxu1 %v5583_v27 }
 0x7de   :  { %5656 = vmatprep.subr.bf16.mxu1 %v5582_v55 }
 0x7e1   :  { %5657 = vmatpush1.bf16.msra.mxu1 %v5581_v39 }
 0x7e2   :  { %5658 = vmatprep.subr.bf16.mxu1 %v5580_v40 }
 0x7e5   :  { %5659 = vmatpush1.bf16.msra.mxu1 %v5579_v28 }
 0x7e6   :  { %5660 = vmatprep.subr.bf16.mxu1 %v5578_v45 }
 0x7e9   :  { %5661 = vmatpush1.bf16.msra.mxu1 %v5577_v11 }
 0x7ea   :  { %5662 = vmatprep.subr.bf16.mxu1 %v5576_v56 }
 0x7ed   :  { %5663 = vmatpush1.bf16.msra.mxu1 %v5575_v59 }
 0x7ee   :  { %5664 = vmatprep.subr.bf16.mxu1 %v5606_v60  ;;  %v5456_v60 = vrot.slane %v6614_v63, %v6533_v6 }
 0x7f1   :  { %5665 = vmatpush2.bf16.msra.mxu1 %v5605_v57 }
 0x7f2   :  { %5666 = vmatprep.subr.bf16.mxu1 %v5604_v51  ;;  %v5482_v51 = vrot.slane %v6616_v41, %v6533_v6 }
 0x7f5   :  { %5667 = vmatpush2.bf16.msra.mxu1 %v5603_v38  ;;  %v5460_v38 = vrot.slane %v6614_v63, %v6499_v53 }
 0x7f6   :  { %5668 = vmatprep.subr.bf16.mxu1 %v5602_v18 }
 0x7f9   :  { %5669 = vmatpush2.bf16.msra.mxu1 %v5601_v17 }
 0x7fa   :  { %5670 = vmatprep.subr.bf16.mxu1 %v5600_v26 }
 0x7fd   :  { %5671 = vmatpush2.bf16.msra.mxu1 %v5599_v16 }
 0x7fe   :  { %5672 = vmatprep.subr.bf16.mxu1 %v5598_v1 }
 0x7ff   :  { %v6612_v19 = vpop.f32.mrf.mxu0 }
 0x801   :  { %v5315_v25 = vpop.f32.mrf.mxu0  ;;  %5673 = vmatpush2.bf16.msra.mxu1 %v5597_v4 }
 0x802   :  { %5674 = vmatprep.subr.bf16.mxu1 %v5596_v8 }
 0x803   :  { %v5317_v23 = vpop.f32.mrf.mxu0 }
 0x805   :  { %v5318_v46 = vpop.f32.mrf.mxu0  ;;  %5675 = vmatpush2.bf16.msra.mxu1 %v5595_v54 }
 0x806   :  { %5676 = vmatprep.subr.bf16.mxu1 %v5594_v21 }
 0x809   :  { %5677 = vmatpush2.bf16.msra.mxu1 %v5593_v30 }
 0x80a   :  { %5678 = vmatprep.subr.bf16.mxu1 %v5592_v31 }
 0x80d   :  { %5679 = vmatpush2.bf16.msra.mxu1 %v5591_v52 }
 0x810   :  { %v5272_v9 = vpop.f32.mrf.mxu1 }
 0x811   :  { %v5273_v49 = vadd.f32 %v5272_v9, %v6606_v10 }
 0x812   :  { %v5274_v20 = vpop.f32.mrf.mxu1 }
 0x813   :  { %v5465_v58 = vmul.f32 %v5448_v32, %v5273_v49  ;;  %v5275_v34 = vadd.f32 %v5274_v20, %v6609_v2 }
 0x814   :  { %v5276_v35 = vpop.f32.mrf.mxu1 }
 0x815   :  { %v5491_v10 = vadd.f32 %v5474_v15, %v5465_v58  ;;  %v5466_v36 = vmul.f32 %v5452_v50, %v5275_v34 }
 0x816   :  { %v5277_v61 = vpop.f32.mrf.mxu1 }
 0x817   :  { %vm5495_vm8 = vcmp.gt.f32.partialorder %v5491_v10, 0.0  ;;  %v5499_v43 = vmul.f32 0.2, %v5491_v10  ;;  %v5492_v33 = vadd.f32 %v5478_v37, %v5466_v36 }
 0x819   :  { %vm5496_vm9 = vcmp.gt.f32.partialorder %v5492_v33, 0.0  ;;  %v5500_v2 = vmul.f32 0.2, %v5492_v33  ;;  %v5503_v42 = vsel %vm5495_vm8, %v5491_v10, %v5499_v43  ;;  %v5723_v10 = vld [vmem:[#allocation17] sm:$0x3] }
 0x81a   :  { %v5507_v55 = vpack.c.bf16 %v5503_v42, %v5503_v42  ;;  %v5728_v30 = vrot.slane %v5723_v10, %v6530_v24 }
 0x81b   :  { %v5504_v29 = vsel %vm5496_vm9, %v5492_v33, %v5500_v2  ;;  %v5732_v2 = vrot.slane %v5723_v10, %v6496_v22 }
 0x81c   :  { %v5508_v27 = vpack.c.bf16 %v5504_v29, %v5504_v29 }
 0x81e   :  { %5639 = vmatprep.mubr.bf16.mxu0 %v5508_v27 }
 0x81f   :  { %5640 = vmatmul.mubr.bf16.vlgmr.msra.gmra.mxu0 %v5507_v55 }
 0x83f   :  { %v5395_v62 = vpop.f32.mrf.mxu0 }
 0x841   :  { %v5397_v39 = vpop.f32.mrf.mxu0 }
 0x843   :  { %v5399_v40 = vpop.f32.mrf.mxu0 }
 0x844   :  { %v6035_v40 = vmov 0  }
 0x845   :  { %v5400_v5 = vpop.f32.mrf.mxu0  ;;  %5793 = vset.pattern.permute.xlu0 %v6035_v40 }
 0x846   :  { %v5773_v5 = vld [vmem:[#allocation2] ss:$0 sm:$0xff] }
 0x850   :  { %v5354_v28 = vpop.f32.mrf.mxu1 }
 0x851   :  { %v5355_v56 = vadd.f32 %v5354_v28, %v6612_v19  ;;  %v5486_v19 = vrot.slane %v6616_v41, %v6499_v53  ;;  %v5689_v53 = vld [vmem:[#allocation14] sm:$0x3]  ;;  %v5703_v41 = vld [vmem:[#allocation16] sm:$0x3] }
 0x852   :  { %v5356_v45 = vpop.f32.mrf.mxu1  ;;  %v5694_v50 = vrot.slane %v5689_v53, %v6530_v24  ;;  %v5708_v54 = vrot.slane %v5703_v41, %v6530_v24  ;;  %v5698_v58 = vrot.slane %v5689_v53, %v6496_v22  ;;  %v5712_v13 = vrot.slane %v5703_v41, %v6496_v22 }
 0x853   :  { %v5357_v3 = vadd.f32 %v5356_v45, %v5315_v25  ;;  %v5396_v59 = vadd.f32 %v5395_v62, %v5355_v56 }
 0x854   :  { %v5358_v14 = vpop.f32.mrf.mxu1 }
 0x855   :  { %v5398_v7 = vadd.f32 %v5397_v39, %v5357_v3 }
 0x856   :  { %v5359_v11 = vpop.f32.mrf.mxu1 }
 0x890   :  { %v5436_v48 = vpop.f32.mrf.mxu1 }
 0x891   :  { %v5437_v57 = vadd.f32 %v5436_v48, %v5396_v59 }
 0x892   :  { %v5438_v18 = vpop.f32.mrf.mxu1 }
 0x893   :  { %v5467_v44 = vmul.f32 %v5456_v60, %v5437_v57  ;;  %v5439_v17 = vadd.f32 %v5438_v18, %v5398_v7 }
 0x894   :  { %v5440_v26 = vpop.f32.mrf.mxu1 }
 0x895   :  { %v5493_v12 = vadd.f32 %v5482_v51, %v5467_v44  ;;  %v5468_v25 = vmul.f32 %v5460_v38, %v5439_v17 }
 0x896   :  { %v5441_v16 = vpop.f32.mrf.mxu1 }
 0x897   :  { %vm5497_vm10 = vcmp.gt.f32.partialorder %v5493_v12, 0.0  ;;  %v5501_v23 = vmul.f32 0.2, %v5493_v12  ;;  %v5494_v1 = vadd.f32 %v5486_v19, %v5468_v25 }
 0x899   :  { %vm5498_vm11 = vcmp.gt.f32.partialorder %v5494_v1, 0.0  ;;  %v5502_v46 = vmul.f32 0.2, %v5494_v1  ;;  %v5505_v6 = vsel %vm5497_vm10, %v5493_v12, %v5501_v23 }
 0x89a   :  { %v5509_v32 = vpack.c.bf16 %v5505_v6, %v5505_v6 }
 0x89b   :  { %v5506_v0 = vsel %vm5498_vm11, %v5494_v1, %v5502_v46 }
 0x89c   :  { %v5510_v4 = vpack.c.bf16 %v5506_v0, %v5506_v0 }
 0x89e   :  { %5680 = vmatprep.mubr.bf16.mxu1 %v5510_v4 }
 0x89f   :  { %5681 = vmatmul.mubr.bf16.vlgmr.msra.gmra.mxu1 %v5509_v32 }
 0x8df   :  { %v5641_v63 = vpop.f32.mrf.mxu0 }
 0x8e1   :  { %v5643_v9 = vpop.f32.mrf.mxu0 }
 0x8e3   :  { %v5645_v49 = vpop.f32.mrf.mxu0 }
 0x8e5   :  { %v5646_v15 = vpop.f32.mrf.mxu0 }
 0x95f   :  { %v5682_v8 = vpop.f32.mrf.mxu1 }
 0x960   :  { %v5683_v20 = vadd.f32 %v5682_v8, %v5641_v63 }
 0x961   :  { %v5684_v34 = vpop.f32.mrf.mxu1 }
 0x962   :  { %v5701_v37 = vmul.f32 %v5694_v50, %v5683_v20  ;;  %v5685_v35 = vadd.f32 %v5684_v34, %v5643_v9 }
 0x963   :  { %v5686_v36 = vpop.f32.mrf.mxu1 }
 0x964   :  { %v5715_v21 = vadd.f32 %v5708_v54, %v5701_v37  ;;  %v5702_v47 = vmul.f32 %v5698_v58, %v5685_v35 }
 0x965   :  { %v5687_v61 = vpop.f32.mrf.mxu1 }
 0x966   :  { %v5716_v43 = vadd.f32 %v5712_v13, %v5702_v47  ;;  %vm5717_vm12 = vcmp.gt.f32.partialorder %v5715_v21, 0.0  ;;  %v5719_v33 = vmul.f32 0.2, %v5715_v21 }
 0x968   :  { %vm5718_vm13 = vcmp.gt.f32.partialorder %v5716_v43, 0.0  ;;  %v5720_v31 = vmul.f32 0.2, %v5716_v43  ;;  %v5721_v42 = vsel %vm5717_vm12, %v5715_v21, %v5719_v33 }
 0x969   :  { %v5735_v52 = vmul.f32 %v5728_v30, %v5721_v42 }
 0x96a   :  { %v5722_v29 = vsel %vm5718_vm13, %v5716_v43, %v5720_v31 }
 0x96b   :  { %v5736_v27 = vmul.f32 %v5732_v2, %v5722_v29  ;;  %v5738_v55 = vsel %vm5737_vm14, %v5735_v52, 0.0 }
 0x96d   :  { %v5739_v62 = vsel %vm5737_vm14, %v5736_v27, 0.0 }
 0x96e   :  { %v5740_v39 = vadd.f32 %v5739_v62, %v5738_v55 }
 0x970   :  { %5741 = vadd.xlane.f32.xlu0 %v5740_v39 }
 0x9f9   :  { %v5742_v24 = vpop.xlane.xlu0 %5741 }
 0x9fa   :  { %v5750_v28 = vadd.f32 %v5773_v5, %v5742_v24 }
 0x9fc   :  { %v5774_v45 = vmul.f32 -1.442695, %v5750_v28 }
 0x9fe   :  { %5800 = vpow2.f32 %v5774_v45 }
 0xa0b   :  { %v5801_v14 = vpop.eup %5800 }
 0xa0c   :  { %v5754_v22 = vadd.f32 1.0, %v5801_v14 }
 0xa0e   :  { %5802 = vrcp.f32 %v5754_v22 }
 0xa1b   :  { %v5803_v11 = vpop.eup %5802 }
 0xa1c   :  { %5759 = vperm.xlu0 %5793, %v5803_v11  }
 0xa97   :  { %v5760_v56 = vpop.permute.xlu0 %5759 }
 0xa98   :  { %5762 = vst [vmem:[%s6658_s12] sm:$0x3] %v5760_v56 }
 0xa99   :  { %5767 = vsyncpa [#allocation4], 1 }
 0xa9a   :  { %5768 = vsyncpa [#allocation6], 1 }
 0xa9b   :  { %5769 = vsyncpa [#allocation9], 1 }
 0xa9c   :  { %5770 = vsyncpa [#allocation12], 1 }
 0xa9d   :  { %5771 = vsyncpa [#allocation15], 1 }
 0xa9e   :  { %5772 = vsyncpa [#allocation18], 1 }

</bundles_post_ra>
